<compile_context>
chip_gen: v7x
topology: tpu7x:2x2x1
jax: 0.10.0
libtpu: 0.0.40
codegen_flags: <defaults>
</compile_context>

<pallas_src>
import functools

import jax
import jax.numpy as jnp
import numpy as np
from jax import lax
from jax.experimental import pallas as pl
from jax.experimental.pallas import tpu as pltpu

EPS = 1e-5  # PyTorch BatchNorm2d default

_LAYER_SPECS = [  # (KH, KW, Cin, Cout); all stride=1, padding=1, bias=False
    (5, 5, 3, 32),
    (3, 3, 32, 64),
    (3, 3, 64, 128),
    (3, 3, 128, 256),
]


def _round_up(x, m):
    return (x + m - 1) // m * m


# --------------------------------------------------------------------------- #
# In-kernel helpers (all shapes/indices static; fully unrolled).
# --------------------------------------------------------------------------- #
def _bn_relu_valid(y, g_ref, b_ref, *, N, Ho, Wo, Wt, C):
    """Training-mode BatchNorm (batch stats, biased var, two-pass) + ReLU on the
    flat conv output y of shape (N*Ho*Wt, C); returns only the valid spatial
    region (N, Ho, Wo, C), dropping any Wt-padded junk columns."""
    Mt = N * Ho * Wt
    cnt = float(N * Ho * Wo)
    if Wt == Wo:
        mean = jnp.sum(y, axis=0, keepdims=True) / cnt                     # (1, C)
        var = jnp.sum((y - mean) ** 2, axis=0, keepdims=True) / cnt
    else:
        # Wt-padded output columns hold junk; exclude them from the statistics.
        row = lax.broadcasted_iota(jnp.int32, (Mt, 1), 0)
        maskf = jnp.where((row % Wt) < Wo, 1.0, 0.0)
        mean = jnp.sum(y * maskf, axis=0, keepdims=True) / cnt
        var = jnp.sum(((y - mean) ** 2) * maskf, axis=0, keepdims=True) / cnt
    scale = g_ref[...] * lax.rsqrt(var + EPS)                              # (1, C)
    bias = b_ref[...] - mean * scale
    act = jnp.maximum(y * scale + bias, 0.0)                               # (Mt, C)
    # Drop padded output columns immediately so nothing downstream sees them.
    return act.reshape(N, Ho, Wt, C)[:, :, :Wo, :]                         # (N,Ho,Wo,C)


def _conv_taps(xpad_ref, w_ref, *, N, Ho, Wt, Cin, KH, KW):
    """Conv as KH*KW accumulated matmuls over shifted windows of the zero-padded
    bf16 activation scratch.  Returns flat (N*Ho*Wt, Cout) in f32."""
    Mt = N * Ho * Wt
    acc = None
    for kh in range(KH):
        for kw in range(KW):
            patch = xpad_ref[:, kh:kh + Ho, kw:kw + Wt, :]                 # bf16
            part = jnp.dot(patch.reshape(Mt, Cin), w_ref[kh * KW + kw],
                           preferred_element_type=jnp.float32)
            acc = part if acc is None else acc + part
    return acc


def _maxpool2x2_store(act, dst_ref, *, N, Ho, Wo):
    """2x2 / stride-2 max pool of act (N, Ho, Wo, C); writes the bf16 result into
    the interior (offset (1,1)) of the next layer's zero-padded scratch with one
    dense store per pooled output row."""
    Wo2 = Wo // 2
    for ph in range(Ho // 2):
        r = jnp.maximum(act[:, 2 * ph], act[:, 2 * ph + 1])                # (N, Wo, C)
        cols = [jnp.maximum(r[:, 2 * pw:2 * pw + 1, :],
                            r[:, 2 * pw + 1:2 * pw + 2, :]) for pw in range(Wo2)]
        rowv = cols[0] if Wo2 == 1 else jnp.concatenate(cols, axis=1)      # (N, Wo2, C)
        dst_ref[:, 1 + ph, 1:1 + Wo2, :] = rowv.astype(dst_ref.dtype)


# --------------------------------------------------------------------------- #
# Single fused kernel: all 4 x (Conv + BN + ReLU + pool) blocks.
# --------------------------------------------------------------------------- #
def _backbone_kernel(cols1, w1, w2, w3, w4,
                     g1, b1, g2, b2, g3, b3, g4, b4,
                     out_ref, xpad2, xpad3, xpad4, *, N, G):
    # Zero the padded activation scratches once (single dense store each);
    # the interiors are overwritten by the pooled outputs below.
    for xp in (xpad2, xpad3, xpad4):
        xp[...] = jnp.zeros(xp.shape, xp.dtype)

    # ---- layer 1: pre-built lane-dense im2col -> one MXU matmul ----
    geo = G[0]
    y = jnp.dot(cols1[...], w1[...], preferred_element_type=jnp.float32)   # (512, 32)
    act = _bn_relu_valid(y, g1, b1, N=N, Ho=geo["Ho"], Wo=geo["Wo"],
                         Wt=geo["Wt"], C=geo["Cout"])
    _maxpool2x2_store(act, xpad2, N=N, Ho=geo["Ho"], Wo=geo["Wo"])

    # ---- layers 2..4: per-tap accumulated matmuls from the bf16 scratch ----
    layer_io = ((xpad2, w2, g2, b2, xpad3),
                (xpad3, w3, g3, b3, xpad4),
                (xpad4, w4, g4, b4, None))
    for li, (src, w, gm, bt, dst) in enumerate(layer_io, start=1):
        geo = G[li]
        y = _conv_taps(src, w, N=N, Ho=geo["Ho"], Wt=geo["Wt"], Cin=geo["Cin"],
                       KH=geo["KH"], KW=geo["KW"])
        act = _bn_relu_valid(y, gm, bt, N=N, Ho=geo["Ho"], Wo=geo["Wo"],
                             Wt=geo["Wt"], C=geo["Cout"])
        if dst is None:
            # AdaptiveMaxPool2d((1, 1)) over the valid spatial region.
            out_ref[...] = jnp.max(act, axis=(1, 2))                       # (N, Cout)
        else:
            _maxpool2x2_store(act, dst, N=N, Ho=geo["Ho"], Wo=geo["Wo"])


# --------------------------------------------------------------------------- #
# Host-side wrapper.
# --------------------------------------------------------------------------- #
def _make_geometry(H, W):
    geoms = []
    h, w = H, W
    for (KH, KW, Cin, Cout) in _LAYER_SPECS:
        Ho = h + 2 - KH + 1            # pad=1, stride=1
        Wo = w + 2 - KW + 1
        Wt = _round_up(Wo, 8)          # sublane multiple -> layout-trivial reshapes
        geoms.append(dict(KH=KH, KW=KW, Cin=Cin, Cout=Cout, Hin=h, Win=w,
                          Ho=Ho, Wo=Wo, Wt=Wt, Hp=h + 2, Wp=Wt + KW - 1))
        h, w = Ho // 2, Wo // 2        # 2x2 pool (last layer's value unused)
    return geoms


def _im2col_nhwc(x, KH, KW, pad):
    """Plain-XLA im2col of an NHWC image: (N*Ho*Wo, KH*KW*C)."""
    N, H, W, C = x.shape
    Ho = H + 2 * pad - KH + 1
    Wo = W + 2 * pad - KW + 1
    xp = jnp.pad(x, ((0, 0), (pad, pad), (pad, pad), (0, 0)))
    taps = [xp[:, kh:kh + Ho, kw:kw + Wo, :] for kh in range(KH) for kw in range(KW)]
    cols = jnp.concatenate(taps, axis=-1)                 # (N, Ho, Wo, KH*KW*C)
    return cols.reshape(N * Ho * Wo, KH * KW * C)


def backbone_forward(params, x_nchw):
    x = jnp.transpose(x_nchw, (0, 2, 3, 1)).astype(jnp.float32)   # NCHW -> NHWC
    N, H, W, _ = x.shape
    G = _make_geometry(H, W)
    assert G[0]["Wt"] == G[0]["Wo"], "layer-1 output width must be a multiple of 8"
    for i in range(3):
        assert G[i]["Ho"] % 2 == 0 and G[i]["Wo"] % 2 == 0

    # Layer-1 operands: lane-dense im2col matrix + flat weight (bf16 MXU inputs).
    cols1 = _im2col_nhwc(x, G[0]["KH"], G[0]["KW"], 1).astype(jnp.bfloat16)
    w1 = params[0]["w"].reshape(G[0]["KH"] * G[0]["KW"] * G[0]["Cin"],
                                G[0]["Cout"]).astype(jnp.bfloat16)
    # Layers 2-4: per-tap weight matrices (KH*KW, Cin, Cout) in bf16.
    wt = [params[i]["w"].reshape(G[i]["KH"] * G[i]["KW"], G[i]["Cin"],
                                 G[i]["Cout"]).astype(jnp.bfloat16)
          for i in range(1, 4)]
    gb = []
    for i in range(4):
        gb.append(params[i]["gamma"].reshape(1, G[i]["Cout"]).astype(jnp.float32))
        gb.append(params[i]["beta"].reshape(1, G[i]["Cout"]).astype(jnp.float32))

    inputs = [cols1, w1, *wt, *gb]

    def full_spec(a):
        zeros = (0,) * a.ndim
        return pl.BlockSpec(a.shape, lambda *_: zeros)

    kernel = functools.partial(_backbone_kernel, N=N, G=G)

    out = pl.pallas_call(
        kernel,
        out_shape=jax.ShapeDtypeStruct((N, G[3]["Cout"]), jnp.float32),
        grid=(1,),
        in_specs=[full_spec(a) for a in inputs],
        out_specs=pl.BlockSpec((N, G[3]["Cout"]), lambda *_: (0, 0)),
        scratch_shapes=[
            pltpu.VMEM((N, G[i]["Hp"], G[i]["Wp"], G[i]["Cin"]), jnp.bfloat16)
            for i in range(1, 4)
        ],
        compiler_params=pltpu.CompilerParams(dimension_semantics=("arbitrary",)),
    )(*inputs)

    return out.reshape(N, G[3]["Cout"], 1, 1)                     # (N, 256, 1, 1)


# --------------------------------------------------------------------------- #
# Parameter init + pure-JAX reference for correctness checking.
# --------------------------------------------------------------------------- #
def init_params(key):
    params = []
    for kh, kw, cin, cout in _LAYER_SPECS:
        key, k_w, k_g, k_b = jax.random.split(key, 4)
        fan_in = kh * kw * cin
        w = jax.random.normal(k_w, (kh, kw, cin, cout), jnp.float32) / jnp.sqrt(fan_in)
        gamma = 1.0 + 0.1 * jax.random.normal(k_g, (cout,), jnp.float32)
        beta = 0.1 * jax.random.normal(k_b, (cout,), jnp.float32)
        params.append({"w": w, "gamma": gamma, "beta": beta})
    return params


def reference_forward(params, x_nchw, matmul_dtype=jnp.bfloat16):
    """Pure-JAX reference.  With matmul_dtype=bfloat16 the conv operands are
    rounded exactly like the kernel's MXU inputs (f32 accumulation)."""
    x = jnp.transpose(x_nchw, (0, 2, 3, 1)).astype(jnp.float32)
    last = len(params) - 1
    for i, p in enumerate(params):
        y = lax.conv_general_dilated(
            x.astype(matmul_dtype), p["w"].astype(matmul_dtype),
            window_strides=(1, 1), padding=[(1, 1), (1, 1)],
            dimension_numbers=("NHWC", "HWIO", "NHWC"),
            preferred_element_type=jnp.float32,
        )
        mean = y.mean(axis=(0, 1, 2))
        var = y.var(axis=(0, 1, 2))
        yb = jnp.maximum((y - mean) / jnp.sqrt(var + EPS) * p["gamma"] + p["beta"], 0.0)
        if i < last:
            n, h, w, c = yb.shape
            yb = yb.reshape(n, h // 2, 2, w // 2, 2, c).max(axis=(2, 4))
        else:
            yb = yb.max(axis=(1, 2), keepdims=True)
        x = yb
    return jnp.transpose(x, (0, 3, 1, 2))


if __name__ == "__main__":
    key = jax.random.PRNGKey(0)
    xkey, pkey = jax.random.split(key)
    # Small input consistent with the module: N=2, C=3, H=W=18
    # (18 -> conv5/p1 -> 16 -> pool 8 -> 8 -> 4 -> 4 -> 2 -> 2 -> global 1).
    x = jax.random.normal(xkey, (2, 3, 18, 18), jnp.float32)
    params = init_params(pkey)

    backbone = jax.jit(backbone_forward)
    out = jax.block_until_ready(backbone(params, x))
    assert out.shape == (2, 256, 1, 1), out.shape

    ref = jax.block_until_ready(reference_forward(params, x, jnp.bfloat16))
    np.testing.assert_allclose(np.asarray(out), np.asarray(ref), rtol=5e-3, atol=5e-3)

    print("KERNEL_OK")
</pallas_src>

<mosaic_0001>
module attributes {stable_mosaic.version = 11 : i64} {
  func.func @_backbone_kernel(%arg0: i32, %arg1: memref<512x75xbf16, #tpu.memory_space<vmem>>, %arg2: memref<75x32xbf16, #tpu.memory_space<vmem>>, %arg3: memref<9x32x64xbf16, #tpu.memory_space<vmem>>, %arg4: memref<9x64x128xbf16, #tpu.memory_space<vmem>>, %arg5: memref<9x128x256xbf16, #tpu.memory_space<vmem>>, %arg6: memref<1x32xf32, #tpu.memory_space<vmem>>, %arg7: memref<1x32xf32, #tpu.memory_space<vmem>>, %arg8: memref<1x64xf32, #tpu.memory_space<vmem>>, %arg9: memref<1x64xf32, #tpu.memory_space<vmem>>, %arg10: memref<1x128xf32, #tpu.memory_space<vmem>>, %arg11: memref<1x128xf32, #tpu.memory_space<vmem>>, %arg12: memref<1x256xf32, #tpu.memory_space<vmem>>, %arg13: memref<1x256xf32, #tpu.memory_space<vmem>>, %arg14: memref<2x256xf32, #tpu.memory_space<vmem>>, %arg15: memref<2x10x10x32xbf16, #tpu.memory_space<vmem>>, %arg16: memref<2x6x10x64xbf16, #tpu.memory_space<vmem>>, %arg17: memref<2x4x10x128xbf16, #tpu.memory_space<vmem>>) attributes {dimension_semantics = [#tpu.dimension_semantics<arbitrary>], iteration_bounds = array<i64: 1>, scalar_prefetch = 0 : i64, scratch_operands = 3 : i64, tpu.core_type = #tpu.core_type<tc>, window_params = [{pipeline_mode = #tpu.pipeline_mode<synchronous>, transform_indices = @transform_0, window_bounds = array<i64: 512, 75>}, {pipeline_mode = #tpu.pipeline_mode<synchronous>, transform_indices = @transform_1, window_bounds = array<i64: 75, 32>}, {pipeline_mode = #tpu.pipeline_mode<synchronous>, transform_indices = @transform_2, window_bounds = array<i64: 9, 32, 64>}, {pipeline_mode = #tpu.pipeline_mode<synchronous>, transform_indices = @transform_3, window_bounds = array<i64: 9, 64, 128>}, {pipeline_mode = #tpu.pipeline_mode<synchronous>, transform_indices = @transform_4, window_bounds = array<i64: 9, 128, 256>}, {pipeline_mode = #tpu.pipeline_mode<synchronous>, transform_indices = @transform_5, window_bounds = array<i64: 1, 32>}, {pipeline_mode = #tpu.pipeline_mode<synchronous>, transform_indices = @transform_6, window_bounds = array<i64: 1, 32>}, {pipeline_mode = #tpu.pipeline_mode<synchronous>, transform_indices = @transform_7, window_bounds = array<i64: 1, 64>}, {pipeline_mode = #tpu.pipeline_mode<synchronous>, transform_indices = @transform_8, window_bounds = array<i64: 1, 64>}, {pipeline_mode = #tpu.pipeline_mode<synchronous>, transform_indices = @transform_9, window_bounds = array<i64: 1, 128>}, {pipeline_mode = #tpu.pipeline_mode<synchronous>, transform_indices = @transform_10, window_bounds = array<i64: 1, 128>}, {pipeline_mode = #tpu.pipeline_mode<synchronous>, transform_indices = @transform_11, window_bounds = array<i64: 1, 256>}, {pipeline_mode = #tpu.pipeline_mode<synchronous>, transform_indices = @transform_12, window_bounds = array<i64: 1, 256>}, {pipeline_mode = #tpu.pipeline_mode<synchronous>, transform_indices = @transform_13, window_bounds = array<i64: 2, 256>}]} {
    %cst = arith.constant 0.000000e+00 : bf16
    %0 = vector.broadcast %cst : bf16 to vector<2x10x10x32xbf16>
    %c0 = arith.constant 0 : index
    %c0_0 = arith.constant 0 : index
    %c0_1 = arith.constant 0 : index
    %c0_2 = arith.constant 0 : index
    %1 = vector.load %arg15[%c0, %c0_0, %c0_1, %c0_2] : memref<2x10x10x32xbf16, #tpu.memory_space<vmem>>, vector<2x10x10x32xbf16>
    tpu.vector_store %arg15[%c0, %c0_0, %c0_1, %c0_2], %0 {strides = array<i32>} : memref<2x10x10x32xbf16, #tpu.memory_space<vmem>>, vector<2x10x10x32xbf16>,
    %cst_3 = arith.constant 0.000000e+00 : bf16
    %2 = vector.broadcast %cst_3 : bf16 to vector<2x6x10x64xbf16>
    %c0_4 = arith.constant 0 : index
    %c0_5 = arith.constant 0 : index
    %c0_6 = arith.constant 0 : index
    %c0_7 = arith.constant 0 : index
    %3 = vector.load %arg16[%c0_4, %c0_5, %c0_6, %c0_7] : memref<2x6x10x64xbf16, #tpu.memory_space<vmem>>, vector<2x6x10x64xbf16>
    tpu.vector_store %arg16[%c0_4, %c0_5, %c0_6, %c0_7], %2 {strides = array<i32>} : memref<2x6x10x64xbf16, #tpu.memory_space<vmem>>, vector<2x6x10x64xbf16>,
    %cst_8 = arith.constant 0.000000e+00 : bf16
    %4 = vector.broadcast %cst_8 : bf16 to vector<2x4x10x128xbf16>
    %c0_9 = arith.constant 0 : index
    %c0_10 = arith.constant 0 : index
    %c0_11 = arith.constant 0 : index
    %c0_12 = arith.constant 0 : index
    %5 = vector.load %arg17[%c0_9, %c0_10, %c0_11, %c0_12] : memref<2x4x10x128xbf16, #tpu.memory_space<vmem>>, vector<2x4x10x128xbf16>
    tpu.vector_store %arg17[%c0_9, %c0_10, %c0_11, %c0_12], %4 {strides = array<i32>} : memref<2x4x10x128xbf16, #tpu.memory_space<vmem>>, vector<2x4x10x128xbf16>,
    %c0_13 = arith.constant 0 : index
    %c0_14 = arith.constant 0 : index
    %6 = vector.load %arg1[%c0_13, %c0_14] : memref<512x75xbf16, #tpu.memory_space<vmem>>, vector<512x75xbf16>
    %c0_15 = arith.constant 0 : index
    %c0_16 = arith.constant 0 : index
    %7 = vector.load %arg2[%c0_15, %c0_16] : memref<75x32xbf16, #tpu.memory_space<vmem>>, vector<75x32xbf16>
    %cst_17 = arith.constant dense<0.000000e+00> : vector<512x32xf32>
    %8 = tpu.matmul %6, %7, %cst_17 {dimension_numbers = #tpu.dot_dimension_numbers<[1], [0], [0], [1], [0, 0, 1, 1], [], []>} : vector<512x75xbf16>, vector<75x32xbf16>, vector<512x32xf32> -> vector<512x32xf32>
    %cst_18 = arith.constant dense<0.000000e+00> : vector<32xf32>
    %9 = vector.multi_reduction <add>, %8, %cst_18 [0] : vector<512x32xf32> to vector<32xf32>
    %10 = vector.shape_cast %9 : vector<32xf32> to vector<1x32xf32>
    %cst_19 = arith.constant 5.120000e+02 : f32
    %11 = vector.broadcast %cst_19 : f32 to vector<1x32xf32>
    %12 = arith.divf %10, %11 : vector<1x32xf32>
    %13 = vector.broadcast %12 : vector<1x32xf32> to vector<512x32xf32>
    %14 = arith.subf %8, %13 : vector<512x32xf32>
    %15 = arith.mulf %14, %14 : vector<512x32xf32>
    %cst_20 = arith.constant dense<0.000000e+00> : vector<32xf32>
    %16 = vector.multi_reduction <add>, %15, %cst_20 [0] : vector<512x32xf32> to vector<32xf32>
    %17 = vector.shape_cast %16 : vector<32xf32> to vector<1x32xf32>
    %cst_21 = arith.constant 5.120000e+02 : f32
    %18 = vector.broadcast %cst_21 : f32 to vector<1x32xf32>
    %19 = arith.divf %17, %18 : vector<1x32xf32>
    %c0_22 = arith.constant 0 : index
    %c0_23 = arith.constant 0 : index
    %20 = vector.load %arg6[%c0_22, %c0_23] : memref<1x32xf32, #tpu.memory_space<vmem>>, vector<1x32xf32>
    %cst_24 = arith.constant 9.99999974E-6 : f32
    %21 = vector.broadcast %cst_24 : f32 to vector<1x32xf32>
    %22 = arith.addf %19, %21 : vector<1x32xf32>
    %23 = math.rsqrt %22 : vector<1x32xf32>
    %24 = arith.mulf %20, %23 : vector<1x32xf32>
    %c0_25 = arith.constant 0 : index
    %c0_26 = arith.constant 0 : index
    %25 = vector.load %arg7[%c0_25, %c0_26] : memref<1x32xf32, #tpu.memory_space<vmem>>, vector<1x32xf32>
    %26 = arith.mulf %12, %24 : vector<1x32xf32>
    %27 = arith.subf %25, %26 : vector<1x32xf32>
    %28 = vector.broadcast %24 : vector<1x32xf32> to vector<512x32xf32>
    %29 = arith.mulf %8, %28 : vector<512x32xf32>
    %30 = vector.broadcast %27 : vector<1x32xf32> to vector<512x32xf32>
    %31 = arith.addf %29, %30 : vector<512x32xf32>
    %cst_27 = arith.constant 0.000000e+00 : f32
    %32 = vector.broadcast %cst_27 : f32 to vector<512x32xf32>
    %33 = arith.maximumf %31, %32 : vector<512x32xf32>
    %34 = vector.shape_cast %33 : vector<512x32xf32> to vector<2x16x16x32xf32>
    %35 = vector.extract_strided_slice %34 {offsets = [0, 0, 0, 0], sizes = [2, 1, 16, 32], strides = [1, 1, 1, 1]} : vector<2x16x16x32xf32> to vector<2x1x16x32xf32>
    %36 = vector.shape_cast %35 : vector<2x1x16x32xf32> to vector<2x16x32xf32>
    %37 = vector.extract_strided_slice %34 {offsets = [0, 1, 0, 0], sizes = [2, 1, 16, 32], strides = [1, 1, 1, 1]} : vector<2x16x16x32xf32> to vector<2x1x16x32xf32>
    %38 = vector.shape_cast %37 : vector<2x1x16x32xf32> to vector<2x16x32xf32>
    %39 = arith.maximumf %36, %38 : vector<2x16x32xf32>
    %40 = vector.extract_strided_slice %39 {offsets = [0, 0, 0], sizes = [2, 1, 32], strides = [1, 1, 1]} : vector<2x16x32xf32> to vector<2x1x32xf32>
    %41 = vector.extract_strided_slice %39 {offsets = [0, 1, 0], sizes = [2, 1, 32], strides = [1, 1, 1]} : vector<2x16x32xf32> to vector<2x1x32xf32>
    %42 = arith.maximumf %40, %41 : vector<2x1x32xf32>
    %43 = vector.extract_strided_slice %39 {offsets = [0, 2, 0], sizes = [2, 1, 32], strides = [1, 1, 1]} : vector<2x16x32xf32> to vector<2x1x32xf32>
    %44 = vector.extract_strided_slice %39 {offsets = [0, 3, 0], sizes = [2, 1, 32], strides = [1, 1, 1]} : vector<2x16x32xf32> to vector<2x1x32xf32>
    %45 = arith.maximumf %43, %44 : vector<2x1x32xf32>
    %46 = vector.extract_strided_slice %39 {offsets = [0, 4, 0], sizes = [2, 1, 32], strides = [1, 1, 1]} : vector<2x16x32xf32> to vector<2x1x32xf32>
    %47 = vector.extract_strided_slice %39 {offsets = [0, 5, 0], sizes = [2, 1, 32], strides = [1, 1, 1]} : vector<2x16x32xf32> to vector<2x1x32xf32>
    %48 = arith.maximumf %46, %47 : vector<2x1x32xf32>
    %49 = vector.extract_strided_slice %39 {offsets = [0, 6, 0], sizes = [2, 1, 32], strides = [1, 1, 1]} : vector<2x16x32xf32> to vector<2x1x32xf32>
    %50 = vector.extract_strided_slice %39 {offsets = [0, 7, 0], sizes = [2, 1, 32], strides = [1, 1, 1]} : vector<2x16x32xf32> to vector<2x1x32xf32>
    %51 = arith.maximumf %49, %50 : vector<2x1x32xf32>
    %52 = vector.extract_strided_slice %39 {offsets = [0, 8, 0], sizes = [2, 1, 32], strides = [1, 1, 1]} : vector<2x16x32xf32> to vector<2x1x32xf32>
    %53 = vector.extract_strided_slice %39 {offsets = [0, 9, 0], sizes = [2, 1, 32], strides = [1, 1, 1]} : vector<2x16x32xf32> to vector<2x1x32xf32>
    %54 = arith.maximumf %52, %53 : vector<2x1x32xf32>
    %55 = vector.extract_strided_slice %39 {offsets = [0, 10, 0], sizes = [2, 1, 32], strides = [1, 1, 1]} : vector<2x16x32xf32> to vector<2x1x32xf32>
    %56 = vector.extract_strided_slice %39 {offsets = [0, 11, 0], sizes = [2, 1, 32], strides = [1, 1, 1]} : vector<2x16x32xf32> to vector<2x1x32xf32>
    %57 = arith.maximumf %55, %56 : vector<2x1x32xf32>
    %58 = vector.extract_strided_slice %39 {offsets = [0, 12, 0], sizes = [2, 1, 32], strides = [1, 1, 1]} : vector<2x16x32xf32> to vector<2x1x32xf32>
    %59 = vector.extract_strided_slice %39 {offsets = [0, 13, 0], sizes = [2, 1, 32], strides = [1, 1, 1]} : vector<2x16x32xf32> to vector<2x1x32xf32>
    %60 = arith.maximumf %58, %59 : vector<2x1x32xf32>
    %61 = vector.extract_strided_slice %39 {offsets = [0, 14, 0], sizes = [2, 1, 32], strides = [1, 1, 1]} : vector<2x16x32xf32> to vector<2x1x32xf32>
    %62 = vector.extract_strided_slice %39 {offsets = [0, 15, 0], sizes = [2, 1, 32], strides = [1, 1, 1]} : vector<2x16x32xf32> to vector<2x1x32xf32>
    %63 = arith.maximumf %61, %62 : vector<2x1x32xf32>
    %64 = tpu.concatenate %42, %45, %48, %51, %54, %57, %60, %63 in 1 : vector<2x1x32xf32>, vector<2x1x32xf32>, vector<2x1x32xf32>, vector<2x1x32xf32>, vector<2x1x32xf32>, vector<2x1x32xf32>, vector<2x1x32xf32>, vector<2x1x32xf32> -> vector<2x8x32xf32>
    %65 = arith.truncf %64 : vector<2x8x32xf32> to vector<2x8x32xbf16>
    %c0_28 = arith.constant 0 : index
    %c1 = arith.constant 1 : index
    %c1_29 = arith.constant 1 : index
    %c0_30 = arith.constant 0 : index
    %66 = vector.load %arg15[%c0_28, %c1, %c1_29, %c0_30] : memref<2x10x10x32xbf16, #tpu.memory_space<vmem>>, vector<2x1x8x32xbf16>
    %67 = vector.shape_cast %66 : vector<2x1x8x32xbf16> to vector<2x8x32xbf16>
    %68 = vector.shape_cast %65 : vector<2x8x32xbf16> to vector<2x1x8x32xbf16>
    tpu.vector_store %arg15[%c0_28, %c1, %c1_29, %c0_30], %68 {strides = array<i32>} : memref<2x10x10x32xbf16, #tpu.memory_space<vmem>>, vector<2x1x8x32xbf16>,
    %69 = vector.extract_strided_slice %34 {offsets = [0, 2, 0, 0], sizes = [2, 1, 16, 32], strides = [1, 1, 1, 1]} : vector<2x16x16x32xf32> to vector<2x1x16x32xf32>
    %70 = vector.shape_cast %69 : vector<2x1x16x32xf32> to vector<2x16x32xf32>
    %71 = vector.extract_strided_slice %34 {offsets = [0, 3, 0, 0], sizes = [2, 1, 16, 32], strides = [1, 1, 1, 1]} : vector<2x16x16x32xf32> to vector<2x1x16x32xf32>
    %72 = vector.shape_cast %71 : vector<2x1x16x32xf32> to vector<2x16x32xf32>
    %73 = arith.maximumf %70, %72 : vector<2x16x32xf32>
    %74 = vector.extract_strided_slice %73 {offsets = [0, 0, 0], sizes = [2, 1, 32], strides = [1, 1, 1]} : vector<2x16x32xf32> to vector<2x1x32xf32>
    %75 = vector.extract_strided_slice %73 {offsets = [0, 1, 0], sizes = [2, 1, 32], strides = [1, 1, 1]} : vector<2x16x32xf32> to vector<2x1x32xf32>
    %76 = arith.maximumf %74, %75 : vector<2x1x32xf32>
    %77 = vector.extract_strided_slice %73 {offsets = [0, 2, 0], sizes = [2, 1, 32], strides = [1, 1, 1]} : vector<2x16x32xf32> to vector<2x1x32xf32>
    %78 = vector.extract_strided_slice %73 {offsets = [0, 3, 0], sizes = [2, 1, 32], strides = [1, 1, 1]} : vector<2x16x32xf32> to vector<2x1x32xf32>
    %79 = arith.maximumf %77, %78 : vector<2x1x32xf32>
    %80 = vector.extract_strided_slice %73 {offsets = [0, 4, 0], sizes = [2, 1, 32], strides = [1, 1, 1]} : vector<2x16x32xf32> to vector<2x1x32xf32>
    %81 = vector.extract_strided_slice %73 {offsets = [0, 5, 0], sizes = [2, 1, 32], strides = [1, 1, 1]} : vector<2x16x32xf32> to vector<2x1x32xf32>
    %82 = arith.maximumf %80, %81 : vector<2x1x32xf32>
    %83 = vector.extract_strided_slice %73 {offsets = [0, 6, 0], sizes = [2, 1, 32], strides = [1, 1, 1]} : vector<2x16x32xf32> to vector<2x1x32xf32>
    %84 = vector.extract_strided_slice %73 {offsets = [0, 7, 0], sizes = [2, 1, 32], strides = [1, 1, 1]} : vector<2x16x32xf32> to vector<2x1x32xf32>
    %85 = arith.maximumf %83, %84 : vector<2x1x32xf32>
    %86 = vector.extract_strided_slice %73 {offsets = [0, 8, 0], sizes = [2, 1, 32], strides = [1, 1, 1]} : vector<2x16x32xf32> to vector<2x1x32xf32>
    %87 = vector.extract_strided_slice %73 {offsets = [0, 9, 0], sizes = [2, 1, 32], strides = [1, 1, 1]} : vector<2x16x32xf32> to vector<2x1x32xf32>
    %88 = arith.maximumf %86, %87 : vector<2x1x32xf32>
    %89 = vector.extract_strided_slice %73 {offsets = [0, 10, 0], sizes = [2, 1, 32], strides = [1, 1, 1]} : vector<2x16x32xf32> to vector<2x1x32xf32>
    %90 = vector.extract_strided_slice %73 {offsets = [0, 11, 0], sizes = [2, 1, 32], strides = [1, 1, 1]} : vector<2x16x32xf32> to vector<2x1x32xf32>
    %91 = arith.maximumf %89, %90 : vector<2x1x32xf32>
    %92 = vector.extract_strided_slice %73 {offsets = [0, 12, 0], sizes = [2, 1, 32], strides = [1, 1, 1]} : vector<2x16x32xf32> to vector<2x1x32xf32>
    %93 = vector.extract_strided_slice %73 {offsets = [0, 13, 0], sizes = [2, 1, 32], strides = [1, 1, 1]} : vector<2x16x32xf32> to vector<2x1x32xf32>
    %94 = arith.maximumf %92, %93 : vector<2x1x32xf32>
    %95 = vector.extract_strided_slice %73 {offsets = [0, 14, 0], sizes = [2, 1, 32], strides = [1, 1, 1]} : vector<2x16x32xf32> to vector<2x1x32xf32>
    %96 = vector.extract_strided_slice %73 {offsets = [0, 15, 0], sizes = [2, 1, 32], strides = [1, 1, 1]} : vector<2x16x32xf32> to vector<2x1x32xf32>
    %97 = arith.maximumf %95, %96 : vector<2x1x32xf32>
    %98 = tpu.concatenate %76, %79, %82, %85, %88, %91, %94, %97 in 1 : vector<2x1x32xf32>, vector<2x1x32xf32>, vector<2x1x32xf32>, vector<2x1x32xf32>, vector<2x1x32xf32>, vector<2x1x32xf32>, vector<2x1x32xf32>, vector<2x1x32xf32> -> vector<2x8x32xf32>
    %99 = arith.truncf %98 : vector<2x8x32xf32> to vector<2x8x32xbf16>
    %c0_31 = arith.constant 0 : index
    %c2 = arith.constant 2 : index
    %c1_32 = arith.constant 1 : index
    %c0_33 = arith.constant 0 : index
    %100 = vector.load %arg15[%c0_31, %c2, %c1_32, %c0_33] : memref<2x10x10x32xbf16, #tpu.memory_space<vmem>>, vector<2x1x8x32xbf16>
    %101 = vector.shape_cast %100 : vector<2x1x8x32xbf16> to vector<2x8x32xbf16>
    %102 = vector.shape_cast %99 : vector<2x8x32xbf16> to vector<2x1x8x32xbf16>
    tpu.vector_store %arg15[%c0_31, %c2, %c1_32, %c0_33], %102 {strides = array<i32>} : memref<2x10x10x32xbf16, #tpu.memory_space<vmem>>, vector<2x1x8x32xbf16>,
    %103 = vector.extract_strided_slice %34 {offsets = [0, 4, 0, 0], sizes = [2, 1, 16, 32], strides = [1, 1, 1, 1]} : vector<2x16x16x32xf32> to vector<2x1x16x32xf32>
    %104 = vector.shape_cast %103 : vector<2x1x16x32xf32> to vector<2x16x32xf32>
    %105 = vector.extract_strided_slice %34 {offsets = [0, 5, 0, 0], sizes = [2, 1, 16, 32], strides = [1, 1, 1, 1]} : vector<2x16x16x32xf32> to vector<2x1x16x32xf32>
    %106 = vector.shape_cast %105 : vector<2x1x16x32xf32> to vector<2x16x32xf32>
    %107 = arith.maximumf %104, %106 : vector<2x16x32xf32>
    %108 = vector.extract_strided_slice %107 {offsets = [0, 0, 0], sizes = [2, 1, 32], strides = [1, 1, 1]} : vector<2x16x32xf32> to vector<2x1x32xf32>
    %109 = vector.extract_strided_slice %107 {offsets = [0, 1, 0], sizes = [2, 1, 32], strides = [1, 1, 1]} : vector<2x16x32xf32> to vector<2x1x32xf32>
    %110 = arith.maximumf %108, %109 : vector<2x1x32xf32>
    %111 = vector.extract_strided_slice %107 {offsets = [0, 2, 0], sizes = [2, 1, 32], strides = [1, 1, 1]} : vector<2x16x32xf32> to vector<2x1x32xf32>
    %112 = vector.extract_strided_slice %107 {offsets = [0, 3, 0], sizes = [2, 1, 32], strides = [1, 1, 1]} : vector<2x16x32xf32> to vector<2x1x32xf32>
    %113 = arith.maximumf %111, %112 : vector<2x1x32xf32>
    %114 = vector.extract_strided_slice %107 {offsets = [0, 4, 0], sizes = [2, 1, 32], strides = [1, 1, 1]} : vector<2x16x32xf32> to vector<2x1x32xf32>
    %115 = vector.extract_strided_slice %107 {offsets = [0, 5, 0], sizes = [2, 1, 32], strides = [1, 1, 1]} : vector<2x16x32xf32> to vector<2x1x32xf32>
    %116 = arith.maximumf %114, %115 : vector<2x1x32xf32>
    %117 = vector.extract_strided_slice %107 {offsets = [0, 6, 0], sizes = [2, 1, 32], strides = [1, 1, 1]} : vector<2x16x32xf32> to vector<2x1x32xf32>
    %118 = vector.extract_strided_slice %107 {offsets = [0, 7, 0], sizes = [2, 1, 32], strides = [1, 1, 1]} : vector<2x16x32xf32> to vector<2x1x32xf32>
    %119 = arith.maximumf %117, %118 : vector<2x1x32xf32>
    %120 = vector.extract_strided_slice %107 {offsets = [0, 8, 0], sizes = [2, 1, 32], strides = [1, 1, 1]} : vector<2x16x32xf32> to vector<2x1x32xf32>
    %121 = vector.extract_strided_slice %107 {offsets = [0, 9, 0], sizes = [2, 1, 32], strides = [1, 1, 1]} : vector<2x16x32xf32> to vector<2x1x32xf32>
    %122 = arith.maximumf %120, %121 : vector<2x1x32xf32>
    %123 = vector.extract_strided_slice %107 {offsets = [0, 10, 0], sizes = [2, 1, 32], strides = [1, 1, 1]} : vector<2x16x32xf32> to vector<2x1x32xf32>
    %124 = vector.extract_strided_slice %107 {offsets = [0, 11, 0], sizes = [2, 1, 32], strides = [1, 1, 1]} : vector<2x16x32xf32> to vector<2x1x32xf32>
    %125 = arith.maximumf %123, %124 : vector<2x1x32xf32>
    %126 = vector.extract_strided_slice %107 {offsets = [0, 12, 0], sizes = [2, 1, 32], strides = [1, 1, 1]} : vector<2x16x32xf32> to vector<2x1x32xf32>
    %127 = vector.extract_strided_slice %107 {offsets = [0, 13, 0], sizes = [2, 1, 32], strides = [1, 1, 1]} : vector<2x16x32xf32> to vector<2x1x32xf32>
    %128 = arith.maximumf %126, %127 : vector<2x1x32xf32>
    %129 = vector.extract_strided_slice %107 {offsets = [0, 14, 0], sizes = [2, 1, 32], strides = [1, 1, 1]} : vector<2x16x32xf32> to vector<2x1x32xf32>
    %130 = vector.extract_strided_slice %107 {offsets = [0, 15, 0], sizes = [2, 1, 32], strides = [1, 1, 1]} : vector<2x16x32xf32> to vector<2x1x32xf32>
    %131 = arith.maximumf %129, %130 : vector<2x1x32xf32>
    %132 = tpu.concatenate %110, %113, %116, %119, %122, %125, %128, %131 in 1 : vector<2x1x32xf32>, vector<2x1x32xf32>, vector<2x1x32xf32>, vector<2x1x32xf32>, vector<2x1x32xf32>, vector<2x1x32xf32>, vector<2x1x32xf32>, vector<2x1x32xf32> -> vector<2x8x32xf32>
    %133 = arith.truncf %132 : vector<2x8x32xf32> to vector<2x8x32xbf16>
    %c0_34 = arith.constant 0 : index
    %c3 = arith.constant 3 : index
    %c1_35 = arith.constant 1 : index
    %c0_36 = arith.constant 0 : index
    %134 = vector.load %arg15[%c0_34, %c3, %c1_35, %c0_36] : memref<2x10x10x32xbf16, #tpu.memory_space<vmem>>, vector<2x1x8x32xbf16>
    %135 = vector.shape_cast %134 : vector<2x1x8x32xbf16> to vector<2x8x32xbf16>
    %136 = vector.shape_cast %133 : vector<2x8x32xbf16> to vector<2x1x8x32xbf16>
    tpu.vector_store %arg15[%c0_34, %c3, %c1_35, %c0_36], %136 {strides = array<i32>} : memref<2x10x10x32xbf16, #tpu.memory_space<vmem>>, vector<2x1x8x32xbf16>,
    %137 = vector.extract_strided_slice %34 {offsets = [0, 6, 0, 0], sizes = [2, 1, 16, 32], strides = [1, 1, 1, 1]} : vector<2x16x16x32xf32> to vector<2x1x16x32xf32>
    %138 = vector.shape_cast %137 : vector<2x1x16x32xf32> to vector<2x16x32xf32>
    %139 = vector.extract_strided_slice %34 {offsets = [0, 7, 0, 0], sizes = [2, 1, 16, 32], strides = [1, 1, 1, 1]} : vector<2x16x16x32xf32> to vector<2x1x16x32xf32>
    %140 = vector.shape_cast %139 : vector<2x1x16x32xf32> to vector<2x16x32xf32>
    %141 = arith.maximumf %138, %140 : vector<2x16x32xf32>
    %142 = vector.extract_strided_slice %141 {offsets = [0, 0, 0], sizes = [2, 1, 32], strides = [1, 1, 1]} : vector<2x16x32xf32> to vector<2x1x32xf32>
    %143 = vector.extract_strided_slice %141 {offsets = [0, 1, 0], sizes = [2, 1, 32], strides = [1, 1, 1]} : vector<2x16x32xf32> to vector<2x1x32xf32>
    %144 = arith.maximumf %142, %143 : vector<2x1x32xf32>
    %145 = vector.extract_strided_slice %141 {offsets = [0, 2, 0], sizes = [2, 1, 32], strides = [1, 1, 1]} : vector<2x16x32xf32> to vector<2x1x32xf32>
    %146 = vector.extract_strided_slice %141 {offsets = [0, 3, 0], sizes = [2, 1, 32], strides = [1, 1, 1]} : vector<2x16x32xf32> to vector<2x1x32xf32>
    %147 = arith.maximumf %145, %146 : vector<2x1x32xf32>
    %148 = vector.extract_strided_slice %141 {offsets = [0, 4, 0], sizes = [2, 1, 32], strides = [1, 1, 1]} : vector<2x16x32xf32> to vector<2x1x32xf32>
    %149 = vector.extract_strided_slice %141 {offsets = [0, 5, 0], sizes = [2, 1, 32], strides = [1, 1, 1]} : vector<2x16x32xf32> to vector<2x1x32xf32>
    %150 = arith.maximumf %148, %149 : vector<2x1x32xf32>
    %151 = vector.extract_strided_slice %141 {offsets = [0, 6, 0], sizes = [2, 1, 32], strides = [1, 1, 1]} : vector<2x16x32xf32> to vector<2x1x32xf32>
    %152 = vector.extract_strided_slice %141 {offsets = [0, 7, 0], sizes = [2, 1, 32], strides = [1, 1, 1]} : vector<2x16x32xf32> to vector<2x1x32xf32>
    %153 = arith.maximumf %151, %152 : vector<2x1x32xf32>
    %154 = vector.extract_strided_slice %141 {offsets = [0, 8, 0], sizes = [2, 1, 32], strides = [1, 1, 1]} : vector<2x16x32xf32> to vector<2x1x32xf32>
    %155 = vector.extract_strided_slice %141 {offsets = [0, 9, 0], sizes = [2, 1, 32], strides = [1, 1, 1]} : vector<2x16x32xf32> to vector<2x1x32xf32>
    %156 = arith.maximumf %154, %155 : vector<2x1x32xf32>
    %157 = vector.extract_strided_slice %141 {offsets = [0, 10, 0], sizes = [2, 1, 32], strides = [1, 1, 1]} : vector<2x16x32xf32> to vector<2x1x32xf32>
    %158 = vector.extract_strided_slice %141 {offsets = [0, 11, 0], sizes = [2, 1, 32], strides = [1, 1, 1]} : vector<2x16x32xf32> to vector<2x1x32xf32>
    %159 = arith.maximumf %157, %158 : vector<2x1x32xf32>
    %160 = vector.extract_strided_slice %141 {offsets = [0, 12, 0], sizes = [2, 1, 32], strides = [1, 1, 1]} : vector<2x16x32xf32> to vector<2x1x32xf32>
    %161 = vector.extract_strided_slice %141 {offsets = [0, 13, 0], sizes = [2, 1, 32], strides = [1, 1, 1]} : vector<2x16x32xf32> to vector<2x1x32xf32>
    %162 = arith.maximumf %160, %161 : vector<2x1x32xf32>
    %163 = vector.extract_strided_slice %141 {offsets = [0, 14, 0], sizes = [2, 1, 32], strides = [1, 1, 1]} : vector<2x16x32xf32> to vector<2x1x32xf32>
    %164 = vector.extract_strided_slice %141 {offsets = [0, 15, 0], sizes = [2, 1, 32], strides = [1, 1, 1]} : vector<2x16x32xf32> to vector<2x1x32xf32>
    %165 = arith.maximumf %163, %164 : vector<2x1x32xf32>
    %166 = tpu.concatenate %144, %147, %150, %153, %156, %159, %162, %165 in 1 : vector<2x1x32xf32>, vector<2x1x32xf32>, vector<2x1x32xf32>, vector<2x1x32xf32>, vector<2x1x32xf32>, vector<2x1x32xf32>, vector<2x1x32xf32>, vector<2x1x32xf32> -> vector<2x8x32xf32>
    %167 = arith.truncf %166 : vector<2x8x32xf32> to vector<2x8x32xbf16>
    %c0_37 = arith.constant 0 : index
    %c4 = arith.constant 4 : index
    %c1_38 = arith.constant 1 : index
    %c0_39 = arith.constant 0 : index
    %168 = vector.load %arg15[%c0_37, %c4, %c1_38, %c0_39] : memref<2x10x10x32xbf16, #tpu.memory_space<vmem>>, vector<2x1x8x32xbf16>
    %169 = vector.shape_cast %168 : vector<2x1x8x32xbf16> to vector<2x8x32xbf16>
    %170 = vector.shape_cast %167 : vector<2x8x32xbf16> to vector<2x1x8x32xbf16>
    tpu.vector_store %arg15[%c0_37, %c4, %c1_38, %c0_39], %170 {strides = array<i32>} : memref<2x10x10x32xbf16, #tpu.memory_space<vmem>>, vector<2x1x8x32xbf16>,
    %171 = vector.extract_strided_slice %34 {offsets = [0, 8, 0, 0], sizes = [2, 1, 16, 32], strides = [1, 1, 1, 1]} : vector<2x16x16x32xf32> to vector<2x1x16x32xf32>
    %172 = vector.shape_cast %171 : vector<2x1x16x32xf32> to vector<2x16x32xf32>
    %173 = vector.extract_strided_slice %34 {offsets = [0, 9, 0, 0], sizes = [2, 1, 16, 32], strides = [1, 1, 1, 1]} : vector<2x16x16x32xf32> to vector<2x1x16x32xf32>
    %174 = vector.shape_cast %173 : vector<2x1x16x32xf32> to vector<2x16x32xf32>
    %175 = arith.maximumf %172, %174 : vector<2x16x32xf32>
    %176 = vector.extract_strided_slice %175 {offsets = [0, 0, 0], sizes = [2, 1, 32], strides = [1, 1, 1]} : vector<2x16x32xf32> to vector<2x1x32xf32>
    %177 = vector.extract_strided_slice %175 {offsets = [0, 1, 0], sizes = [2, 1, 32], strides = [1, 1, 1]} : vector<2x16x32xf32> to vector<2x1x32xf32>
    %178 = arith.maximumf %176, %177 : vector<2x1x32xf32>
    %179 = vector.extract_strided_slice %175 {offsets = [0, 2, 0], sizes = [2, 1, 32], strides = [1, 1, 1]} : vector<2x16x32xf32> to vector<2x1x32xf32>
    %180 = vector.extract_strided_slice %175 {offsets = [0, 3, 0], sizes = [2, 1, 32], strides = [1, 1, 1]} : vector<2x16x32xf32> to vector<2x1x32xf32>
    %181 = arith.maximumf %179, %180 : vector<2x1x32xf32>
    %182 = vector.extract_strided_slice %175 {offsets = [0, 4, 0], sizes = [2, 1, 32], strides = [1, 1, 1]} : vector<2x16x32xf32> to vector<2x1x32xf32>
    %183 = vector.extract_strided_slice %175 {offsets = [0, 5, 0], sizes = [2, 1, 32], strides = [1, 1, 1]} : vector<2x16x32xf32> to vector<2x1x32xf32>
    %184 = arith.maximumf %182, %183 : vector<2x1x32xf32>
    %185 = vector.extract_strided_slice %175 {offsets = [0, 6, 0], sizes = [2, 1, 32], strides = [1, 1, 1]} : vector<2x16x32xf32> to vector<2x1x32xf32>
    %186 = vector.extract_strided_slice %175 {offsets = [0, 7, 0], sizes = [2, 1, 32], strides = [1, 1, 1]} : vector<2x16x32xf32> to vector<2x1x32xf32>
    %187 = arith.maximumf %185, %186 : vector<2x1x32xf32>
    %188 = vector.extract_strided_slice %175 {offsets = [0, 8, 0], sizes = [2, 1, 32], strides = [1, 1, 1]} : vector<2x16x32xf32> to vector<2x1x32xf32>
    %189 = vector.extract_strided_slice %175 {offsets = [0, 9, 0], sizes = [2, 1, 32], strides = [1, 1, 1]} : vector<2x16x32xf32> to vector<2x1x32xf32>
    %190 = arith.maximumf %188, %189 : vector<2x1x32xf32>
    %191 = vector.extract_strided_slice %175 {offsets = [0, 10, 0], sizes = [2, 1, 32], strides = [1, 1, 1]} : vector<2x16x32xf32> to vector<2x1x32xf32>
    %192 = vector.extract_strided_slice %175 {offsets = [0, 11, 0], sizes = [2, 1, 32], strides = [1, 1, 1]} : vector<2x16x32xf32> to vector<2x1x32xf32>
    %193 = arith.maximumf %191, %192 : vector<2x1x32xf32>
    %194 = vector.extract_strided_slice %175 {offsets = [0, 12, 0], sizes = [2, 1, 32], strides = [1, 1, 1]} : vector<2x16x32xf32> to vector<2x1x32xf32>
    %195 = vector.extract_strided_slice %175 {offsets = [0, 13, 0], sizes = [2, 1, 32], strides = [1, 1, 1]} : vector<2x16x32xf32> to vector<2x1x32xf32>
    %196 = arith.maximumf %194, %195 : vector<2x1x32xf32>
    %197 = vector.extract_strided_slice %175 {offsets = [0, 14, 0], sizes = [2, 1, 32], strides = [1, 1, 1]} : vector<2x16x32xf32> to vector<2x1x32xf32>
    %198 = vector.extract_strided_slice %175 {offsets = [0, 15, 0], sizes = [2, 1, 32], strides = [1, 1, 1]} : vector<2x16x32xf32> to vector<2x1x32xf32>
    %199 = arith.maximumf %197, %198 : vector<2x1x32xf32>
    %200 = tpu.concatenate %178, %181, %184, %187, %190, %193, %196, %199 in 1 : vector<2x1x32xf32>, vector<2x1x32xf32>, vector<2x1x32xf32>, vector<2x1x32xf32>, vector<2x1x32xf32>, vector<2x1x32xf32>, vector<2x1x32xf32>, vector<2x1x32xf32> -> vector<2x8x32xf32>
    %201 = arith.truncf %200 : vector<2x8x32xf32> to vector<2x8x32xbf16>
    %c0_40 = arith.constant 0 : index
    %c5 = arith.constant 5 : index
    %c1_41 = arith.constant 1 : index
    %c0_42 = arith.constant 0 : index
    %202 = vector.load %arg15[%c0_40, %c5, %c1_41, %c0_42] : memref<2x10x10x32xbf16, #tpu.memory_space<vmem>>, vector<2x1x8x32xbf16>
    %203 = vector.shape_cast %202 : vector<2x1x8x32xbf16> to vector<2x8x32xbf16>
    %204 = vector.shape_cast %201 : vector<2x8x32xbf16> to vector<2x1x8x32xbf16>
    tpu.vector_store %arg15[%c0_40, %c5, %c1_41, %c0_42], %204 {strides = array<i32>} : memref<2x10x10x32xbf16, #tpu.memory_space<vmem>>, vector<2x1x8x32xbf16>,
    %205 = vector.extract_strided_slice %34 {offsets = [0, 10, 0, 0], sizes = [2, 1, 16, 32], strides = [1, 1, 1, 1]} : vector<2x16x16x32xf32> to vector<2x1x16x32xf32>
    %206 = vector.shape_cast %205 : vector<2x1x16x32xf32> to vector<2x16x32xf32>
    %207 = vector.extract_strided_slice %34 {offsets = [0, 11, 0, 0], sizes = [2, 1, 16, 32], strides = [1, 1, 1, 1]} : vector<2x16x16x32xf32> to vector<2x1x16x32xf32>
    %208 = vector.shape_cast %207 : vector<2x1x16x32xf32> to vector<2x16x32xf32>
    %209 = arith.maximumf %206, %208 : vector<2x16x32xf32>
    %210 = vector.extract_strided_slice %209 {offsets = [0, 0, 0], sizes = [2, 1, 32], strides = [1, 1, 1]} : vector<2x16x32xf32> to vector<2x1x32xf32>
    %211 = vector.extract_strided_slice %209 {offsets = [0, 1, 0], sizes = [2, 1, 32], strides = [1, 1, 1]} : vector<2x16x32xf32> to vector<2x1x32xf32>
    %212 = arith.maximumf %210, %211 : vector<2x1x32xf32>
    %213 = vector.extract_strided_slice %209 {offsets = [0, 2, 0], sizes = [2, 1, 32], strides = [1, 1, 1]} : vector<2x16x32xf32> to vector<2x1x32xf32>
    %214 = vector.extract_strided_slice %209 {offsets = [0, 3, 0], sizes = [2, 1, 32], strides = [1, 1, 1]} : vector<2x16x32xf32> to vector<2x1x32xf32>
    %215 = arith.maximumf %213, %214 : vector<2x1x32xf32>
    %216 = vector.extract_strided_slice %209 {offsets = [0, 4, 0], sizes = [2, 1, 32], strides = [1, 1, 1]} : vector<2x16x32xf32> to vector<2x1x32xf32>
    %217 = vector.extract_strided_slice %209 {offsets = [0, 5, 0], sizes = [2, 1, 32], strides = [1, 1, 1]} : vector<2x16x32xf32> to vector<2x1x32xf32>
    %218 = arith.maximumf %216, %217 : vector<2x1x32xf32>
    %219 = vector.extract_strided_slice %209 {offsets = [0, 6, 0], sizes = [2, 1, 32], strides = [1, 1, 1]} : vector<2x16x32xf32> to vector<2x1x32xf32>
    %220 = vector.extract_strided_slice %209 {offsets = [0, 7, 0], sizes = [2, 1, 32], strides = [1, 1, 1]} : vector<2x16x32xf32> to vector<2x1x32xf32>
    %221 = arith.maximumf %219, %220 : vector<2x1x32xf32>
    %222 = vector.extract_strided_slice %209 {offsets = [0, 8, 0], sizes = [2, 1, 32], strides = [1, 1, 1]} : vector<2x16x32xf32> to vector<2x1x32xf32>
    %223 = vector.extract_strided_slice %209 {offsets = [0, 9, 0], sizes = [2, 1, 32], strides = [1, 1, 1]} : vector<2x16x32xf32> to vector<2x1x32xf32>
    %224 = arith.maximumf %222, %223 : vector<2x1x32xf32>
    %225 = vector.extract_strided_slice %209 {offsets = [0, 10, 0], sizes = [2, 1, 32], strides = [1, 1, 1]} : vector<2x16x32xf32> to vector<2x1x32xf32>
    %226 = vector.extract_strided_slice %209 {offsets = [0, 11, 0], sizes = [2, 1, 32], strides = [1, 1, 1]} : vector<2x16x32xf32> to vector<2x1x32xf32>
    %227 = arith.maximumf %225, %226 : vector<2x1x32xf32>
    %228 = vector.extract_strided_slice %209 {offsets = [0, 12, 0], sizes = [2, 1, 32], strides = [1, 1, 1]} : vector<2x16x32xf32> to vector<2x1x32xf32>
    %229 = vector.extract_strided_slice %209 {offsets = [0, 13, 0], sizes = [2, 1, 32], strides = [1, 1, 1]} : vector<2x16x32xf32> to vector<2x1x32xf32>
    %230 = arith.maximumf %228, %229 : vector<2x1x32xf32>
    %231 = vector.extract_strided_slice %209 {offsets = [0, 14, 0], sizes = [2, 1, 32], strides = [1, 1, 1]} : vector<2x16x32xf32> to vector<2x1x32xf32>
    %232 = vector.extract_strided_slice %209 {offsets = [0, 15, 0], sizes = [2, 1, 32], strides = [1, 1, 1]} : vector<2x16x32xf32> to vector<2x1x32xf32>
    %233 = arith.maximumf %231, %232 : vector<2x1x32xf32>
    %234 = tpu.concatenate %212, %215, %218, %221, %224, %227, %230, %233 in 1 : vector<2x1x32xf32>, vector<2x1x32xf32>, vector<2x1x32xf32>, vector<2x1x32xf32>, vector<2x1x32xf32>, vector<2x1x32xf32>, vector<2x1x32xf32>, vector<2x1x32xf32> -> vector<2x8x32xf32>
    %235 = arith.truncf %234 : vector<2x8x32xf32> to vector<2x8x32xbf16>
    %c0_43 = arith.constant 0 : index
    %c6 = arith.constant 6 : index
    %c1_44 = arith.constant 1 : index
    %c0_45 = arith.constant 0 : index
    %236 = vector.load %arg15[%c0_43, %c6, %c1_44, %c0_45] : memref<2x10x10x32xbf16, #tpu.memory_space<vmem>>, vector<2x1x8x32xbf16>
    %237 = vector.shape_cast %236 : vector<2x1x8x32xbf16> to vector<2x8x32xbf16>
    %238 = vector.shape_cast %235 : vector<2x8x32xbf16> to vector<2x1x8x32xbf16>
    tpu.vector_store %arg15[%c0_43, %c6, %c1_44, %c0_45], %238 {strides = array<i32>} : memref<2x10x10x32xbf16, #tpu.memory_space<vmem>>, vector<2x1x8x32xbf16>,
    %239 = vector.extract_strided_slice %34 {offsets = [0, 12, 0, 0], sizes = [2, 1, 16, 32], strides = [1, 1, 1, 1]} : vector<2x16x16x32xf32> to vector<2x1x16x32xf32>
    %240 = vector.shape_cast %239 : vector<2x1x16x32xf32> to vector<2x16x32xf32>
    %241 = vector.extract_strided_slice %34 {offsets = [0, 13, 0, 0], sizes = [2, 1, 16, 32], strides = [1, 1, 1, 1]} : vector<2x16x16x32xf32> to vector<2x1x16x32xf32>
    %242 = vector.shape_cast %241 : vector<2x1x16x32xf32> to vector<2x16x32xf32>
    %243 = arith.maximumf %240, %242 : vector<2x16x32xf32>
    %244 = vector.extract_strided_slice %243 {offsets = [0, 0, 0], sizes = [2, 1, 32], strides = [1, 1, 1]} : vector<2x16x32xf32> to vector<2x1x32xf32>
    %245 = vector.extract_strided_slice %243 {offsets = [0, 1, 0], sizes = [2, 1, 32], strides = [1, 1, 1]} : vector<2x16x32xf32> to vector<2x1x32xf32>
    %246 = arith.maximumf %244, %245 : vector<2x1x32xf32>
    %247 = vector.extract_strided_slice %243 {offsets = [0, 2, 0], sizes = [2, 1, 32], strides = [1, 1, 1]} : vector<2x16x32xf32> to vector<2x1x32xf32>
    %248 = vector.extract_strided_slice %243 {offsets = [0, 3, 0], sizes = [2, 1, 32], strides = [1, 1, 1]} : vector<2x16x32xf32> to vector<2x1x32xf32>
    %249 = arith.maximumf %247, %248 : vector<2x1x32xf32>
    %250 = vector.extract_strided_slice %243 {offsets = [0, 4, 0], sizes = [2, 1, 32], strides = [1, 1, 1]} : vector<2x16x32xf32> to vector<2x1x32xf32>
    %251 = vector.extract_strided_slice %243 {offsets = [0, 5, 0], sizes = [2, 1, 32], strides = [1, 1, 1]} : vector<2x16x32xf32> to vector<2x1x32xf32>
    %252 = arith.maximumf %250, %251 : vector<2x1x32xf32>
    %253 = vector.extract_strided_slice %243 {offsets = [0, 6, 0], sizes = [2, 1, 32], strides = [1, 1, 1]} : vector<2x16x32xf32> to vector<2x1x32xf32>
    %254 = vector.extract_strided_slice %243 {offsets = [0, 7, 0], sizes = [2, 1, 32], strides = [1, 1, 1]} : vector<2x16x32xf32> to vector<2x1x32xf32>
    %255 = arith.maximumf %253, %254 : vector<2x1x32xf32>
    %256 = vector.extract_strided_slice %243 {offsets = [0, 8, 0], sizes = [2, 1, 32], strides = [1, 1, 1]} : vector<2x16x32xf32> to vector<2x1x32xf32>
    %257 = vector.extract_strided_slice %243 {offsets = [0, 9, 0], sizes = [2, 1, 32], strides = [1, 1, 1]} : vector<2x16x32xf32> to vector<2x1x32xf32>
    %258 = arith.maximumf %256, %257 : vector<2x1x32xf32>
    %259 = vector.extract_strided_slice %243 {offsets = [0, 10, 0], sizes = [2, 1, 32], strides = [1, 1, 1]} : vector<2x16x32xf32> to vector<2x1x32xf32>
    %260 = vector.extract_strided_slice %243 {offsets = [0, 11, 0], sizes = [2, 1, 32], strides = [1, 1, 1]} : vector<2x16x32xf32> to vector<2x1x32xf32>
    %261 = arith.maximumf %259, %260 : vector<2x1x32xf32>
    %262 = vector.extract_strided_slice %243 {offsets = [0, 12, 0], sizes = [2, 1, 32], strides = [1, 1, 1]} : vector<2x16x32xf32> to vector<2x1x32xf32>
    %263 = vector.extract_strided_slice %243 {offsets = [0, 13, 0], sizes = [2, 1, 32], strides = [1, 1, 1]} : vector<2x16x32xf32> to vector<2x1x32xf32>
    %264 = arith.maximumf %262, %263 : vector<2x1x32xf32>
    %265 = vector.extract_strided_slice %243 {offsets = [0, 14, 0], sizes = [2, 1, 32], strides = [1, 1, 1]} : vector<2x16x32xf32> to vector<2x1x32xf32>
    %266 = vector.extract_strided_slice %243 {offsets = [0, 15, 0], sizes = [2, 1, 32], strides = [1, 1, 1]} : vector<2x16x32xf32> to vector<2x1x32xf32>
    %267 = arith.maximumf %265, %266 : vector<2x1x32xf32>
    %268 = tpu.concatenate %246, %249, %252, %255, %258, %261, %264, %267 in 1 : vector<2x1x32xf32>, vector<2x1x32xf32>, vector<2x1x32xf32>, vector<2x1x32xf32>, vector<2x1x32xf32>, vector<2x1x32xf32>, vector<2x1x32xf32>, vector<2x1x32xf32> -> vector<2x8x32xf32>
    %269 = arith.truncf %268 : vector<2x8x32xf32> to vector<2x8x32xbf16>
    %c0_46 = arith.constant 0 : index
    %c7 = arith.constant 7 : index
    %c1_47 = arith.constant 1 : index
    %c0_48 = arith.constant 0 : index
    %270 = vector.load %arg15[%c0_46, %c7, %c1_47, %c0_48] : memref<2x10x10x32xbf16, #tpu.memory_space<vmem>>, vector<2x1x8x32xbf16>
    %271 = vector.shape_cast %270 : vector<2x1x8x32xbf16> to vector<2x8x32xbf16>
    %272 = vector.shape_cast %269 : vector<2x8x32xbf16> to vector<2x1x8x32xbf16>
    tpu.vector_store %arg15[%c0_46, %c7, %c1_47, %c0_48], %272 {strides = array<i32>} : memref<2x10x10x32xbf16, #tpu.memory_space<vmem>>, vector<2x1x8x32xbf16>,
    %273 = vector.extract_strided_slice %34 {offsets = [0, 14, 0, 0], sizes = [2, 1, 16, 32], strides = [1, 1, 1, 1]} : vector<2x16x16x32xf32> to vector<2x1x16x32xf32>
    %274 = vector.shape_cast %273 : vector<2x1x16x32xf32> to vector<2x16x32xf32>
    %275 = vector.extract_strided_slice %34 {offsets = [0, 15, 0, 0], sizes = [2, 1, 16, 32], strides = [1, 1, 1, 1]} : vector<2x16x16x32xf32> to vector<2x1x16x32xf32>
    %276 = vector.shape_cast %275 : vector<2x1x16x32xf32> to vector<2x16x32xf32>
    %277 = arith.maximumf %274, %276 : vector<2x16x32xf32>
    %278 = vector.extract_strided_slice %277 {offsets = [0, 0, 0], sizes = [2, 1, 32], strides = [1, 1, 1]} : vector<2x16x32xf32> to vector<2x1x32xf32>
    %279 = vector.extract_strided_slice %277 {offsets = [0, 1, 0], sizes = [2, 1, 32], strides = [1, 1, 1]} : vector<2x16x32xf32> to vector<2x1x32xf32>
    %280 = arith.maximumf %278, %279 : vector<2x1x32xf32>
    %281 = vector.extract_strided_slice %277 {offsets = [0, 2, 0], sizes = [2, 1, 32], strides = [1, 1, 1]} : vector<2x16x32xf32> to vector<2x1x32xf32>
    %282 = vector.extract_strided_slice %277 {offsets = [0, 3, 0], sizes = [2, 1, 32], strides = [1, 1, 1]} : vector<2x16x32xf32> to vector<2x1x32xf32>
    %283 = arith.maximumf %281, %282 : vector<2x1x32xf32>
    %284 = vector.extract_strided_slice %277 {offsets = [0, 4, 0], sizes = [2, 1, 32], strides = [1, 1, 1]} : vector<2x16x32xf32> to vector<2x1x32xf32>
    %285 = vector.extract_strided_slice %277 {offsets = [0, 5, 0], sizes = [2, 1, 32], strides = [1, 1, 1]} : vector<2x16x32xf32> to vector<2x1x32xf32>
    %286 = arith.maximumf %284, %285 : vector<2x1x32xf32>
    %287 = vector.extract_strided_slice %277 {offsets = [0, 6, 0], sizes = [2, 1, 32], strides = [1, 1, 1]} : vector<2x16x32xf32> to vector<2x1x32xf32>
    %288 = vector.extract_strided_slice %277 {offsets = [0, 7, 0], sizes = [2, 1, 32], strides = [1, 1, 1]} : vector<2x16x32xf32> to vector<2x1x32xf32>
    %289 = arith.maximumf %287, %288 : vector<2x1x32xf32>
    %290 = vector.extract_strided_slice %277 {offsets = [0, 8, 0], sizes = [2, 1, 32], strides = [1, 1, 1]} : vector<2x16x32xf32> to vector<2x1x32xf32>
    %291 = vector.extract_strided_slice %277 {offsets = [0, 9, 0], sizes = [2, 1, 32], strides = [1, 1, 1]} : vector<2x16x32xf32> to vector<2x1x32xf32>
    %292 = arith.maximumf %290, %291 : vector<2x1x32xf32>
    %293 = vector.extract_strided_slice %277 {offsets = [0, 10, 0], sizes = [2, 1, 32], strides = [1, 1, 1]} : vector<2x16x32xf32> to vector<2x1x32xf32>
    %294 = vector.extract_strided_slice %277 {offsets = [0, 11, 0], sizes = [2, 1, 32], strides = [1, 1, 1]} : vector<2x16x32xf32> to vector<2x1x32xf32>
    %295 = arith.maximumf %293, %294 : vector<2x1x32xf32>
    %296 = vector.extract_strided_slice %277 {offsets = [0, 12, 0], sizes = [2, 1, 32], strides = [1, 1, 1]} : vector<2x16x32xf32> to vector<2x1x32xf32>
    %297 = vector.extract_strided_slice %277 {offsets = [0, 13, 0], sizes = [2, 1, 32], strides = [1, 1, 1]} : vector<2x16x32xf32> to vector<2x1x32xf32>
    %298 = arith.maximumf %296, %297 : vector<2x1x32xf32>
    %299 = vector.extract_strided_slice %277 {offsets = [0, 14, 0], sizes = [2, 1, 32], strides = [1, 1, 1]} : vector<2x16x32xf32> to vector<2x1x32xf32>
    %300 = vector.extract_strided_slice %277 {offsets = [0, 15, 0], sizes = [2, 1, 32], strides = [1, 1, 1]} : vector<2x16x32xf32> to vector<2x1x32xf32>
    %301 = arith.maximumf %299, %300 : vector<2x1x32xf32>
    %302 = tpu.concatenate %280, %283, %286, %289, %292, %295, %298, %301 in 1 : vector<2x1x32xf32>, vector<2x1x32xf32>, vector<2x1x32xf32>, vector<2x1x32xf32>, vector<2x1x32xf32>, vector<2x1x32xf32>, vector<2x1x32xf32>, vector<2x1x32xf32> -> vector<2x8x32xf32>
    %303 = arith.truncf %302 : vector<2x8x32xf32> to vector<2x8x32xbf16>
    %c0_49 = arith.constant 0 : index
    %c8 = arith.constant 8 : index
    %c1_50 = arith.constant 1 : index
    %c0_51 = arith.constant 0 : index
    %304 = vector.load %arg15[%c0_49, %c8, %c1_50, %c0_51] : memref<2x10x10x32xbf16, #tpu.memory_space<vmem>>, vector<2x1x8x32xbf16>
    %305 = vector.shape_cast %304 : vector<2x1x8x32xbf16> to vector<2x8x32xbf16>
    %306 = vector.shape_cast %303 : vector<2x8x32xbf16> to vector<2x1x8x32xbf16>
    tpu.vector_store %arg15[%c0_49, %c8, %c1_50, %c0_51], %306 {strides = array<i32>} : memref<2x10x10x32xbf16, #tpu.memory_space<vmem>>, vector<2x1x8x32xbf16>,
    %c0_52 = arith.constant 0 : index
    %c0_53 = arith.constant 0 : index
    %c0_54 = arith.constant 0 : index
    %c0_55 = arith.constant 0 : index
    %307 = vector.load %arg15[%c0_52, %c0_53, %c0_54, %c0_55] : memref<2x10x10x32xbf16, #tpu.memory_space<vmem>>, vector<2x8x8x32xbf16>
    %308 = vector.shape_cast %307 : vector<2x8x8x32xbf16> to vector<128x32xbf16>
    %c0_56 = arith.constant 0 : index
    %c0_57 = arith.constant 0 : index
    %c0_58 = arith.constant 0 : index
    %309 = vector.load %arg3[%c0_56, %c0_57, %c0_58] : memref<9x32x64xbf16, #tpu.memory_space<vmem>>, vector<1x32x64xbf16>
    %310 = vector.shape_cast %309 : vector<1x32x64xbf16> to vector<32x64xbf16>
    %cst_59 = arith.constant dense<0.000000e+00> : vector<128x64xf32>
    %311 = tpu.matmul %308, %310, %cst_59 {dimension_numbers = #tpu.dot_dimension_numbers<[1], [0], [0], [1], [0, 0, 1, 1], [], []>} : vector<128x32xbf16>, vector<32x64xbf16>, vector<128x64xf32> -> vector<128x64xf32>
    %c0_60 = arith.constant 0 : index
    %c0_61 = arith.constant 0 : index
    %c1_62 = arith.constant 1 : index
    %c0_63 = arith.constant 0 : index
    %312 = vector.load %arg15[%c0_60, %c0_61, %c1_62, %c0_63] : memref<2x10x10x32xbf16, #tpu.memory_space<vmem>>, vector<2x8x8x32xbf16>
    %313 = vector.shape_cast %312 : vector<2x8x8x32xbf16> to vector<128x32xbf16>
    %c1_64 = arith.constant 1 : index
    %c0_65 = arith.constant 0 : index
    %c0_66 = arith.constant 0 : index
    %314 = vector.load %arg3[%c1_64, %c0_65, %c0_66] : memref<9x32x64xbf16, #tpu.memory_space<vmem>>, vector<1x32x64xbf16>
    %315 = vector.shape_cast %314 : vector<1x32x64xbf16> to vector<32x64xbf16>
    %cst_67 = arith.constant dense<0.000000e+00> : vector<128x64xf32>
    %316 = tpu.matmul %313, %315, %cst_67 {dimension_numbers = #tpu.dot_dimension_numbers<[1], [0], [0], [1], [0, 0, 1, 1], [], []>} : vector<128x32xbf16>, vector<32x64xbf16>, vector<128x64xf32> -> vector<128x64xf32>
    %317 = arith.addf %311, %316 : vector<128x64xf32>
    %c0_68 = arith.constant 0 : index
    %c0_69 = arith.constant 0 : index
    %c2_70 = arith.constant 2 : index
    %c0_71 = arith.constant 0 : index
    %318 = vector.load %arg15[%c0_68, %c0_69, %c2_70, %c0_71] : memref<2x10x10x32xbf16, #tpu.memory_space<vmem>>, vector<2x8x8x32xbf16>
    %319 = vector.shape_cast %318 : vector<2x8x8x32xbf16> to vector<128x32xbf16>
    %c2_72 = arith.constant 2 : index
    %c0_73 = arith.constant 0 : index
    %c0_74 = arith.constant 0 : index
    %320 = vector.load %arg3[%c2_72, %c0_73, %c0_74] : memref<9x32x64xbf16, #tpu.memory_space<vmem>>, vector<1x32x64xbf16>
    %321 = vector.shape_cast %320 : vector<1x32x64xbf16> to vector<32x64xbf16>
    %cst_75 = arith.constant dense<0.000000e+00> : vector<128x64xf32>
    %322 = tpu.matmul %319, %321, %cst_75 {dimension_numbers = #tpu.dot_dimension_numbers<[1], [0], [0], [1], [0, 0, 1, 1], [], []>} : vector<128x32xbf16>, vector<32x64xbf16>, vector<128x64xf32> -> vector<128x64xf32>
    %323 = arith.addf %317, %322 : vector<128x64xf32>
    %c0_76 = arith.constant 0 : index
    %c1_77 = arith.constant 1 : index
    %c0_78 = arith.constant 0 : index
    %c0_79 = arith.constant 0 : index
    %324 = vector.load %arg15[%c0_76, %c1_77, %c0_78, %c0_79] : memref<2x10x10x32xbf16, #tpu.memory_space<vmem>>, vector<2x8x8x32xbf16>
    %325 = vector.shape_cast %324 : vector<2x8x8x32xbf16> to vector<128x32xbf16>
    %c3_80 = arith.constant 3 : index
    %c0_81 = arith.constant 0 : index
    %c0_82 = arith.constant 0 : index
    %326 = vector.load %arg3[%c3_80, %c0_81, %c0_82] : memref<9x32x64xbf16, #tpu.memory_space<vmem>>, vector<1x32x64xbf16>
    %327 = vector.shape_cast %326 : vector<1x32x64xbf16> to vector<32x64xbf16>
    %cst_83 = arith.constant dense<0.000000e+00> : vector<128x64xf32>
    %328 = tpu.matmul %325, %327, %cst_83 {dimension_numbers = #tpu.dot_dimension_numbers<[1], [0], [0], [1], [0, 0, 1, 1], [], []>} : vector<128x32xbf16>, vector<32x64xbf16>, vector<128x64xf32> -> vector<128x64xf32>
    %329 = arith.addf %323, %328 : vector<128x64xf32>
    %c0_84 = arith.constant 0 : index
    %c1_85 = arith.constant 1 : index
    %c1_86 = arith.constant 1 : index
    %c0_87 = arith.constant 0 : index
    %330 = vector.load %arg15[%c0_84, %c1_85, %c1_86, %c0_87] : memref<2x10x10x32xbf16, #tpu.memory_space<vmem>>, vector<2x8x8x32xbf16>
    %331 = vector.shape_cast %330 : vector<2x8x8x32xbf16> to vector<128x32xbf16>
    %c4_88 = arith.constant 4 : index
    %c0_89 = arith.constant 0 : index
    %c0_90 = arith.constant 0 : index
    %332 = vector.load %arg3[%c4_88, %c0_89, %c0_90] : memref<9x32x64xbf16, #tpu.memory_space<vmem>>, vector<1x32x64xbf16>
    %333 = vector.shape_cast %332 : vector<1x32x64xbf16> to vector<32x64xbf16>
    %cst_91 = arith.constant dense<0.000000e+00> : vector<128x64xf32>
    %334 = tpu.matmul %331, %333, %cst_91 {dimension_numbers = #tpu.dot_dimension_numbers<[1], [0], [0], [1], [0, 0, 1, 1], [], []>} : vector<128x32xbf16>, vector<32x64xbf16>, vector<128x64xf32> -> vector<128x64xf32>
    %335 = arith.addf %329, %334 : vector<128x64xf32>
    %c0_92 = arith.constant 0 : index
    %c1_93 = arith.constant 1 : index
    %c2_94 = arith.constant 2 : index
    %c0_95 = arith.constant 0 : index
    %336 = vector.load %arg15[%c0_92, %c1_93, %c2_94, %c0_95] : memref<2x10x10x32xbf16, #tpu.memory_space<vmem>>, vector<2x8x8x32xbf16>
    %337 = vector.shape_cast %336 : vector<2x8x8x32xbf16> to vector<128x32xbf16>
    %c5_96 = arith.constant 5 : index
    %c0_97 = arith.constant 0 : index
    %c0_98 = arith.constant 0 : index
    %338 = vector.load %arg3[%c5_96, %c0_97, %c0_98] : memref<9x32x64xbf16, #tpu.memory_space<vmem>>, vector<1x32x64xbf16>
    %339 = vector.shape_cast %338 : vector<1x32x64xbf16> to vector<32x64xbf16>
    %cst_99 = arith.constant dense<0.000000e+00> : vector<128x64xf32>
    %340 = tpu.matmul %337, %339, %cst_99 {dimension_numbers = #tpu.dot_dimension_numbers<[1], [0], [0], [1], [0, 0, 1, 1], [], []>} : vector<128x32xbf16>, vector<32x64xbf16>, vector<128x64xf32> -> vector<128x64xf32>
    %341 = arith.addf %335, %340 : vector<128x64xf32>
    %c0_100 = arith.constant 0 : index
    %c2_101 = arith.constant 2 : index
    %c0_102 = arith.constant 0 : index
    %c0_103 = arith.constant 0 : index
    %342 = vector.load %arg15[%c0_100, %c2_101, %c0_102, %c0_103] : memref<2x10x10x32xbf16, #tpu.memory_space<vmem>>, vector<2x8x8x32xbf16>
    %343 = vector.shape_cast %342 : vector<2x8x8x32xbf16> to vector<128x32xbf16>
    %c6_104 = arith.constant 6 : index
    %c0_105 = arith.constant 0 : index
    %c0_106 = arith.constant 0 : index
    %344 = vector.load %arg3[%c6_104, %c0_105, %c0_106] : memref<9x32x64xbf16, #tpu.memory_space<vmem>>, vector<1x32x64xbf16>
    %345 = vector.shape_cast %344 : vector<1x32x64xbf16> to vector<32x64xbf16>
    %cst_107 = arith.constant dense<0.000000e+00> : vector<128x64xf32>
    %346 = tpu.matmul %343, %345, %cst_107 {dimension_numbers = #tpu.dot_dimension_numbers<[1], [0], [0], [1], [0, 0, 1, 1], [], []>} : vector<128x32xbf16>, vector<32x64xbf16>, vector<128x64xf32> -> vector<128x64xf32>
    %347 = arith.addf %341, %346 : vector<128x64xf32>
    %c0_108 = arith.constant 0 : index
    %c2_109 = arith.constant 2 : index
    %c1_110 = arith.constant 1 : index
    %c0_111 = arith.constant 0 : index
    %348 = vector.load %arg15[%c0_108, %c2_109, %c1_110, %c0_111] : memref<2x10x10x32xbf16, #tpu.memory_space<vmem>>, vector<2x8x8x32xbf16>
    %349 = vector.shape_cast %348 : vector<2x8x8x32xbf16> to vector<128x32xbf16>
    %c7_112 = arith.constant 7 : index
    %c0_113 = arith.constant 0 : index
    %c0_114 = arith.constant 0 : index
    %350 = vector.load %arg3[%c7_112, %c0_113, %c0_114] : memref<9x32x64xbf16, #tpu.memory_space<vmem>>, vector<1x32x64xbf16>
    %351 = vector.shape_cast %350 : vector<1x32x64xbf16> to vector<32x64xbf16>
    %cst_115 = arith.constant dense<0.000000e+00> : vector<128x64xf32>
    %352 = tpu.matmul %349, %351, %cst_115 {dimension_numbers = #tpu.dot_dimension_numbers<[1], [0], [0], [1], [0, 0, 1, 1], [], []>} : vector<128x32xbf16>, vector<32x64xbf16>, vector<128x64xf32> -> vector<128x64xf32>
    %353 = arith.addf %347, %352 : vector<128x64xf32>
    %c0_116 = arith.constant 0 : index
    %c2_117 = arith.constant 2 : index
    %c2_118 = arith.constant 2 : index
    %c0_119 = arith.constant 0 : index
    %354 = vector.load %arg15[%c0_116, %c2_117, %c2_118, %c0_119] : memref<2x10x10x32xbf16, #tpu.memory_space<vmem>>, vector<2x8x8x32xbf16>
    %355 = vector.shape_cast %354 : vector<2x8x8x32xbf16> to vector<128x32xbf16>
    %c8_120 = arith.constant 8 : index
    %c0_121 = arith.constant 0 : index
    %c0_122 = arith.constant 0 : index
    %356 = vector.load %arg3[%c8_120, %c0_121, %c0_122] : memref<9x32x64xbf16, #tpu.memory_space<vmem>>, vector<1x32x64xbf16>
    %357 = vector.shape_cast %356 : vector<1x32x64xbf16> to vector<32x64xbf16>
    %cst_123 = arith.constant dense<0.000000e+00> : vector<128x64xf32>
    %358 = tpu.matmul %355, %357, %cst_123 {dimension_numbers = #tpu.dot_dimension_numbers<[1], [0], [0], [1], [0, 0, 1, 1], [], []>} : vector<128x32xbf16>, vector<32x64xbf16>, vector<128x64xf32> -> vector<128x64xf32>
    %359 = arith.addf %353, %358 : vector<128x64xf32>
    %cst_124 = arith.constant dense<0.000000e+00> : vector<64xf32>
    %360 = vector.multi_reduction <add>, %359, %cst_124 [0] : vector<128x64xf32> to vector<64xf32>
    %361 = vector.shape_cast %360 : vector<64xf32> to vector<1x64xf32>
    %cst_125 = arith.constant 1.280000e+02 : f32
    %362 = vector.broadcast %cst_125 : f32 to vector<1x64xf32>
    %363 = arith.divf %361, %362 : vector<1x64xf32>
    %364 = vector.broadcast %363 : vector<1x64xf32> to vector<128x64xf32>
    %365 = arith.subf %359, %364 : vector<128x64xf32>
    %366 = arith.mulf %365, %365 : vector<128x64xf32>
    %cst_126 = arith.constant dense<0.000000e+00> : vector<64xf32>
    %367 = vector.multi_reduction <add>, %366, %cst_126 [0] : vector<128x64xf32> to vector<64xf32>
    %368 = vector.shape_cast %367 : vector<64xf32> to vector<1x64xf32>
    %cst_127 = arith.constant 1.280000e+02 : f32
    %369 = vector.broadcast %cst_127 : f32 to vector<1x64xf32>
    %370 = arith.divf %368, %369 : vector<1x64xf32>
    %c0_128 = arith.constant 0 : index
    %c0_129 = arith.constant 0 : index
    %371 = vector.load %arg8[%c0_128, %c0_129] : memref<1x64xf32, #tpu.memory_space<vmem>>, vector<1x64xf32>
    %cst_130 = arith.constant 9.99999974E-6 : f32
    %372 = vector.broadcast %cst_130 : f32 to vector<1x64xf32>
    %373 = arith.addf %370, %372 : vector<1x64xf32>
    %374 = math.rsqrt %373 : vector<1x64xf32>
    %375 = arith.mulf %371, %374 : vector<1x64xf32>
    %c0_131 = arith.constant 0 : index
    %c0_132 = arith.constant 0 : index
    %376 = vector.load %arg9[%c0_131, %c0_132] : memref<1x64xf32, #tpu.memory_space<vmem>>, vector<1x64xf32>
    %377 = arith.mulf %363, %375 : vector<1x64xf32>
    %378 = arith.subf %376, %377 : vector<1x64xf32>
    %379 = vector.broadcast %375 : vector<1x64xf32> to vector<128x64xf32>
    %380 = arith.mulf %359, %379 : vector<128x64xf32>
    %381 = vector.broadcast %378 : vector<1x64xf32> to vector<128x64xf32>
    %382 = arith.addf %380, %381 : vector<128x64xf32>
    %cst_133 = arith.constant 0.000000e+00 : f32
    %383 = vector.broadcast %cst_133 : f32 to vector<128x64xf32>
    %384 = arith.maximumf %382, %383 : vector<128x64xf32>
    %385 = vector.shape_cast %384 : vector<128x64xf32> to vector<2x8x8x64xf32>
    %386 = vector.extract_strided_slice %385 {offsets = [0, 0, 0, 0], sizes = [2, 1, 8, 64], strides = [1, 1, 1, 1]} : vector<2x8x8x64xf32> to vector<2x1x8x64xf32>
    %387 = vector.shape_cast %386 : vector<2x1x8x64xf32> to vector<2x8x64xf32>
    %388 = vector.extract_strided_slice %385 {offsets = [0, 1, 0, 0], sizes = [2, 1, 8, 64], strides = [1, 1, 1, 1]} : vector<2x8x8x64xf32> to vector<2x1x8x64xf32>
    %389 = vector.shape_cast %388 : vector<2x1x8x64xf32> to vector<2x8x64xf32>
    %390 = arith.maximumf %387, %389 : vector<2x8x64xf32>
    %391 = vector.extract_strided_slice %390 {offsets = [0, 0, 0], sizes = [2, 1, 64], strides = [1, 1, 1]} : vector<2x8x64xf32> to vector<2x1x64xf32>
    %392 = vector.extract_strided_slice %390 {offsets = [0, 1, 0], sizes = [2, 1, 64], strides = [1, 1, 1]} : vector<2x8x64xf32> to vector<2x1x64xf32>
    %393 = arith.maximumf %391, %392 : vector<2x1x64xf32>
    %394 = vector.extract_strided_slice %390 {offsets = [0, 2, 0], sizes = [2, 1, 64], strides = [1, 1, 1]} : vector<2x8x64xf32> to vector<2x1x64xf32>
    %395 = vector.extract_strided_slice %390 {offsets = [0, 3, 0], sizes = [2, 1, 64], strides = [1, 1, 1]} : vector<2x8x64xf32> to vector<2x1x64xf32>
    %396 = arith.maximumf %394, %395 : vector<2x1x64xf32>
    %397 = vector.extract_strided_slice %390 {offsets = [0, 4, 0], sizes = [2, 1, 64], strides = [1, 1, 1]} : vector<2x8x64xf32> to vector<2x1x64xf32>
    %398 = vector.extract_strided_slice %390 {offsets = [0, 5, 0], sizes = [2, 1, 64], strides = [1, 1, 1]} : vector<2x8x64xf32> to vector<2x1x64xf32>
    %399 = arith.maximumf %397, %398 : vector<2x1x64xf32>
    %400 = vector.extract_strided_slice %390 {offsets = [0, 6, 0], sizes = [2, 1, 64], strides = [1, 1, 1]} : vector<2x8x64xf32> to vector<2x1x64xf32>
    %401 = vector.extract_strided_slice %390 {offsets = [0, 7, 0], sizes = [2, 1, 64], strides = [1, 1, 1]} : vector<2x8x64xf32> to vector<2x1x64xf32>
    %402 = arith.maximumf %400, %401 : vector<2x1x64xf32>
    %403 = tpu.concatenate %393, %396, %399, %402 in 1 : vector<2x1x64xf32>, vector<2x1x64xf32>, vector<2x1x64xf32>, vector<2x1x64xf32> -> vector<2x4x64xf32>
    %404 = arith.truncf %403 : vector<2x4x64xf32> to vector<2x4x64xbf16>
    %c0_134 = arith.constant 0 : index
    %c1_135 = arith.constant 1 : index
    %c1_136 = arith.constant 1 : index
    %c0_137 = arith.constant 0 : index
    %405 = vector.load %arg16[%c0_134, %c1_135, %c1_136, %c0_137] : memref<2x6x10x64xbf16, #tpu.memory_space<vmem>>, vector<2x1x4x64xbf16>
    %406 = vector.shape_cast %405 : vector<2x1x4x64xbf16> to vector<2x4x64xbf16>
    %407 = vector.shape_cast %404 : vector<2x4x64xbf16> to vector<2x1x4x64xbf16>
    tpu.vector_store %arg16[%c0_134, %c1_135, %c1_136, %c0_137], %407 {strides = array<i32>} : memref<2x6x10x64xbf16, #tpu.memory_space<vmem>>, vector<2x1x4x64xbf16>,
    %408 = vector.extract_strided_slice %385 {offsets = [0, 2, 0, 0], sizes = [2, 1, 8, 64], strides = [1, 1, 1, 1]} : vector<2x8x8x64xf32> to vector<2x1x8x64xf32>
    %409 = vector.shape_cast %408 : vector<2x1x8x64xf32> to vector<2x8x64xf32>
    %410 = vector.extract_strided_slice %385 {offsets = [0, 3, 0, 0], sizes = [2, 1, 8, 64], strides = [1, 1, 1, 1]} : vector<2x8x8x64xf32> to vector<2x1x8x64xf32>
    %411 = vector.shape_cast %410 : vector<2x1x8x64xf32> to vector<2x8x64xf32>
    %412 = arith.maximumf %409, %411 : vector<2x8x64xf32>
    %413 = vector.extract_strided_slice %412 {offsets = [0, 0, 0], sizes = [2, 1, 64], strides = [1, 1, 1]} : vector<2x8x64xf32> to vector<2x1x64xf32>
    %414 = vector.extract_strided_slice %412 {offsets = [0, 1, 0], sizes = [2, 1, 64], strides = [1, 1, 1]} : vector<2x8x64xf32> to vector<2x1x64xf32>
    %415 = arith.maximumf %413, %414 : vector<2x1x64xf32>
    %416 = vector.extract_strided_slice %412 {offsets = [0, 2, 0], sizes = [2, 1, 64], strides = [1, 1, 1]} : vector<2x8x64xf32> to vector<2x1x64xf32>
    %417 = vector.extract_strided_slice %412 {offsets = [0, 3, 0], sizes = [2, 1, 64], strides = [1, 1, 1]} : vector<2x8x64xf32> to vector<2x1x64xf32>
    %418 = arith.maximumf %416, %417 : vector<2x1x64xf32>
    %419 = vector.extract_strided_slice %412 {offsets = [0, 4, 0], sizes = [2, 1, 64], strides = [1, 1, 1]} : vector<2x8x64xf32> to vector<2x1x64xf32>
    %420 = vector.extract_strided_slice %412 {offsets = [0, 5, 0], sizes = [2, 1, 64], strides = [1, 1, 1]} : vector<2x8x64xf32> to vector<2x1x64xf32>
    %421 = arith.maximumf %419, %420 : vector<2x1x64xf32>
    %422 = vector.extract_strided_slice %412 {offsets = [0, 6, 0], sizes = [2, 1, 64], strides = [1, 1, 1]} : vector<2x8x64xf32> to vector<2x1x64xf32>
    %423 = vector.extract_strided_slice %412 {offsets = [0, 7, 0], sizes = [2, 1, 64], strides = [1, 1, 1]} : vector<2x8x64xf32> to vector<2x1x64xf32>
    %424 = arith.maximumf %422, %423 : vector<2x1x64xf32>
    %425 = tpu.concatenate %415, %418, %421, %424 in 1 : vector<2x1x64xf32>, vector<2x1x64xf32>, vector<2x1x64xf32>, vector<2x1x64xf32> -> vector<2x4x64xf32>
    %426 = arith.truncf %425 : vector<2x4x64xf32> to vector<2x4x64xbf16>
    %c0_138 = arith.constant 0 : index
    %c2_139 = arith.constant 2 : index
    %c1_140 = arith.constant 1 : index
    %c0_141 = arith.constant 0 : index
    %427 = vector.load %arg16[%c0_138, %c2_139, %c1_140, %c0_141] : memref<2x6x10x64xbf16, #tpu.memory_space<vmem>>, vector<2x1x4x64xbf16>
    %428 = vector.shape_cast %427 : vector<2x1x4x64xbf16> to vector<2x4x64xbf16>
    %429 = vector.shape_cast %426 : vector<2x4x64xbf16> to vector<2x1x4x64xbf16>
    tpu.vector_store %arg16[%c0_138, %c2_139, %c1_140, %c0_141], %429 {strides = array<i32>} : memref<2x6x10x64xbf16, #tpu.memory_space<vmem>>, vector<2x1x4x64xbf16>,
    %430 = vector.extract_strided_slice %385 {offsets = [0, 4, 0, 0], sizes = [2, 1, 8, 64], strides = [1, 1, 1, 1]} : vector<2x8x8x64xf32> to vector<2x1x8x64xf32>
    %431 = vector.shape_cast %430 : vector<2x1x8x64xf32> to vector<2x8x64xf32>
    %432 = vector.extract_strided_slice %385 {offsets = [0, 5, 0, 0], sizes = [2, 1, 8, 64], strides = [1, 1, 1, 1]} : vector<2x8x8x64xf32> to vector<2x1x8x64xf32>
    %433 = vector.shape_cast %432 : vector<2x1x8x64xf32> to vector<2x8x64xf32>
    %434 = arith.maximumf %431, %433 : vector<2x8x64xf32>
    %435 = vector.extract_strided_slice %434 {offsets = [0, 0, 0], sizes = [2, 1, 64], strides = [1, 1, 1]} : vector<2x8x64xf32> to vector<2x1x64xf32>
    %436 = vector.extract_strided_slice %434 {offsets = [0, 1, 0], sizes = [2, 1, 64], strides = [1, 1, 1]} : vector<2x8x64xf32> to vector<2x1x64xf32>
    %437 = arith.maximumf %435, %436 : vector<2x1x64xf32>
    %438 = vector.extract_strided_slice %434 {offsets = [0, 2, 0], sizes = [2, 1, 64], strides = [1, 1, 1]} : vector<2x8x64xf32> to vector<2x1x64xf32>
    %439 = vector.extract_strided_slice %434 {offsets = [0, 3, 0], sizes = [2, 1, 64], strides = [1, 1, 1]} : vector<2x8x64xf32> to vector<2x1x64xf32>
    %440 = arith.maximumf %438, %439 : vector<2x1x64xf32>
    %441 = vector.extract_strided_slice %434 {offsets = [0, 4, 0], sizes = [2, 1, 64], strides = [1, 1, 1]} : vector<2x8x64xf32> to vector<2x1x64xf32>
    %442 = vector.extract_strided_slice %434 {offsets = [0, 5, 0], sizes = [2, 1, 64], strides = [1, 1, 1]} : vector<2x8x64xf32> to vector<2x1x64xf32>
    %443 = arith.maximumf %441, %442 : vector<2x1x64xf32>
    %444 = vector.extract_strided_slice %434 {offsets = [0, 6, 0], sizes = [2, 1, 64], strides = [1, 1, 1]} : vector<2x8x64xf32> to vector<2x1x64xf32>
    %445 = vector.extract_strided_slice %434 {offsets = [0, 7, 0], sizes = [2, 1, 64], strides = [1, 1, 1]} : vector<2x8x64xf32> to vector<2x1x64xf32>
    %446 = arith.maximumf %444, %445 : vector<2x1x64xf32>
    %447 = tpu.concatenate %437, %440, %443, %446 in 1 : vector<2x1x64xf32>, vector<2x1x64xf32>, vector<2x1x64xf32>, vector<2x1x64xf32> -> vector<2x4x64xf32>
    %448 = arith.truncf %447 : vector<2x4x64xf32> to vector<2x4x64xbf16>
    %c0_142 = arith.constant 0 : index
    %c3_143 = arith.constant 3 : index
    %c1_144 = arith.constant 1 : index
    %c0_145 = arith.constant 0 : index
    %449 = vector.load %arg16[%c0_142, %c3_143, %c1_144, %c0_145] : memref<2x6x10x64xbf16, #tpu.memory_space<vmem>>, vector<2x1x4x64xbf16>
    %450 = vector.shape_cast %449 : vector<2x1x4x64xbf16> to vector<2x4x64xbf16>
    %451 = vector.shape_cast %448 : vector<2x4x64xbf16> to vector<2x1x4x64xbf16>
    tpu.vector_store %arg16[%c0_142, %c3_143, %c1_144, %c0_145], %451 {strides = array<i32>} : memref<2x6x10x64xbf16, #tpu.memory_space<vmem>>, vector<2x1x4x64xbf16>,
    %452 = vector.extract_strided_slice %385 {offsets = [0, 6, 0, 0], sizes = [2, 1, 8, 64], strides = [1, 1, 1, 1]} : vector<2x8x8x64xf32> to vector<2x1x8x64xf32>
    %453 = vector.shape_cast %452 : vector<2x1x8x64xf32> to vector<2x8x64xf32>
    %454 = vector.extract_strided_slice %385 {offsets = [0, 7, 0, 0], sizes = [2, 1, 8, 64], strides = [1, 1, 1, 1]} : vector<2x8x8x64xf32> to vector<2x1x8x64xf32>
    %455 = vector.shape_cast %454 : vector<2x1x8x64xf32> to vector<2x8x64xf32>
    %456 = arith.maximumf %453, %455 : vector<2x8x64xf32>
    %457 = vector.extract_strided_slice %456 {offsets = [0, 0, 0], sizes = [2, 1, 64], strides = [1, 1, 1]} : vector<2x8x64xf32> to vector<2x1x64xf32>
    %458 = vector.extract_strided_slice %456 {offsets = [0, 1, 0], sizes = [2, 1, 64], strides = [1, 1, 1]} : vector<2x8x64xf32> to vector<2x1x64xf32>
    %459 = arith.maximumf %457, %458 : vector<2x1x64xf32>
    %460 = vector.extract_strided_slice %456 {offsets = [0, 2, 0], sizes = [2, 1, 64], strides = [1, 1, 1]} : vector<2x8x64xf32> to vector<2x1x64xf32>
    %461 = vector.extract_strided_slice %456 {offsets = [0, 3, 0], sizes = [2, 1, 64], strides = [1, 1, 1]} : vector<2x8x64xf32> to vector<2x1x64xf32>
    %462 = arith.maximumf %460, %461 : vector<2x1x64xf32>
    %463 = vector.extract_strided_slice %456 {offsets = [0, 4, 0], sizes = [2, 1, 64], strides = [1, 1, 1]} : vector<2x8x64xf32> to vector<2x1x64xf32>
    %464 = vector.extract_strided_slice %456 {offsets = [0, 5, 0], sizes = [2, 1, 64], strides = [1, 1, 1]} : vector<2x8x64xf32> to vector<2x1x64xf32>
    %465 = arith.maximumf %463, %464 : vector<2x1x64xf32>
    %466 = vector.extract_strided_slice %456 {offsets = [0, 6, 0], sizes = [2, 1, 64], strides = [1, 1, 1]} : vector<2x8x64xf32> to vector<2x1x64xf32>
    %467 = vector.extract_strided_slice %456 {offsets = [0, 7, 0], sizes = [2, 1, 64], strides = [1, 1, 1]} : vector<2x8x64xf32> to vector<2x1x64xf32>
    %468 = arith.maximumf %466, %467 : vector<2x1x64xf32>
    %469 = tpu.concatenate %459, %462, %465, %468 in 1 : vector<2x1x64xf32>, vector<2x1x64xf32>, vector<2x1x64xf32>, vector<2x1x64xf32> -> vector<2x4x64xf32>
    %470 = arith.truncf %469 : vector<2x4x64xf32> to vector<2x4x64xbf16>
    %c0_146 = arith.constant 0 : index
    %c4_147 = arith.constant 4 : index
    %c1_148 = arith.constant 1 : index
    %c0_149 = arith.constant 0 : index
    %471 = vector.load %arg16[%c0_146, %c4_147, %c1_148, %c0_149] : memref<2x6x10x64xbf16, #tpu.memory_space<vmem>>, vector<2x1x4x64xbf16>
    %472 = vector.shape_cast %471 : vector<2x1x4x64xbf16> to vector<2x4x64xbf16>
    %473 = vector.shape_cast %470 : vector<2x4x64xbf16> to vector<2x1x4x64xbf16>
    tpu.vector_store %arg16[%c0_146, %c4_147, %c1_148, %c0_149], %473 {strides = array<i32>} : memref<2x6x10x64xbf16, #tpu.memory_space<vmem>>, vector<2x1x4x64xbf16>,
    %c0_150 = arith.constant 0 : index
    %c0_151 = arith.constant 0 : index
    %c0_152 = arith.constant 0 : index
    %c0_153 = arith.constant 0 : index
    %474 = vector.load %arg16[%c0_150, %c0_151, %c0_152, %c0_153] : memref<2x6x10x64xbf16, #tpu.memory_space<vmem>>, vector<2x4x8x64xbf16>
    %475 = vector.shape_cast %474 : vector<2x4x8x64xbf16> to vector<64x64xbf16>
    %c0_154 = arith.constant 0 : index
    %c0_155 = arith.constant 0 : index
    %c0_156 = arith.constant 0 : index
    %476 = vector.load %arg4[%c0_154, %c0_155, %c0_156] : memref<9x64x128xbf16, #tpu.memory_space<vmem>>, vector<1x64x128xbf16>
    %477 = vector.shape_cast %476 : vector<1x64x128xbf16> to vector<64x128xbf16>
    %cst_157 = arith.constant dense<0.000000e+00> : vector<64x128xf32>
    %478 = tpu.matmul %475, %477, %cst_157 {dimension_numbers = #tpu.dot_dimension_numbers<[1], [0], [0], [1], [0, 0, 1, 1], [], []>} : vector<64x64xbf16>, vector<64x128xbf16>, vector<64x128xf32> -> vector<64x128xf32>
    %c0_158 = arith.constant 0 : index
    %c0_159 = arith.constant 0 : index
    %c1_160 = arith.constant 1 : index
    %c0_161 = arith.constant 0 : index
    %479 = vector.load %arg16[%c0_158, %c0_159, %c1_160, %c0_161] : memref<2x6x10x64xbf16, #tpu.memory_space<vmem>>, vector<2x4x8x64xbf16>
    %480 = vector.shape_cast %479 : vector<2x4x8x64xbf16> to vector<64x64xbf16>
    %c1_162 = arith.constant 1 : index
    %c0_163 = arith.constant 0 : index
    %c0_164 = arith.constant 0 : index
    %481 = vector.load %arg4[%c1_162, %c0_163, %c0_164] : memref<9x64x128xbf16, #tpu.memory_space<vmem>>, vector<1x64x128xbf16>
    %482 = vector.shape_cast %481 : vector<1x64x128xbf16> to vector<64x128xbf16>
    %cst_165 = arith.constant dense<0.000000e+00> : vector<64x128xf32>
    %483 = tpu.matmul %480, %482, %cst_165 {dimension_numbers = #tpu.dot_dimension_numbers<[1], [0], [0], [1], [0, 0, 1, 1], [], []>} : vector<64x64xbf16>, vector<64x128xbf16>, vector<64x128xf32> -> vector<64x128xf32>
    %484 = arith.addf %478, %483 : vector<64x128xf32>
    %c0_166 = arith.constant 0 : index
    %c0_167 = arith.constant 0 : index
    %c2_168 = arith.constant 2 : index
    %c0_169 = arith.constant 0 : index
    %485 = vector.load %arg16[%c0_166, %c0_167, %c2_168, %c0_169] : memref<2x6x10x64xbf16, #tpu.memory_space<vmem>>, vector<2x4x8x64xbf16>
    %486 = vector.shape_cast %485 : vector<2x4x8x64xbf16> to vector<64x64xbf16>
    %c2_170 = arith.constant 2 : index
    %c0_171 = arith.constant 0 : index
    %c0_172 = arith.constant 0 : index
    %487 = vector.load %arg4[%c2_170, %c0_171, %c0_172] : memref<9x64x128xbf16, #tpu.memory_space<vmem>>, vector<1x64x128xbf16>
    %488 = vector.shape_cast %487 : vector<1x64x128xbf16> to vector<64x128xbf16>
    %cst_173 = arith.constant dense<0.000000e+00> : vector<64x128xf32>
    %489 = tpu.matmul %486, %488, %cst_173 {dimension_numbers = #tpu.dot_dimension_numbers<[1], [0], [0], [1], [0, 0, 1, 1], [], []>} : vector<64x64xbf16>, vector<64x128xbf16>, vector<64x128xf32> -> vector<64x128xf32>
    %490 = arith.addf %484, %489 : vector<64x128xf32>
    %c0_174 = arith.constant 0 : index
    %c1_175 = arith.constant 1 : index
    %c0_176 = arith.constant 0 : index
    %c0_177 = arith.constant 0 : index
    %491 = vector.load %arg16[%c0_174, %c1_175, %c0_176, %c0_177] : memref<2x6x10x64xbf16, #tpu.memory_space<vmem>>, vector<2x4x8x64xbf16>
    %492 = vector.shape_cast %491 : vector<2x4x8x64xbf16> to vector<64x64xbf16>
    %c3_178 = arith.constant 3 : index
    %c0_179 = arith.constant 0 : index
    %c0_180 = arith.constant 0 : index
    %493 = vector.load %arg4[%c3_178, %c0_179, %c0_180] : memref<9x64x128xbf16, #tpu.memory_space<vmem>>, vector<1x64x128xbf16>
    %494 = vector.shape_cast %493 : vector<1x64x128xbf16> to vector<64x128xbf16>
    %cst_181 = arith.constant dense<0.000000e+00> : vector<64x128xf32>
    %495 = tpu.matmul %492, %494, %cst_181 {dimension_numbers = #tpu.dot_dimension_numbers<[1], [0], [0], [1], [0, 0, 1, 1], [], []>} : vector<64x64xbf16>, vector<64x128xbf16>, vector<64x128xf32> -> vector<64x128xf32>
    %496 = arith.addf %490, %495 : vector<64x128xf32>
    %c0_182 = arith.constant 0 : index
    %c1_183 = arith.constant 1 : index
    %c1_184 = arith.constant 1 : index
    %c0_185 = arith.constant 0 : index
    %497 = vector.load %arg16[%c0_182, %c1_183, %c1_184, %c0_185] : memref<2x6x10x64xbf16, #tpu.memory_space<vmem>>, vector<2x4x8x64xbf16>
    %498 = vector.shape_cast %497 : vector<2x4x8x64xbf16> to vector<64x64xbf16>
    %c4_186 = arith.constant 4 : index
    %c0_187 = arith.constant 0 : index
    %c0_188 = arith.constant 0 : index
    %499 = vector.load %arg4[%c4_186, %c0_187, %c0_188] : memref<9x64x128xbf16, #tpu.memory_space<vmem>>, vector<1x64x128xbf16>
    %500 = vector.shape_cast %499 : vector<1x64x128xbf16> to vector<64x128xbf16>
    %cst_189 = arith.constant dense<0.000000e+00> : vector<64x128xf32>
    %501 = tpu.matmul %498, %500, %cst_189 {dimension_numbers = #tpu.dot_dimension_numbers<[1], [0], [0], [1], [0, 0, 1, 1], [], []>} : vector<64x64xbf16>, vector<64x128xbf16>, vector<64x128xf32> -> vector<64x128xf32>
    %502 = arith.addf %496, %501 : vector<64x128xf32>
    %c0_190 = arith.constant 0 : index
    %c1_191 = arith.constant 1 : index
    %c2_192 = arith.constant 2 : index
    %c0_193 = arith.constant 0 : index
    %503 = vector.load %arg16[%c0_190, %c1_191, %c2_192, %c0_193] : memref<2x6x10x64xbf16, #tpu.memory_space<vmem>>, vector<2x4x8x64xbf16>
    %504 = vector.shape_cast %503 : vector<2x4x8x64xbf16> to vector<64x64xbf16>
    %c5_194 = arith.constant 5 : index
    %c0_195 = arith.constant 0 : index
    %c0_196 = arith.constant 0 : index
    %505 = vector.load %arg4[%c5_194, %c0_195, %c0_196] : memref<9x64x128xbf16, #tpu.memory_space<vmem>>, vector<1x64x128xbf16>
    %506 = vector.shape_cast %505 : vector<1x64x128xbf16> to vector<64x128xbf16>
    %cst_197 = arith.constant dense<0.000000e+00> : vector<64x128xf32>
    %507 = tpu.matmul %504, %506, %cst_197 {dimension_numbers = #tpu.dot_dimension_numbers<[1], [0], [0], [1], [0, 0, 1, 1], [], []>} : vector<64x64xbf16>, vector<64x128xbf16>, vector<64x128xf32> -> vector<64x128xf32>
    %508 = arith.addf %502, %507 : vector<64x128xf32>
    %c0_198 = arith.constant 0 : index
    %c2_199 = arith.constant 2 : index
    %c0_200 = arith.constant 0 : index
    %c0_201 = arith.constant 0 : index
    %509 = vector.load %arg16[%c0_198, %c2_199, %c0_200, %c0_201] : memref<2x6x10x64xbf16, #tpu.memory_space<vmem>>, vector<2x4x8x64xbf16>
    %510 = vector.shape_cast %509 : vector<2x4x8x64xbf16> to vector<64x64xbf16>
    %c6_202 = arith.constant 6 : index
    %c0_203 = arith.constant 0 : index
    %c0_204 = arith.constant 0 : index
    %511 = vector.load %arg4[%c6_202, %c0_203, %c0_204] : memref<9x64x128xbf16, #tpu.memory_space<vmem>>, vector<1x64x128xbf16>
    %512 = vector.shape_cast %511 : vector<1x64x128xbf16> to vector<64x128xbf16>
    %cst_205 = arith.constant dense<0.000000e+00> : vector<64x128xf32>
    %513 = tpu.matmul %510, %512, %cst_205 {dimension_numbers = #tpu.dot_dimension_numbers<[1], [0], [0], [1], [0, 0, 1, 1], [], []>} : vector<64x64xbf16>, vector<64x128xbf16>, vector<64x128xf32> -> vector<64x128xf32>
    %514 = arith.addf %508, %513 : vector<64x128xf32>
    %c0_206 = arith.constant 0 : index
    %c2_207 = arith.constant 2 : index
    %c1_208 = arith.constant 1 : index
    %c0_209 = arith.constant 0 : index
    %515 = vector.load %arg16[%c0_206, %c2_207, %c1_208, %c0_209] : memref<2x6x10x64xbf16, #tpu.memory_space<vmem>>, vector<2x4x8x64xbf16>
    %516 = vector.shape_cast %515 : vector<2x4x8x64xbf16> to vector<64x64xbf16>
    %c7_210 = arith.constant 7 : index
    %c0_211 = arith.constant 0 : index
    %c0_212 = arith.constant 0 : index
    %517 = vector.load %arg4[%c7_210, %c0_211, %c0_212] : memref<9x64x128xbf16, #tpu.memory_space<vmem>>, vector<1x64x128xbf16>
    %518 = vector.shape_cast %517 : vector<1x64x128xbf16> to vector<64x128xbf16>
    %cst_213 = arith.constant dense<0.000000e+00> : vector<64x128xf32>
    %519 = tpu.matmul %516, %518, %cst_213 {dimension_numbers = #tpu.dot_dimension_numbers<[1], [0], [0], [1], [0, 0, 1, 1], [], []>} : vector<64x64xbf16>, vector<64x128xbf16>, vector<64x128xf32> -> vector<64x128xf32>
    %520 = arith.addf %514, %519 : vector<64x128xf32>
    %c0_214 = arith.constant 0 : index
    %c2_215 = arith.constant 2 : index
    %c2_216 = arith.constant 2 : index
    %c0_217 = arith.constant 0 : index
    %521 = vector.load %arg16[%c0_214, %c2_215, %c2_216, %c0_217] : memref<2x6x10x64xbf16, #tpu.memory_space<vmem>>, vector<2x4x8x64xbf16>
    %522 = vector.shape_cast %521 : vector<2x4x8x64xbf16> to vector<64x64xbf16>
    %c8_218 = arith.constant 8 : index
    %c0_219 = arith.constant 0 : index
    %c0_220 = arith.constant 0 : index
    %523 = vector.load %arg4[%c8_218, %c0_219, %c0_220] : memref<9x64x128xbf16, #tpu.memory_space<vmem>>, vector<1x64x128xbf16>
    %524 = vector.shape_cast %523 : vector<1x64x128xbf16> to vector<64x128xbf16>
    %cst_221 = arith.constant dense<0.000000e+00> : vector<64x128xf32>
    %525 = tpu.matmul %522, %524, %cst_221 {dimension_numbers = #tpu.dot_dimension_numbers<[1], [0], [0], [1], [0, 0, 1, 1], [], []>} : vector<64x64xbf16>, vector<64x128xbf16>, vector<64x128xf32> -> vector<64x128xf32>
    %526 = arith.addf %520, %525 : vector<64x128xf32>
    %527 = tpu.iota {dimensions = array<i32: 0>} : vector<64x1xi32>
    %c8_i32 = arith.constant 8 : i32
    %c0_i32 = arith.constant 0 : i32
    %528 = arith.cmpi eq, %c8_i32, %c0_i32 : i32
    %c1_i32 = arith.constant 1 : i32
    %529 = arith.select %528, %c1_i32, %c8_i32 : i32
    %530 = vector.broadcast %529 : i32 to vector<64x1xi32>
    %531 = arith.remsi %527, %530 : vector<64x1xi32>
    %c0_i32_222 = arith.constant 0 : i32
    %532 = vector.broadcast %c0_i32_222 : i32 to vector<64x1xi32>
    %533 = arith.cmpi ne, %531, %532 : vector<64x1xi32>
    %c0_i32_223 = arith.constant 0 : i32
    %534 = vector.broadcast %c0_i32_223 : i32 to vector<64x1xi32>
    %535 = arith.cmpi slt, %531, %534 : vector<64x1xi32>
    %c0_i32_224 = arith.constant 0 : i32
    %536 = arith.cmpi slt, %529, %c0_i32_224 : i32
    %537 = vector.broadcast %536 : i1 to vector<64x1xi1>
    %538 = vector.broadcast %537 : vector<64x1xi1> to vector<64x1xi1>
    %539 = arith.xori %535, %538 : vector<64x1xi1>
    %540 = arith.andi %539, %533 : vector<64x1xi1>
    %541 = vector.broadcast %529 : i32 to vector<64x1xi32>
    %542 = arith.addi %531, %541 : vector<64x1xi32>
    %543 = arith.select %540, %542, %531 : vector<64x1xi1>, vector<64x1xi32>
    %c4_i32 = arith.constant 4 : i32
    %544 = vector.broadcast %c4_i32 : i32 to vector<64x1xi32>
    %545 = arith.cmpi slt, %543, %544 : vector<64x1xi32>
    %cst_225 = arith.constant 1.000000e+00 : f32
    %cst_226 = arith.constant 0.000000e+00 : f32
    %546 = vector.broadcast %cst_225 : f32 to vector<64x1xf32>
    %547 = vector.broadcast %cst_226 : f32 to vector<64x1xf32>
    %548 = arith.select %545, %546, %547 : vector<64x1xi1>, vector<64x1xf32>
    %549 = vector.broadcast %548 : vector<64x1xf32> to vector<64x128xf32>
    %550 = arith.mulf %526, %549 : vector<64x128xf32>
    %cst_227 = arith.constant dense<0.000000e+00> : vector<128xf32>
    %551 = vector.multi_reduction <add>, %550, %cst_227 [0] : vector<64x128xf32> to vector<128xf32>
    %552 = vector.shape_cast %551 : vector<128xf32> to vector<1x128xf32>
    %cst_228 = arith.constant 3.200000e+01 : f32
    %553 = vector.broadcast %cst_228 : f32 to vector<1x128xf32>
    %554 = arith.divf %552, %553 : vector<1x128xf32>
    %555 = vector.broadcast %554 : vector<1x128xf32> to vector<64x128xf32>
    %556 = arith.subf %526, %555 : vector<64x128xf32>
    %557 = arith.mulf %556, %556 : vector<64x128xf32>
    %558 = vector.broadcast %548 : vector<64x1xf32> to vector<64x128xf32>
    %559 = arith.mulf %557, %558 : vector<64x128xf32>
    %cst_229 = arith.constant dense<0.000000e+00> : vector<128xf32>
    %560 = vector.multi_reduction <add>, %559, %cst_229 [0] : vector<64x128xf32> to vector<128xf32>
    %561 = vector.shape_cast %560 : vector<128xf32> to vector<1x128xf32>
    %cst_230 = arith.constant 3.200000e+01 : f32
    %562 = vector.broadcast %cst_230 : f32 to vector<1x128xf32>
    %563 = arith.divf %561, %562 : vector<1x128xf32>
    %c0_231 = arith.constant 0 : index
    %c0_232 = arith.constant 0 : index
    %564 = vector.load %arg10[%c0_231, %c0_232] : memref<1x128xf32, #tpu.memory_space<vmem>>, vector<1x128xf32>
    %cst_233 = arith.constant 9.99999974E-6 : f32
    %565 = vector.broadcast %cst_233 : f32 to vector<1x128xf32>
    %566 = arith.addf %563, %565 : vector<1x128xf32>
    %567 = math.rsqrt %566 : vector<1x128xf32>
    %568 = arith.mulf %564, %567 : vector<1x128xf32>
    %c0_234 = arith.constant 0 : index
    %c0_235 = arith.constant 0 : index
    %569 = vector.load %arg11[%c0_234, %c0_235] : memref<1x128xf32, #tpu.memory_space<vmem>>, vector<1x128xf32>
    %570 = arith.mulf %554, %568 : vector<1x128xf32>
    %571 = arith.subf %569, %570 : vector<1x128xf32>
    %572 = vector.broadcast %568 : vector<1x128xf32> to vector<64x128xf32>
    %573 = arith.mulf %526, %572 : vector<64x128xf32>
    %574 = vector.broadcast %571 : vector<1x128xf32> to vector<64x128xf32>
    %575 = arith.addf %573, %574 : vector<64x128xf32>
    %cst_236 = arith.constant 0.000000e+00 : f32
    %576 = vector.broadcast %cst_236 : f32 to vector<64x128xf32>
    %577 = arith.maximumf %575, %576 : vector<64x128xf32>
    %578 = vector.shape_cast %577 : vector<64x128xf32> to vector<2x4x8x128xf32>
    %579 = vector.extract_strided_slice %578 {offsets = [0, 0, 0, 0], sizes = [2, 4, 4, 128], strides = [1, 1, 1, 1]} : vector<2x4x8x128xf32> to vector<2x4x4x128xf32>
    %580 = vector.extract_strided_slice %579 {offsets = [0, 0, 0, 0], sizes = [2, 1, 4, 128], strides = [1, 1, 1, 1]} : vector<2x4x4x128xf32> to vector<2x1x4x128xf32>
    %581 = vector.shape_cast %580 : vector<2x1x4x128xf32> to vector<2x4x128xf32>
    %582 = vector.extract_strided_slice %579 {offsets = [0, 1, 0, 0], sizes = [2, 1, 4, 128], strides = [1, 1, 1, 1]} : vector<2x4x4x128xf32> to vector<2x1x4x128xf32>
    %583 = vector.shape_cast %582 : vector<2x1x4x128xf32> to vector<2x4x128xf32>
    %584 = arith.maximumf %581, %583 : vector<2x4x128xf32>
    %585 = vector.extract_strided_slice %584 {offsets = [0, 0, 0], sizes = [2, 1, 128], strides = [1, 1, 1]} : vector<2x4x128xf32> to vector<2x1x128xf32>
    %586 = vector.extract_strided_slice %584 {offsets = [0, 1, 0], sizes = [2, 1, 128], strides = [1, 1, 1]} : vector<2x4x128xf32> to vector<2x1x128xf32>
    %587 = arith.maximumf %585, %586 : vector<2x1x128xf32>
    %588 = vector.extract_strided_slice %584 {offsets = [0, 2, 0], sizes = [2, 1, 128], strides = [1, 1, 1]} : vector<2x4x128xf32> to vector<2x1x128xf32>
    %589 = vector.extract_strided_slice %584 {offsets = [0, 3, 0], sizes = [2, 1, 128], strides = [1, 1, 1]} : vector<2x4x128xf32> to vector<2x1x128xf32>
    %590 = arith.maximumf %588, %589 : vector<2x1x128xf32>
    %591 = tpu.concatenate %587, %590 in 1 : vector<2x1x128xf32>, vector<2x1x128xf32> -> vector<2x2x128xf32>
    %592 = arith.truncf %591 : vector<2x2x128xf32> to vector<2x2x128xbf16>
    %c0_237 = arith.constant 0 : index
    %c1_238 = arith.constant 1 : index
    %c1_239 = arith.constant 1 : index
    %c0_240 = arith.constant 0 : index
    %593 = vector.load %arg17[%c0_237, %c1_238, %c1_239, %c0_240] : memref<2x4x10x128xbf16, #tpu.memory_space<vmem>>, vector<2x1x2x128xbf16>
    %594 = vector.shape_cast %593 : vector<2x1x2x128xbf16> to vector<2x2x128xbf16>
    %595 = vector.shape_cast %592 : vector<2x2x128xbf16> to vector<2x1x2x128xbf16>
    tpu.vector_store %arg17[%c0_237, %c1_238, %c1_239, %c0_240], %595 {strides = array<i32>} : memref<2x4x10x128xbf16, #tpu.memory_space<vmem>>, vector<2x1x2x128xbf16>,
    %596 = vector.extract_strided_slice %579 {offsets = [0, 2, 0, 0], sizes = [2, 1, 4, 128], strides = [1, 1, 1, 1]} : vector<2x4x4x128xf32> to vector<2x1x4x128xf32>
    %597 = vector.shape_cast %596 : vector<2x1x4x128xf32> to vector<2x4x128xf32>
    %598 = vector.extract_strided_slice %579 {offsets = [0, 3, 0, 0], sizes = [2, 1, 4, 128], strides = [1, 1, 1, 1]} : vector<2x4x4x128xf32> to vector<2x1x4x128xf32>
    %599 = vector.shape_cast %598 : vector<2x1x4x128xf32> to vector<2x4x128xf32>
    %600 = arith.maximumf %597, %599 : vector<2x4x128xf32>
    %601 = vector.extract_strided_slice %600 {offsets = [0, 0, 0], sizes = [2, 1, 128], strides = [1, 1, 1]} : vector<2x4x128xf32> to vector<2x1x128xf32>
    %602 = vector.extract_strided_slice %600 {offsets = [0, 1, 0], sizes = [2, 1, 128], strides = [1, 1, 1]} : vector<2x4x128xf32> to vector<2x1x128xf32>
    %603 = arith.maximumf %601, %602 : vector<2x1x128xf32>
    %604 = vector.extract_strided_slice %600 {offsets = [0, 2, 0], sizes = [2, 1, 128], strides = [1, 1, 1]} : vector<2x4x128xf32> to vector<2x1x128xf32>
    %605 = vector.extract_strided_slice %600 {offsets = [0, 3, 0], sizes = [2, 1, 128], strides = [1, 1, 1]} : vector<2x4x128xf32> to vector<2x1x128xf32>
    %606 = arith.maximumf %604, %605 : vector<2x1x128xf32>
    %607 = tpu.concatenate %603, %606 in 1 : vector<2x1x128xf32>, vector<2x1x128xf32> -> vector<2x2x128xf32>
    %608 = arith.truncf %607 : vector<2x2x128xf32> to vector<2x2x128xbf16>
    %c0_241 = arith.constant 0 : index
    %c2_242 = arith.constant 2 : index
    %c1_243 = arith.constant 1 : index
    %c0_244 = arith.constant 0 : index
    %609 = vector.load %arg17[%c0_241, %c2_242, %c1_243, %c0_244] : memref<2x4x10x128xbf16, #tpu.memory_space<vmem>>, vector<2x1x2x128xbf16>
    %610 = vector.shape_cast %609 : vector<2x1x2x128xbf16> to vector<2x2x128xbf16>
    %611 = vector.shape_cast %608 : vector<2x2x128xbf16> to vector<2x1x2x128xbf16>
    tpu.vector_store %arg17[%c0_241, %c2_242, %c1_243, %c0_244], %611 {strides = array<i32>} : memref<2x4x10x128xbf16, #tpu.memory_space<vmem>>, vector<2x1x2x128xbf16>,
    %c0_245 = arith.constant 0 : index
    %c0_246 = arith.constant 0 : index
    %c0_247 = arith.constant 0 : index
    %c0_248 = arith.constant 0 : index
    %612 = vector.load %arg17[%c0_245, %c0_246, %c0_247, %c0_248] : memref<2x4x10x128xbf16, #tpu.memory_space<vmem>>, vector<2x2x8x128xbf16>
    %613 = vector.shape_cast %612 : vector<2x2x8x128xbf16> to vector<32x128xbf16>
    %c0_249 = arith.constant 0 : index
    %c0_250 = arith.constant 0 : index
    %c0_251 = arith.constant 0 : index
    %614 = vector.load %arg5[%c0_249, %c0_250, %c0_251] : memref<9x128x256xbf16, #tpu.memory_space<vmem>>, vector<1x128x256xbf16>
    %615 = vector.shape_cast %614 : vector<1x128x256xbf16> to vector<128x256xbf16>
    %cst_252 = arith.constant dense<0.000000e+00> : vector<32x256xf32>
    %616 = tpu.matmul %613, %615, %cst_252 {dimension_numbers = #tpu.dot_dimension_numbers<[1], [0], [0], [1], [0, 0, 1, 1], [], []>} : vector<32x128xbf16>, vector<128x256xbf16>, vector<32x256xf32> -> vector<32x256xf32>
    %c0_253 = arith.constant 0 : index
    %c0_254 = arith.constant 0 : index
    %c1_255 = arith.constant 1 : index
    %c0_256 = arith.constant 0 : index
    %617 = vector.load %arg17[%c0_253, %c0_254, %c1_255, %c0_256] : memref<2x4x10x128xbf16, #tpu.memory_space<vmem>>, vector<2x2x8x128xbf16>
    %618 = vector.shape_cast %617 : vector<2x2x8x128xbf16> to vector<32x128xbf16>
    %c1_257 = arith.constant 1 : index
    %c0_258 = arith.constant 0 : index
    %c0_259 = arith.constant 0 : index
    %619 = vector.load %arg5[%c1_257, %c0_258, %c0_259] : memref<9x128x256xbf16, #tpu.memory_space<vmem>>, vector<1x128x256xbf16>
    %620 = vector.shape_cast %619 : vector<1x128x256xbf16> to vector<128x256xbf16>
    %cst_260 = arith.constant dense<0.000000e+00> : vector<32x256xf32>
    %621 = tpu.matmul %618, %620, %cst_260 {dimension_numbers = #tpu.dot_dimension_numbers<[1], [0], [0], [1], [0, 0, 1, 1], [], []>} : vector<32x128xbf16>, vector<128x256xbf16>, vector<32x256xf32> -> vector<32x256xf32>
    %622 = arith.addf %616, %621 : vector<32x256xf32>
    %c0_261 = arith.constant 0 : index
    %c0_262 = arith.constant 0 : index
    %c2_263 = arith.constant 2 : index
    %c0_264 = arith.constant 0 : index
    %623 = vector.load %arg17[%c0_261, %c0_262, %c2_263, %c0_264] : memref<2x4x10x128xbf16, #tpu.memory_space<vmem>>, vector<2x2x8x128xbf16>
    %624 = vector.shape_cast %623 : vector<2x2x8x128xbf16> to vector<32x128xbf16>
    %c2_265 = arith.constant 2 : index
    %c0_266 = arith.constant 0 : index
    %c0_267 = arith.constant 0 : index
    %625 = vector.load %arg5[%c2_265, %c0_266, %c0_267] : memref<9x128x256xbf16, #tpu.memory_space<vmem>>, vector<1x128x256xbf16>
    %626 = vector.shape_cast %625 : vector<1x128x256xbf16> to vector<128x256xbf16>
    %cst_268 = arith.constant dense<0.000000e+00> : vector<32x256xf32>
    %627 = tpu.matmul %624, %626, %cst_268 {dimension_numbers = #tpu.dot_dimension_numbers<[1], [0], [0], [1], [0, 0, 1, 1], [], []>} : vector<32x128xbf16>, vector<128x256xbf16>, vector<32x256xf32> -> vector<32x256xf32>
    %628 = arith.addf %622, %627 : vector<32x256xf32>
    %c0_269 = arith.constant 0 : index
    %c1_270 = arith.constant 1 : index
    %c0_271 = arith.constant 0 : index
    %c0_272 = arith.constant 0 : index
    %629 = vector.load %arg17[%c0_269, %c1_270, %c0_271, %c0_272] : memref<2x4x10x128xbf16, #tpu.memory_space<vmem>>, vector<2x2x8x128xbf16>
    %630 = vector.shape_cast %629 : vector<2x2x8x128xbf16> to vector<32x128xbf16>
    %c3_273 = arith.constant 3 : index
    %c0_274 = arith.constant 0 : index
    %c0_275 = arith.constant 0 : index
    %631 = vector.load %arg5[%c3_273, %c0_274, %c0_275] : memref<9x128x256xbf16, #tpu.memory_space<vmem>>, vector<1x128x256xbf16>
    %632 = vector.shape_cast %631 : vector<1x128x256xbf16> to vector<128x256xbf16>
    %cst_276 = arith.constant dense<0.000000e+00> : vector<32x256xf32>
    %633 = tpu.matmul %630, %632, %cst_276 {dimension_numbers = #tpu.dot_dimension_numbers<[1], [0], [0], [1], [0, 0, 1, 1], [], []>} : vector<32x128xbf16>, vector<128x256xbf16>, vector<32x256xf32> -> vector<32x256xf32>
    %634 = arith.addf %628, %633 : vector<32x256xf32>
    %c0_277 = arith.constant 0 : index
    %c1_278 = arith.constant 1 : index
    %c1_279 = arith.constant 1 : index
    %c0_280 = arith.constant 0 : index
    %635 = vector.load %arg17[%c0_277, %c1_278, %c1_279, %c0_280] : memref<2x4x10x128xbf16, #tpu.memory_space<vmem>>, vector<2x2x8x128xbf16>
    %636 = vector.shape_cast %635 : vector<2x2x8x128xbf16> to vector<32x128xbf16>
    %c4_281 = arith.constant 4 : index
    %c0_282 = arith.constant 0 : index
    %c0_283 = arith.constant 0 : index
    %637 = vector.load %arg5[%c4_281, %c0_282, %c0_283] : memref<9x128x256xbf16, #tpu.memory_space<vmem>>, vector<1x128x256xbf16>
    %638 = vector.shape_cast %637 : vector<1x128x256xbf16> to vector<128x256xbf16>
    %cst_284 = arith.constant dense<0.000000e+00> : vector<32x256xf32>
    %639 = tpu.matmul %636, %638, %cst_284 {dimension_numbers = #tpu.dot_dimension_numbers<[1], [0], [0], [1], [0, 0, 1, 1], [], []>} : vector<32x128xbf16>, vector<128x256xbf16>, vector<32x256xf32> -> vector<32x256xf32>
    %640 = arith.addf %634, %639 : vector<32x256xf32>
    %c0_285 = arith.constant 0 : index
    %c1_286 = arith.constant 1 : index
    %c2_287 = arith.constant 2 : index
    %c0_288 = arith.constant 0 : index
    %641 = vector.load %arg17[%c0_285, %c1_286, %c2_287, %c0_288] : memref<2x4x10x128xbf16, #tpu.memory_space<vmem>>, vector<2x2x8x128xbf16>
    %642 = vector.shape_cast %641 : vector<2x2x8x128xbf16> to vector<32x128xbf16>
    %c5_289 = arith.constant 5 : index
    %c0_290 = arith.constant 0 : index
    %c0_291 = arith.constant 0 : index
    %643 = vector.load %arg5[%c5_289, %c0_290, %c0_291] : memref<9x128x256xbf16, #tpu.memory_space<vmem>>, vector<1x128x256xbf16>
    %644 = vector.shape_cast %643 : vector<1x128x256xbf16> to vector<128x256xbf16>
    %cst_292 = arith.constant dense<0.000000e+00> : vector<32x256xf32>
    %645 = tpu.matmul %642, %644, %cst_292 {dimension_numbers = #tpu.dot_dimension_numbers<[1], [0], [0], [1], [0, 0, 1, 1], [], []>} : vector<32x128xbf16>, vector<128x256xbf16>, vector<32x256xf32> -> vector<32x256xf32>
    %646 = arith.addf %640, %645 : vector<32x256xf32>
    %c0_293 = arith.constant 0 : index
    %c2_294 = arith.constant 2 : index
    %c0_295 = arith.constant 0 : index
    %c0_296 = arith.constant 0 : index
    %647 = vector.load %arg17[%c0_293, %c2_294, %c0_295, %c0_296] : memref<2x4x10x128xbf16, #tpu.memory_space<vmem>>, vector<2x2x8x128xbf16>
    %648 = vector.shape_cast %647 : vector<2x2x8x128xbf16> to vector<32x128xbf16>
    %c6_297 = arith.constant 6 : index
    %c0_298 = arith.constant 0 : index
    %c0_299 = arith.constant 0 : index
    %649 = vector.load %arg5[%c6_297, %c0_298, %c0_299] : memref<9x128x256xbf16, #tpu.memory_space<vmem>>, vector<1x128x256xbf16>
    %650 = vector.shape_cast %649 : vector<1x128x256xbf16> to vector<128x256xbf16>
    %cst_300 = arith.constant dense<0.000000e+00> : vector<32x256xf32>
    %651 = tpu.matmul %648, %650, %cst_300 {dimension_numbers = #tpu.dot_dimension_numbers<[1], [0], [0], [1], [0, 0, 1, 1], [], []>} : vector<32x128xbf16>, vector<128x256xbf16>, vector<32x256xf32> -> vector<32x256xf32>
    %652 = arith.addf %646, %651 : vector<32x256xf32>
    %c0_301 = arith.constant 0 : index
    %c2_302 = arith.constant 2 : index
    %c1_303 = arith.constant 1 : index
    %c0_304 = arith.constant 0 : index
    %653 = vector.load %arg17[%c0_301, %c2_302, %c1_303, %c0_304] : memref<2x4x10x128xbf16, #tpu.memory_space<vmem>>, vector<2x2x8x128xbf16>
    %654 = vector.shape_cast %653 : vector<2x2x8x128xbf16> to vector<32x128xbf16>
    %c7_305 = arith.constant 7 : index
    %c0_306 = arith.constant 0 : index
    %c0_307 = arith.constant 0 : index
    %655 = vector.load %arg5[%c7_305, %c0_306, %c0_307] : memref<9x128x256xbf16, #tpu.memory_space<vmem>>, vector<1x128x256xbf16>
    %656 = vector.shape_cast %655 : vector<1x128x256xbf16> to vector<128x256xbf16>
    %cst_308 = arith.constant dense<0.000000e+00> : vector<32x256xf32>
    %657 = tpu.matmul %654, %656, %cst_308 {dimension_numbers = #tpu.dot_dimension_numbers<[1], [0], [0], [1], [0, 0, 1, 1], [], []>} : vector<32x128xbf16>, vector<128x256xbf16>, vector<32x256xf32> -> vector<32x256xf32>
    %658 = arith.addf %652, %657 : vector<32x256xf32>
    %c0_309 = arith.constant 0 : index
    %c2_310 = arith.constant 2 : index
    %c2_311 = arith.constant 2 : index
    %c0_312 = arith.constant 0 : index
    %659 = vector.load %arg17[%c0_309, %c2_310, %c2_311, %c0_312] : memref<2x4x10x128xbf16, #tpu.memory_space<vmem>>, vector<2x2x8x128xbf16>
    %660 = vector.shape_cast %659 : vector<2x2x8x128xbf16> to vector<32x128xbf16>
    %c8_313 = arith.constant 8 : index
    %c0_314 = arith.constant 0 : index
    %c0_315 = arith.constant 0 : index
    %661 = vector.load %arg5[%c8_313, %c0_314, %c0_315] : memref<9x128x256xbf16, #tpu.memory_space<vmem>>, vector<1x128x256xbf16>
    %662 = vector.shape_cast %661 : vector<1x128x256xbf16> to vector<128x256xbf16>
    %cst_316 = arith.constant dense<0.000000e+00> : vector<32x256xf32>
    %663 = tpu.matmul %660, %662, %cst_316 {dimension_numbers = #tpu.dot_dimension_numbers<[1], [0], [0], [1], [0, 0, 1, 1], [], []>} : vector<32x128xbf16>, vector<128x256xbf16>, vector<32x256xf32> -> vector<32x256xf32>
    %664 = arith.addf %658, %663 : vector<32x256xf32>
    %665 = tpu.iota {dimensions = array<i32: 0>} : vector<32x1xi32>
    %c8_i32_317 = arith.constant 8 : i32
    %c0_i32_318 = arith.constant 0 : i32
    %666 = arith.cmpi eq, %c8_i32_317, %c0_i32_318 : i32
    %c1_i32_319 = arith.constant 1 : i32
    %667 = arith.select %666, %c1_i32_319, %c8_i32_317 : i32
    %668 = vector.broadcast %667 : i32 to vector<32x1xi32>
    %669 = arith.remsi %665, %668 : vector<32x1xi32>
    %c0_i32_320 = arith.constant 0 : i32
    %670 = vector.broadcast %c0_i32_320 : i32 to vector<32x1xi32>
    %671 = arith.cmpi ne, %669, %670 : vector<32x1xi32>
    %c0_i32_321 = arith.constant 0 : i32
    %672 = vector.broadcast %c0_i32_321 : i32 to vector<32x1xi32>
    %673 = arith.cmpi slt, %669, %672 : vector<32x1xi32>
    %c0_i32_322 = arith.constant 0 : i32
    %674 = arith.cmpi slt, %667, %c0_i32_322 : i32
    %675 = vector.broadcast %674 : i1 to vector<32x1xi1>
    %676 = vector.broadcast %675 : vector<32x1xi1> to vector<32x1xi1>
    %677 = arith.xori %673, %676 : vector<32x1xi1>
    %678 = arith.andi %677, %671 : vector<32x1xi1>
    %679 = vector.broadcast %667 : i32 to vector<32x1xi32>
    %680 = arith.addi %669, %679 : vector<32x1xi32>
    %681 = arith.select %678, %680, %669 : vector<32x1xi1>, vector<32x1xi32>
    %c2_i32 = arith.constant 2 : i32
    %682 = vector.broadcast %c2_i32 : i32 to vector<32x1xi32>
    %683 = arith.cmpi slt, %681, %682 : vector<32x1xi32>
    %cst_323 = arith.constant 1.000000e+00 : f32
    %cst_324 = arith.constant 0.000000e+00 : f32
    %684 = vector.broadcast %cst_323 : f32 to vector<32x1xf32>
    %685 = vector.broadcast %cst_324 : f32 to vector<32x1xf32>
    %686 = arith.select %683, %684, %685 : vector<32x1xi1>, vector<32x1xf32>
    %687 = vector.broadcast %686 : vector<32x1xf32> to vector<32x256xf32>
    %688 = arith.mulf %664, %687 : vector<32x256xf32>
    %cst_325 = arith.constant dense<0.000000e+00> : vector<256xf32>
    %689 = vector.multi_reduction <add>, %688, %cst_325 [0] : vector<32x256xf32> to vector<256xf32>
    %690 = vector.shape_cast %689 : vector<256xf32> to vector<1x256xf32>
    %cst_326 = arith.constant 8.000000e+00 : f32
    %691 = vector.broadcast %cst_326 : f32 to vector<1x256xf32>
    %692 = arith.divf %690, %691 : vector<1x256xf32>
    %693 = vector.broadcast %692 : vector<1x256xf32> to vector<32x256xf32>
    %694 = arith.subf %664, %693 : vector<32x256xf32>
    %695 = arith.mulf %694, %694 : vector<32x256xf32>
    %696 = vector.broadcast %686 : vector<32x1xf32> to vector<32x256xf32>
    %697 = arith.mulf %695, %696 : vector<32x256xf32>
    %cst_327 = arith.constant dense<0.000000e+00> : vector<256xf32>
    %698 = vector.multi_reduction <add>, %697, %cst_327 [0] : vector<32x256xf32> to vector<256xf32>
    %699 = vector.shape_cast %698 : vector<256xf32> to vector<1x256xf32>
    %cst_328 = arith.constant 8.000000e+00 : f32
    %700 = vector.broadcast %cst_328 : f32 to vector<1x256xf32>
    %701 = arith.divf %699, %700 : vector<1x256xf32>
    %c0_329 = arith.constant 0 : index
    %c0_330 = arith.constant 0 : index
    %702 = vector.load %arg12[%c0_329, %c0_330] : memref<1x256xf32, #tpu.memory_space<vmem>>, vector<1x256xf32>
    %cst_331 = arith.constant 9.99999974E-6 : f32
    %703 = vector.broadcast %cst_331 : f32 to vector<1x256xf32>
    %704 = arith.addf %701, %703 : vector<1x256xf32>
    %705 = math.rsqrt %704 : vector<1x256xf32>
    %706 = arith.mulf %702, %705 : vector<1x256xf32>
    %c0_332 = arith.constant 0 : index
    %c0_333 = arith.constant 0 : index
    %707 = vector.load %arg13[%c0_332, %c0_333] : memref<1x256xf32, #tpu.memory_space<vmem>>, vector<1x256xf32>
    %708 = arith.mulf %692, %706 : vector<1x256xf32>
    %709 = arith.subf %707, %708 : vector<1x256xf32>
    %710 = vector.broadcast %706 : vector<1x256xf32> to vector<32x256xf32>
    %711 = arith.mulf %664, %710 : vector<32x256xf32>
    %712 = vector.broadcast %709 : vector<1x256xf32> to vector<32x256xf32>
    %713 = arith.addf %711, %712 : vector<32x256xf32>
    %cst_334 = arith.constant 0.000000e+00 : f32
    %714 = vector.broadcast %cst_334 : f32 to vector<32x256xf32>
    %715 = arith.maximumf %713, %714 : vector<32x256xf32>
    %716 = vector.shape_cast %715 : vector<32x256xf32> to vector<2x2x8x256xf32>
    %717 = vector.extract_strided_slice %716 {offsets = [0, 0, 0, 0], sizes = [2, 2, 2, 256], strides = [1, 1, 1, 1]} : vector<2x2x8x256xf32> to vector<2x2x2x256xf32>
    %cst_335 = arith.constant dense<0xFF800000> : vector<2x256xf32>
    %718 = vector.multi_reduction <maximumf>, %717, %cst_335 [1, 2] : vector<2x2x2x256xf32> to vector<2x256xf32>
    %c0_336 = arith.constant 0 : index
    %c0_337 = arith.constant 0 : index
    %719 = vector.load %arg14[%c0_336, %c0_337] : memref<2x256xf32, #tpu.memory_space<vmem>>, vector<2x256xf32>
    tpu.vector_store %arg14[%c0_336, %c0_337], %718 {strides = array<i32>} : memref<2x256xf32, #tpu.memory_space<vmem>>, vector<2x256xf32>,
    return
  }
  func.func @transform_0(%arg0: i32) -> (i32, i32) {
    %c0_i32 = arith.constant 0 : i32
    %c0_i32_0 = arith.constant 0 : i32
    %c0_i32_1 = arith.constant 0 : i32
    return %c0_i32, %c0_i32_0 : i32, i32
  }
  func.func @transform_1(%arg0: i32) -> (i32, i32) {
    %c0_i32 = arith.constant 0 : i32
    %c0_i32_0 = arith.constant 0 : i32
    %c0_i32_1 = arith.constant 0 : i32
    return %c0_i32, %c0_i32_0 : i32, i32
  }
  func.func @transform_2(%arg0: i32) -> (i32, i32, i32) {
    %c0_i32 = arith.constant 0 : i32
    %c0_i32_0 = arith.constant 0 : i32
    %c0_i32_1 = arith.constant 0 : i32
    %c0_i32_2 = arith.constant 0 : i32
    return %c0_i32, %c0_i32_0, %c0_i32_1 : i32, i32, i32
  }
  func.func @transform_3(%arg0: i32) -> (i32, i32, i32) {
    %c0_i32 = arith.constant 0 : i32
    %c0_i32_0 = arith.constant 0 : i32
    %c0_i32_1 = arith.constant 0 : i32
    %c0_i32_2 = arith.constant 0 : i32
    return %c0_i32, %c0_i32_0, %c0_i32_1 : i32, i32, i32
  }
  func.func @transform_4(%arg0: i32) -> (i32, i32, i32) {
    %c0_i32 = arith.constant 0 : i32
    %c0_i32_0 = arith.constant 0 : i32
    %c0_i32_1 = arith.constant 0 : i32
    %c0_i32_2 = arith.constant 0 : i32
    return %c0_i32, %c0_i32_0, %c0_i32_1 : i32, i32, i32
  }
  func.func @transform_5(%arg0: i32) -> (i32, i32) {
    %c0_i32 = arith.constant 0 : i32
    %c0_i32_0 = arith.constant 0 : i32
    %c0_i32_1 = arith.constant 0 : i32
    return %c0_i32, %c0_i32_0 : i32, i32
  }
  func.func @transform_6(%arg0: i32) -> (i32, i32) {
    %c0_i32 = arith.constant 0 : i32
    %c0_i32_0 = arith.constant 0 : i32
    %c0_i32_1 = arith.constant 0 : i32
    return %c0_i32, %c0_i32_0 : i32, i32
  }
  func.func @transform_7(%arg0: i32) -> (i32, i32) {
    %c0_i32 = arith.constant 0 : i32
    %c0_i32_0 = arith.constant 0 : i32
    %c0_i32_1 = arith.constant 0 : i32
    return %c0_i32, %c0_i32_0 : i32, i32
  }
  func.func @transform_8(%arg0: i32) -> (i32, i32) {
    %c0_i32 = arith.constant 0 : i32
    %c0_i32_0 = arith.constant 0 : i32
    %c0_i32_1 = arith.constant 0 : i32
    return %c0_i32, %c0_i32_0 : i32, i32
  }
  func.func @transform_9(%arg0: i32) -> (i32, i32) {
    %c0_i32 = arith.constant 0 : i32
    %c0_i32_0 = arith.constant 0 : i32
    %c0_i32_1 = arith.constant 0 : i32
    return %c0_i32, %c0_i32_0 : i32, i32
  }
  func.func @transform_10(%arg0: i32) -> (i32, i32) {
    %c0_i32 = arith.constant 0 : i32
    %c0_i32_0 = arith.constant 0 : i32
    %c0_i32_1 = arith.constant 0 : i32
    return %c0_i32, %c0_i32_0 : i32, i32
  }
  func.func @transform_11(%arg0: i32) -> (i32, i32) {
    %c0_i32 = arith.constant 0 : i32
    %c0_i32_0 = arith.constant 0 : i32
    %c0_i32_1 = arith.constant 0 : i32
    return %c0_i32, %c0_i32_0 : i32, i32
  }
  func.func @transform_12(%arg0: i32) -> (i32, i32) {
    %c0_i32 = arith.constant 0 : i32
    %c0_i32_0 = arith.constant 0 : i32
    %c0_i32_1 = arith.constant 0 : i32
    return %c0_i32, %c0_i32_0 : i32, i32
  }
  func.func @transform_13(%arg0: i32) -> (i32, i32) {
    %c0_i32 = arith.constant 0 : i32
    %c0_i32_0 = arith.constant 0 : i32
    %c0_i32_1 = arith.constant 0 : i32
    return %c0_i32, %c0_i32_0 : i32, i32
  }
}

</mosaic_0001>

<bundles_post_ra>
// kernel: backbone_forward.1
= control target key start
LH: loop header
LB: loop body
LE: loop exit
PB: predicated region body
PF: predicated region fallthrough
CT: control target
= control target key end

     0   :  { %vm489_vm0 = vcmask 1044480   ;;  %vm392_vm1 = vcmask 613376   ;;  %vm490_vm2 = vcmask 1045504   ;;  %v11622_v4 = vmov 65535   ;;  %s15429_s1 = inlined_call_operand.vmem [shape: bf16[75,32], index: 1, kind: input, shape index: {}]   ;;  %s15430_s0 = inlined_call_operand.vmem [shape: bf16[512,75], index: 0, kind: input, shape index: {}]   ;;  %s15431_s2 = inlined_call_operand.vmem [shape: bf16[9,32,64], index: 2, kind: input, shape index: {}]   ;;  %s15432_s5 = inlined_call_operand.vmem [shape: f32[1,32], index: 5, kind: input, shape index: {}]   ;;  %s15433_s6 = inlined_call_operand.vmem [shape: f32[1,32], index: 6, kind: input, shape index: {}]   ;;  %s15434_s3 = inlined_call_operand.vmem [shape: bf16[9,64,128], index: 3, kind: input, shape index: {}]   ;;  %s15435_s7 = inlined_call_operand.vmem [shape: f32[1,64], index: 7, kind: input, shape index: {}]   ;;  %s15436_s8 = inlined_call_operand.vmem [shape: f32[1,64], index: 8, kind: input, shape index: {}]   ;;  %s15437_s4 = inlined_call_operand.vmem [shape: bf16[9,128,256], index: 4, kind: input, shape index: {}]   ;;  %s15438_s9 = inlined_call_operand.vmem [shape: f32[1,128], index: 9, kind: input, shape index: {}]   ;;  %s15439_s10 = inlined_call_operand.vmem [shape: f32[1,128], index: 10, kind: input, shape index: {}]   ;;  %s15440_s11 = inlined_call_operand.vmem [shape: f32[1,256], index: 11, kind: input, shape index: {}]   ;;  %s15441_s12 = inlined_call_operand.vmem [shape: f32[1,256], index: 12, kind: input, shape index: {}]   ;;  %s15442_s13 = inlined_call_operand.vmem [shape: f32[2,256], index: 13, kind: output, shape index: {}]  }
   0x1   :  { %v11259_v0 = vld [vmem:[%s15429_s1] sm:$0xff]   ;;  %v11260_v1 = vld [vmem:[%s15429_s1 + $0x8] sm:$0xff]   ;;  %v11261_v2 = vld [vmem:[%s15429_s1 + $0x10] sm:$0xff]   ;;  %v491_v5 = vsel %vm489_vm0, 4294967295, %v11622_v4  ;;  %vm45_vm3 = vcmask 257024   ;;  %vm47_vm4 = vcmask 253952  }
   0x2   :  { %10600 = vmatprep.subr.bf16.mxu0 %v11259_v0  ;;  %v11264_v3 = vld [vmem:[%s15430_s0] sm:$0xff]   ;;  %v11262_v6 = vld [vmem:[%s15429_s1 + $0x18] sm:$0xff]   ;;  %v492_v8 = vsel %vm490_vm2, %v491_v5, 0  ;;  %v11265_v10 = vld [vmem:[%s15430_s0 + $0x8] sm:$0xff]   ;;  %v15443_v34 = vmov 0   ;;  %vm785_vm5 = vcmask 261120  }
   0x3   :  { %10601 = vmatpush3.bf16.msra.mxu0 %v11259_v0  ;;  %10610 = vmatprep.mubr.msk.bf16.mxu0 %vm392_vm1, %v11264_v3  ;;  %v11263_v7 = vld [vmem:[%s15429_s1 + $0x20] sm:$0x3f]   ;;  %v11266_v11 = vld [vmem:[%s15430_s0 + $0x10] sm:$0xff]   ;;  %v11267_v12 = vld [vmem:[%s15430_s0 + $0x18] sm:$0xff]   ;;  %49 = vst.msk [vmem:[#allocation2 + $0x8] sm:$0xf] %vm45_vm3, %v15443_v34 }
   0x4   :  { %10602 = vmatprep.subr.bf16.mxu0 %v11260_v1  ;;  %v494_v9 = vand.u32 %v11263_v7, %v492_v8  ;;  %v11268_v13 = vld [vmem:[%s15430_s0 + $0x20] sm:$0xff]   ;;  %v11269_v14 = vld [vmem:[%s15430_s0 + $0x28] sm:$0xff]   ;;  %v11270_v15 = vld [vmem:[%s15430_s0 + $0x30] sm:$0xff]   ;;  %50 = vst.msk [vmem:[#allocation2 + $0xc] sm:$0x1] %vm47_vm4, %v15443_v34  ;;  %vm1446_vm6 = vcmask 1040384  }
   0x5   :  { %v11271_v16 = vld [vmem:[%s15430_s0 + $0x38] sm:$0xff]   ;;  %v11272_v17 = vld [vmem:[%s15430_s0 + $0x40] sm:$0xff]   ;;  %v11273_v18 = vld [vmem:[%s15430_s0 + $0x48] sm:$0xff]   ;;  %46 = vst.msk [vmem:[#allocation2] sm:$0xf] %vm45_vm3, %v15443_v34  ;;  %vm1449_vm7 = vcmask 1041408  }
   0x6   :  { %v11274_v19 = vld [vmem:[%s15430_s0 + $0x50] sm:$0xff]   ;;  %v11275_v20 = vld [vmem:[%s15430_s0 + $0x58] sm:$0xff]   ;;  %v11276_v21 = vld [vmem:[%s15430_s0 + $0x60] sm:$0xff]   ;;  %48 = vst.msk [vmem:[#allocation2 + $0x4] sm:$0x1] %vm47_vm4, %v15443_v34  ;;  %vm1452_vm8 = vcmask 1042432  }
   0x7   :  { %10603 = vmatpush3.bf16.msra.mxu0 %v11260_v1  ;;  %v11277_v22 = vld [vmem:[%s15430_s0 + $0x68] sm:$0xff]   ;;  %v11278_v23 = vld [vmem:[%s15430_s0 + $0x70] sm:$0xff]   ;;  %v11279_v24 = vld [vmem:[%s15430_s0 + $0x78] sm:$0xff]   ;;  %51 = vst.msk [vmem:[#allocation2 + $0x10] sm:$0xf] %vm45_vm3, %v15443_v34  ;;  %vm1455_vm9 = vcmask 1043456  }
   0x8   :  { %10604 = vmatprep.subr.bf16.mxu0 %v11261_v2  ;;  %v11280_v25 = vld [vmem:[%s15430_s0 + $0x80] sm:$0xff]   ;;  %v11281_v26 = vld [vmem:[%s15430_s0 + $0x88] sm:$0xff]   ;;  %v11282_v27 = vld [vmem:[%s15430_s0 + $0x90] sm:$0xff]   ;;  %52 = vst.msk [vmem:[#allocation2 + $0x14] sm:$0x1] %vm47_vm4, %v15443_v34  ;;  %vm1462_vm10 = vcmask 1046528  }
   0x9   :  { %v11283_v28 = vld [vmem:[%s15430_s0 + $0x98] sm:$0xff]   ;;  %v11284_v29 = vld [vmem:[%s15430_s0 + $0xa0] sm:$0xff]   ;;  %v11285_v30 = vld [vmem:[%s15430_s0 + $0xa8] sm:$0xff]   ;;  %53 = vst.msk [vmem:[#allocation2 + $0x18] sm:$0xf] %vm45_vm3, %v15443_v34 }
   0xa   :  { %v11286_v31 = vld [vmem:[%s15430_s0 + $0xb0] sm:$0xff]   ;;  %v11287_v32 = vld [vmem:[%s15430_s0 + $0xb8] sm:$0xff]   ;;  %v11288_v33 = vld [vmem:[%s15430_s0 + $0xc0] sm:$0xff]   ;;  %54 = vst.msk [vmem:[#allocation2 + $0x1c] sm:$0x1] %vm47_vm4, %v15443_v34 }
   0xb   :  { %10605 = vmatpush3.bf16.msra.mxu0 %v11261_v2  ;;  %55 = vst.msk [vmem:[#allocation2 + $0x20] sm:$0xf] %vm45_vm3, %v15443_v34  ;;  %57 = vst.msk [vmem:[#allocation2 + $0x28] sm:$0xf] %vm45_vm3, %v15443_v34  ;;  %v11289_v35 = vld [vmem:[%s15430_s0 + $0xc8] sm:$0xff]   ;;  %v11290_v36 = vld [vmem:[%s15430_s0 + $0xd0] sm:$0xff]  }
   0xc   :  { %10606 = vmatprep.subr.bf16.mxu0 %v11262_v6  ;;  %56 = vst.msk [vmem:[#allocation2 + $0x24] sm:$0x1] %vm47_vm4, %v15443_v34  ;;  %58 = vst.msk [vmem:[#allocation2 + $0x2c] sm:$0x1] %vm47_vm4, %v15443_v34  ;;  %v11291_v37 = vld [vmem:[%s15430_s0 + $0xd8] sm:$0xff]   ;;  %v11292_v38 = vld [vmem:[%s15430_s0 + $0xe0] sm:$0xff]  }
   0xd   :  { %59 = vst.msk [vmem:[#allocation2 + $0x30] sm:$0xf] %vm45_vm3, %v15443_v34  ;;  %61 = vst.msk [vmem:[#allocation2 + $0x38] sm:$0xf] %vm45_vm3, %v15443_v34  ;;  %v11293_v39 = vld [vmem:[%s15430_s0 + $0xe8] sm:$0xff]   ;;  %v11294_v40 = vld [vmem:[%s15430_s0 + $0xf0] sm:$0xff]  }
   0xe   :  { %60 = vst.msk [vmem:[#allocation2 + $0x34] sm:$0x1] %vm47_vm4, %v15443_v34  ;;  %62 = vst.msk [vmem:[#allocation2 + $0x3c] sm:$0x1] %vm47_vm4, %v15443_v34  ;;  %v11295_v41 = vld [vmem:[%s15430_s0 + $0xf8] sm:$0xff]  }
   0xf   :  { %10607 = vmatpush3.bf16.msra.mxu0 %v11262_v6  ;;  %63 = vst.msk [vmem:[#allocation2 + $0x40] sm:$0xf] %vm45_vm3, %v15443_v34  ;;  %65 = vst.msk [vmem:[#allocation2 + $0x48] sm:$0xf] %vm45_vm3, %v15443_v34  ;;  %vm1495_vm11 = vsmask.f32 7938 }
  0x10   :  { %10608 = vmatprep.subr.bf16.mxu0 %v494_v9  ;;  %64 = vst.msk [vmem:[#allocation2 + $0x44] sm:$0x1] %vm47_vm4, %v15443_v34  ;;  %66 = vst.msk [vmem:[#allocation2 + $0x4c] sm:$0x1] %vm47_vm4, %v15443_v34  ;;  %vm1501_vm12 = vsmask.f32 256 }
  0x11   :  { %67 = vst.msk [vmem:[#allocation2 + $0x50] sm:$0xf] %vm45_vm3, %v15443_v34  ;;  %69 = vst.msk [vmem:[#allocation2 + $0x58] sm:$0xf] %vm45_vm3, %v15443_v34  ;;  %vm2297_vm15 = vsmask.f32 3328 }
  0x12   :  { %68 = vst.msk [vmem:[#allocation2 + $0x54] sm:$0x1] %vm47_vm4, %v15443_v34  ;;  %70 = vst.msk [vmem:[#allocation2 + $0x5c] sm:$0x1] %vm47_vm4, %v15443_v34 }
  0x13   :  { %10609 = vmatpush3.bf16.msra.mxu0 %v494_v9  ;;  %71 = vst.msk [vmem:[#allocation2 + $0x60] sm:$0xf] %vm45_vm3, %v15443_v34  ;;  %73 = vst.msk [vmem:[#allocation2 + $0x68] sm:$0xf] %vm45_vm3, %v15443_v34 }
  0x14   :  { %72 = vst.msk [vmem:[#allocation2 + $0x64] sm:$0x1] %vm47_vm4, %v15443_v34  ;;  %74 = vst.msk [vmem:[#allocation2 + $0x6c] sm:$0x1] %vm47_vm4, %v15443_v34 }
  0x15   :  { %75 = vst.msk [vmem:[#allocation2 + $0x70] sm:$0xf] %vm45_vm3, %v15443_v34  ;;  %77 = vst.msk [vmem:[#allocation2 + $0x78] sm:$0xf] %vm45_vm3, %v15443_v34 }
  0x16   :  { %10611 = vmatmul.mubr.msk.bf16.vlgmr.msra.gmra.mrb[0].mxu0 %vm392_vm1, %v11265_v10  ;;  %76 = vst.msk [vmem:[#allocation2 + $0x74] sm:$0x1] %vm47_vm4, %v15443_v34  ;;  %78 = vst.msk [vmem:[#allocation2 + $0x7c] sm:$0x1] %vm47_vm4, %v15443_v34 }
  0x17   :  { %10614 = vmatprep.mubr.msk.bf16.mxu0 %vm392_vm1, %v11266_v11  ;;  %79 = vst.msk [vmem:[#allocation2 + $0x80] sm:$0xf] %vm45_vm3, %v15443_v34  ;;  %81 = vst.msk [vmem:[#allocation2 + $0x88] sm:$0xf] %vm45_vm3, %v15443_v34 }
  0x18   :  { %80 = vst.msk [vmem:[#allocation2 + $0x84] sm:$0x1] %vm47_vm4, %v15443_v34  ;;  %82 = vst.msk [vmem:[#allocation2 + $0x8c] sm:$0x1] %vm47_vm4, %v15443_v34 }
  0x19   :  { %83 = vst.msk [vmem:[#allocation2 + $0x90] sm:$0xf] %vm45_vm3, %v15443_v34  ;;  %85 = vst.msk [vmem:[#allocation2 + $0x98] sm:$0xf] %vm45_vm3, %v15443_v34 }
  0x1a   :  { %84 = vst.msk [vmem:[#allocation2 + $0x94] sm:$0x1] %vm47_vm4, %v15443_v34  ;;  %86 = vst.msk [vmem:[#allocation2 + $0x9c] sm:$0x1] %vm47_vm4, %v15443_v34 }
  0x1b   :  { %113 = vst [vmem:[#allocation4] sm:$0xf] %v15443_v34  ;;  %114 = vst [vmem:[#allocation4 + $0x4] sm:$0x1] %v15443_v34 }
  0x1c   :  { %115 = vst [vmem:[#allocation4 + $0x8] sm:$0xf] %v15443_v34  ;;  %116 = vst [vmem:[#allocation4 + $0xc] sm:$0x1] %v15443_v34 }
  0x1d   :  { %117 = vst [vmem:[#allocation4 + $0x10] sm:$0xf] %v15443_v34  ;;  %118 = vst [vmem:[#allocation4 + $0x14] sm:$0x1] %v15443_v34 }
  0x1e   :  { %10615 = vmatmul.mubr.msk.bf16.gmra.mrb[4].mxu0 %vm392_vm1, %v11267_v12  ;;  %119 = vst [vmem:[#allocation4 + $0x18] sm:$0xf] %v15443_v34  ;;  %120 = vst [vmem:[#allocation4 + $0x1c] sm:$0x1] %v15443_v34 }
  0x1f   :  { %10618 = vmatprep.mubr.msk.bf16.mxu0 %vm392_vm1, %v11268_v13  ;;  %121 = vst [vmem:[#allocation4 + $0x20] sm:$0xf] %v15443_v34  ;;  %122 = vst [vmem:[#allocation4 + $0x24] sm:$0x1] %v15443_v34 }
  0x20   :  { %123 = vst [vmem:[#allocation4 + $0x28] sm:$0xf] %v15443_v34  ;;  %124 = vst [vmem:[#allocation4 + $0x2c] sm:$0x1] %v15443_v34 }
  0x21   :  { %125 = vst [vmem:[#allocation4 + $0x30] sm:$0xf] %v15443_v34  ;;  %126 = vst [vmem:[#allocation4 + $0x34] sm:$0x1] %v15443_v34 }
  0x22   :  { %127 = vst [vmem:[#allocation4 + $0x38] sm:$0xf] %v15443_v34  ;;  %128 = vst [vmem:[#allocation4 + $0x3c] sm:$0x1] %v15443_v34 }
  0x23   :  { %vm12711_vm13 = vmand %vm45_vm3, %vm1495_vm11  ;;  %vm5253_vm11 = vsmask.f32 2306 }
  0x24   :  { %vm12729_vm14 = vmand %vm47_vm4, %vm1501_vm12  ;;  %vm87_vm4 = vcmask 519168  }
  0x26   :  { %10619 = vmatmul.mubr.msk.bf16.gmra.mrb[8].mxu0 %vm392_vm1, %v11269_v14 }
  0x27   :  { %10622 = vmatprep.mubr.msk.bf16.mxu0 %vm392_vm1, %v11270_v15 }
  0x2e   :  { %10623 = vmatmul.mubr.msk.bf16.gmra.mrb[12].mxu0 %vm392_vm1, %v11271_v16 }
  0x2f   :  { %10626 = vmatprep.mubr.msk.bf16.mxu0 %vm392_vm1, %v11272_v17 }
  0x36   :  { %10627 = vmatmul.mubr.msk.bf16.gmra.mrb[16].mxu0 %vm392_vm1, %v11273_v18 }
  0x37   :  { %10630 = vmatprep.mubr.msk.bf16.mxu0 %vm392_vm1, %v11274_v19 }
  0x3e   :  { %10631 = vmatmul.mubr.msk.bf16.gmra.mrb[20].mxu0 %vm392_vm1, %v11275_v20 }
  0x3f   :  { %10634 = vmatprep.mubr.msk.bf16.mxu0 %vm392_vm1, %v11276_v21 }
  0x46   :  { %10635 = vmatmul.mubr.msk.bf16.gmra.mrb[24].mxu0 %vm392_vm1, %v11277_v22 }
  0x47   :  { %10638 = vmatprep.mubr.msk.bf16.mxu0 %vm392_vm1, %v11278_v23 }
  0x4e   :  { %10639 = vmatmul.mubr.msk.bf16.gmra.mrb[28].mxu0 %vm392_vm1, %v11279_v24 }
  0x4f   :  { %10642 = vmatprep.mubr.msk.bf16.mxu0 %vm392_vm1, %v11280_v25 }
  0x56   :  { %10643 = vmatmul.mubr.msk.bf16.gmra.mrb[32].mxu0 %vm392_vm1, %v11281_v26 }
  0x57   :  { %10646 = vmatprep.mubr.msk.bf16.mxu0 %vm392_vm1, %v11282_v27 }
  0x5e   :  { %10647 = vmatmul.mubr.msk.bf16.gmra.mrb[36].mxu0 %vm392_vm1, %v11283_v28 }
  0x5f   :  { %10650 = vmatprep.mubr.msk.bf16.mxu0 %vm392_vm1, %v11284_v29 }
  0x66   :  { %10651 = vmatmul.mubr.msk.bf16.gmra.mrb[40].mxu0 %vm392_vm1, %v11285_v30 }
  0x67   :  { %10654 = vmatprep.mubr.msk.bf16.mxu0 %vm392_vm1, %v11286_v31 }
  0x6e   :  { %10655 = vmatmul.mubr.msk.bf16.gmra.mrb[44].mxu0 %vm392_vm1, %v11287_v32 }
  0x6f   :  { %10658 = vmatprep.mubr.msk.bf16.mxu0 %vm392_vm1, %v11288_v33 }
  0x76   :  { %10659 = vmatmul.mubr.msk.bf16.gmra.mrb[48].mxu0 %vm392_vm1, %v11289_v35 }
  0x77   :  { %10662 = vmatprep.mubr.msk.bf16.mxu0 %vm392_vm1, %v11290_v36 }
  0x7e   :  { %10663 = vmatmul.mubr.msk.bf16.gmra.mrb[52].mxu0 %vm392_vm1, %v11291_v37 }
  0x7f   :  { %10666 = vmatprep.mubr.msk.bf16.mxu0 %vm392_vm1, %v11292_v38 }
  0x86   :  { %10667 = vmatmul.mubr.msk.bf16.gmra.mrb[56].mxu0 %vm392_vm1, %v11293_v39 }
  0x87   :  { %10670 = vmatprep.mubr.msk.bf16.mxu0 %vm392_vm1, %v11294_v40 }
  0x8e   :  { %10671 = vmatmul.mubr.msk.bf16.gmra.mrb[60].mxu0 %vm392_vm1, %v11295_v41  ;;  %vm2298_vm1 = vsmask.f32 7440 }
  0x8f   :  { %vm13339_vm3 = vmor %vm2297_vm15, %vm2298_vm1 }
  0xe9   :  { %v11938_v42 = vpop.f32.mrb[0].mxu0 }
  0xea   :  { %15527 = vst [vmem:[#allocation5_spill] sm:$0xff] %v11938_v42  ;;  %v11940_v43 = vpop.f32.mrb[1].mxu0  ;;  %v789_v49 = vsel %vm785_vm5, %v11938_v42, 0.0 }
  0xeb   :  { %v11942_v44 = vpop.f32.mrb[2].mxu0  ;;  %v786_v46 = vsel %vm785_vm5, %v11940_v43, 0.0 }
  0xec   :  { %15528 = vst [vmem:[#allocation6_spill] sm:$0xff] %v11942_v44  ;;  %v11944_v45 = vpop.f32.mrb[3].mxu0  ;;  %v791_v51 = vsel %vm785_vm5, %v11942_v44, 0.0 }
  0xed   :  { %v787_v47 = vsel %vm785_vm5, %v11944_v45, 0.0 }
  0xee   :  { %v788_v48 = vadd.f32 %v787_v47, %v786_v46 }
  0xf0   :  { %v790_v50 = vadd.f32 %v789_v49, %v788_v48 }
  0xf1   :  { %v11954_v52 = vpop.f32.mrb[4].mxu0 }
  0xf2   :  { %v11956_v53 = vpop.f32.mrb[5].mxu0  ;;  %v792_v54 = vadd.f32 %v791_v51, %v790_v50  ;;  %v797_v61 = vsel %vm785_vm5, %v11954_v52, 0.0 }
  0xf3   :  { %15529 = vst [vmem:[#allocation7_spill] sm:$0xff] %v11956_v53  ;;  %v793_v55 = vsel %vm785_vm5, %v11956_v53, 0.0  ;;  %v11960_v56 = vpop.f32.mrb[6].mxu0 }
  0xf4   :  { %v794_v57 = vadd.f32 %v793_v55, %v792_v54  ;;  %v11962_v58 = vpop.f32.mrb[7].mxu0  ;;  %v799_v63 = vsel %vm785_vm5, %v11960_v56, 0.0 }
  0xf5   :  { %15530 = vst [vmem:[#allocation8_spill] sm:$0xff] %v11962_v58  ;;  %v795_v59 = vsel %vm785_vm5, %v11962_v58, 0.0 }
  0xf6   :  { %v796_v60 = vadd.f32 %v795_v59, %v794_v57 }
  0xf8   :  { %v798_v62 = vadd.f32 %v797_v61, %v796_v60 }
  0xf9   :  { %v11970_v0 = vpop.f32.mrb[8].mxu0 }
  0xfa   :  { %v11972_v1 = vpop.f32.mrb[9].mxu0  ;;  %v800_v2 = vadd.f32 %v799_v63, %v798_v62  ;;  %v805_v9 = vsel %vm785_vm5, %v11970_v0, 0.0 }
  0xfb   :  { %v801_v3 = vsel %vm785_vm5, %v11972_v1, 0.0  ;;  %v11976_v4 = vpop.f32.mrb[10].mxu0 }
  0xfc   :  { %v802_v5 = vadd.f32 %v801_v3, %v800_v2  ;;  %v11978_v6 = vpop.f32.mrb[11].mxu0  ;;  %v807_v11 = vsel %vm785_vm5, %v11976_v4, 0.0 }
  0xfd   :  { %v803_v7 = vsel %vm785_vm5, %v11978_v6, 0.0 }
  0xfe   :  { %v804_v8 = vadd.f32 %v803_v7, %v802_v5 }
 0x100   :  { %v806_v10 = vadd.f32 %v805_v9, %v804_v8 }
 0x101   :  { %v11986_v12 = vpop.f32.mrb[12].mxu0 }
 0x102   :  { %v11988_v13 = vpop.f32.mrb[13].mxu0  ;;  %v808_v14 = vadd.f32 %v807_v11, %v806_v10  ;;  %v813_v21 = vsel %vm785_vm5, %v11986_v12, 0.0 }
 0x103   :  { %v809_v15 = vsel %vm785_vm5, %v11988_v13, 0.0  ;;  %v11992_v16 = vpop.f32.mrb[14].mxu0 }
 0x104   :  { %v810_v17 = vadd.f32 %v809_v15, %v808_v14  ;;  %v11994_v18 = vpop.f32.mrb[15].mxu0  ;;  %v815_v23 = vsel %vm785_vm5, %v11992_v16, 0.0 }
 0x105   :  { %v811_v19 = vsel %vm785_vm5, %v11994_v18, 0.0 }
 0x106   :  { %v812_v20 = vadd.f32 %v811_v19, %v810_v17 }
 0x108   :  { %v814_v22 = vadd.f32 %v813_v21, %v812_v20 }
 0x109   :  { %v12002_v24 = vpop.f32.mrb[16].mxu0 }
 0x10a   :  { %v12004_v25 = vpop.f32.mrb[17].mxu0  ;;  %v816_v26 = vadd.f32 %v815_v23, %v814_v22  ;;  %v821_v33 = vsel %vm785_vm5, %v12002_v24, 0.0 }
 0x10b   :  { %v817_v27 = vsel %vm785_vm5, %v12004_v25, 0.0  ;;  %v12008_v28 = vpop.f32.mrb[18].mxu0 }
 0x10c   :  { %v818_v29 = vadd.f32 %v817_v27, %v816_v26  ;;  %v12010_v30 = vpop.f32.mrb[19].mxu0  ;;  %v823_v36 = vsel %vm785_vm5, %v12008_v28, 0.0 }
 0x10d   :  { %v819_v31 = vsel %vm785_vm5, %v12010_v30, 0.0 }
 0x10e   :  { %v820_v32 = vadd.f32 %v819_v31, %v818_v29 }
 0x110   :  { %v822_v35 = vadd.f32 %v821_v33, %v820_v32 }
 0x111   :  { %v12018_v37 = vpop.f32.mrb[20].mxu0 }
 0x112   :  { %v12020_v38 = vpop.f32.mrb[21].mxu0  ;;  %v824_v39 = vadd.f32 %v823_v36, %v822_v35  ;;  %v829_v50 = vsel %vm785_vm5, %v12018_v37, 0.0 }
 0x113   :  { %v825_v40 = vsel %vm785_vm5, %v12020_v38, 0.0  ;;  %v12024_v41 = vpop.f32.mrb[22].mxu0 }
 0x114   :  { %v826_v46 = vadd.f32 %v825_v40, %v824_v39  ;;  %v12026_v47 = vpop.f32.mrb[23].mxu0  ;;  %v831_v54 = vsel %vm785_vm5, %v12024_v41, 0.0 }
 0x115   :  { %v827_v48 = vsel %vm785_vm5, %v12026_v47, 0.0 }
 0x116   :  { %v828_v49 = vadd.f32 %v827_v48, %v826_v46 }
 0x118   :  { %v830_v51 = vadd.f32 %v829_v50, %v828_v49 }
 0x119   :  { %v12034_v55 = vpop.f32.mrb[24].mxu0 }
 0x11a   :  { %v12036_v57 = vpop.f32.mrb[25].mxu0  ;;  %v832_v59 = vadd.f32 %v831_v54, %v830_v51  ;;  %v837_v5 = vsel %vm785_vm5, %v12034_v55, 0.0 }
 0x11b   :  { %v833_v60 = vsel %vm785_vm5, %v12036_v57, 0.0  ;;  %v12040_v61 = vpop.f32.mrb[26].mxu0 }
 0x11c   :  { %v834_v62 = vadd.f32 %v833_v60, %v832_v59  ;;  %v12042_v63 = vpop.f32.mrb[27].mxu0  ;;  %v839_v8 = vsel %vm785_vm5, %v12040_v61, 0.0 }
 0x11d   :  { %v835_v2 = vsel %vm785_vm5, %v12042_v63, 0.0 }
 0x11e   :  { %v836_v3 = vadd.f32 %v835_v2, %v834_v62 }
 0x120   :  { %v838_v7 = vadd.f32 %v837_v5, %v836_v3 }
 0x121   :  { %v12050_v9 = vpop.f32.mrb[28].mxu0 }
 0x122   :  { %15531 = vst [vmem:[#allocation9_spill] sm:$0xff] %v12050_v9  ;;  %v12052_v10 = vpop.f32.mrb[29].mxu0  ;;  %v840_v11 = vadd.f32 %v839_v8, %v838_v7  ;;  %v845_v22 = vsel %vm785_vm5, %v12050_v9, 0.0 }
 0x123   :  { %v841_v14 = vsel %vm785_vm5, %v12052_v10, 0.0  ;;  %v12056_v15 = vpop.f32.mrb[30].mxu0 }
 0x124   :  { %15532 = vst [vmem:[#allocation10_spill] sm:$0xff] %v12056_v15  ;;  %v842_v17 = vadd.f32 %v841_v14, %v840_v11  ;;  %v12058_v19 = vpop.f32.mrb[31].mxu0  ;;  %v847_v26 = vsel %vm785_vm5, %v12056_v15, 0.0 }
 0x125   :  { %15533 = vst [vmem:[#allocation11_spill] sm:$0xff] %v12058_v19  ;;  %v843_v20 = vsel %vm785_vm5, %v12058_v19, 0.0 }
 0x126   :  { %v844_v21 = vadd.f32 %v843_v20, %v842_v17 }
 0x128   :  { %v846_v23 = vadd.f32 %v845_v22, %v844_v21 }
 0x129   :  { %v12066_v27 = vpop.f32.mrb[32].mxu0 }
 0x12a   :  { %15534 = vst [vmem:[#allocation12_spill] sm:$0xff] %v12066_v27  ;;  %v12068_v29 = vpop.f32.mrb[33].mxu0  ;;  %v848_v31 = vadd.f32 %v847_v26, %v846_v23  ;;  %v853_v46 = vsel %vm785_vm5, %v12066_v27, 0.0 }
 0x12b   :  { %15535 = vst [vmem:[#allocation13_spill] sm:$0xff] %v12068_v29  ;;  %v849_v32 = vsel %vm785_vm5, %v12068_v29, 0.0  ;;  %v12072_v33 = vpop.f32.mrb[34].mxu0 }
 0x12c   :  { %15536 = vst [vmem:[#allocation14_spill] sm:$0xff] %v12072_v33  ;;  %v850_v35 = vadd.f32 %v849_v32, %v848_v31  ;;  %v12074_v36 = vpop.f32.mrb[35].mxu0  ;;  %v855_v49 = vsel %vm785_vm5, %v12072_v33, 0.0 }
 0x12d   :  { %15537 = vst [vmem:[#allocation15_spill] sm:$0xff] %v12074_v36  ;;  %v851_v39 = vsel %vm785_vm5, %v12074_v36, 0.0 }
 0x12e   :  { %v852_v40 = vadd.f32 %v851_v39, %v850_v35 }
 0x130   :  { %v854_v48 = vadd.f32 %v853_v46, %v852_v40 }
 0x131   :  { %v12082_v50 = vpop.f32.mrb[36].mxu0 }
 0x132   :  { %15538 = vst [vmem:[#allocation16_spill] sm:$0xff] %v12082_v50  ;;  %v12084_v51 = vpop.f32.mrb[37].mxu0  ;;  %v856_v54 = vadd.f32 %v855_v49, %v854_v48  ;;  %v861_v7 = vsel %vm785_vm5, %v12082_v50, 0.0 }
 0x133   :  { %15539 = vst [vmem:[#allocation17_spill] sm:$0xff] %v12084_v51  ;;  %v857_v59 = vsel %vm785_vm5, %v12084_v51, 0.0  ;;  %v12088_v60 = vpop.f32.mrb[38].mxu0 }
 0x134   :  { %v858_v62 = vadd.f32 %v857_v59, %v856_v54  ;;  %v12090_v2 = vpop.f32.mrb[39].mxu0  ;;  %v863_v11 = vsel %vm785_vm5, %v12088_v60, 0.0 }
 0x135   :  { %15540 = vst [vmem:[#allocation18_spill] sm:$0xff] %v12090_v2  ;;  %v859_v3 = vsel %vm785_vm5, %v12090_v2, 0.0 }
 0x136   :  { %v860_v5 = vadd.f32 %v859_v3, %v858_v62 }
 0x138   :  { %v862_v8 = vadd.f32 %v861_v7, %v860_v5 }
 0x139   :  { %v12098_v14 = vpop.f32.mrb[40].mxu0 }
 0x13a   :  { %v12100_v17 = vpop.f32.mrb[41].mxu0  ;;  %v864_v20 = vadd.f32 %v863_v11, %v862_v8  ;;  %v869_v35 = vsel %vm785_vm5, %v12098_v14, 0.0 }
 0x13b   :  { %v865_v21 = vsel %vm785_vm5, %v12100_v17, 0.0  ;;  %v12104_v22 = vpop.f32.mrb[42].mxu0 }
 0x13c   :  { %v866_v23 = vadd.f32 %v865_v21, %v864_v20  ;;  %v12106_v26 = vpop.f32.mrb[43].mxu0  ;;  %v871_v40 = vsel %vm785_vm5, %v12104_v22, 0.0 }
 0x13d   :  { %v867_v31 = vsel %vm785_vm5, %v12106_v26, 0.0 }
 0x13e   :  { %v868_v32 = vadd.f32 %v867_v31, %v866_v23 }
 0x140   :  { %v870_v39 = vadd.f32 %v869_v35, %v868_v32 }
 0x141   :  { %v12114_v46 = vpop.f32.mrb[44].mxu0 }
 0x142   :  { %v12116_v48 = vpop.f32.mrb[45].mxu0  ;;  %v872_v49 = vadd.f32 %v871_v40, %v870_v39  ;;  %v877_v8 = vsel %vm785_vm5, %v12114_v46, 0.0 }
 0x143   :  { %v873_v54 = vsel %vm785_vm5, %v12116_v48, 0.0  ;;  %v12120_v59 = vpop.f32.mrb[46].mxu0 }
 0x144   :  { %15541 = vst [vmem:[#allocation19_spill] sm:$0xff] %v12120_v59  ;;  %v874_v62 = vadd.f32 %v873_v54, %v872_v49  ;;  %v12122_v3 = vpop.f32.mrb[47].mxu0  ;;  %v879_v20 = vsel %vm785_vm5, %v12120_v59, 0.0 }
 0x145   :  { %v875_v5 = vsel %vm785_vm5, %v12122_v3, 0.0 }
 0x146   :  { %v876_v7 = vadd.f32 %v875_v5, %v874_v62 }
 0x148   :  { %v878_v11 = vadd.f32 %v877_v8, %v876_v7 }
 0x149   :  { %v12130_v21 = vpop.f32.mrb[48].mxu0 }
 0x14a   :  { %15542 = vst [vmem:[#allocation20_spill] sm:$0xff] %v12130_v21  ;;  %v12132_v23 = vpop.f32.mrb[49].mxu0  ;;  %v880_v31 = vadd.f32 %v879_v20, %v878_v11  ;;  %v885_v62 = vsel %vm785_vm5, %v12130_v21, 0.0 }
 0x14b   :  { %15543 = vst [vmem:[#allocation21_spill] sm:$0xff] %v12132_v23  ;;  %v881_v32 = vsel %vm785_vm5, %v12132_v23, 0.0  ;;  %v12136_v35 = vpop.f32.mrb[50].mxu0 }
 0x14c   :  { %15544 = vst [vmem:[#allocation22_spill] sm:$0xff] %v12136_v35  ;;  %v882_v39 = vadd.f32 %v881_v32, %v880_v31  ;;  %v12138_v40 = vpop.f32.mrb[51].mxu0  ;;  %v887_v7 = vsel %vm785_vm5, %v12136_v35, 0.0 }
 0x14d   :  { %15545 = vst [vmem:[#allocation23_spill] sm:$0xff] %v12138_v40  ;;  %v883_v49 = vsel %vm785_vm5, %v12138_v40, 0.0 }
 0x14e   :  { %v884_v54 = vadd.f32 %v883_v49, %v882_v39 }
 0x150   :  { %v886_v5 = vadd.f32 %v885_v62, %v884_v54 }
 0x151   :  { %v12146_v8 = vpop.f32.mrb[52].mxu0 }
 0x152   :  { %15546 = vst [vmem:[#allocation24_spill] sm:$0xff] %v12146_v8  ;;  %v12148_v11 = vpop.f32.mrb[53].mxu0  ;;  %v888_v20 = vadd.f32 %v887_v7, %v886_v5  ;;  %v893_v54 = vsel %vm785_vm5, %v12146_v8, 0.0 }
 0x153   :  { %15547 = vst [vmem:[#allocation25_spill] sm:$0xff] %v12148_v11  ;;  %v889_v31 = vsel %vm785_vm5, %v12148_v11, 0.0  ;;  %v12152_v32 = vpop.f32.mrb[54].mxu0 }
 0x154   :  { %15548 = vst [vmem:[#allocation26_spill] sm:$0xff] %v12152_v32  ;;  %v890_v34 = vadd.f32 %v889_v31, %v888_v20  ;;  %v12154_v40 = vpop.f32.mrb[55].mxu0  ;;  %v895_v35 = vsel %vm785_vm5, %v12152_v32, 0.0 }
 0x155   :  { %15549 = vst [vmem:[#allocation27_spill] sm:$0xff] %v12154_v40  ;;  %v891_v39 = vsel %vm785_vm5, %v12154_v40, 0.0 }
 0x156   :  { %v892_v49 = vadd.f32 %v891_v39, %v890_v34 }
 0x158   :  { %v894_v62 = vadd.f32 %v893_v54, %v892_v49 }
 0x159   :  { %v12162_v5 = vpop.f32.mrb[56].mxu0 }
 0x15a   :  { %15550 = vst [vmem:[#allocation28_spill] sm:$0xff] %v12162_v5  ;;  %v12164_v7 = vpop.f32.mrb[57].mxu0  ;;  %v896_v11 = vadd.f32 %v895_v35, %v894_v62  ;;  %v901_v49 = vsel %vm785_vm5, %v12162_v5, 0.0 }
 0x15b   :  { %15551 = vst [vmem:[#allocation29_spill] sm:$0xff] %v12164_v7  ;;  %v897_v20 = vsel %vm785_vm5, %v12164_v7, 0.0  ;;  %v12168_v31 = vpop.f32.mrb[58].mxu0 }
 0x15c   :  { %15552 = vst [vmem:[#allocation30_spill] sm:$0xff] %v12168_v31  ;;  %v898_v21 = vadd.f32 %v897_v20, %v896_v11  ;;  %v12170_v40 = vpop.f32.mrb[59].mxu0  ;;  %v903_v32 = vsel %vm785_vm5, %v12168_v31, 0.0 }
 0x15d   :  { %15553 = vst [vmem:[#allocation31_spill] sm:$0xff] %v12170_v40  ;;  %v899_v34 = vsel %vm785_vm5, %v12170_v40, 0.0 }
 0x15e   :  { %v900_v39 = vadd.f32 %v899_v34, %v898_v21 }
 0x160   :  { %v902_v54 = vadd.f32 %v901_v49, %v900_v39 }
 0x161   :  { %v12178_v35 = vpop.f32.mrb[60].mxu0 }
 0x162   :  { %v12180_v62 = vpop.f32.mrb[61].mxu0  ;;  %v904_v7 = vadd.f32 %v903_v32, %v902_v54  ;;  %v909_v39 = vsel %vm785_vm5, %v12178_v35, 0.0 }
 0x163   :  { %15554 = vst [vmem:[#allocation32_spill] sm:$0xff] %v12180_v62  ;;  %v905_v11 = vsel %vm785_vm5, %v12180_v62, 0.0  ;;  %v12184_v20 = vpop.f32.mrb[62].mxu0 }
 0x164   :  { %v906_v8 = vadd.f32 %v905_v11, %v904_v7  ;;  %v12186_v40 = vpop.f32.mrb[63].mxu0  ;;  %v911_v31 = vsel %vm785_vm5, %v12184_v20, 0.0 }
 0x165   :  { %15555 = vst [vmem:[#allocation33_spill] sm:$0xff] %v12186_v40  ;;  %v907_v21 = vsel %vm785_vm5, %v12186_v40, 0.0 }
 0x166   :  { %v908_v34 = vadd.f32 %v907_v21, %v906_v8 }
 0x168   :  { %v910_v49 = vadd.f32 %v909_v39, %v908_v34 }
 0x16a   :  { %v912_v32 = vadd.f32 %v911_v31, %v910_v49 }
 0x16c   :  { %v913_v54 = vrot.slane %v912_v32, 4 }
 0x16e   :  { %v914_v5 = vadd.f32 %v913_v54, %v912_v32 }
 0x170   :  { %v915_v62 = vrot.slane %v914_v5, 2 }
 0x172   :  { %v916_v23 = vadd.f32 %v915_v62, %v914_v5 }
 0x174   :  { %v917_v59 = vrot.slane %v916_v23, 1 }
 0x176   :  { %v918_v7 = vadd.f32 %v917_v59, %v916_v23 }
 0x178   :  { %v12194_v11 = vmul.f32 0.001953125, %v918_v7 }
 0x17a   :  { %v921_v40 = vsub.f32 %v11940_v43, %v12194_v11  ;;  %v922_v8 = vsub.f32 %v11944_v45, %v12194_v11  ;;  %v923_v21 = vsub.f32 %v11938_v42, %v12194_v11  ;;  %v924_v31 = vsub.f32 %v11942_v44, %v12194_v11 }
 0x17b   :  { %v925_v5 = vsub.f32 %v11956_v53, %v12194_v11  ;;  %v926_v23 = vsub.f32 %v11962_v58, %v12194_v11  ;;  %v927_v7 = vsub.f32 %v11954_v52, %v12194_v11  ;;  %v928_v53 = vsub.f32 %v11960_v56, %v12194_v11 }
 0x17c   :  { %v985_v34 = vmul.f32 %v921_v40, %v921_v40  ;;  %v986_v39 = vmul.f32 %v922_v8, %v922_v8  ;;  %v987_v59 = vmul.f32 %v923_v21, %v923_v21  ;;  %v988_v62 = vmul.f32 %v924_v31, %v924_v31 }
 0x17d   :  { %v989_v42 = vmul.f32 %v925_v5, %v925_v5  ;;  %v990_v21 = vmul.f32 %v926_v23, %v926_v23  ;;  %v929_v31 = vsub.f32 %v11972_v1, %v12194_v11  ;;  %v930_v5 = vsub.f32 %v11978_v6, %v12194_v11 }
 0x17e   :  { %v1049_v49 = vsel %vm785_vm5, %v985_v34, 0.0  ;;  %v1050_v32 = vsel %vm785_vm5, %v986_v39, 0.0  ;;  %v1052_v40 = vsel %vm785_vm5, %v987_v59, 0.0  ;;  %v1054_v44 = vsel %vm785_vm5, %v988_v62, 0.0 }
 0x17f   :  { %v1051_v54 = vadd.f32 %v1050_v32, %v1049_v49  ;;  %v991_v34 = vmul.f32 %v927_v7, %v927_v7  ;;  %v1056_v39 = vsel %vm785_vm5, %v989_v42, 0.0  ;;  %v992_v32 = vmul.f32 %v928_v53, %v928_v53 }
 0x180   :  { %v1058_v59 = vsel %vm785_vm5, %v990_v21, 0.0  ;;  %v931_v23 = vsub.f32 %v11970_v0, %v12194_v11  ;;  %v932_v7 = vsub.f32 %v11976_v4, %v12194_v11  ;;  %v933_v53 = vsub.f32 %v11988_v13, %v12194_v11 }
 0x181   :  { %v1053_v8 = vadd.f32 %v1052_v40, %v1051_v54  ;;  %v993_v40 = vmul.f32 %v929_v31, %v929_v31  ;;  %v1062_v42 = vsel %vm785_vm5, %v992_v32, 0.0  ;;  %v934_v31 = vsub.f32 %v11994_v18, %v12194_v11 }
 0x183   :  { %v1055_v58 = vadd.f32 %v1054_v44, %v1053_v8  ;;  %v1060_v44 = vsel %vm785_vm5, %v991_v34, 0.0  ;;  %v994_v8 = vmul.f32 %v930_v5, %v930_v5  ;;  %v1064_v21 = vsel %vm785_vm5, %v993_v40, 0.0 }
 0x184   :  { %v935_v5 = vsub.f32 %v11986_v12, %v12194_v11 }
 0x185   :  { %v1057_v49 = vadd.f32 %v1056_v39, %v1055_v58  ;;  %v995_v39 = vmul.f32 %v931_v23, %v931_v23  ;;  %v1066_v34 = vsel %vm785_vm5, %v994_v8, 0.0  ;;  %v936_v23 = vsub.f32 %v11992_v16, %v12194_v11 }
 0x187   :  { %v1059_v54 = vadd.f32 %v1058_v59, %v1057_v49  ;;  %v996_v59 = vmul.f32 %v932_v7, %v932_v7  ;;  %v1068_v32 = vsel %vm785_vm5, %v995_v39, 0.0  ;;  %v937_v7 = vsub.f32 %v12004_v25, %v12194_v11 }
 0x189   :  { %v1061_v62 = vadd.f32 %v1060_v44, %v1059_v54  ;;  %v997_v44 = vmul.f32 %v933_v53, %v933_v53  ;;  %v1070_v40 = vsel %vm785_vm5, %v996_v59, 0.0  ;;  %v938_v53 = vsub.f32 %v12010_v30, %v12194_v11 }
 0x18b   :  { %v1063_v58 = vadd.f32 %v1062_v42, %v1061_v62  ;;  %v998_v42 = vmul.f32 %v934_v31, %v934_v31  ;;  %v1072_v8 = vsel %vm785_vm5, %v997_v44, 0.0  ;;  %v939_v31 = vsub.f32 %v12002_v24, %v12194_v11 }
 0x18d   :  { %v1065_v49 = vadd.f32 %v1064_v21, %v1063_v58  ;;  %v999_v21 = vmul.f32 %v935_v5, %v935_v5  ;;  %v1074_v39 = vsel %vm785_vm5, %v998_v42, 0.0  ;;  %v940_v5 = vsub.f32 %v12008_v28, %v12194_v11 }
 0x18f   :  { %v1067_v54 = vadd.f32 %v1066_v34, %v1065_v49  ;;  %v1000_v34 = vmul.f32 %v936_v23, %v936_v23  ;;  %v1076_v59 = vsel %vm785_vm5, %v999_v21, 0.0  ;;  %v941_v23 = vsub.f32 %v12020_v38, %v12194_v11 }
 0x191   :  { %v1069_v62 = vadd.f32 %v1068_v32, %v1067_v54  ;;  %v1001_v32 = vmul.f32 %v937_v7, %v937_v7  ;;  %v1078_v44 = vsel %vm785_vm5, %v1000_v34, 0.0  ;;  %v942_v7 = vsub.f32 %v12026_v47, %v12194_v11 }
 0x193   :  { %v1071_v58 = vadd.f32 %v1070_v40, %v1069_v62  ;;  %v1002_v40 = vmul.f32 %v938_v53, %v938_v53  ;;  %v1080_v42 = vsel %vm785_vm5, %v1001_v32, 0.0  ;;  %v943_v53 = vsub.f32 %v12018_v37, %v12194_v11 }
 0x195   :  { %v1073_v49 = vadd.f32 %v1072_v8, %v1071_v58  ;;  %v1003_v8 = vmul.f32 %v939_v31, %v939_v31  ;;  %v1082_v21 = vsel %vm785_vm5, %v1002_v40, 0.0  ;;  %v944_v31 = vsub.f32 %v12024_v41, %v12194_v11 }
 0x197   :  { %v1075_v54 = vadd.f32 %v1074_v39, %v1073_v49  ;;  %v1004_v39 = vmul.f32 %v940_v5, %v940_v5  ;;  %v1084_v34 = vsel %vm785_vm5, %v1003_v8, 0.0  ;;  %v945_v5 = vsub.f32 %v12036_v57, %v12194_v11 }
 0x199   :  { %v1077_v62 = vadd.f32 %v1076_v59, %v1075_v54  ;;  %v1005_v59 = vmul.f32 %v941_v23, %v941_v23  ;;  %v1086_v32 = vsel %vm785_vm5, %v1004_v39, 0.0  ;;  %v946_v23 = vsub.f32 %v12042_v63, %v12194_v11 }
 0x19b   :  { %v1079_v58 = vadd.f32 %v1078_v44, %v1077_v62  ;;  %v1006_v44 = vmul.f32 %v942_v7, %v942_v7  ;;  %v1088_v40 = vsel %vm785_vm5, %v1005_v59, 0.0  ;;  %v947_v7 = vsub.f32 %v12034_v55, %v12194_v11 }
 0x19d   :  { %v1081_v49 = vadd.f32 %v1080_v42, %v1079_v58  ;;  %v1007_v42 = vmul.f32 %v943_v53, %v943_v53  ;;  %v1090_v8 = vsel %vm785_vm5, %v1006_v44, 0.0  ;;  %v948_v53 = vsub.f32 %v12040_v61, %v12194_v11 }
 0x19f   :  { %v1083_v54 = vadd.f32 %v1082_v21, %v1081_v49  ;;  %v1008_v21 = vmul.f32 %v944_v31, %v944_v31  ;;  %v1092_v39 = vsel %vm785_vm5, %v1007_v42, 0.0  ;;  %v949_v31 = vsub.f32 %v12052_v10, %v12194_v11 }
 0x1a1   :  { %v1085_v62 = vadd.f32 %v1084_v34, %v1083_v54  ;;  %v1009_v34 = vmul.f32 %v945_v5, %v945_v5  ;;  %v1094_v59 = vsel %vm785_vm5, %v1008_v21, 0.0  ;;  %v950_v5 = vsub.f32 %v12058_v19, %v12194_v11 }
 0x1a3   :  { %v1087_v58 = vadd.f32 %v1086_v32, %v1085_v62  ;;  %v1010_v32 = vmul.f32 %v946_v23, %v946_v23  ;;  %v1096_v44 = vsel %vm785_vm5, %v1009_v34, 0.0  ;;  %v951_v23 = vsub.f32 %v12050_v9, %v12194_v11 }
 0x1a4   :  { %v953_v34 = vsub.f32 %v12068_v29, %v12194_v11 }
 0x1a5   :  { %v1089_v49 = vadd.f32 %v1088_v40, %v1087_v58  ;;  %v1011_v40 = vmul.f32 %v947_v7, %v947_v7  ;;  %v1098_v42 = vsel %vm785_vm5, %v1010_v32, 0.0 }
 0x1a7   :  { %v1091_v54 = vadd.f32 %v1090_v8, %v1089_v49  ;;  %v1012_v8 = vmul.f32 %v948_v53, %v948_v53  ;;  %v1100_v21 = vsel %vm785_vm5, %v1011_v40, 0.0  ;;  %v1014_v53 = vmul.f32 %v950_v5, %v950_v5 }
 0x1a8   :  { %v957_v40 = vsub.f32 %v12084_v51, %v12194_v11 }
 0x1a9   :  { %v1093_v62 = vadd.f32 %v1092_v39, %v1091_v54  ;;  %v1013_v39 = vmul.f32 %v949_v31, %v949_v31  ;;  %v1102_v32 = vsel %vm785_vm5, %v1012_v8, 0.0  ;;  %v956_v31 = vsub.f32 %v12072_v33, %v12194_v11 }
 0x1aa   :  { %v1021_v51 = vmul.f32 %v957_v40, %v957_v40 }
 0x1ab   :  { %v1095_v58 = vadd.f32 %v1094_v59, %v1093_v62  ;;  %v952_v62 = vsub.f32 %v12056_v15, %v12194_v11  ;;  %v954_v59 = vsub.f32 %v12074_v36, %v12194_v11  ;;  %v1104_v5 = vsel %vm785_vm5, %v1013_v39, 0.0 }
 0x1ac   :  { %v1017_v36 = vmul.f32 %v953_v34, %v953_v34  ;;  %v1020_v15 = vmul.f32 %v956_v31, %v956_v31 }
 0x1ad   :  { %v1097_v49 = vadd.f32 %v1096_v44, %v1095_v58  ;;  %v955_v58 = vsub.f32 %v12066_v27, %v12194_v11  ;;  %v1106_v27 = vsel %vm785_vm5, %v1014_v53, 0.0  ;;  %v1018_v29 = vmul.f32 %v954_v59, %v954_v59 }
 0x1ae   :  { %v1112_v39 = vsel %vm785_vm5, %v1017_v36, 0.0  ;;  %v1118_v59 = vsel %vm785_vm5, %v1020_v15, 0.0  ;;  %v1120_v53 = vsel %vm785_vm5, %v1021_v51, 0.0  ;;  %v962_v15 = vsub.f32 %v12106_v26, %v12194_v11 }
 0x1af   :  { %v1099_v54 = vadd.f32 %v1098_v42, %v1097_v49  ;;  %v958_v49 = vsub.f32 %v12090_v2, %v12194_v11  ;;  %v959_v42 = vsub.f32 %v12082_v50, %v12194_v11  ;;  %v1019_v33 = vmul.f32 %v955_v58, %v955_v58 }
 0x1b1   :  { %v1101_v7 = vadd.f32 %v1100_v21, %v1099_v54  ;;  %v1015_v54 = vmul.f32 %v951_v23, %v951_v23  ;;  %v1016_v21 = vmul.f32 %v952_v62, %v952_v62  ;;  %v1114_v62 = vsel %vm785_vm5, %v1018_v29, 0.0 }
 0x1b2   :  { %v1116_v34 = vsel %vm785_vm5, %v1019_v33, 0.0  ;;  %v961_v29 = vsub.f32 %v12100_v17, %v12194_v11 }
 0x1b3   :  { %v1103_v44 = vadd.f32 %v1102_v32, %v1101_v7  ;;  %v1022_v7 = vmul.f32 %v958_v49, %v958_v49  ;;  %v1023_v32 = vmul.f32 %v959_v42, %v959_v42  ;;  %v1108_v2 = vsel %vm785_vm5, %v1015_v54, 0.0 }
 0x1b4   :  { %v1110_v50 = vsel %vm785_vm5, %v1016_v21, 0.0  ;;  %v964_v42 = vsub.f32 %v12104_v22, %v12194_v11  ;;  %v1026_v54 = vmul.f32 %v962_v15, %v962_v15  ;;  %v965_v21 = vsub.f32 %v12116_v48, %v12194_v11 }
 0x1b5   :  { %v1105_v8 = vadd.f32 %v1104_v5, %v1103_v44  ;;  %v1124_v58 = vsel %vm785_vm5, %v1023_v32, 0.0  ;;  %v1025_v44 = vmul.f32 %v961_v29, %v961_v29 }
 0x1b7   :  { %v1107_v9 = vadd.f32 %v1106_v27, %v1105_v8  ;;  %v1122_v27 = vsel %vm785_vm5, %v1022_v7, 0.0  ;;  %v1128_v32 = vsel %vm785_vm5, %v1025_v44, 0.0  ;;  %v15558_v44 = vld [vmem:[#allocation23_spill] sm:$0xff] }
 0x1b9   :  { %v1109_v19 = vadd.f32 %v1108_v2, %v1107_v9  ;;  %v963_v2 = vsub.f32 %v12098_v14, %v12194_v11 }
 0x1bb   :  { %v1111_v23 = vadd.f32 %v1110_v50, %v1109_v19  ;;  %v960_v19 = vsub.f32 %v12088_v60, %v12194_v11  ;;  %v1027_v7 = vmul.f32 %v963_v2, %v963_v2 }
 0x1bd   :  { %v1113_v31 = vadd.f32 %v1112_v39, %v1111_v23  ;;  %v1024_v33 = vmul.f32 %v960_v19, %v960_v19  ;;  %v966_v39 = vsub.f32 %v12122_v3, %v12194_v11 }
 0x1bf   :  { %v1115_v40 = vadd.f32 %v1114_v62, %v1113_v31  ;;  %v1126_v5 = vsel %vm785_vm5, %v1024_v33, 0.0  ;;  %v1028_v62 = vmul.f32 %v964_v42, %v964_v42  ;;  %v1030_v19 = vmul.f32 %v966_v39, %v966_v39  ;;  %v15560_v39 = vld [vmem:[#allocation22_spill] sm:$0xff] }
 0x1c1   :  { %v1117_v9 = vadd.f32 %v1116_v34, %v1115_v40  ;;  %v1130_v34 = vsel %vm785_vm5, %v1026_v54, 0.0  ;;  %v15556_v40 = vld [vmem:[#allocation19_spill] sm:$0xff]  ;;  %v1138_v54 = vsel %vm785_vm5, %v1030_v19, 0.0 }
 0x1c3   :  { %v1119_v50 = vadd.f32 %v1118_v59, %v1117_v9  ;;  %v968_v9 = vsub.f32 %v15556_v40, %v12194_v11 }
 0x1c5   :  { %v1121_v36 = vadd.f32 %v1120_v53, %v1119_v50  ;;  %v967_v53 = vsub.f32 %v12114_v46, %v12194_v11  ;;  %v1134_v50 = vsel %vm785_vm5, %v1028_v62, 0.0  ;;  %v1032_v42 = vmul.f32 %v968_v9, %v968_v9 }
 0x1c6   :  { %v972_v62 = vsub.f32 %v15560_v39, %v12194_v11 }
 0x1c7   :  { %v1123_v51 = vadd.f32 %v1122_v27, %v1121_v36  ;;  %v1029_v27 = vmul.f32 %v965_v21, %v965_v21  ;;  %v15557_v36 = vld [vmem:[#allocation21_spill] sm:$0xff]  ;;  %v1031_v33 = vmul.f32 %v967_v53, %v967_v53 }
 0x1c8   :  { %v969_v15 = vsub.f32 %v15557_v36, %v12194_v11 }
 0x1c9   :  { %v1125_v49 = vadd.f32 %v1124_v58, %v1123_v51  ;;  %v1132_v58 = vsel %vm785_vm5, %v1027_v7, 0.0  ;;  %v1136_v51 = vsel %vm785_vm5, %v1029_v27, 0.0  ;;  %v15561_v27 = vld [vmem:[#allocation25_spill] sm:$0xff] }
 0x1ca   :  { %v1033_v7 = vmul.f32 %v969_v15, %v969_v15  ;;  %v1036_v15 = vmul.f32 %v972_v62, %v972_v62 }
 0x1cb   :  { %v1127_v8 = vadd.f32 %v1126_v5, %v1125_v49  ;;  %v970_v49 = vsub.f32 %v15558_v44, %v12194_v11 }
 0x1cc   :  { %v1144_v9 = vsel %vm785_vm5, %v1033_v7, 0.0  ;;  %v1150_v7 = vsel %vm785_vm5, %v1036_v15, 0.0 }
 0x1cd   :  { %v1129_v23 = vadd.f32 %v1128_v32, %v1127_v8  ;;  %v15559_v8 = vld [vmem:[#allocation20_spill] sm:$0xff]  ;;  %v1140_v32 = vsel %vm785_vm5, %v1031_v33, 0.0 }
 0x1ce   :  { %v971_v21 = vsub.f32 %v15559_v8, %v12194_v11 }
 0x1cf   :  { %v1131_v59 = vadd.f32 %v1130_v34, %v1129_v23  ;;  %v1034_v34 = vmul.f32 %v970_v49, %v970_v49 }
 0x1d1   :  { %v1133_v31 = vadd.f32 %v1132_v58, %v1131_v59  ;;  %v1142_v59 = vsel %vm785_vm5, %v1032_v42, 0.0  ;;  %v973_v58 = vsub.f32 %v15561_v27, %v12194_v11  ;;  %v1146_v33 = vsel %vm785_vm5, %v1034_v34, 0.0 }
 0x1d3   :  { %v1135_v29 = vadd.f32 %v1134_v50, %v1133_v31  ;;  %v1035_v31 = vmul.f32 %v971_v21, %v971_v21  ;;  %v15562_v50 = vld [vmem:[#allocation27_spill] sm:$0xff] }
 0x1d5   :  { %v1137_v2 = vadd.f32 %v1136_v51, %v1135_v29  ;;  %v974_v29 = vsub.f32 %v15562_v50, %v12194_v11  ;;  %v1148_v42 = vsel %vm785_vm5, %v1035_v31, 0.0 }
 0x1d7   :  { %v1139_v5 = vadd.f32 %v1138_v54, %v1137_v2  ;;  %v15563_v2 = vld [vmem:[#allocation24_spill] sm:$0xff]  ;;  %v1037_v54 = vmul.f32 %v973_v58, %v973_v58 }
 0x1d8   :  { %v975_v49 = vsub.f32 %v15563_v2, %v12194_v11 }
 0x1d9   :  { %v1141_v23 = vadd.f32 %v1140_v32, %v1139_v5  ;;  %v15564_v32 = vld [vmem:[#allocation26_spill] sm:$0xff]  ;;  %v1152_v34 = vsel %vm785_vm5, %v1037_v54, 0.0 }
 0x1da   :  { %v976_v21 = vsub.f32 %v15564_v32, %v12194_v11 }
 0x1db   :  { %v1143_v53 = vadd.f32 %v1142_v59, %v1141_v23  ;;  %v1038_v23 = vmul.f32 %v974_v29, %v974_v29 }
 0x1dc   :  { %v1040_v2 = vmul.f32 %v976_v21, %v976_v21 }
 0x1dd   :  { %v1145_v19 = vadd.f32 %v1144_v9, %v1143_v53  ;;  %v15565_v53 = vld [vmem:[#allocation29_spill] sm:$0xff]  ;;  %v1039_v9 = vmul.f32 %v975_v49, %v975_v49  ;;  %v1154_v31 = vsel %vm785_vm5, %v1038_v23, 0.0 }
 0x1de   :  { %v977_v62 = vsub.f32 %v15565_v53, %v12194_v11  ;;  %v1158_v54 = vsel %vm785_vm5, %v1040_v2, 0.0 }
 0x1df   :  { %v1147_v51 = vadd.f32 %v1146_v33, %v1145_v19  ;;  %v15566_v33 = vld [vmem:[#allocation31_spill] sm:$0xff]  ;;  %v1156_v15 = vsel %vm785_vm5, %v1039_v9, 0.0 }
 0x1e0   :  { %v978_v58 = vsub.f32 %v15566_v33, %v12194_v11  ;;  %v1041_v32 = vmul.f32 %v977_v62, %v977_v62 }
 0x1e1   :  { %v1149_v5 = vadd.f32 %v1148_v42, %v1147_v51  ;;  %v15567_v42 = vld [vmem:[#allocation28_spill] sm:$0xff] }
 0x1e2   :  { %v979_v29 = vsub.f32 %v15567_v42, %v12194_v11  ;;  %v1042_v53 = vmul.f32 %v978_v58, %v978_v58  ;;  %v1160_v23 = vsel %vm785_vm5, %v1041_v32, 0.0  ;;  %v983_v58 = vsub.f32 %v12178_v35, %v12194_v11 }
 0x1e3   :  { %v1151_v59 = vadd.f32 %v1150_v7, %v1149_v5  ;;  %v15568_v7 = vld [vmem:[#allocation30_spill] sm:$0xff] }
 0x1e4   :  { %v980_v49 = vsub.f32 %v15568_v7, %v12194_v11  ;;  %v1043_v33 = vmul.f32 %v979_v29, %v979_v29  ;;  %v1162_v9 = vsel %vm785_vm5, %v1042_v53, 0.0  ;;  %v984_v29 = vsub.f32 %v12184_v20, %v12194_v11 }
 0x1e5   :  { %v1153_v19 = vadd.f32 %v1152_v34, %v1151_v59  ;;  %v15569_v34 = vld [vmem:[#allocation32_spill] sm:$0xff] }
 0x1e6   :  { %v981_v21 = vsub.f32 %v15569_v34, %v12194_v11  ;;  %v1044_v42 = vmul.f32 %v980_v49, %v980_v49  ;;  %v1164_v2 = vsel %vm785_vm5, %v1043_v33, 0.0  ;;  %v1048_v53 = vmul.f32 %v984_v29, %v984_v29 }
 0x1e7   :  { %v1155_v51 = vadd.f32 %v1154_v31, %v1153_v19  ;;  %v15570_v31 = vld [vmem:[#allocation33_spill] sm:$0xff] }
 0x1e8   :  { %v982_v62 = vsub.f32 %v15570_v31, %v12194_v11  ;;  %v1166_v32 = vsel %vm785_vm5, %v1044_v42, 0.0  ;;  %v1174_v33 = vsel %vm785_vm5, %v1048_v53, 0.0 }
 0x1e9   :  { %v1157_v5 = vadd.f32 %v1156_v15, %v1155_v51  ;;  %v1045_v15 = vmul.f32 %v981_v21, %v981_v21 }
 0x1eb   :  { %v1159_v59 = vadd.f32 %v1158_v54, %v1157_v5  ;;  %v1046_v54 = vmul.f32 %v982_v62, %v982_v62  ;;  %v1168_v49 = vsel %vm785_vm5, %v1045_v15, 0.0  ;;  %v1191_v15 = vlaneseq }
 0x1ed   :  { %v1161_v19 = vadd.f32 %v1160_v23, %v1159_v59  ;;  %v1047_v23 = vmul.f32 %v983_v58, %v983_v58  ;;  %v12388_v29 = vshrl.u32 %v1191_v15, 7 }
 0x1ef   :  { %v1163_v51 = vadd.f32 %v1162_v9, %v1161_v19  ;;  %v1170_v19 = vsel %vm785_vm5, %v1046_v54, 0.0  ;;  %v1172_v21 = vsel %vm785_vm5, %v1047_v23, 0.0  ;;  %15571 = vst [vmem:[#allocation19_spill] sm:$0xff] %v12388_v29  ;;  %v12394_v54 = vsub.s32 0, %v12388_v29  ;;  %v15587_v29 = vld [vmem:[#allocation17_spill] sm:$0xff] }
 0x1f1   :  { %v1165_v5 = vadd.f32 %v1164_v2, %v1163_v51  ;;  %15572 = vst [vmem:[#allocation21_spill] sm:$0xff] %v12394_v54 }
 0x1f3   :  { %v1167_v59 = vadd.f32 %v1166_v32, %v1165_v5 }
 0x1f5   :  { %v1169_v7 = vadd.f32 %v1168_v49, %v1167_v59 }
 0x1f7   :  { %v1171_v9 = vadd.f32 %v1170_v19, %v1169_v7  ;;  %v1183_v7 = vld [vmem:[%s15432_s5] sm:$0x1] }
 0x1f9   :  { %v1173_v50 = vadd.f32 %v1172_v21, %v1171_v9 }
 0x1fb   :  { %v1175_v51 = vadd.f32 %v1174_v33, %v1173_v50 }
 0x1fd   :  { %v1176_v2 = vrot.slane %v1175_v51, 4 }
 0x1ff   :  { %v1177_v27 = vadd.f32 %v1176_v2, %v1175_v51  ;;  %v15573_v51 = vld [vmem:[#allocation5_spill] sm:$0xff] }
 0x201   :  { %v1178_v62 = vrot.slane %v1177_v27, 2 }
 0x203   :  { %v1179_v39 = vadd.f32 %v1178_v62, %v1177_v27  ;;  %v1187_v27 = vld [vmem:[%s15433_s6] sm:$0x1] }
 0x205   :  { %v1180_v42 = vrot.slane %v1179_v39, 1 }
 0x207   :  { %v1181_v5 = vadd.f32 %v1180_v42, %v1179_v39 }
 0x209   :  { %v1182_v58 = vmul.f32 0.001953125, %v1181_v5 }
 0x20b   :  { %v1184_v32 = vadd.f32 1e-05, %v1182_v58 }
 0x20d   :  { %11607 = vrsqrt.f32 %v1184_v32 }
 0x217   :  { %v11608_v50 = vpop.eup %11607 }
 0x218   :  { %v1186_v59 = vmul.f32 %v11608_v50, %v1183_v7 }
 0x21a   :  { %v1188_v39 = vmul.f32 %v1186_v59, %v12194_v11  ;;  %v12401_v23 = vrot.slane %v1186_v59, %v12394_v54 }
 0x21c   :  { %v1189_v49 = vsub.f32 %v1187_v27, %v1188_v39  ;;  %v1256_v53 = vmul.f32 %v12401_v23, %v15569_v34  ;;  %v1257_v19 = vmul.f32 %v12401_v23, %v15570_v31  ;;  %v1258_v9 = vmul.f32 %v12178_v35, %v12401_v23  ;;  %v15574_v35 = vld [vmem:[#allocation6_spill] sm:$0xff] }
 0x21d   :  { %v1259_v21 = vmul.f32 %v12184_v20, %v12401_v23  ;;  %v12413_v33 = vmul.f32 %v12401_v23, %v11940_v43  ;;  %v12417_v11 = vmul.f32 %v12401_v23, %v11944_v45  ;;  %v12421_v34 = vmul.f32 %v15573_v51, %v12401_v23  ;;  %v15575_v20 = vld [vmem:[#allocation7_spill] sm:$0xff]  ;;  %v15576_v43 = vld [vmem:[#allocation8_spill] sm:$0xff] }
 0x21e   :  { %v12424_v31 = vrot.slane %v1189_v49, %v12394_v54  ;;  %v12428_v2 = vmul.f32 %v15574_v35, %v12401_v23  ;;  %v12432_v62 = vmul.f32 %v12401_v23, %v15575_v20  ;;  %v12436_v42 = vmul.f32 %v12401_v23, %v15576_v43  ;;  %v15577_v20 = vld [vmem:[#allocation11_spill] sm:$0xff] }
 0x21f   :  { %v12440_v45 = vmul.f32 %v11954_v52, %v12401_v23  ;;  %v12444_v5 = vmul.f32 %v11960_v56, %v12401_v23  ;;  %v12448_v58 = vmul.f32 %v12401_v23, %v11972_v1  ;;  %v12452_v32 = vmul.f32 %v12401_v23, %v11978_v6 }
 0x220   :  { %v1326_v15 = vadd.f32 %v12424_v31, %v1256_v53  ;;  %v1327_v7 = vadd.f32 %v12424_v31, %v1257_v19  ;;  %v1328_v50 = vadd.f32 %v12424_v31, %v1258_v9  ;;  %v1329_v52 = vadd.f32 %v12424_v31, %v1259_v21 }
 0x221   :  { %v12460_v56 = vmul.f32 %v11970_v0, %v12401_v23  ;;  %v12464_v1 = vmul.f32 %v11976_v4, %v12401_v23  ;;  %v12468_v6 = vmul.f32 %v12401_v23, %v11988_v13  ;;  %v12472_v59 = vmul.f32 %v12401_v23, %v11994_v18 }
 0x222   :  { %v1390_v27 = vmax.f32 %v1326_v15, 0.0  ;;  %v1391_v39 = vmax.f32 %v1327_v7, 0.0  ;;  %v1392_v49 = vmax.f32 %v1328_v50, 0.0  ;;  %v1393_v53 = vmax.f32 %v1329_v52, 0.0  ;;  %v15578_v15 = vld [vmem:[#allocation9_spill] sm:$0xff] }
 0x223   :  { %v12476_v0 = vmul.f32 %v11986_v12, %v12401_v23  ;;  %v12480_v4 = vmul.f32 %v11992_v16, %v12401_v23  ;;  %v12484_v13 = vmul.f32 %v12401_v23, %v12004_v25  ;;  %v12488_v18 = vmul.f32 %v12401_v23, %v12010_v30 }
 0x224   :  { %v2156_v19 = vmax.f32 %v1390_v27, %v1392_v49  ;;  %v2157_v9 = vmax.f32 %v1391_v39, %v1393_v53  ;;  %v12492_v21 = vmul.f32 %v12002_v24, %v12401_v23  ;;  %v12496_v12 = vmul.f32 %v12008_v28, %v12401_v23  ;;  %v15583_v39 = vld [vmem:[#allocation12_spill] sm:$0xff]  ;;  %v15585_v53 = vld [vmem:[#allocation14_spill] sm:$0xff] }
 0x225   :  { %v12500_v16 = vmul.f32 %v12401_v23, %v12020_v38  ;;  %v12504_v25 = vmul.f32 %v12401_v23, %v12026_v47  ;;  %v12508_v30 = vmul.f32 %v12018_v37, %v12401_v23  ;;  %v12512_v24 = vmul.f32 %v12024_v41, %v12401_v23 }
 0x226   :  { %v2161_v51 = vrot.slane %v2156_v19, 1  ;;  %v2169_v35 = vrot.slane %v2157_v9, 1  ;;  %v12516_v28 = vmul.f32 %v12401_v23, %v12036_v57  ;;  %v12520_v38 = vmul.f32 %v12401_v23, %v12042_v63 }
 0x227   :  { %v12524_v47 = vmul.f32 %v12034_v55, %v12401_v23  ;;  %v12528_v37 = vmul.f32 %v12040_v61, %v12401_v23  ;;  %v12532_v41 = vmul.f32 %v12401_v23, %v12052_v10  ;;  %v12536_v57 = vmul.f32 %v12401_v23, %v15577_v20  ;;  %v15579_v55 = vld [vmem:[#allocation10_spill] sm:$0xff]  ;;  %v15580_v61 = vld [vmem:[#allocation13_spill] sm:$0xff]  ;;  %v15581_v10 = vld [vmem:[#allocation15_spill] sm:$0xff] }
 0x228   :  { %v2165_v43 = vmax.f32 %v2156_v19, %v2161_v51  ;;  %v2173_v63 = vmax.f32 %v2157_v9, %v2169_v35  ;;  %v12540_v7 = vmul.f32 %v15578_v15, %v12401_v23  ;;  %v12544_v50 = vmul.f32 %v15579_v55, %v12401_v23 }
 0x229   :  { %v12548_v52 = vmul.f32 %v12401_v23, %v15580_v61  ;;  %v12552_v27 = vmul.f32 %v12401_v23, %v15581_v10  ;;  %v12556_v49 = vmul.f32 %v15583_v39, %v12401_v23  ;;  %v12560_v19 = vmul.f32 %v15585_v53, %v12401_v23  ;;  %v15588_v39 = vld [vmem:[#allocation18_spill] sm:$0xff]  ;;  %v15589_v53 = vld [vmem:[#allocation16_spill] sm:$0xff] }
 0x22a   :  { %v2177_v9 = vrot.slane %v2165_v43, 1  ;;  %v2181_v51 = vrot.slane %v2165_v43, 2  ;;  %v2185_v35 = vrot.slane %v2165_v43, 3  ;;  %v2191_v20 = vrot.slane %v2173_v63, 4 }
 0x22b   :  { %15582 = vst [vmem:[#allocation23_spill] sm:$0xff] %v12552_v27  ;;  %15584 = vst [vmem:[#allocation20_spill] sm:$0xff] %v12556_v49  ;;  %v2195_v15 = vrot.slane %v2173_v63, 5  ;;  %v2199_v55 = vrot.slane %v2173_v63, 6  ;;  %v2203_v61 = vrot.slane %v2173_v63, 7  ;;  %v12564_v54 = vmul.f32 %v12401_v23, %v15587_v29 }
 0x22c   :  { %15586 = vst [vmem:[#allocation32_spill] sm:$0xff] %v12560_v19  ;;  %v2207_v10 = vsel %vm1446_vm6, %v2165_v43, %v2177_v9  ;;  %v12569_v49 = vmul.f32 %v12401_v23, %v15588_v39  ;;  %v12573_v19 = vmul.f32 %v15589_v53, %v12401_v23  ;;  %v12577_v27 = vmul.f32 %v12088_v60, %v12401_v23  ;;  %v15592_v53 = vld [vmem:[#allocation25_spill] sm:$0xff] }
 0x22d   :  { %v2209_v63 = vsel %vm1449_vm7, %v2207_v10, %v2181_v51  ;;  %v12582_v29 = vmul.f32 %v12401_v23, %v12100_v17  ;;  %v12586_v43 = vmul.f32 %v12401_v23, %v12106_v26  ;;  %v12590_v9 = vmul.f32 %v12098_v14, %v12401_v23 }
 0x22e   :  { %v2211_v39 = vsel %vm1452_vm8, %v2209_v63, %v2185_v35  ;;  %v12595_v60 = vmul.f32 %v12104_v22, %v12401_v23  ;;  %v12599_v51 = vmul.f32 %v12401_v23, %v12116_v48  ;;  %v12603_v17 = vmul.f32 %v12401_v23, %v12122_v3  ;;  %v15594_v63 = vld [vmem:[#allocation27_spill] sm:$0xff] }
 0x22f   :  { %v2213_v26 = vsel %vm1455_vm9, %v2211_v39, %v2191_v20  ;;  %v12608_v14 = vmul.f32 %v12114_v46, %v12401_v23  ;;  %v12612_v35 = vmul.f32 %v15556_v40, %v12401_v23  ;;  %v12616_v22 = vmul.f32 %v12401_v23, %v15557_v36  ;;  %v15590_v46 = vld [vmem:[#allocation22_spill] sm:$0xff] }
 0x230   :  { %v2215_v48 = vsel %vm489_vm0, %v2213_v26, %v2195_v15  ;;  %v12621_v3 = vmul.f32 %v12401_v23, %v15558_v44  ;;  %v12625_v20 = vmul.f32 %v15559_v8, %v12401_v23  ;;  %v12629_v10 = vmul.f32 %v15590_v46, %v12401_v23  ;;  %v15596_v44 = vld [vmem:[#allocation24_spill] sm:$0xff]  ;;  %v15597_v26 = vld [vmem:[#allocation26_spill] sm:$0xff] }
 0x231   :  { %v2217_v40 = vsel %vm490_vm2, %v2215_v48, %v2199_v55  ;;  %v12634_v36 = vmul.f32 %v12401_v23, %v15592_v53  ;;  %v12638_v15 = vmul.f32 %v12401_v23, %v15594_v63  ;;  %v12642_v39 = vmul.f32 %v15596_v44, %v12401_v23  ;;  %v15599_v48 = vld [vmem:[#allocation31_spill] sm:$0xff]  ;;  %v15601_v44 = vld [vmem:[#allocation30_spill] sm:$0xff] }
 0x232   :  { %15591 = vst [vmem:[#allocation33_spill] sm:$0xff] %v12629_v10  ;;  %v2219_v8 = vsel %vm1462_vm10, %v2217_v40, %v2203_v61  ;;  %v12647_v46 = vmul.f32 %v15597_v26, %v12401_v23  ;;  %v15598_v10 = vld [vmem:[#allocation29_spill] sm:$0xff]  ;;  %v12655_v53 = vmul.f32 %v12401_v23, %v15599_v48  ;;  %v12663_v61 = vmul.f32 %v15601_v44, %v12401_v23  ;;  %v2255_v44 = vld [vmem:[#allocation2 + $0x90] sm:$0xf] }
 0x233   :  { %15593 = vst [vmem:[#allocation5_spill] sm:$0xff] %v12634_v36  ;;  %15595 = vst [vmem:[#allocation6_spill] sm:$0xff] %v12638_v15  ;;  %v12651_v55 = vmul.f32 %v12401_v23, %v15598_v10  ;;  %v10388_v63 = vpack.c.bf16 %v2219_v8, %v2219_v8  ;;  %v15600_v15 = vld [vmem:[#allocation28_spill] sm:$0xff]  ;;  %v12667_v40 = vadd.f32 %v12424_v31, %v12413_v33 }
 0x234   :  { %v12659_v36 = vmul.f32 %v15600_v15, %v12401_v23  ;;  %v12671_v10 = vadd.f32 %v12424_v31, %v12417_v11  ;;  %v12675_v26 = vadd.f32 %v12424_v31, %v12421_v34  ;;  %v12679_v15 = vadd.f32 %v12424_v31, %v12428_v2 }
 0x235   :  { %15602 = vst [vmem:[#allocation7_spill] sm:$0xff] %v12667_v40  ;;  %v12683_v23 = vadd.f32 %v12424_v31, %v12432_v62  ;;  %v2237_v8 = vshrl.u32 %v10388_v63, 16  ;;  %v2240_v48 = vshll.u32 %v10388_v63, 16  ;;  %v12687_v33 = vadd.f32 %v12424_v31, %v12436_v42 }
 0x236   :  { %15603 = vst [vmem:[#allocation8_spill] sm:$0xff] %v12671_v10  ;;  %15604 = vst [vmem:[#allocation11_spill] sm:$0xff] %v12675_v26  ;;  %v12691_v11 = vadd.f32 %v12424_v31, %v12440_v45  ;;  %v12695_v34 = vadd.f32 %v12424_v31, %v12444_v5  ;;  %v12699_v2 = vadd.f32 %v12424_v31, %v12448_v58  ;;  %v15606_v45 = vmov 0 }
 0x237   :  { %v12703_v62 = vadd.f32 %v12424_v31, %v12452_v32  ;;  %v12707_v42 = vadd.f32 %v12424_v31, %v12460_v56  ;;  %v15607_v45 = vsel %vm12711_vm13, 4294967295, %v15606_v45  ;;  %v2239_v5 = vrot.slane %v2237_v8, 7  ;;  %v2258_v8 = vld [vmem:[#allocation2 + $0x94] sm:$0x1] }
 0x238   :  { %15608 = vst [vmem:[#allocation10_spill] sm:$0xff] %v15607_v45  ;;  %v12717_v63 = vadd.f32 %v12424_v31, %v12464_v1  ;;  %v12721_v58 = vadd.f32 %v12424_v31, %v12468_v6  ;;  %v12725_v32 = vadd.f32 %v12424_v31, %v12472_v59  ;;  %v15612_v56 = vmov 0 }
 0x239   :  { %15605 = vst [vmem:[#allocation9_spill] sm:$0xff] %v12707_v42  ;;  %v15613_v56 = vsel %vm12729_vm14, 4294967295, %v15612_v56  ;;  %v12735_v1 = vadd.f32 %v12424_v31, %v12476_v0  ;;  %v12739_v6 = vadd.f32 %v12424_v31, %v12480_v4  ;;  %v12743_v59 = vadd.f32 %v12424_v31, %v12484_v13 }
 0x23a   :  { %15609 = vst [vmem:[#allocation13_spill] sm:$0xff] %v12717_v63  ;;  %15610 = vst [vmem:[#allocation15_spill] sm:$0xff] %v12721_v58  ;;  %v2242_v58 = vor.u32 %v2240_v48, %v2239_v5  ;;  %v2243_v63 = vrot.slane %v2239_v5, 4  ;;  %v12751_v42 = vadd.f32 %v12424_v31, %v12492_v21  ;;  %v12755_v0 = vadd.f32 %v12424_v31, %v12496_v12 }
 0x23b   :  { %15611 = vst [vmem:[#allocation12_spill] sm:$0xff] %v12725_v32  ;;  %15614 = vst [vmem:[#allocation14_spill] sm:$0xff] %v15613_v56  ;;  %v12747_v32 = vadd.f32 %v12424_v31, %v12488_v18  ;;  %v12759_v4 = vadd.f32 %v12424_v31, %v12500_v16  ;;  %v12763_v13 = vadd.f32 %v12424_v31, %v12504_v25 }
 0x23c   :  { %v12767_v18 = vadd.f32 %v12424_v31, %v12508_v30  ;;  %v12771_v21 = vadd.f32 %v12424_v31, %v12512_v24  ;;  %v2256_v12 = vsel %vm12711_vm13, %v2242_v58, %v2255_v44  ;;  %v2259_v48 = vsel %vm12729_vm14, %v2243_v63, %v2258_v8  ;;  %v15624_v63 = vld [vmem:[#allocation23_spill] sm:$0xff]  ;;  %v15625_v58 = vld [vmem:[#allocation20_spill] sm:$0xff] }
 0x23d   :  { %15615 = vst [vmem:[#allocation17_spill] sm:$0xff] %v12747_v32  ;;  %15616 = vst [vmem:[#allocation18_spill] sm:$0xff] %v12759_v4  ;;  %v12779_v16 = vadd.f32 %v12424_v31, %v12516_v28  ;;  %v12783_v25 = vadd.f32 %v12424_v31, %v12520_v38  ;;  %v12787_v30 = vadd.f32 %v12424_v31, %v12524_v47  ;;  %v15626_v44 = vld [vmem:[#allocation32_spill] sm:$0xff] }
 0x23e   :  { %15617 = vst [vmem:[#allocation16_spill] sm:$0xff] %v12763_v13  ;;  %2257 = vst [vmem:[#allocation2 + $0x90] sm:$0xf] %v2256_v12  ;;  %v12791_v24 = vadd.f32 %v12424_v31, %v12528_v37  ;;  %v12795_v5 = vadd.f32 %v12424_v31, %v12532_v41  ;;  %v12799_v28 = vadd.f32 %v12424_v31, %v12536_v57 }
 0x23f   :  { %15618 = vst [vmem:[#allocation22_spill] sm:$0xff] %v12783_v25  ;;  %2260 = vst [vmem:[#allocation2 + $0x94] sm:$0x1] %v2259_v48  ;;  %v12803_v38 = vadd.f32 %v12424_v31, %v12540_v7  ;;  %v12807_v47 = vadd.f32 %v12424_v31, %v12544_v50  ;;  %v12811_v37 = vadd.f32 %v12424_v31, %v12548_v52 }
 0x240   :  { %15619 = vst [vmem:[#allocation25_spill] sm:$0xff] %v12791_v24  ;;  %15620 = vst [vmem:[#allocation27_spill] sm:$0xff] %v12795_v5  ;;  %v12815_v41 = vadd.f32 %v12424_v31, %v15624_v63  ;;  %v12819_v57 = vadd.f32 %v12424_v31, %v15625_v58  ;;  %v12823_v7 = vadd.f32 %v12424_v31, %v15626_v44  ;;  %v15627_v63 = vld [vmem:[#allocation33_spill] sm:$0xff]  ;;  %v15629_v44 = vld [vmem:[#allocation6_spill] sm:$0xff] }
 0x241   :  { %15621 = vst [vmem:[#allocation24_spill] sm:$0xff] %v12799_v28  ;;  %15622 = vst [vmem:[#allocation26_spill] sm:$0xff] %v12803_v38  ;;  %v12827_v50 = vadd.f32 %v12424_v31, %v12564_v54  ;;  %v12831_v52 = vadd.f32 %v12424_v31, %v12569_v49  ;;  %v12835_v8 = vadd.f32 %v12424_v31, %v12573_v19  ;;  %v15628_v58 = vld [vmem:[#allocation5_spill] sm:$0xff]  ;;  %v15636_v10 = vld [vmem:[#allocation15_spill] sm:$0xff]  ;;  %v1362_v56 = vmax.f32 %v12811_v37, 0.0 }
 0x242   :  { %15623 = vst [vmem:[#allocation29_spill] sm:$0xff] %v12807_v47  ;;  %v12839_v12 = vadd.f32 %v12424_v31, %v12577_v27  ;;  %v12843_v48 = vadd.f32 %v12424_v31, %v12582_v29  ;;  %v12847_v54 = vadd.f32 %v12424_v31, %v12586_v43  ;;  %v12851_v49 = vadd.f32 %v12424_v31, %v12590_v9  ;;  %v15635_v40 = vld [vmem:[#allocation13_spill] sm:$0xff]  ;;  %v15637_v26 = vld [vmem:[#allocation12_spill] sm:$0xff] }
 0x243   :  { %v12855_v19 = vadd.f32 %v12424_v31, %v12595_v60  ;;  %v12859_v27 = vadd.f32 %v12424_v31, %v12599_v51  ;;  %v12863_v29 = vadd.f32 %v12424_v31, %v12603_v17  ;;  %v12867_v43 = vadd.f32 %v12424_v31, %v12608_v14 }
 0x244   :  { %v12871_v9 = vadd.f32 %v12424_v31, %v12612_v35  ;;  %v12875_v60 = vadd.f32 %v12424_v31, %v12616_v22  ;;  %v12879_v51 = vadd.f32 %v12424_v31, %v12621_v3  ;;  %v12883_v17 = vadd.f32 %v12424_v31, %v12625_v20 }
 0x245   :  { %v12887_v14 = vadd.f32 %v12424_v31, %v15627_v63  ;;  %v12891_v35 = vadd.f32 %v12424_v31, %v15628_v58  ;;  %v12895_v22 = vadd.f32 %v12424_v31, %v15629_v44  ;;  %v12899_v3 = vadd.f32 %v12424_v31, %v12642_v39 }
 0x246   :  { %v12903_v20 = vadd.f32 %v12424_v31, %v12647_v46  ;;  %v12907_v63 = vadd.f32 %v12424_v31, %v12651_v55  ;;  %v12911_v58 = vadd.f32 %v12424_v31, %v12655_v53  ;;  %v12915_v44 = vadd.f32 %v12424_v31, %v12659_v36  ;;  %v11297_v46 = vld [vmem:[%s15431_s2 + $0x18] sm:$0xff]   ;;  %v11298_v36 = vld [vmem:[%s15431_s2 + $0x40] sm:$0xff]  }
 0x247   :  { %v12919_v39 = vadd.f32 %v12424_v31, %v12663_v61  ;;  %v15634_v61 = vld [vmem:[#allocation9_spill] sm:$0xff]  ;;  %v11296_v31 = vld [vmem:[%s15431_s2 + $0x10] sm:$0xff]   ;;  %10754 = vmatprep.subr.bf16.mxu1 %v11298_v36  ;;  %v1363_v45 = vmax.f32 %v12815_v41, 0.0  ;;  %v1364_v55 = vmax.f32 %v12819_v57, 0.0  ;;  %v1365_v53 = vmax.f32 %v12823_v7, 0.0 }
 0x248   :  { %15630 = vst [vmem:[#allocation31_spill] sm:$0xff] %v12907_v63  ;;  %15631 = vst [vmem:[#allocation28_spill] sm:$0xff] %v12911_v58  ;;  %v11299_v58 = vld [vmem:[%s15431_s2 + $0x48] sm:$0xff]   ;;  %10674 = vmatprep.subr.bf16.mxu0 %v11296_v31  ;;  %10755 = vmatpush3.bf16.msra.mxu1 %v11298_v36  ;;  %v1366_v13 = vmax.f32 %v12827_v50, 0.0  ;;  %v1367_v4 = vmax.f32 %v12831_v52, 0.0  ;;  %v1369_v37 = vmax.f32 %v12839_v12, 0.0 }
 0x249   :  { %15632 = vst [vmem:[#allocation30_spill] sm:$0xff] %v12915_v44  ;;  %15633 = vst [vmem:[#allocation23_spill] sm:$0xff] %v12919_v39  ;;  %10675 = vmatpush3.bf16.msra.mxu0 %v11296_v31  ;;  %10756 = vmatprep.subr.bf16.mxu1 %v11299_v58  ;;  %v11300_v31 = vld [vmem:[%s15431_s2 + $0x50] sm:$0xff]   ;;  %v1368_v44 = vmax.f32 %v12835_v8, 0.0  ;;  %v15645_v50 = vmax.f32 %v12679_v15, 0.0  ;;  %v1396_v25 = vmax.f32 %v1362_v56, %v1364_v55  ;;  %v15648_v63 = vmax.f32 %v12691_v11, 0.0 }
 0x24a   :  { %10676 = vmatprep.subr.bf16.mxu0 %v11297_v46  ;;  %v15641_v36 = vld [vmem:[#allocation11_spill] sm:$0xff]  ;;  %v1397_v52 = vmax.f32 %v1363_v45, %v1365_v53  ;;  %v15649_v8 = vmax.f32 %v12683_v23, 0.0  ;;  %v15650_v12 = vmax.f32 %v12695_v34, 0.0 }
 0x24b   :  { %v15642_v47 = vmax.f32 %v15641_v36, 0.0  ;;  %v15643_v41 = vld [vmem:[#allocation7_spill] sm:$0xff]  ;;  %v1401_v15 = vrot.slane %v1396_v25, 1 }
 0x24c   :  { %10757 = vmatpush3.bf16.msra.mxu1 %v11299_v58  ;;  %v15644_v5 = vmax.f32 %v15643_v41, 0.0  ;;  %v1512_v57 = vmax.f32 %v15649_v8, %v15648_v63  ;;  %v15651_v58 = vmax.f32 %v12687_v33, 0.0  ;;  %v1409_v32 = vrot.slane %v1397_v52, 1 }
 0x24d   :  { %10677 = vmatpush3.bf16.msra.mxu0 %v11297_v46  ;;  %10774 = vmatprep.subr.bf16.mxu1 %v11300_v31  ;;  %v15646_v31 = vld [vmem:[#allocation8_spill] sm:$0xff]  ;;  %v1405_v53 = vmax.f32 %v1396_v25, %v1401_v15 }
 0x24e   :  { %v1394_v7 = vmax.f32 %v15644_v5, %v15642_v47  ;;  %v15647_v38 = vmax.f32 %v15646_v31, 0.0  ;;  %v1513_v36 = vmax.f32 %v15651_v58, %v15650_v12  ;;  %v1514_v5 = vmax.f32 %v1366_v13, %v1368_v44 }
 0x24f   :  { %v1515_v47 = vmax.f32 %v1367_v4, %v1369_v37  ;;  %v1518_v31 = vrot.slane %v1512_v57, 1  ;;  %v1413_v23 = vmax.f32 %v1397_v52, %v1409_v32  ;;  %v1417_v13 = vrot.slane %v1405_v53, 1 }
 0x250   :  { %v1395_v46 = vmax.f32 %v15647_v38, %v15645_v50  ;;  %v1400_v39 = vrot.slane %v1394_v7, 1  ;;  %v1526_v38 = vrot.slane %v1513_v36, 1  ;;  %v1519_v55 = vrot.slane %v1514_v5, 1 }
 0x251   :  { %v1527_v11 = vrot.slane %v1515_v47, 1  ;;  %v13012_v63 = vmax.f32 %v1512_v57, %v1518_v31  ;;  %v1421_v4 = vrot.slane %v1405_v53, 2  ;;  %v1425_v44 = vrot.slane %v1405_v53, 3 }
 0x252   :  { %v1408_v41 = vrot.slane %v1395_v46, 1  ;;  %v1404_v56 = vmax.f32 %v1394_v7, %v1400_v39  ;;  %v13014_v34 = vmax.f32 %v1513_v36, %v1526_v38  ;;  %v1431_v37 = vrot.slane %v1413_v23, 4 }
 0x253   :  { %v1435_v28 = vrot.slane %v1413_v23, 5  ;;  %v1439_v7 = vrot.slane %v1413_v23, 6  ;;  %v1448_v25 = vsel %vm1446_vm6, %v1405_v53, %v1417_v13  ;;  %v1523_v36 = vmax.f32 %v1514_v5, %v1519_v55 }
 0x254   :  { %v1412_v45 = vmax.f32 %v1395_v46, %v1408_v41  ;;  %v1416_v33 = vrot.slane %v1404_v56, 1  ;;  %v1420_v50 = vrot.slane %v1404_v56, 2  ;;  %v1424_v8 = vrot.slane %v1404_v56, 3 }
 0x255   :  { %v1443_v41 = vrot.slane %v1413_v23, 7  ;;  %v1451_v52 = vsel %vm1449_vm7, %v1448_v25, %v1421_v4  ;;  %v13020_v15 = vmax.f32 %v1515_v47, %v1527_v11  ;;  %v1534_v24 = vrot.slane %v13012_v63, 1 }
 0x256   :  { %v1430_v12 = vrot.slane %v1412_v45, 4  ;;  %v1434_v58 = vrot.slane %v1412_v45, 5  ;;  %v1438_v39 = vrot.slane %v1412_v45, 6  ;;  %v1442_v46 = vrot.slane %v1412_v45, 7 }
 0x257   :  { %v1447_v32 = vsel %vm1446_vm6, %v1404_v56, %v1416_v33  ;;  %v1454_v38 = vsel %vm1452_vm8, %v1451_v52, %v1425_v44  ;;  %v1538_v45 = vrot.slane %v13012_v63, 2  ;;  %v1535_v53 = vrot.slane %v1523_v36, 1 }
 0x258   :  { %v1450_v57 = vsel %vm1449_vm7, %v1447_v32, %v1420_v50  ;;  %v1457_v56 = vsel %vm1455_vm9, %v1454_v38, %v1431_v37  ;;  %v1539_v33 = vrot.slane %v1523_v36, 2  ;;  %v1542_v47 = vrot.slane %v13012_v63, 3 }
 0x259   :  { %v1453_v31 = vsel %vm1452_vm8, %v1450_v57, %v1424_v8  ;;  %v1459_v5 = vsel %vm489_vm0, %v1457_v56, %v1435_v28  ;;  %v1543_v55 = vrot.slane %v1523_v36, 3  ;;  %v1548_v13 = vrot.slane %v13014_v34, 4 }
 0x25a   :  { %v1456_v23 = vsel %vm1455_vm9, %v1453_v31, %v1430_v12  ;;  %v1461_v8 = vsel %vm490_vm2, %v1459_v5, %v1439_v7  ;;  %v1549_v4 = vrot.slane %v13020_v15, 4  ;;  %v1552_v37 = vrot.slane %v13014_v34, 5 }
 0x25b   :  { %v1458_v50 = vsel %vm489_vm0, %v1456_v23, %v1434_v58  ;;  %v1464_v44 = vsel %vm1462_vm10, %v1461_v8, %v1443_v41  ;;  %v1553_v58 = vrot.slane %v13020_v15, 5  ;;  %v1556_v25 = vrot.slane %v13014_v34, 6 }
 0x25c   :  { %v1460_v11 = vsel %vm490_vm2, %v1458_v50, %v1438_v39  ;;  %v10374_v32 = vpack.c.bf16 %v1464_v44, %v1464_v44  ;;  %v1557_v39 = vrot.slane %v13020_v15, 6  ;;  %v1560_v7 = vrot.slane %v13014_v34, 7 }
 0x25d   :  { %v1463_v12 = vsel %vm1462_vm10, %v1460_v11, %v1442_v46  ;;  %v1561_v57 = vrot.slane %v13020_v15, 7  ;;  %v1564_v52 = vsel %vm1446_vm6, %v13012_v63, %v1534_v24  ;;  %v1565_v46 = vsel %vm1446_vm6, %v1523_v36, %v1535_v53  ;;  %v1497_v63 = vld [vmem:[#allocation2 + $0x8] sm:$0xf] }
 0x25e   :  { %v10373_v28 = vpack.c.bf16 %v1463_v12, %v1463_v12  ;;  %v1482_v38 = vshrl.u32 %v10374_v32, 16  ;;  %v1485_v23 = vshll.u32 %v10374_v32, 16  ;;  %v1566_v56 = vsel %vm1449_vm7, %v1564_v52, %v1538_v45  ;;  %v1503_v45 = vld [vmem:[#allocation2 + $0xc] sm:$0x1] }
 0x25f   :  { %v1567_v50 = vsel %vm1449_vm7, %v1565_v46, %v1539_v33  ;;  %v15652_v5 = vmax.f32 %v15634_v61, 0.0  ;;  %v15653_v11 = vmax.f32 %v12699_v2, 0.0  ;;  %v15654_v15 = vmax.f32 %v15635_v40, 0.0  ;;  %v1509_v33 = vld [vmem:[#allocation2 + $0x5c] sm:$0x1] }
 0x260   :  { %v1474_v41 = vshrl.u32 %v10373_v28, 16  ;;  %v1477_v31 = vshll.u32 %v10373_v28, 16  ;;  %v15655_v8 = vmax.f32 %v12703_v62, 0.0  ;;  %v1484_v53 = vrot.slane %v1482_v38, 7  ;;  %v1506_v28 = vld [vmem:[#allocation2 + $0x58] sm:$0xf] }
 0x261   :  { %v1619_v34 = vmax.f32 %v15653_v11, %v15652_v5  ;;  %v1568_v12 = vsel %vm1452_vm8, %v1566_v56, %v1542_v47  ;;  %v1569_v44 = vsel %vm1452_vm8, %v1567_v50, %v1543_v55  ;;  %v15656_v32 = vmax.f32 %v12851_v49, 0.0 }
 0x262   :  { %v1620_v24 = vmax.f32 %v15655_v8, %v15654_v15  ;;  %v1476_v36 = vrot.slane %v1474_v41, 7  ;;  %v1570_v61 = vsel %vm1455_vm9, %v1568_v12, %v1548_v13  ;;  %v1571_v2 = vsel %vm1455_vm9, %v1569_v44, %v1549_v4 }
 0x263   :  { %v15657_v40 = vmax.f32 %v12843_v48, 0.0  ;;  %v15658_v52 = vmax.f32 %v12855_v19, 0.0  ;;  %v15659_v46 = vmax.f32 %v12847_v54, 0.0  ;;  %v1487_v55 = vor.u32 %v1485_v23, %v1484_v53 }
 0x264   :  { %v1479_v47 = vor.u32 %v1477_v31, %v1476_v36  ;;  %v1480_v38 = vrot.slane %v1476_v36, 4  ;;  %v1488_v56 = vrot.slane %v1484_v53, 4  ;;  %v1572_v50 = vsel %vm489_vm0, %v1570_v61, %v1552_v37 }
 0x265   :  { %v1621_v62 = vmax.f32 %v15657_v40, %v15656_v32  ;;  %v1622_v41 = vmax.f32 %v15659_v46, %v15658_v52  ;;  %v1573_v13 = vsel %vm489_vm0, %v1571_v2, %v1553_v58  ;;  %v1625_v5 = vrot.slane %v1619_v34, 1 }
 0x266   :  { %v1498_v49 = vsel %vm12711_vm13, %v1479_v47, %v1497_v63  ;;  %v1504_v15 = vsel %vm12729_vm14, %v1480_v38, %v1503_v45  ;;  %v1507_v54 = vsel %vm12711_vm13, %v1487_v55, %v1506_v28  ;;  %v1510_v19 = vsel %vm12729_vm14, %v1488_v56, %v1509_v33  ;;  %v1613_v38 = vld [vmem:[#allocation2 + $0x60] sm:$0xf] }
 0x267   :  { %v1626_v4 = vrot.slane %v1621_v62, 1  ;;  %1499 = vst [vmem:[#allocation2 + $0x8] sm:$0xf] %v1498_v49  ;;  %1505 = vst [vmem:[#allocation2 + $0xc] sm:$0x1] %v1504_v15  ;;  %v1574_v37 = vsel %vm490_vm2, %v1572_v50, %v1556_v25  ;;  %v1575_v58 = vsel %vm490_vm2, %v1573_v13, %v1557_v39  ;;  %v1629_v31 = vmax.f32 %v1619_v34, %v1625_v5 }
 0x268   :  { %1508 = vst [vmem:[#allocation2 + $0x58] sm:$0xf] %v1507_v54  ;;  %1511 = vst [vmem:[#allocation2 + $0x5c] sm:$0x1] %v1510_v19  ;;  %v1576_v8 = vsel %vm1462_vm10, %v1574_v37, %v1560_v7  ;;  %v1577_v63 = vsel %vm1462_vm10, %v1575_v58, %v1561_v57  ;;  %v1633_v36 = vrot.slane %v1620_v24, 1  ;;  %v1634_v53 = vrot.slane %v1622_v41, 1 }
 0x269   :  { %v1630_v23 = vmax.f32 %v1621_v62, %v1626_v4  ;;  %v10375_v12 = vpack.c.bf16 %v1576_v8, %v1576_v8  ;;  %v10376_v44 = vpack.c.bf16 %v1577_v63, %v1577_v63  ;;  %v1641_v45 = vrot.slane %v1629_v31, 1  ;;  %v1607_v34 = vld [vmem:[#allocation2 + $0x10] sm:$0xf]  ;;  %v1610_v62 = vld [vmem:[#allocation2 + $0x14] sm:$0x1] }
 0x26a   :  { %v1637_v33 = vmax.f32 %v1620_v24, %v1633_v36  ;;  %v1638_v61 = vmax.f32 %v1622_v41, %v1634_v53  ;;  %v1645_v2 = vrot.slane %v1629_v31, 2  ;;  %v1649_v46 = vrot.slane %v1629_v31, 3  ;;  %v1616_v5 = vld [vmem:[#allocation2 + $0x64] sm:$0x1] }
 0x26b   :  { %v1642_v28 = vrot.slane %v1630_v23, 1  ;;  %v1646_v32 = vrot.slane %v1630_v23, 2  ;;  %v1587_v40 = vshrl.u32 %v10375_v12, 16  ;;  %v1590_v25 = vshll.u32 %v10375_v12, 16 }
 0x26c   :  { %v1595_v52 = vshrl.u32 %v10376_v44, 16  ;;  %v1598_v39 = vshll.u32 %v10376_v44, 16  ;;  %v1650_v7 = vrot.slane %v1630_v23, 3  ;;  %v1655_v47 = vrot.slane %v1637_v33, 4 }
 0x26d   :  { %v1656_v57 = vrot.slane %v1638_v61, 4  ;;  %v1589_v55 = vrot.slane %v1587_v40, 7  ;;  %v1659_v50 = vrot.slane %v1637_v33, 5  ;;  %v1660_v13 = vrot.slane %v1638_v61, 5 }
 0x26e   :  { %v1597_v56 = vrot.slane %v1595_v52, 7  ;;  %v1663_v24 = vrot.slane %v1637_v33, 6  ;;  %v1664_v41 = vrot.slane %v1638_v61, 6  ;;  %v1667_v4 = vrot.slane %v1637_v33, 7 }
 0x26f   :  { %v1668_v49 = vrot.slane %v1638_v61, 7  ;;  %v1592_v15 = vor.u32 %v1590_v25, %v1589_v55  ;;  %v1593_v54 = vrot.slane %v1589_v55, 4  ;;  %v1671_v58 = vsel %vm1446_vm6, %v1629_v31, %v1641_v45 }
 0x270   :  { %v1600_v19 = vor.u32 %v1598_v39, %v1597_v56  ;;  %v1601_v37 = vrot.slane %v1597_v56, 4  ;;  %v1672_v8 = vsel %vm1446_vm6, %v1630_v23, %v1642_v28  ;;  %v15662_v63 = vmax.f32 %v12735_v1, 0.0 }
 0x271   :  { %v15663_v36 = vmax.f32 %v15636_v10, 0.0  ;;  %v15664_v12 = vmax.f32 %v12739_v6, 0.0  ;;  %v15665_v44 = vmax.f32 %v15637_v26, 0.0  ;;  %v1608_v33 = vsel %vm12711_vm13, %v1592_v15, %v1607_v34 }
 0x272   :  { %v1611_v61 = vsel %vm12729_vm14, %v1593_v54, %v1610_v62  ;;  %v1614_v31 = vsel %vm12711_vm13, %v1600_v19, %v1613_v38  ;;  %v1617_v1 = vsel %vm12729_vm14, %v1601_v37, %v1616_v5  ;;  %1609 = vst [vmem:[#allocation2 + $0x10] sm:$0xf] %v1608_v33  ;;  %v1673_v10 = vsel %vm1449_vm7, %v1671_v58, %v1645_v2 }
 0x273   :  { %v1726_v53 = vmax.f32 %v15663_v36, %v15662_v63  ;;  %v1727_v40 = vmax.f32 %v15665_v44, %v15664_v12  ;;  %1612 = vst [vmem:[#allocation2 + $0x14] sm:$0x1] %v1611_v61  ;;  %1615 = vst [vmem:[#allocation2 + $0x60] sm:$0xf] %v1614_v31  ;;  %v1674_v26 = vsel %vm1449_vm7, %v1672_v8, %v1646_v32  ;;  %v15666_v6 = vmax.f32 %v12867_v43, 0.0 }
 0x274   :  { %1618 = vst [vmem:[#allocation2 + $0x64] sm:$0x1] %v1617_v1  ;;  %v15667_v23 = vmax.f32 %v12859_v27, 0.0  ;;  %v15668_v28 = vmax.f32 %v12871_v9, 0.0  ;;  %v15669_v25 = vmax.f32 %v12863_v29, 0.0  ;;  %v1675_v39 = vsel %vm1452_vm8, %v1673_v10, %v1649_v46 }
 0x275   :  { %v1676_v34 = vsel %vm1452_vm8, %v1674_v26, %v1650_v7  ;;  %v1732_v62 = vrot.slane %v1726_v53, 1  ;;  %v1740_v38 = vrot.slane %v1727_v40, 1  ;;  %v1677_v2 = vsel %vm1455_vm9, %v1675_v39, %v1655_v47  ;;  %v1714_v61 = vld [vmem:[#allocation2 + $0x18] sm:$0xf] }
 0x276   :  { %v1728_v45 = vmax.f32 %v15667_v23, %v15666_v6  ;;  %v1729_v52 = vmax.f32 %v15669_v25, %v15668_v28  ;;  %v1678_v32 = vsel %vm1455_vm9, %v1676_v34, %v1656_v57  ;;  %v1679_v27 = vsel %vm489_vm0, %v1677_v2, %v1659_v50  ;;  %v1717_v6 = vld [vmem:[#allocation2 + $0x1c] sm:$0x1]  ;;  %v1720_v23 = vld [vmem:[#allocation2 + $0x68] sm:$0xf] }
 0x277   :  { %v1680_v56 = vsel %vm489_vm0, %v1678_v32, %v1660_v13  ;;  %v1736_v9 = vmax.f32 %v1726_v53, %v1732_v62  ;;  %v13116_v5 = vmax.f32 %v1727_v40, %v1740_v38  ;;  %v1681_v29 = vsel %vm490_vm2, %v1679_v27, %v1663_v24  ;;  %v15673_v38 = vld [vmem:[#allocation17_spill] sm:$0xff] }
 0x278   :  { %v1733_v55 = vrot.slane %v1728_v45, 1  ;;  %v1741_v43 = vrot.slane %v1729_v52, 1  ;;  %v1682_v46 = vsel %vm490_vm2, %v1680_v56, %v1664_v41  ;;  %v1683_v47 = vsel %vm1462_vm10, %v1681_v29, %v1667_v4 }
 0x279   :  { %v1684_v57 = vsel %vm1462_vm10, %v1682_v46, %v1668_v49  ;;  %v1748_v54 = vrot.slane %v1736_v9, 1  ;;  %v1752_v19 = vrot.slane %v1736_v9, 2  ;;  %v10377_v37 = vpack.c.bf16 %v1683_v47, %v1683_v47 }
 0x27a   :  { %v1737_v7 = vmax.f32 %v1728_v45, %v1733_v55  ;;  %v13120_v15 = vmax.f32 %v1729_v52, %v1741_v43  ;;  %v10378_v50 = vpack.c.bf16 %v1684_v57, %v1684_v57  ;;  %v1756_v8 = vrot.slane %v1736_v9, 3  ;;  %v1723_v45 = vld [vmem:[#allocation2 + $0x6c] sm:$0x1] }
 0x27b   :  { %v1762_v36 = vrot.slane %v13116_v5, 4  ;;  %v1694_v41 = vshrl.u32 %v10377_v37, 16  ;;  %v1697_v53 = vshll.u32 %v10377_v37, 16  ;;  %v1766_v4 = vrot.slane %v13116_v5, 5 }
 0x27c   :  { %v1749_v58 = vrot.slane %v1737_v7, 1  ;;  %v1753_v13 = vrot.slane %v1737_v7, 2  ;;  %v1757_v63 = vrot.slane %v1737_v7, 3  ;;  %v1763_v24 = vrot.slane %v13120_v15, 4 }
 0x27d   :  { %v1702_v12 = vshrl.u32 %v10378_v50, 16  ;;  %v1705_v44 = vshll.u32 %v10378_v50, 16  ;;  %v1767_v49 = vrot.slane %v13120_v15, 5  ;;  %v1770_v40 = vrot.slane %v13116_v5, 6 }
 0x27e   :  { %v1771_v33 = vrot.slane %v13120_v15, 6  ;;  %v1696_v31 = vrot.slane %v1694_v41, 7  ;;  %v1774_v10 = vrot.slane %v13116_v5, 7  ;;  %v1775_v26 = vrot.slane %v13120_v15, 7 }
 0x27f   :  { %v1704_v1 = vrot.slane %v1702_v12, 7  ;;  %v1778_v28 = vsel %vm1446_vm6, %v1736_v9, %v1748_v54  ;;  %v1779_v25 = vsel %vm1446_vm6, %v1737_v7, %v1749_v58  ;;  %v15670_v52 = vmax.f32 %v12751_v42, 0.0 }
 0x280   :  { %v15671_v39 = vmax.f32 %v12743_v59, 0.0  ;;  %v15672_v62 = vmax.f32 %v12755_v0, 0.0  ;;  %v15674_v2 = vmax.f32 %v15673_v38, 0.0  ;;  %v1699_v55 = vor.u32 %v1697_v53, %v1696_v31 }
 0x281   :  { %v1700_v43 = vrot.slane %v1696_v31, 4  ;;  %v1707_v27 = vor.u32 %v1705_v44, %v1704_v1  ;;  %v1708_v56 = vrot.slane %v1704_v1, 4  ;;  %v1780_v5 = vsel %vm1449_vm7, %v1778_v28, %v1752_v19 }
 0x282   :  { %v1833_v34 = vmax.f32 %v15671_v39, %v15670_v52  ;;  %v1834_v32 = vmax.f32 %v15674_v2, %v15672_v62  ;;  %v1781_v9 = vsel %vm1449_vm7, %v1779_v25, %v1753_v13  ;;  %v15675_v29 = vmax.f32 %v12883_v17, 0.0  ;;  %v13179_v25 = vld [vmem:[%s15431_s2] sm:$0xff]  }
 0x283   :  { %v15676_v42 = vmax.f32 %v12875_v60, 0.0  ;;  %v15677_v59 = vmax.f32 %v12887_v14, 0.0  ;;  %v15678_v0 = vmax.f32 %v12879_v51, 0.0  ;;  %v1715_v15 = vsel %vm12711_vm13, %v1699_v55, %v1714_v61  ;;  %10694 = vmatprep.subr.bf16.mxu0 %v13179_v25 }
 0x284   :  { %v1718_v47 = vsel %vm12729_vm14, %v1700_v43, %v1717_v6  ;;  %v1721_v57 = vsel %vm12711_vm13, %v1707_v27, %v1720_v23  ;;  %v1724_v17 = vsel %vm12729_vm14, %v1708_v56, %v1723_v45  ;;  %1716 = vst [vmem:[#allocation2 + $0x18] sm:$0xf] %v1715_v15  ;;  %v1782_v60 = vsel %vm1452_vm8, %v1780_v5, %v1756_v8  ;;  %v1824_v5 = vld [vmem:[#allocation2 + $0x24] sm:$0x1] }
 0x285   :  { %v1835_v46 = vmax.f32 %v15676_v42, %v15675_v29  ;;  %v1836_v7 = vmax.f32 %v15678_v0, %v15677_v59  ;;  %1719 = vst [vmem:[#allocation2 + $0x1c] sm:$0x1] %v1718_v47  ;;  %1722 = vst [vmem:[#allocation2 + $0x68] sm:$0xf] %v1721_v57  ;;  %v1783_v51 = vsel %vm1452_vm8, %v1781_v9, %v1757_v63  ;;  %v1839_v14 = vrot.slane %v1833_v34, 1  ;;  %v15680_v0 = vld [vmem:[#allocation18_spill] sm:$0xff] }
 0x286   :  { %1725 = vst [vmem:[#allocation2 + $0x6c] sm:$0x1] %v1724_v17  ;;  %v1784_v19 = vsel %vm1455_vm9, %v1782_v60, %v1762_v36  ;;  %v1785_v37 = vsel %vm1455_vm9, %v1783_v51, %v1763_v24  ;;  %v1847_v50 = vrot.slane %v1834_v32, 1  ;;  %v1827_v9 = vld [vmem:[#allocation2 + $0x70] sm:$0xf]  ;;  %v15679_v59 = vmax.f32 %v12767_v18, 0.0 }
 0x287   :  { %v1840_v54 = vrot.slane %v1835_v46, 1  ;;  %v1848_v58 = vrot.slane %v1836_v7, 1  ;;  %v1786_v13 = vsel %vm489_vm0, %v1784_v19, %v1766_v4  ;;  %v1787_v41 = vsel %vm489_vm0, %v1785_v37, %v1767_v49  ;;  %v1830_v29 = vld [vmem:[#allocation2 + $0x74] sm:$0x1]  ;;  %v15683_v57 = vld [vmem:[#allocation16_spill] sm:$0xff] }
 0x288   :  { %v1843_v53 = vmax.f32 %v1833_v34, %v1839_v14  ;;  %v1788_v44 = vsel %vm490_vm2, %v1786_v13, %v1770_v40  ;;  %v1789_v8 = vsel %vm490_vm2, %v1787_v41, %v1771_v33  ;;  %v13168_v61 = vmax.f32 %v1834_v32, %v1847_v50  ;;  %v1821_v32 = vld [vmem:[#allocation2 + $0x20] sm:$0xf] }
 0x289   :  { %v1844_v12 = vmax.f32 %v1835_v46, %v1840_v54  ;;  %v13170_v63 = vmax.f32 %v1836_v7, %v1848_v58  ;;  %v1790_v36 = vsel %vm1462_vm10, %v1788_v44, %v1774_v10  ;;  %v1791_v24 = vsel %vm1462_vm10, %v1789_v8, %v1775_v26 }
 0x28a   :  { %v1855_v31 = vrot.slane %v1843_v53, 1  ;;  %v10379_v6 = vpack.c.bf16 %v1790_v36, %v1790_v36  ;;  %v10380_v4 = vpack.c.bf16 %v1791_v24, %v1791_v24  ;;  %v1859_v23 = vrot.slane %v1843_v53, 2 }
 0x28b   :  { %v1856_v1 = vrot.slane %v1844_v12, 1  ;;  %v1860_v49 = vrot.slane %v1844_v12, 2  ;;  %v1863_v45 = vrot.slane %v1843_v53, 3  ;;  %v1864_v28 = vrot.slane %v1844_v12, 3 }
 0x28c   :  { %v1869_v40 = vrot.slane %v13168_v61, 4  ;;  %v1870_v33 = vrot.slane %v13170_v63, 4  ;;  %v1801_v10 = vshrl.u32 %v10379_v6, 16  ;;  %v1804_v52 = vshll.u32 %v10379_v6, 16 }
 0x28d   :  { %v1809_v26 = vshrl.u32 %v10380_v4, 16  ;;  %v1812_v39 = vshll.u32 %v10380_v4, 16  ;;  %v1873_v34 = vrot.slane %v13168_v61, 5  ;;  %v1874_v62 = vrot.slane %v13170_v63, 5 }
 0x28e   :  { %v1877_v38 = vrot.slane %v13168_v61, 6  ;;  %v1878_v2 = vrot.slane %v13170_v63, 6  ;;  %v1803_v55 = vrot.slane %v1801_v10, 7  ;;  %v1881_v27 = vrot.slane %v13168_v61, 7 }
 0x28f   :  { %v1811_v43 = vrot.slane %v1809_v26, 7  ;;  %v1882_v56 = vrot.slane %v13170_v63, 7  ;;  %v1885_v42 = vsel %vm1446_vm6, %v1843_v53, %v1855_v31  ;;  %v1886_v46 = vsel %vm1446_vm6, %v1844_v12, %v1856_v1 }
 0x290   :  { %v15681_v7 = vmax.f32 %v15680_v0, 0.0  ;;  %v15682_v47 = vmax.f32 %v12771_v21, 0.0  ;;  %v15684_v17 = vmax.f32 %v15683_v57, 0.0  ;;  %v1806_v51 = vor.u32 %v1804_v52, %v1803_v55  ;;  %v1928_v0 = vld [vmem:[#allocation2 + $0x28] sm:$0xf] }
 0x291   :  { %v1807_v14 = vrot.slane %v1803_v55, 4  ;;  %v1814_v54 = vor.u32 %v1812_v39, %v1811_v43  ;;  %v1815_v19 = vrot.slane %v1811_v43, 4  ;;  %v1887_v37 = vsel %vm1449_vm7, %v1885_v42, %v1859_v23 }
 0x292   :  { %v1940_v15 = vmax.f32 %v15681_v7, %v15679_v59  ;;  %v1941_v60 = vmax.f32 %v15684_v17, %v15682_v47  ;;  %v1888_v50 = vsel %vm1449_vm7, %v1886_v46, %v1860_v49  ;;  %v15685_v58 = vmax.f32 %v12899_v3, 0.0  ;;  %v1931_v17 = vld [vmem:[#allocation2 + $0x2c] sm:$0x1] }
 0x293   :  { %v15686_v18 = vmax.f32 %v12891_v35, 0.0  ;;  %v15687_v41 = vmax.f32 %v12903_v20, 0.0  ;;  %v15688_v21 = vmax.f32 %v12895_v22, 0.0  ;;  %v1822_v12 = vsel %vm12711_vm13, %v1806_v51, %v1821_v32  ;;  %v1937_v51 = vld [vmem:[#allocation2 + $0x7c] sm:$0x1] }
 0x294   :  { %v1825_v44 = vsel %vm12729_vm14, %v1807_v14, %v1824_v5  ;;  %v1828_v8 = vsel %vm12711_vm13, %v1814_v54, %v1827_v9  ;;  %v1831_v3 = vsel %vm12729_vm14, %v1815_v19, %v1830_v29  ;;  %1823 = vst [vmem:[#allocation2 + $0x20] sm:$0xf] %v1822_v12  ;;  %v1889_v35 = vsel %vm1452_vm8, %v1887_v37, %v1863_v45 }
 0x295   :  { %v1942_v13 = vmax.f32 %v15686_v18, %v15685_v58  ;;  %v1943_v53 = vmax.f32 %v15688_v21, %v15687_v41  ;;  %1826 = vst [vmem:[#allocation2 + $0x24] sm:$0x1] %v1825_v44  ;;  %1829 = vst [vmem:[#allocation2 + $0x70] sm:$0xf] %v1828_v8  ;;  %v1890_v22 = vsel %vm1452_vm8, %v1888_v50, %v1864_v28  ;;  %v1946_v20 = vrot.slane %v1940_v15, 1  ;;  %v15691_v58 = vld [vmem:[#allocation25_spill] sm:$0xff] }
 0x296   :  { %1832 = vst [vmem:[#allocation2 + $0x74] sm:$0x1] %v1831_v3  ;;  %v1891_v63 = vsel %vm1455_vm9, %v1889_v35, %v1869_v40  ;;  %v1892_v36 = vsel %vm1455_vm9, %v1890_v22, %v1870_v33  ;;  %v1954_v24 = vrot.slane %v1941_v60, 1  ;;  %v15689_v19 = vmax.f32 %v12787_v30, 0.0  ;;  %v15695_v22 = vld [vmem:[#allocation30_spill] sm:$0xff] }
 0x297   :  { %v1947_v61 = vrot.slane %v1942_v13, 1  ;;  %v1955_v31 = vrot.slane %v1943_v53, 1  ;;  %v1893_v1 = vsel %vm489_vm0, %v1891_v63, %v1873_v34  ;;  %v1894_v6 = vsel %vm489_vm0, %v1892_v36, %v1874_v62 }
 0x298   :  { %v1950_v4 = vmax.f32 %v1940_v15, %v1946_v20  ;;  %v1895_v49 = vsel %vm490_vm2, %v1893_v1, %v1877_v38  ;;  %v1896_v45 = vsel %vm490_vm2, %v1894_v6, %v1878_v2  ;;  %v13224_v10 = vmax.f32 %v1941_v60, %v1954_v24  ;;  %v1934_v60 = vld [vmem:[#allocation2 + $0x78] sm:$0xf] }
 0x299   :  { %v1951_v23 = vmax.f32 %v1942_v13, %v1947_v61  ;;  %v13226_v28 = vmax.f32 %v1943_v53, %v1955_v31  ;;  %v1897_v40 = vsel %vm1462_vm10, %v1895_v49, %v1881_v27  ;;  %v1898_v33 = vsel %vm1462_vm10, %v1896_v45, %v1882_v56  ;;  %v15693_v13 = vld [vmem:[#allocation22_spill] sm:$0xff]  ;;  %v15697_v61 = vld [vmem:[#allocation31_spill] sm:$0xff]  ;;  %v15701_v24 = vld [vmem:[#allocation28_spill] sm:$0xff] }
 0x29a   :  { %v1962_v52 = vrot.slane %v1950_v4, 1  ;;  %v10381_v39 = vpack.c.bf16 %v1897_v40, %v1897_v40  ;;  %v10382_v34 = vpack.c.bf16 %v1898_v33, %v1898_v33  ;;  %v1966_v32 = vrot.slane %v1950_v4, 2 }
 0x29b   :  { %v1963_v26 = vrot.slane %v1951_v23, 1  ;;  %v1967_v62 = vrot.slane %v1951_v23, 2  ;;  %v1970_v55 = vrot.slane %v1950_v4, 3  ;;  %v1971_v43 = vrot.slane %v1951_v23, 3 }
 0x29c   :  { %v1976_v38 = vrot.slane %v13224_v10, 4  ;;  %v1977_v2 = vrot.slane %v13226_v28, 4  ;;  %v1908_v5 = vshrl.u32 %v10381_v39, 16  ;;  %v1911_v9 = vshll.u32 %v10381_v39, 16 }
 0x29d   :  { %v1916_v29 = vshrl.u32 %v10382_v34, 16  ;;  %v1919_v42 = vshll.u32 %v10382_v34, 16  ;;  %v1980_v27 = vrot.slane %v13224_v10, 5  ;;  %v1981_v56 = vrot.slane %v13226_v28, 5 }
 0x29e   :  { %v1984_v46 = vrot.slane %v13224_v10, 6  ;;  %v1985_v59 = vrot.slane %v13226_v28, 6  ;;  %v1910_v7 = vrot.slane %v1908_v5, 7  ;;  %v1988_v47 = vrot.slane %v13224_v10, 7 }
 0x29f   :  { %v1918_v15 = vrot.slane %v1916_v29, 7  ;;  %v1989_v57 = vrot.slane %v13226_v28, 7  ;;  %v1992_v14 = vsel %vm1446_vm6, %v1950_v4, %v1962_v52  ;;  %v1993_v54 = vsel %vm1446_vm6, %v1951_v23, %v1963_v26 }
 0x2a0   :  { %v15690_v37 = vmax.f32 %v12779_v16, 0.0  ;;  %v15692_v18 = vmax.f32 %v15691_v58, 0.0  ;;  %v15694_v41 = vmax.f32 %v15693_v13, 0.0  ;;  %v1913_v53 = vor.u32 %v1911_v9, %v1910_v7  ;;  %v15699_v16 = vld [vmem:[#allocation23_spill] sm:$0xff] }
 0x2a1   :  { %v1914_v12 = vrot.slane %v1910_v7, 4  ;;  %v1921_v44 = vor.u32 %v1919_v42, %v1918_v15  ;;  %v1922_v8 = vrot.slane %v1918_v15, 4  ;;  %v1994_v3 = vsel %vm1449_vm7, %v1992_v14, %v1966_v32  ;;  %v2035_v58 = vld [vmem:[#allocation2 + $0x30] sm:$0xf] }
 0x2a2   :  { %v2047_v50 = vmax.f32 %v15690_v37, %v15689_v19  ;;  %v2048_v21 = vmax.f32 %v15694_v41, %v15692_v18  ;;  %v1995_v35 = vsel %vm1449_vm7, %v1993_v54, %v1967_v62  ;;  %v15696_v20 = vmax.f32 %v15695_v22, 0.0 }
 0x2a3   :  { %v15698_v30 = vmax.f32 %v15697_v61, 0.0  ;;  %v15700_v36 = vmax.f32 %v15699_v16, 0.0  ;;  %v15702_v31 = vmax.f32 %v15701_v24, 0.0  ;;  %v1929_v6 = vsel %vm12711_vm13, %v1913_v53, %v1928_v0  ;;  %v2038_v53 = vld [vmem:[#allocation2 + $0x34] sm:$0x1] }
 0x2a4   :  { %v1932_v4 = vsel %vm12729_vm14, %v1914_v12, %v1931_v17  ;;  %v1935_v23 = vsel %vm12711_vm13, %v1921_v44, %v1934_v60  ;;  %v1938_v49 = vsel %vm12729_vm14, %v1922_v8, %v1937_v51  ;;  %1930 = vst [vmem:[#allocation2 + $0x28] sm:$0xf] %v1929_v6  ;;  %v1996_v45 = vsel %vm1452_vm8, %v1994_v3, %v1970_v55  ;;  %v2041_v12 = vld [vmem:[#allocation2 + $0x80] sm:$0xf]  ;;  %v2044_v44 = vld [vmem:[#allocation2 + $0x84] sm:$0x1] }
 0x2a5   :  { %v2049_v63 = vmax.f32 %v15698_v30, %v15696_v20  ;;  %v2050_v1 = vmax.f32 %v15702_v31, %v15700_v36  ;;  %1933 = vst [vmem:[#allocation2 + $0x2c] sm:$0x1] %v1932_v4  ;;  %1936 = vst [vmem:[#allocation2 + $0x78] sm:$0xf] %v1935_v23  ;;  %v1997_v10 = vsel %vm1452_vm8, %v1995_v35, %v1971_v43  ;;  %v2053_v28 = vrot.slane %v2047_v50, 1  ;;  %v15703_v35 = vld [vmem:[#allocation26_spill] sm:$0xff] }
 0x2a6   :  { %1939 = vst [vmem:[#allocation2 + $0x7c] sm:$0x1] %v1938_v49  ;;  %v1998_v33 = vsel %vm1455_vm9, %v1996_v45, %v1976_v38  ;;  %v1999_v52 = vsel %vm1455_vm9, %v1997_v10, %v1977_v2  ;;  %v2061_v26 = vrot.slane %v2048_v21, 1  ;;  %v15704_v22 = vmax.f32 %v15703_v35, 0.0  ;;  %v15705_v20 = vld [vmem:[#allocation27_spill] sm:$0xff]  ;;  %v15709_v36 = vld [vmem:[#allocation24_spill] sm:$0xff] }
 0x2a7   :  { %v2054_v40 = vrot.slane %v2049_v63, 1  ;;  %v2062_v39 = vrot.slane %v2050_v1, 1  ;;  %v2000_v34 = vsel %vm489_vm0, %v1998_v33, %v1980_v27  ;;  %v2001_v32 = vsel %vm489_vm0, %v1999_v52, %v1981_v56  ;;  %v2145_v35 = vld [vmem:[#allocation2 + $0x3c] sm:$0x1] }
 0x2a8   :  { %v2057_v62 = vmax.f32 %v2047_v50, %v2053_v28  ;;  %v2002_v9 = vsel %vm490_vm2, %v2000_v34, %v1984_v46  ;;  %v2003_v55 = vsel %vm490_vm2, %v2001_v32, %v1985_v59  ;;  %v13274_v29 = vmax.f32 %v2048_v21, %v2061_v26 }
 0x2a9   :  { %v2058_v5 = vmax.f32 %v2049_v63, %v2054_v40  ;;  %v13276_v43 = vmax.f32 %v2050_v1, %v2062_v39  ;;  %v2004_v38 = vsel %vm1462_vm10, %v2002_v9, %v1988_v47  ;;  %v2005_v2 = vsel %vm1462_vm10, %v2003_v55, %v1989_v57  ;;  %v15707_v63 = vld [vmem:[#allocation29_spill] sm:$0xff] }
 0x2aa   :  { %v2069_v42 = vrot.slane %v2057_v62, 1  ;;  %v10383_v7 = vpack.c.bf16 %v2004_v38, %v2004_v38  ;;  %v10384_v27 = vpack.c.bf16 %v2005_v2, %v2005_v2  ;;  %v2073_v15 = vrot.slane %v2057_v62, 2 }
 0x2ab   :  { %v2070_v0 = vrot.slane %v2058_v5, 1  ;;  %v2074_v56 = vrot.slane %v2058_v5, 2  ;;  %v2077_v17 = vrot.slane %v2057_v62, 3  ;;  %v2078_v60 = vrot.slane %v2058_v5, 3 }
 0x2ac   :  { %v2083_v46 = vrot.slane %v13274_v29, 4  ;;  %v2084_v59 = vrot.slane %v13276_v43, 4  ;;  %v2015_v51 = vshrl.u32 %v10383_v7, 16  ;;  %v2018_v14 = vshll.u32 %v10383_v7, 16 }
 0x2ad   :  { %v2023_v54 = vshrl.u32 %v10384_v27, 16  ;;  %v2026_v19 = vshll.u32 %v10384_v27, 16  ;;  %v2087_v47 = vrot.slane %v13274_v29, 5  ;;  %v2088_v57 = vrot.slane %v13276_v43, 5  ;;  %v13319_v27 = vld [vmem:[#allocation2] sm:$0xf] }
 0x2ae   :  { %v2091_v37 = vrot.slane %v13274_v29, 6  ;;  %v2092_v50 = vrot.slane %v13276_v43, 6  ;;  %v2017_v18 = vrot.slane %v2015_v51, 7  ;;  %v2095_v41 = vrot.slane %v13274_v29, 7 }
 0x2af   :  { %v2025_v13 = vrot.slane %v2023_v54, 7  ;;  %v2096_v21 = vrot.slane %v13276_v43, 7  ;;  %v2099_v8 = vsel %vm1446_vm6, %v2057_v62, %v2069_v42  ;;  %v2100_v3 = vsel %vm1446_vm6, %v2058_v5, %v2070_v0  ;;  %v2281_v54 = vld [vmem:[#allocation2 + $0x4] sm:$0x1] }
 0x2b0   :  { %v15706_v61 = vmax.f32 %v15705_v20, 0.0  ;;  %v15708_v16 = vmax.f32 %v15707_v63, 0.0  ;;  %v15710_v24 = vmax.f32 %v15709_v36, 0.0  ;;  %v2020_v1 = vor.u32 %v2018_v14, %v2017_v18  ;;  %v2148_v63 = vld [vmem:[#allocation2 + $0x88] sm:$0xf] }
 0x2b1   :  { %v2021_v6 = vrot.slane %v2017_v18, 4  ;;  %v2028_v4 = vor.u32 %v2026_v19, %v2025_v13  ;;  %v2029_v23 = vrot.slane %v2025_v13, 4  ;;  %v2101_v49 = vsel %vm1449_vm7, %v2099_v8, %v2073_v15 }
 0x2b2   :  { %v2154_v30 = vmax.f32 %v15706_v61, %v15704_v22  ;;  %v2155_v31 = vmax.f32 %v15710_v24, %v15708_v16  ;;  %v2102_v45 = vsel %vm1449_vm7, %v2100_v3, %v2074_v56  ;;  %v2036_v40 = vsel %vm12711_vm13, %v2020_v1, %v2035_v58  ;;  %v2151_v16 = vld [vmem:[#allocation2 + $0x8c] sm:$0x1] }
 0x2b3   :  { %v2039_v33 = vsel %vm12729_vm14, %v2021_v6, %v2038_v53  ;;  %v2042_v52 = vsel %vm12711_vm13, %v2028_v4, %v2041_v12  ;;  %v2045_v26 = vsel %vm12729_vm14, %v2029_v23, %v2044_v44  ;;  %2037 = vst [vmem:[#allocation2 + $0x30] sm:$0xf] %v2036_v40  ;;  %v2103_v39 = vsel %vm1452_vm8, %v2101_v49, %v2077_v17  ;;  %v2142_v53 = vld [vmem:[#allocation2 + $0x38] sm:$0xf] }
 0x2b4   :  { %v2160_v10 = vrot.slane %v2154_v30, 1  ;;  %v2168_v28 = vrot.slane %v2155_v31, 1  ;;  %2040 = vst [vmem:[#allocation2 + $0x34] sm:$0x1] %v2039_v33  ;;  %2043 = vst [vmem:[#allocation2 + $0x80] sm:$0xf] %v2042_v52  ;;  %v2104_v34 = vsel %vm1452_vm8, %v2102_v45, %v2078_v60  ;;  %v2105_v5 = vsel %vm1455_vm9, %v2103_v39, %v2083_v46 }
 0x2b5   :  { %2046 = vst [vmem:[#allocation2 + $0x84] sm:$0x1] %v2045_v26  ;;  %v2106_v9 = vsel %vm1455_vm9, %v2104_v34, %v2084_v59  ;;  %v2107_v55 = vsel %vm489_vm0, %v2105_v5, %v2087_v47  ;;  %v13328_v47 = vld [vmem:[#allocation2 + $0x8] sm:$0xf]  ;;  %v3364_v5 = vld [vmem:[#allocation2 + $0x10] sm:$0xf] }
 0x2b6   :  { %v2164_v32 = vmax.f32 %v2154_v30, %v2160_v10  ;;  %v13310_v62 = vmax.f32 %v2155_v31, %v2168_v28  ;;  %v2108_v29 = vsel %vm489_vm0, %v2106_v9, %v2088_v57  ;;  %v2109_v2 = vsel %vm490_vm2, %v2107_v55, %v2091_v37  ;;  %v3362_v52 = vld [vmem:[#allocation2 + $0x8] sm:$0xf]  ;;  %v11597_v45 = vld [vmem:[%s15437_s4 + $0x444] ss:$8 sps:$4 sm:$0xff]  }
 0x2b7   :  { %v2110_v42 = vsel %vm490_vm2, %v2108_v29, %v2092_v50  ;;  %v2111_v15 = vsel %vm1462_vm10, %v2109_v2, %v2095_v41  ;;  %v2301_v57 = vshrl.u32 %v13319_v27, 16  ;;  %v2304_v37 = vshll.u32 %v13319_v27, 16  ;;  %v13357_v2 = vld [vmem:[#allocation2 + $0x14] sm:$0x1] }
 0x2b8   :  { %v2176_v43 = vrot.slane %v2164_v32, 1  ;;  %v2180_v38 = vrot.slane %v2164_v32, 2  ;;  %v2184_v0 = vrot.slane %v2164_v32, 3  ;;  %v2190_v7 = vrot.slane %v13310_v62, 4 }
 0x2b9   :  { %v2112_v56 = vsel %vm1462_vm10, %v2110_v42, %v2096_v21  ;;  %v2194_v17 = vrot.slane %v13310_v62, 5  ;;  %v2198_v60 = vrot.slane %v13310_v62, 6  ;;  %v10385_v46 = vpack.c.bf16 %v2111_v15, %v2111_v15  ;;  %v2282_v21 = vld [vmem:[#allocation2 + $0xc] sm:$0x1] }
 0x2ba   :  { %v10386_v59 = vpack.c.bf16 %v2112_v56, %v2112_v56  ;;  %v2202_v51 = vrot.slane %v13310_v62, 7  ;;  %v2206_v14 = vsel %vm1446_vm6, %v2164_v32, %v2176_v43  ;;  %v2310_v50 = vshll.u32 %v2281_v54, 16  ;;  %v13352_v62 = vld [vmem:[#allocation2 + $0xc] sm:$0x1] }
 0x2bb   :  { %v2208_v19 = vsel %vm1449_vm7, %v2206_v14, %v2180_v38  ;;  %v2122_v58 = vshrl.u32 %v10385_v46, 16  ;;  %v2125_v18 = vshll.u32 %v10385_v46, 16  ;;  %v2303_v44 = vrot.slane %v2301_v57, 4  ;;  %v13360_v14 = vld [vmem:[#allocation2 + $0x10] sm:$0xf] }
 0x2bc   :  { %v2130_v13 = vshrl.u32 %v10386_v59, 16  ;;  %v2133_v41 = vshll.u32 %v10386_v59, 16  ;;  %v2210_v12 = vsel %vm1452_vm8, %v2208_v19, %v2184_v0  ;;  %v2306_v8 = vrot.slane %v2304_v37, 5  ;;  %v2249_v37 = vld [vmem:[#allocation2 + $0x40] sm:$0xf] }
 0x2bd   :  { %v2312_v3 = vrot.slane %v2310_v50, 5  ;;  %v2124_v22 = vrot.slane %v2122_v58, 7  ;;  %v2212_v61 = vsel %vm1455_vm9, %v2210_v12, %v2190_v7  ;;  %v2315_v30 = vshrl.u32 %v13328_v47, 16 }
 0x2be   :  { %v2132_v20 = vrot.slane %v2130_v13, 7  ;;  %v2214_v36 = vsel %vm489_vm0, %v2212_v61, %v2194_v17  ;;  %v2307_v24 = vor.u32 %v2306_v8, %v2303_v44  ;;  %v2318_v31 = vshll.u32 %v13328_v47, 16  ;;  %v2283_v44 = vld [vmem:[#allocation2 + $0x14] sm:$0x1] }
 0x2bf   :  { %v2324_v1 = vshll.u32 %v2282_v21, 16  ;;  %v2127_v6 = vor.u32 %v2125_v18, %v2124_v22  ;;  %v2128_v4 = vrot.slane %v2124_v22, 4  ;;  %v2216_v10 = vsel %vm490_vm2, %v2214_v36, %v2198_v60  ;;  %v2252_v21 = vld [vmem:[#allocation2 + $0x44] sm:$0x1] }
 0x2c0   :  { %v2135_v23 = vor.u32 %v2133_v41, %v2132_v20  ;;  %v2136_v49 = vrot.slane %v2132_v20, 4  ;;  %v2308_v28 = vrot.slane %v2307_v24, 4  ;;  %v2317_v40 = vrot.slane %v2315_v30, 4  ;;  %v13365_v41 = vld [vmem:[#allocation2 + $0x18] sm:$0xf] }
 0x2c1   :  { %v2320_v33 = vrot.slane %v2318_v31, 5  ;;  %v2143_v26 = vsel %vm12711_vm13, %v2127_v6, %v2142_v53  ;;  %v2146_v39 = vsel %vm12729_vm14, %v2128_v4, %v2145_v35  ;;  %v2218_v9 = vsel %vm1462_vm10, %v2216_v10, %v2202_v51  ;;  %v2284_v20 = vld [vmem:[#allocation2 + $0x1c] sm:$0x1]  ;;  %v3366_v24 = vld [vmem:[#allocation2 + $0x18] sm:$0xf] }
 0x2c2   :  { %v2149_v34 = vsel %vm12711_vm13, %v2135_v23, %v2148_v63  ;;  %v2152_v32 = vsel %vm12729_vm14, %v2136_v49, %v2151_v16  ;;  %2144 = vst [vmem:[#allocation2 + $0x38] sm:$0xf] %v2143_v26  ;;  %2147 = vst [vmem:[#allocation2 + $0x3c] sm:$0x1] %v2146_v39  ;;  %v2313_v55 = vsel %vm13339_vm3, %v2308_v28, %v2312_v3  ;;  %v2326_v38 = vrot.slane %v2324_v1, 5 }
 0x2c3   :  { %2150 = vst [vmem:[#allocation2 + $0x88] sm:$0xf] %v2149_v34  ;;  %2153 = vst [vmem:[#allocation2 + $0x8c] sm:$0x1] %v2152_v32  ;;  %v2321_v29 = vor.u32 %v2320_v33, %v2317_v40  ;;  %v10387_v43 = vpack.c.bf16 %v2218_v9, %v2218_v9  ;;  %v3395_v42 = vshrl.u32 %v3362_v52, 16  ;;  %v3398_v0 = vshll.u32 %v3362_v52, 16 }
 0x2c4   :  { %v3404_v15 = vshll.u32 %v13352_v62, 16  ;;  %v3409_v56 = vshrl.u32 %v3364_v5, 16  ;;  %v3412_v17 = vshll.u32 %v3364_v5, 16  ;;  %v3418_v57 = vshll.u32 %v13357_v2, 16  ;;  %v3368_v23 = vld [vmem:[#allocation2 + $0x20] sm:$0xf] }
 0x2c5   :  { %v2322_v7 = vrot.slane %v2321_v29, 4  ;;  %v2229_v60 = vshrl.u32 %v10387_v43, 16  ;;  %v3397_v46 = vrot.slane %v3395_v42, 4  ;;  %v3400_v59 = vrot.slane %v3398_v0, 5  ;;  %v13380_v33 = vld [vmem:[#allocation2 + $0x1c] sm:$0x1] }
 0x2c6   :  { %v3411_v54 = vrot.slane %v3409_v56, 4  ;;  %v3414_v19 = vrot.slane %v3412_v17, 5  ;;  %v2232_v58 = vshll.u32 %v10387_v43, 16  ;;  %v3406_v53 = vrot.slane %v3404_v15, 5  ;;  %v13382_v26 = vld [vmem:[#allocation2 + $0x24] sm:$0x1] }
 0x2c7   :  { %v2327_v51 = vsel %vm13339_vm3, %v2322_v7, %v2326_v38  ;;  %v2231_v50 = vrot.slane %v2229_v60, 7  ;;  %v3401_v13 = vor.u32 %v3400_v59, %v3397_v46  ;;  %v2329_v8 = vshrl.u32 %v13360_v14, 16  ;;  %v13389_v0 = vld [vmem:[#allocation2 + $0x24] sm:$0x1]  ;;  %v13391_v60 = vld [vmem:[#allocation2 + $0x28] sm:$0xf] }
 0x2c8   :  { %v9625_v18 = vcombine.low %v2313_v55, %v2327_v51  ;;  %v3415_v12 = vor.u32 %v3414_v19, %v3411_v54  ;;  %v2332_v61 = vshll.u32 %v13360_v14, 16  ;;  %v3420_v63 = vrot.slane %v3418_v57, 5  ;;  %v13385_v55 = vld [vmem:[#allocation2 + $0x20] sm:$0xf]  ;;  %15713 = vst [vmem:[#allocation20_spill] sm:$0xff] %v13389_v0 }
 0x2c9   :  { %v2234_v3 = vor.u32 %v2232_v58, %v2231_v50  ;;  %v2235_v35 = vrot.slane %v2231_v50, 4  ;;  %v3402_v22 = vrot.slane %v3401_v13, 4  ;;  %v2331_v16 = vrot.slane %v2329_v8, 4  ;;  %v13397_v50 = vld [vmem:[#allocation2 + $0x2c] sm:$0x1] }
 0x2ca   :  { %10678 = vmatprep.mubr.msk.bf16.mxu0 %vm785_vm5, %v9625_v18  ;;  %v3416_v30 = vrot.slane %v3415_v12, 4  ;;  %v2343_v36 = vshrl.u32 %v13365_v41, 16  ;;  %v2334_v4 = vrot.slane %v2332_v61, 5  ;;  %v2338_v10 = vshll.u32 %v2283_v44, 16  ;;  %15714 = vst [vmem:[#allocation32_spill] sm:$0xff] %v13397_v50 }
 0x2cb   :  { %v2250_v31 = vsel %vm12711_vm13, %v2234_v3, %v2249_v37  ;;  %v2253_v1 = vsel %vm12729_vm14, %v2235_v35, %v2252_v21  ;;  %v3407_v6 = vsel %vm13339_vm3, %v3402_v22, %v3406_v53  ;;  %v2346_v40 = vshll.u32 %v13365_v41, 16  ;;  %v3370_v12 = vld [vmem:[#allocation2 + $0x28] sm:$0xf]  ;;  %v13405_v22 = vld [vmem:[#allocation2 + $0x2c] sm:$0x1] }
 0x2cc   :  { %2251 = vst [vmem:[#allocation2 + $0x40] sm:$0xf] %v2250_v31  ;;  %2254 = vst [vmem:[#allocation2 + $0x44] sm:$0x1] %v2253_v1  ;;  %v3421_v49 = vsel %vm13339_vm3, %v3416_v30, %v3420_v63  ;;  %v2345_v28 = vrot.slane %v2343_v36, 4  ;;  %v2335_v52 = vor.u32 %v2334_v4, %v2331_v16  ;;  %v2352_v48 = vshll.u32 %v2284_v20, 16 }
 0x2cd   :  { %v9725_v11 = vcombine.low %v3407_v6, %v3421_v49  ;;  %v3423_v39 = vshrl.u32 %v3366_v24, 16  ;;  %v2348_v32 = vrot.slane %v2346_v40, 5  ;;  %v3426_v5 = vshll.u32 %v3366_v24, 16  ;;  %v3372_v16 = vld [vmem:[#allocation2 + $0x30] sm:$0xf]  ;;  %v11304_v36 = vld [vmem:[%s15431_s2 + $0x8] sm:$0xff]  }
 0x2ce   :  { %v3437_v9 = vshrl.u32 %v3368_v23, 16  ;;  %v2336_v29 = vrot.slane %v2335_v52, 4  ;;  %v3432_v38 = vshll.u32 %v13380_v33, 16  ;;  %v3440_v42 = vshll.u32 %v3368_v23, 16  ;;  %v13414_v4 = vld [vmem:[#allocation2 + $0x34] sm:$0x1] }
 0x2cf   :  { %10758 = vmatprep.mubr.msk.bf16.mxu1 %vm785_vm5, %v9725_v11  ;;  %v3425_v43 = vrot.slane %v3423_v39, 4  ;;  %v2340_v7 = vrot.slane %v2338_v10, 5  ;;  %v2349_v15 = vor.u32 %v2348_v32, %v2345_v28  ;;  %v3428_v56 = vrot.slane %v3426_v5, 5  ;;  %v11301_v23 = vld [vmem:[%s15431_s2 + $0x58] sm:$0xff]   ;;  %v13422_v11 = vld [vmem:[#allocation2 + $0x30] sm:$0xf] }
 0x2d0   :  { %v3439_v17 = vrot.slane %v3437_v9, 4  ;;  %v2354_v59 = vrot.slane %v2352_v48, 5  ;;  %v3442_v51 = vrot.slane %v3440_v42, 5  ;;  %v3446_v54 = vshll.u32 %v13382_v26, 16  ;;  %v13429_v5 = vld [vmem:[%s15431_s2 + $0x20] sm:$0xff]  }
 0x2d1   :  { %v2341_v19 = vsel %vm13339_vm3, %v2336_v29, %v2340_v7  ;;  %v2350_v57 = vrot.slane %v2349_v15, 4  ;;  %v3429_v37 = vor.u32 %v3428_v56, %v3425_v43  ;;  %v2357_v58 = vshrl.u32 %v13385_v55, 16  ;;  %v13431_v42 = vld [vmem:[#allocation2 + $0x34] sm:$0x1]  ;;  %v3388_v46 = vld [vmem:[#allocation2 + $0x80] sm:$0xf] }
 0x2d2   :  { %v3434_v18 = vrot.slane %v3432_v38, 5  ;;  %v3443_v13 = vor.u32 %v3442_v51, %v3439_v17  ;;  %v2360_v21 = vshll.u32 %v13385_v55, 16  ;;  %v2366_v53 = vshll.u32 %v13389_v0, 16  ;;  %15715 = vst [vmem:[#allocation33_spill] sm:$0xff] %v13431_v42 }
 0x2d3   :  { %v2355_v44 = vsel %vm13339_vm3, %v2350_v57, %v2354_v59  ;;  %v3430_v8 = vrot.slane %v3429_v37, 4  ;;  %v2359_v3 = vrot.slane %v2357_v58, 4  ;;  %v2371_v35 = vshrl.u32 %v13391_v60, 16  ;;  %v13434_v59 = vld [vmem:[#allocation2 + $0x38] sm:$0xf] }
 0x2d4   :  { %v9626_v20 = vcombine.low %v2341_v19, %v2355_v44  ;;  %v3444_v61 = vrot.slane %v3443_v13, 4  ;;  %v3448_v30 = vrot.slane %v3446_v54, 5  ;;  %v2362_v63 = vrot.slane %v2360_v21, 5  ;;  %v13440_v57 = vld [vmem:[#allocation2 + $0x3c] sm:$0x1] }
 0x2d5   :  { %v3435_v24 = vsel %vm13339_vm3, %v3430_v8, %v3434_v18  ;;  %v2373_v31 = vrot.slane %v2371_v35, 4  ;;  %v2374_v1 = vshll.u32 %v13391_v60, 16  ;;  %v2380_v6 = vshll.u32 %v13397_v50, 16  ;;  %15716 = vst [vmem:[#allocation5_spill] sm:$0xff] %v13440_v57 }
 0x2d6   :  { %10679 = vmatmul.mubr.msk.bf16.vlgmr.msra.gmra.mrb[64].mxu0 %vm785_vm5, %v9626_v20  ;;  %v3449_v49 = vsel %vm13339_vm3, %v3444_v61, %v3448_v30  ;;  %v2363_v10 = vor.u32 %v2362_v63, %v2359_v3  ;;  %v3451_v28 = vshrl.u32 %v3370_v12, 16  ;;  %v3454_v40 = vshll.u32 %v3370_v12, 16  ;;  %v3374_v63 = vld [vmem:[#allocation2 + $0x38] sm:$0xf] }
 0x2d7   :  { %v9726_v52 = vcombine.low %v3435_v24, %v3449_v49  ;;  %v2368_v48 = vrot.slane %v2366_v53, 5  ;;  %v2376_v39 = vrot.slane %v2374_v1, 5  ;;  %v3460_v32 = vshll.u32 %v13405_v22, 16  ;;  %10695 = vmatpush3.bf16.msra.mxu0 %v13179_v25  ;;  %v11617_v25 = vld [vmem:[%s15431_s2 + $0x50] sm:$0xff]   ;;  %v13449_v53 = vld [vmem:[%s15431_s2 + $0x60] sm:$0xff]  }
 0x2d8   :  { %v2364_v9 = vrot.slane %v2363_v10, 4  ;;  %v3453_v29 = vrot.slane %v3451_v28, 4  ;;  %v3456_v43 = vrot.slane %v3454_v40, 5  ;;  %v3465_v38 = vshrl.u32 %v3372_v16, 16  ;;  %10696 = vmatprep.subr.bf16.mxu0 %v11304_v36 }
 0x2d9   :  { %10759 = vmatmul.mubr.msk.bf16.vlgmr.msra.gmra.mrb[0].mxu1 %vm785_vm5, %v9726_v52  ;;  %v2377_v7 = vor.u32 %v2376_v39, %v2373_v31  ;;  %v2382_v15 = vrot.slane %v2380_v6, 5  ;;  %v3462_v56 = vrot.slane %v3460_v32, 5  ;;  %v3468_v17 = vshll.u32 %v3372_v16, 16  ;;  %v3376_v16 = vld [vmem:[#allocation2 + $0x40] sm:$0xf] }
 0x2da   :  { %10775 = vmatpush3.bf16.msra.mxu1 %v11617_v25  ;;  %v3457_v51 = vor.u32 %v3456_v43, %v3453_v29  ;;  %v3467_v54 = vrot.slane %v3465_v38, 4  ;;  %v3474_v19 = vshll.u32 %v13414_v4, 16  ;;  %v2385_v37 = vshrl.u32 %v13422_v11, 16  ;;  %v13459_v6 = vld [vmem:[#allocation2 + $0x3c] sm:$0x1] }
 0x2db   :  { %v2369_v58 = vsel %vm13339_vm3, %v2364_v9, %v2368_v48  ;;  %v2378_v18 = vrot.slane %v2377_v7, 4  ;;  %v3470_v13 = vrot.slane %v3468_v17, 5  ;;  %v2388_v21 = vshll.u32 %v13422_v11, 16  ;;  %10776 = vmatprep.subr.bf16.mxu1 %v11301_v23  ;;  %10697 = vmatpush3.bf16.msra.mxu0 %v11304_v36  ;;  %v13466_v38 = vld [vmem:[#allocation2 + $0x44] sm:$0x1] }
 0x2dc   :  { %v3458_v12 = vrot.slane %v3457_v51, 4  ;;  %v2387_v44 = vrot.slane %v2385_v37, 4  ;;  %v2394_v8 = vshll.u32 %v13431_v42, 16  ;;  %v2399_v3 = vshrl.u32 %v13434_v59, 16  ;;  %10714 = vmatprep.subr.bf16.mxu0 %v13429_v5  ;;  %v13469_v7 = vld [vmem:[#allocation2 + $0x50] sm:$0xf] }
 0x2dd   :  { %v2383_v35 = vsel %vm13339_vm3, %v2378_v18, %v2382_v15  ;;  %v3471_v20 = vor.u32 %v3470_v13, %v3467_v54  ;;  %v2390_v61 = vrot.slane %v2388_v21, 5  ;;  %v2402_v30 = vshll.u32 %v13434_v59, 16  ;;  %v13471_v51 = vld [vmem:[#allocation2 + $0x58] sm:$0xf]  ;;  %v13475_v18 = vld [vmem:[#allocation2 + $0x54] sm:$0x1] }
 0x2de   :  { %v9627_v36 = vcombine.low %v2369_v58, %v2383_v35  ;;  %v3463_v24 = vsel %vm13339_vm3, %v3458_v12, %v3462_v56  ;;  %v3476_v31 = vrot.slane %v3474_v19, 5  ;;  %v2401_v1 = vrot.slane %v2399_v3, 4  ;;  %10777 = vmatpush3.bf16.msra.mxu1 %v11301_v23  ;;  %v13477_v13 = vld [vmem:[#allocation2 + $0x5c] sm:$0x1]  ;;  %v3378_v21 = vld [vmem:[#allocation2 + $0x58] sm:$0xf] }
 0x2df   :  { %v3472_v49 = vrot.slane %v3471_v20, 4  ;;  %v2391_v10 = vor.u32 %v2390_v61, %v2387_v44  ;;  %v2404_v28 = vrot.slane %v2402_v30, 5  ;;  %v2408_v40 = vshll.u32 %v13440_v57, 16  ;;  %10794 = vmatprep.subr.bf16.mxu1 %v13449_v53  ;;  %v13483_v35 = vld [vmem:[#allocation2 + $0x5c] sm:$0x1] }
 0x2e0   :  { %10682 = vmatprep.mubr.msk.bf16.mxu0 %vm785_vm5, %v9627_v36  ;;  %v2396_v52 = vrot.slane %v2394_v8, 5  ;;  %v3479_v48 = vshrl.u32 %v3374_v63, 16  ;;  %v3482_v39 = vshll.u32 %v3374_v63, 16  ;;  %v3493_v32 = vshrl.u32 %v3376_v16, 16  ;;  %v13550_v42 = vld [vmem:[#allocation2 + $0x7c] sm:$0x1] }
 0x2e1   :  { %v3477_v9 = vsel %vm13339_vm3, %v3472_v49, %v3476_v31  ;;  %v2392_v29 = vrot.slane %v2391_v10, 4  ;;  %v2405_v43 = vor.u32 %v2404_v28, %v2401_v1  ;;  %v3488_v23 = vshll.u32 %v13459_v6, 16 }
 0x2e2   :  { %v9727_v15 = vcombine.low %v3463_v24, %v3477_v9  ;;  %v2410_v56 = vrot.slane %v2408_v40, 5  ;;  %v3481_v17 = vrot.slane %v3479_v48, 4  ;;  %v3484_v25 = vrot.slane %v3482_v39, 5  ;;  %v3380_v40 = vld [vmem:[#allocation2 + $0x60] sm:$0xf] }
 0x2e3   :  { %v2397_v54 = vsel %vm13339_vm3, %v2392_v29, %v2396_v52  ;;  %v2406_v19 = vrot.slane %v2405_v43, 4  ;;  %v3495_v37 = vrot.slane %v3493_v32, 4  ;;  %v3496_v58 = vshll.u32 %v3376_v16, 16  ;;  %v13494_v43 = vld [vmem:[#allocation2 + $0x64] sm:$0x1] }
 0x2e4   :  { %10762 = vmatprep.mubr.msk.bf16.mxu1 %vm785_vm5, %v9727_v15  ;;  %v3485_v12 = vor.u32 %v3484_v25, %v3481_v17  ;;  %v3502_v44 = vshll.u32 %v13466_v38, 16  ;;  %v2413_v8 = vshrl.u32 %v13469_v7, 16  ;;  %v2416_v3 = vshll.u32 %v13469_v7, 16 }
 0x2e5   :  { %v2411_v20 = vsel %vm13339_vm3, %v2406_v19, %v2410_v56  ;;  %v3490_v61 = vrot.slane %v3488_v23, 5  ;;  %v3498_v30 = vrot.slane %v3496_v58, 5  ;;  %v2427_v63 = vshrl.u32 %v13471_v51, 16  ;;  %v13497_v19 = vld [vmem:[#allocation2 + $0x60] sm:$0xf] }
 0x2e6   :  { %v9628_v16 = vcombine.low %v2397_v54, %v2411_v20  ;;  %v3486_v36 = vrot.slane %v3485_v12, 4  ;;  %v2415_v24 = vrot.slane %v2413_v8, 4  ;;  %v2422_v31 = vshll.u32 %v13475_v18, 16  ;;  %v13501_v8 = vld [vmem:[#allocation2 + $0x64] sm:$0x1] }
 0x2e7   :  { %v3499_v1 = vor.u32 %v3498_v30, %v3495_v37  ;;  %v3504_v49 = vrot.slane %v3502_v44, 5  ;;  %v2418_v10 = vrot.slane %v2416_v3, 5  ;;  %v2429_v28 = vrot.slane %v2427_v63, 4  ;;  %v13503_v30 = vld [vmem:[#allocation2 + $0x68] sm:$0xf] }
 0x2e8   :  { %10683 = vmatmul.mubr.msk.bf16.gmra.mrb[68].mxu0 %vm785_vm5, %v9628_v16  ;;  %v3491_v52 = vsel %vm13339_vm3, %v3486_v36, %v3490_v61  ;;  %v2430_v48 = vshll.u32 %v13471_v51, 16  ;;  %v2436_v39 = vshll.u32 %v13477_v13, 16  ;;  %v3507_v32 = vshrl.u32 %v3378_v21, 16 }
 0x2e9   :  { %v3500_v9 = vrot.slane %v3499_v1, 4  ;;  %v2419_v29 = vor.u32 %v2418_v10, %v2415_v24  ;;  %v3510_v23 = vshll.u32 %v3378_v21, 16  ;;  %v3516_v15 = vshll.u32 %v13483_v35, 16  ;;  %v13510_v10 = vld [vmem:[#allocation2 + $0x6c] sm:$0x1] }
 0x2ea   :  { %v2424_v56 = vrot.slane %v2422_v31, 5  ;;  %v2432_v17 = vrot.slane %v2430_v48, 5  ;;  %v3509_v25 = vrot.slane %v3507_v32, 4  ;;  %v3521_v54 = vshrl.u32 %v3380_v40, 16  ;;  %v3382_v32 = vld [vmem:[#allocation2 + $0x68] sm:$0xf] }
 0x2eb   :  { %v3505_v37 = vsel %vm13339_vm3, %v3500_v9, %v3504_v49  ;;  %v2420_v58 = vrot.slane %v2419_v29, 4  ;;  %v2438_v12 = vrot.slane %v2436_v39, 5  ;;  %v3512_v44 = vrot.slane %v3510_v23, 5 }
 0x2ec   :  { %v9728_v3 = vcombine.low %v3491_v52, %v3505_v37  ;;  %v2433_v20 = vor.u32 %v2432_v17, %v2429_v28  ;;  %v3523_v61 = vrot.slane %v3521_v54, 4  ;;  %v3524_v21 = vshll.u32 %v3380_v40, 16 }
 0x2ed   :  { %v3513_v63 = vor.u32 %v3512_v44, %v3509_v25  ;;  %v3518_v16 = vrot.slane %v3516_v15, 5  ;;  %v3530_v36 = vshll.u32 %v13494_v43, 16  ;;  %v2441_v24 = vshrl.u32 %v13497_v19, 16 }
 0x2ee   :  { %10763 = vmatmul.mubr.msk.bf16.gmra.mrb[4].mxu1 %vm785_vm5, %v9728_v3  ;;  %v2425_v31 = vsel %vm13339_vm3, %v2420_v58, %v2424_v56  ;;  %v2434_v1 = vrot.slane %v2433_v20, 4  ;;  %v3526_v49 = vrot.slane %v3524_v21, 5  ;;  %v2444_v28 = vshll.u32 %v13497_v19, 16  ;;  %v3384_v56 = vld [vmem:[#allocation2 + $0x70] sm:$0xf] }
 0x2ef   :  { %v3514_v40 = vrot.slane %v3513_v63, 4  ;;  %v2443_v52 = vrot.slane %v2441_v24, 4  ;;  %v2450_v48 = vshll.u32 %v13501_v8, 16  ;;  %v2455_v39 = vshrl.u32 %v13503_v30, 16  ;;  %v13520_v58 = vld [vmem:[#allocation2 + $0x6c] sm:$0x1] }
 0x2f0   :  { %v2439_v9 = vsel %vm13339_vm3, %v2434_v1, %v2438_v12  ;;  %v3527_v29 = vor.u32 %v3526_v49, %v3523_v61  ;;  %v3532_v23 = vrot.slane %v3530_v36, 5  ;;  %v2446_v15 = vrot.slane %v2444_v28, 5  ;;  %v13524_v63 = vld [vmem:[#allocation2 + $0x74] sm:$0x1]  ;;  %v13529_v28 = vld [vmem:[#allocation2 + $0x70] sm:$0xf] }
 0x2f1   :  { %v9629_v17 = vcombine.low %v2425_v31, %v2439_v9  ;;  %v3519_v25 = vsel %vm13339_vm3, %v3514_v40, %v3518_v16  ;;  %v2457_v54 = vrot.slane %v2455_v39, 4  ;;  %v2458_v37 = vshll.u32 %v13503_v30, 16 }
 0x2f2   :  { %v3528_v44 = vrot.slane %v3527_v29, 4  ;;  %v2447_v3 = vor.u32 %v2446_v15, %v2443_v52  ;;  %v2464_v20 = vshll.u32 %v13510_v10, 16  ;;  %v3535_v21 = vshrl.u32 %v3382_v32, 16  ;;  %v13531_v29 = vld [vmem:[#allocation2 + $0x78] sm:$0xf] }
 0x2f3   :  { %10686 = vmatprep.mubr.msk.bf16.mxu0 %vm785_vm5, %v9629_v17  ;;  %v2452_v12 = vrot.slane %v2450_v48, 5  ;;  %v2460_v61 = vrot.slane %v2458_v37, 5  ;;  %v3538_v36 = vshll.u32 %v3382_v32, 16  ;;  %v3549_v24 = vshrl.u32 %v3384_v56, 16  ;;  %v13533_v48 = vld [vmem:[#allocation2 + $0x74] sm:$0x1] }
 0x2f4   :  { %v3533_v16 = vsel %vm13339_vm3, %v3528_v44, %v3532_v23  ;;  %v2448_v31 = vrot.slane %v2447_v3, 4  ;;  %v3537_v1 = vrot.slane %v3535_v21, 4  ;;  %v3544_v49 = vshll.u32 %v13520_v58, 16  ;;  %15717 = vst [vmem:[#allocation6_spill] sm:$0xff] %v13533_v48  ;;  %v13542_v21 = vld [vmem:[#allocation2 + $0x7c] sm:$0x1] }
 0x2f5   :  { %v9729_v40 = vcombine.low %v3519_v25, %v3533_v16  ;;  %v2461_v52 = vor.u32 %v2460_v61, %v2457_v54  ;;  %v2466_v39 = vrot.slane %v2464_v20, 5  ;;  %v3540_v9 = vrot.slane %v3538_v36, 5  ;;  %15718 = vst [vmem:[#allocation9_spill] sm:$0xff] %v13542_v21 }
 0x2f6   :  { %v2453_v32 = vsel %vm13339_vm3, %v2448_v31, %v2452_v12  ;;  %v3551_v15 = vrot.slane %v3549_v24, 4  ;;  %v3552_v17 = vshll.u32 %v3384_v56, 16  ;;  %v3558_v23 = vshll.u32 %v13524_v63, 16  ;;  %v3386_v31 = vld [vmem:[#allocation2 + $0x78] sm:$0xf] }
 0x2f7   :  { %10766 = vmatprep.mubr.msk.bf16.mxu1 %vm785_vm5, %v9729_v40  ;;  %v2462_v37 = vrot.slane %v2461_v52, 4  ;;  %v3541_v44 = vor.u32 %v3540_v9, %v3537_v1  ;;  %v2469_v25 = vshrl.u32 %v13529_v28, 16  ;;  %v2472_v54 = vshll.u32 %v13529_v28, 16 }
 0x2f8   :  { %v3554_v20 = vrot.slane %v3552_v17, 5  ;;  %v2478_v61 = vshll.u32 %v13533_v48, 16  ;;  %v2483_v12 = vshrl.u32 %v13531_v29, 16  ;;  %v3546_v40 = vrot.slane %v3544_v49, 5 }
 0x2f9   :  { %v2467_v56 = vsel %vm13339_vm3, %v2462_v37, %v2466_v39  ;;  %v3542_v36 = vrot.slane %v3541_v44, 4  ;;  %v2471_v24 = vrot.slane %v2469_v25, 4  ;;  %v2474_v16 = vrot.slane %v2472_v54, 5  ;;  %v13555_v44 = vld [vmem:[#allocation2 + $0x84] sm:$0x1] }
 0x2fa   :  { %v9630_v1 = vcombine.low %v2453_v32, %v2467_v56  ;;  %v3555_v52 = vor.u32 %v3554_v20, %v3551_v15  ;;  %v3560_v9 = vrot.slane %v3558_v23, 5  ;;  %v2485_v17 = vrot.slane %v2483_v12, 4  ;;  %v13557_v20 = vld [vmem:[#allocation2 + $0x80] sm:$0xf] }
 0x2fb   :  { %v2475_v3 = vor.u32 %v2474_v16, %v2471_v24  ;;  %v2486_v34 = vshll.u32 %v13531_v29, 16  ;;  %v2492_v57 = vshll.u32 %v13542_v21, 16  ;;  %v3547_v39 = vsel %vm13339_vm3, %v3542_v36, %v3546_v40  ;;  %15719 = vst [vmem:[#allocation13_spill] sm:$0xff] %v13557_v20 }
 0x2fc   :  { %10687 = vmatmul.mubr.msk.bf16.gmra.mrb[72].mxu0 %vm785_vm5, %v9630_v1  ;;  %v3556_v37 = vrot.slane %v3555_v52, 4  ;;  %v3563_v49 = vshrl.u32 %v3386_v31, 16  ;;  %v3566_v32 = vshll.u32 %v3386_v31, 16  ;;  %v2480_v23 = vrot.slane %v2478_v61, 5  ;;  %v13562_v1 = vld [vmem:[#allocation2 + $0x88] sm:$0xf] }
 0x2fd   :  { %v2476_v15 = vrot.slane %v2475_v3, 4  ;;  %v2488_v25 = vrot.slane %v2486_v34, 5  ;;  %v3577_v54 = vshrl.u32 %v3388_v46, 16  ;;  %v3572_v16 = vshll.u32 %v13550_v42, 16  ;;  %15720 = vst [vmem:[#allocation15_spill] sm:$0xff] %v13562_v1 }
 0x2fe   :  { %v3561_v12 = vsel %vm13339_vm3, %v3556_v37, %v3560_v9  ;;  %v3565_v56 = vrot.slane %v3563_v49, 4  ;;  %v3568_v24 = vrot.slane %v3566_v32, 5  ;;  %v2494_v52 = vrot.slane %v2492_v57, 5  ;;  %v13565_v61 = vld [vmem:[#allocation2 + $0x84] sm:$0x1] }
 0x2ff   :  { %v9730_v36 = vcombine.low %v3547_v39, %v3561_v12  ;;  %v2489_v40 = vor.u32 %v2488_v25, %v2485_v17  ;;  %v3579_v50 = vrot.slane %v3577_v54, 4  ;;  %v3580_v3 = vshll.u32 %v3388_v46, 16  ;;  %15721 = vst [vmem:[#allocation12_spill] sm:$0xff] %v13565_v61  ;;  %v13571_v49 = vld [vmem:[#allocation2 + $0x8c] sm:$0x1] }
 0x300   :  { %v3569_v31 = vor.u32 %v3568_v24, %v3565_v56  ;;  %v3586_v34 = vshll.u32 %v13555_v44, 16  ;;  %v2497_v0 = vshrl.u32 %v13557_v20, 16  ;;  %v2481_v9 = vsel %vm13339_vm3, %v2476_v15, %v2480_v23  ;;  %15722 = vst [vmem:[#allocation11_spill] sm:$0xff] %v13571_v49  ;;  %v3390_v54 = vld [vmem:[#allocation2 + $0x88] sm:$0xf] }
 0x301   :  { %10767 = vmatmul.mubr.msk.bf16.gmra.mrb[8].mxu1 %vm785_vm5, %v9730_v36  ;;  %v2490_v37 = vrot.slane %v2489_v40, 4  ;;  %v2500_v17 = vshll.u32 %v13557_v20, 16  ;;  %v2511_v57 = vshrl.u32 %v13562_v1, 16  ;;  %v3574_v46 = vrot.slane %v3572_v16, 5  ;;  %v3392_v15 = vld [vmem:[#allocation2 + $0x90] sm:$0xf] }
 0x302   :  { %v3570_v39 = vrot.slane %v3569_v31, 4  ;;  %v3582_v32 = vrot.slane %v3580_v3, 5  ;;  %v2499_v25 = vrot.slane %v2497_v0, 4  ;;  %v3588_v56 = vrot.slane %v3586_v34, 5  ;;  %v13580_v16 = vld [vmem:[#allocation2 + $0x8c] sm:$0x1] }
 0x303   :  { %v2495_v12 = vsel %vm13339_vm3, %v2490_v37, %v2494_v52  ;;  %v2502_v24 = vrot.slane %v2500_v17, 5  ;;  %v2506_v36 = vshll.u32 %v13565_v61, 16  ;;  %v2513_v21 = vrot.slane %v2511_v57, 4  ;;  %v13585_v57 = vld [vmem:[#allocation2 + $0x94] sm:$0x1] }
 0x304   :  { %v9631_v23 = vcombine.low %v2481_v9, %v2495_v12  ;;  %v3583_v40 = vor.u32 %v3582_v32, %v3579_v50  ;;  %v2514_v20 = vshll.u32 %v13562_v1, 16  ;;  %v2520_v31 = vshll.u32 %v13571_v49, 16  ;;  %v3797_v49 = vld [vmem:[#allocation2 + $0x10] sm:$0xe] }
 0x305   :  { %v2503_v48 = vor.u32 %v2502_v24, %v2499_v25  ;;  %v3591_v0 = vshrl.u32 %v3390_v54, 16  ;;  %v3594_v3 = vshll.u32 %v3390_v54, 16  ;;  %v3575_v52 = vsel %vm13339_vm3, %v3570_v39, %v3574_v46 }
 0x306   :  { %10690 = vmatprep.mubr.msk.bf16.mxu0 %vm785_vm5, %v9631_v23  ;;  %v3584_v34 = vrot.slane %v3583_v40, 4  ;;  %v2516_v37 = vrot.slane %v2514_v20, 5  ;;  %v3605_v17 = vshrl.u32 %v3392_v15, 16  ;;  %v2508_v50 = vrot.slane %v2506_v36, 5  ;;  %v3796_v23 = vld [vmem:[#allocation2 + $0x8] sm:$0xe] }
 0x307   :  { %v2504_v9 = vrot.slane %v2503_v48, 4  ;;  %v3593_v32 = vrot.slane %v3591_v0, 4  ;;  %v3596_v25 = vrot.slane %v3594_v3, 5  ;;  %v2522_v1 = vrot.slane %v2520_v31, 5  ;;  %v3798_v40 = vld [vmem:[#allocation2 + $0x18] sm:$0xe] }
 0x308   :  { %v3589_v12 = vsel %vm13339_vm3, %v3584_v34, %v3588_v56  ;;  %v2517_v24 = vor.u32 %v2516_v37, %v2513_v21  ;;  %v3600_v54 = vshll.u32 %v13580_v16, 16  ;;  %v3607_v46 = vrot.slane %v3605_v17, 4 }
 0x309   :  { %v9731_v61 = vcombine.low %v3575_v52, %v3589_v12  ;;  %v3597_v39 = vor.u32 %v3596_v25, %v3593_v32  ;;  %v3608_v20 = vshll.u32 %v3392_v15, 16  ;;  %v2509_v48 = vsel %vm13339_vm3, %v2504_v9, %v2508_v50  ;;  %v3799_v15 = vld [vmem:[#allocation2 + $0x20] sm:$0xe] }
 0x30a   :  { %v2518_v36 = vrot.slane %v2517_v24, 4  ;;  %v3614_v0 = vshll.u32 %v13585_v57, 16  ;;  %vm2908_vm0 = vcmask 1046532   ;;  %v9743_v3 = vrot.slane %v3796_v23, 9 }
 0x30b   :  { %10770 = vmatprep.mubr.msk.bf16.mxu1 %vm785_vm5, %v9731_v61  ;;  %v3598_v21 = vrot.slane %v3597_v39, 4  ;;  %v3610_v56 = vrot.slane %v3608_v20, 5  ;;  %vm13595_vm2 = vmor %vm1452_vm8, %vm2908_vm0  ;;  %v9744_v52 = vrot.slane %v3797_v49, 9  ;;  %v3858_v34 = vrot.slane %v13382_v26, 5  ;;  %v3800_v39 = vld [vmem:[#allocation2 + $0x28] sm:$0xe] }
 0x30c   :  { %v2523_v37 = vsel %vm13339_vm3, %v2518_v36, %v2522_v1  ;;  %v3602_v17 = vrot.slane %v3600_v54, 5  ;;  %v9745_v9 = vrot.slane %v3798_v40, 9  ;;  %v9643_v61 = vcombine.low %v13319_v27, %v13328_v47 }
 0x30d   :  { %v9632_v50 = vcombine.low %v2509_v48, %v2523_v37  ;;  %v3611_v32 = vor.u32 %v3610_v56, %v3607_v46  ;;  %v15725_v25 = vrot.slane %v13352_v62, 5  ;;  %v15726_v49 = vrot.slane %v13357_v2, 5  ;;  %v3801_v46 = vld [vmem:[#allocation2 + $0x30] sm:$0xe]  ;;  %v3802_v56 = vld [vmem:[#allocation2 + $0x38] sm:$0xe] }
 0x30e   :  { %v15727_v24 = vrot.slane %v13380_v33, 5  ;;  %v9746_v54 = vrot.slane %v3799_v15, 9  ;;  %v9645_v23 = vcombine.low %v13385_v55, %v13391_v60  ;;  %v3603_v27 = vsel %vm13339_vm3, %v3598_v21, %v3602_v17  ;;  %v11316_v15 = vld [vmem:[%s15431_s2 + $0x28] sm:$0xff]  }
 0x30f   :  { %v3847_v12 = vsel %vm13595_vm2, %v9743_v3, %v15725_v25  ;;  %v3851_v26 = vsel %vm13595_vm2, %v9744_v52, %v15726_v49  ;;  %10691 = vmatmul.mubr.msk.bf16.gmra.mrb[76].mxu0 %vm785_vm5, %v9632_v50  ;;  %v3612_v47 = vrot.slane %v3611_v32, 4  ;;  %v3616_v62 = vrot.slane %v3614_v0, 5  ;;  %v3803_v3 = vld [vmem:[#allocation2 + $0x40] sm:$0xe]  ;;  %v3807_v25 = vld [vmem:[#allocation2 + $0x70] sm:$0xe] }
 0x310   :  { %v3855_v1 = vsel %vm13595_vm2, %v9745_v9, %v15727_v24  ;;  %v9763_v2 = vcombine.low %v3847_v12, %v3851_v26  ;;  %10698 = vmatprep.mubr.msk.bf16.mxu0 %vm785_vm5, %v9643_v61  ;;  %v3859_v33 = vsel %vm13595_vm2, %v9746_v54, %v3858_v34  ;;  %v9646_v20 = vcombine.low %v13422_v11, %v13434_v59  ;;  %v3804_v59 = vld [vmem:[#allocation2 + $0x58] sm:$0xe]  ;;  %v3805_v52 = vld [vmem:[#allocation2 + $0x60] sm:$0xe]  ;;  %v3806_v61 = vld [vmem:[#allocation2 + $0x68] sm:$0xe] }
 0x311   :  { %v3617_v55 = vsel %vm13339_vm3, %v3612_v47, %v3616_v62  ;;  %v9764_v60 = vcombine.low %v3855_v1, %v3859_v33  ;;  %v9747_v48 = vrot.slane %v3800_v39, 9  ;;  %v3862_v36 = vrot.slane %v13405_v22, 5  ;;  %v3808_v12 = vld [vmem:[#allocation2 + $0x78] sm:$0xe] }
 0x312   :  { %v9732_v40 = vcombine.low %v3603_v27, %v3617_v55  ;;  %v9748_v0 = vrot.slane %v3801_v46, 9  ;;  %v3866_v21 = vrot.slane %v13414_v4, 5  ;;  %v9644_v11 = vcombine.low %v13360_v14, %v13365_v41  ;;  %v13673_v46 = vld [vmem:[#allocation2 + $0x88] sm:$0xe] }
 0x313   :  { %v3863_v22 = vsel %vm13595_vm2, %v9747_v48, %v3862_v36  ;;  %v9749_v34 = vrot.slane %v3802_v56, 9  ;;  %v3870_v37 = vrot.slane %v13459_v6, 5  ;;  %v9750_v17 = vrot.slane %v3803_v3, 9  ;;  %v11310_v6 = vld [vmem:[%s15431_s2 + $0x68] sm:$0xff]   ;;  %v2869_v36 = vld [vmem:[#allocation2 + $0x60] sm:$0xe] }
 0x314   :  { %10771 = vmatmul.mubr.msk.bf16.gmra.mrb[12].mxu1 %vm785_vm5, %v9732_v40  ;;  %v3867_v4 = vsel %vm13595_vm2, %v9748_v0, %v3866_v21  ;;  %v3874_v14 = vrot.slane %v13466_v38, 5  ;;  %v9751_v41 = vrot.slane %v3804_v59, 9  ;;  %v3878_v9 = vrot.slane %v13483_v35, 5  ;;  %v13654_v38 = vld [vmem:[%s15431_s2 + $0x30] sm:$0xff]   ;;  %v2860_v40 = vld [vmem:[#allocation2 + $0x8] sm:$0xe] }
 0x315   :  { %10778 = vmatprep.mubr.msk.bf16.mxu1 %vm785_vm5, %v9763_v2  ;;  %v9752_v50 = vrot.slane %v3805_v52, 9  ;;  %v3882_v32 = vrot.slane %v13494_v43, 5  ;;  %v9765_v49 = vcombine.low %v3863_v22, %v3867_v4  ;;  %v3871_v35 = vsel %vm13595_vm2, %v9749_v34, %v3870_v37  ;;  %v3809_v43 = vld [vmem:[#allocation2 + $0x80] sm:$0xe]  ;;  %v2870_v0 = vld [vmem:[#allocation2 + $0x68] sm:$0xe] }
 0x316   :  { %v3879_v26 = vsel %vm13595_vm2, %v9751_v41, %v3878_v9  ;;  %v9753_v1 = vrot.slane %v3806_v61, 9  ;;  %v3886_v54 = vrot.slane %v13520_v58, 5  ;;  %v3890_v27 = vrot.slane %v13524_v63, 5  ;;  %v2867_v58 = vld [vmem:[#allocation2 + $0x50] sm:$0xe] }
 0x317   :  { %10699 = vmatmul.mubr.msk.bf16.vlgmr.msra.gmra.mrb[64].mxu0 %vm785_vm5, %v9644_v11  ;;  %v3883_v24 = vsel %vm13595_vm2, %v9752_v50, %v3882_v32  ;;  %v9755_v47 = vrot.slane %v3808_v12, 9  ;;  %v3894_v62 = vrot.slane %v13550_v42, 5  ;;  %v9647_v2 = vcombine.low %v13469_v7, %v13471_v51  ;;  %v2868_v7 = vld [vmem:[#allocation2 + $0x58] sm:$0xe]  ;;  %v2871_v3 = vld [vmem:[#allocation2 + $0x70] sm:$0xe] }
 0x318   :  { %10702 = vmatprep.mubr.msk.bf16.mxu0 %vm785_vm5, %v9645_v23  ;;  %10715 = vmatpush3.bf16.msra.mxu0 %v13429_v5  ;;  %v3875_v5 = vsel %vm13595_vm2, %v9750_v17, %v3874_v14  ;;  %v9754_v23 = vrot.slane %v3807_v25, 9  ;;  %v9756_v39 = vrot.slane %v3809_v43, 9  ;;  %v3898_v33 = vrot.slane %v13555_v44, 5  ;;  %v11618_v59 = vld [vmem:[#allocation2 + $0x4] sm:$0x1] }
 0x319   :  { %10716 = vmatprep.subr.bf16.mxu0 %v11316_v15  ;;  %v9648_v42 = vcombine.low %v13497_v19, %v13503_v30  ;;  %v9766_v51 = vcombine.low %v3871_v35, %v3875_v5  ;;  %v9767_v63 = vcombine.low %v3879_v26, %v3883_v24  ;;  %v13687_v44 = vsel %vm13595_vm2, %v9753_v1, %v3886_v54  ;;  %v2872_v34 = vld [vmem:[#allocation2 + $0x78] sm:$0xe]  ;;  %v2873_v14 = vld [vmem:[#allocation2 + $0x80] sm:$0xe]  ;;  %v2874_v32 = vld [vmem:[#allocation2 + $0x88] sm:$0xe] }
 0x31a   :  { %v9649_v55 = vcombine.low %v13529_v28, %v13531_v29  ;;  %v3895_v19 = vsel %vm13595_vm2, %v9755_v47, %v3894_v62  ;;  %v9757_v30 = vrot.slane %v13673_v46, 9  ;;  %v3902_v48 = vrot.slane %v13580_v16, 5  ;;  %v11619_v16 = vld [vmem:[#allocation2 + $0xc] sm:$0x1]  ;;  %v3811_v61 = vld [vmem:[#allocation2 + $0x90] sm:$0xe] }
 0x31b   :  { %v3899_v21 = vsel %vm13595_vm2, %v9756_v39, %v3898_v33  ;;  %v9669_v28 = vrot.slane %v2867_v58, 9  ;;  %v2944_v29 = vrot.slane %v13475_v18, 5  ;;  %v9670_v56 = vrot.slane %v2868_v7, 9  ;;  %v15730_v26 = vld [vmem:[#allocation12_spill] sm:$0xff]  ;;  %v2861_v58 = vld [vmem:[#allocation2 + $0x10] sm:$0xe] }
 0x31c   :  { %10779 = vmatmul.mubr.msk.bf16.vlgmr.msra.gmra.mrb[0].mxu1 %vm785_vm5, %v9764_v60  ;;  %10717 = vmatpush3.bf16.msra.mxu0 %v11316_v15  ;;  %v2859_v60 = vld [vmem:[#allocation2] sm:$0xe]  ;;  %v2912_v52 = vrot.slane %v11618_v59, 5  ;;  %v9662_v15 = vrot.slane %v2860_v40, 9  ;;  %v2948_v22 = vrot.slane %v13477_v13, 5  ;;  %v2916_v4 = vrot.slane %v11619_v16, 5 }
 0x31d   :  { %10795 = vmatpush3.bf16.msra.mxu1 %v13449_v53  ;;  %10782 = vmatprep.mubr.msk.bf16.mxu1 %vm785_vm5, %v9765_v49  ;;  %v13678_v53 = vld [vmem:[%s15431_s2 + $0x70] sm:$0xff]   ;;  %v9661_v11 = vrot.slane %v2859_v60, 9  ;;  %v13705_v37 = vsel %vm13595_vm2, %v9669_v28, %v2944_v29  ;;  %v9671_v17 = vrot.slane %v2869_v36, 9  ;;  %v2952_v18 = vrot.slane %v13501_v8, 5  ;;  %v15728_v8 = vld [vmem:[#allocation6_spill] sm:$0xff]  ;;  %v15735_v46 = vld [vmem:[#allocation32_spill] sm:$0xff] }
 0x31e   :  { %10796 = vmatprep.subr.bf16.mxu1 %v11310_v6  ;;  %10734 = vmatprep.subr.bf16.mxu0 %v13654_v38  ;;  %v13711_v41 = vsel %vm13595_vm2, %v9670_v56, %v2948_v22  ;;  %v9672_v13 = vrot.slane %v2870_v0, 9  ;;  %v2956_v9 = vrot.slane %v13510_v10, 5  ;;  %v9673_v50 = vrot.slane %v2871_v3, 9  ;;  %v15729_v10 = vld [vmem:[#allocation9_spill] sm:$0xff]  ;;  %v2862_v60 = vld [vmem:[#allocation2 + $0x18] sm:$0xe] }
 0x31f   :  { %10703 = vmatmul.mubr.msk.bf16.gmra.mrb[68].mxu0 %vm785_vm5, %v9646_v20  ;;  %v3891_v20 = vsel %vm13595_vm2, %v9754_v23, %v3890_v27  ;;  %v9685_v25 = vcombine.low %v13705_v37, %v13711_v41  ;;  %v2960_v12 = vrot.slane %v15728_v8, 5  ;;  %v9674_v49 = vrot.slane %v2872_v34, 9  ;;  %v15731_v27 = vld [vmem:[#allocation11_spill] sm:$0xff]  ;;  %v15733_v0 = vld [vmem:[#allocation13_spill] sm:$0xff]  ;;  %v15734_v34 = vld [vmem:[#allocation20_spill] sm:$0xff] }
 0x320   :  { %10706 = vmatprep.mubr.msk.bf16.mxu0 %vm785_vm5, %v9647_v2  ;;  %v13724_v35 = vsel %vm13595_vm2, %v9672_v13, %v2956_v9  ;;  %v2964_v5 = vrot.slane %v15729_v10, 5  ;;  %v9675_v43 = vrot.slane %v2873_v14, 9  ;;  %v2968_v24 = vrot.slane %v15730_v26, 5  ;;  %v15732_v36 = vld [vmem:[#allocation15_spill] sm:$0xff]  ;;  %v15736_v10 = vld [vmem:[#allocation33_spill] sm:$0xff] }
 0x321   :  { %10797 = vmatpush3.bf16.msra.mxu1 %v11310_v6  ;;  %v13718_v6 = vsel %vm13595_vm2, %v9671_v17, %v2952_v18  ;;  %v13733_v54 = vsel %vm13595_vm2, %v9673_v50, %v2960_v12  ;;  %v9676_v23 = vrot.slane %v2874_v32, 9  ;;  %v2972_v47 = vrot.slane %v15731_v27, 5  ;;  %v11620_v3 = vld [vmem:[#allocation2 + $0x14] sm:$0x1]  ;;  %v2865_v14 = vld [vmem:[#allocation2 + $0x30] sm:$0xe] }
 0x322   :  { %10814 = vmatprep.subr.bf16.mxu1 %v13678_v53  ;;  %v9686_v1 = vcombine.low %v13718_v6, %v13724_v35  ;;  %v9758_v62 = vrot.slane %v3811_v61, 9  ;;  %v3906_v2 = vrot.slane %v13585_v57, 5  ;;  %v13739_v39 = vsel %vm13595_vm2, %v9674_v49, %v2964_v5  ;;  %v11315_v13 = vld [vmem:[#allocation2 + $0x10] ss:$8 sps:$4 sm:$0xff]   ;;  %v15737_v26 = vld [vmem:[#allocation5_spill] sm:$0xff] }
 0x323   :  { %v13743_v33 = vsel %vm13595_vm2, %v9675_v43, %v2968_v24  ;;  %v9687_v7 = vcombine.low %v13733_v54, %v13739_v39  ;;  %v2913_v57 = vsel %vm13595_vm2, %v9661_v11, %v2912_v52  ;;  %v9650_v28 = vcombine.low %v15733_v0, %v15732_v36  ;;  %v11621_v52 = vld [vmem:[#allocation2 + $0x1c] sm:$0x1]  ;;  %v2866_v32 = vld [vmem:[#allocation2 + $0x38] sm:$0xe]  ;;  %v11318_v27 = vld [vmem:[#allocation2 + $0x20] ss:$8 sps:$4 sm:$0xff]  }
 0x324   :  { %10783 = vmatmul.mubr.msk.bf16.gmra.mrb[4].mxu1 %vm785_vm5, %v9766_v51  ;;  %v13750_v51 = vsel %vm13595_vm2, %v9676_v23, %v2972_v47  ;;  %v9663_v29 = vrot.slane %v2861_v58, 9  ;;  %v2920_v11 = vrot.slane %v11620_v3, 5  ;;  %v9664_v59 = vrot.slane %v2862_v60, 9  ;;  %v11328_v12 = vld [vmem:[%s15431_s2 + $0x38] sm:$0xff]   ;;  %v4296_v23 = vld [vmem:[#allocation2 + $0x10] sm:$0xf] }
 0x325   :  { %10786 = vmatprep.mubr.msk.bf16.mxu1 %vm785_vm5, %v9767_v63  ;;  %v9769_v63 = vcombine.low %v3895_v19, %v3899_v21  ;;  %v9688_v40 = vcombine.low %v13743_v33, %v13750_v51  ;;  %v3903_v19 = vsel %vm13595_vm2, %v9757_v30, %v3902_v48  ;;  %v3907_v21 = vsel %vm13595_vm2, %v9758_v62, %v3906_v2  ;;  %v11322_v2 = vld [vmem:[%s15431_s2 + $0x78] sm:$0xff]   ;;  %v4302_v60 = vld [vmem:[#allocation2 + $0x28] sm:$0xf]  ;;  %v13803_v36 = vld [vmem:[%s15431_s2 + $0x80] sm:$0xff]  }
 0x326   :  { %v2928_v16 = vrot.slane %v15734_v34, 5  ;;  %v2932_v17 = vrot.slane %v15735_v46, 5  ;;  %v9770_v30 = vcombine.low %v3903_v19, %v3907_v21  ;;  %v2921_v48 = vsel %vm13595_vm2, %v9663_v29, %v2920_v11  ;;  %v13806_v0 = vld [vmem:[#allocation2 + $0x14] sm:$0x1]  ;;  %v11321_v3 = vld [vmem:[#allocation2 + $0x60] ss:$8 sps:$4 sm:$0xff]  }
 0x327   :  { %10707 = vmatmul.mubr.msk.bf16.gmra.mrb[72].mxu0 %vm785_vm5, %v9648_v42  ;;  %v9768_v42 = vcombine.low %v13687_v44, %v3891_v20  ;;  %v2863_v44 = vld [vmem:[#allocation2 + $0x20] sm:$0xe]  ;;  %v2864_v20 = vld [vmem:[#allocation2 + $0x28] sm:$0xe]  ;;  %v9667_v8 = vrot.slane %v2865_v14, 9  ;;  %v2936_v5 = vrot.slane %v15736_v10, 5 }
 0x328   :  { %10710 = vmatprep.mubr.msk.bf16.mxu0 %vm785_vm5, %v9649_v55  ;;  %v2917_v55 = vsel %vm13595_vm2, %v9662_v15, %v2916_v4  ;;  %v2924_v15 = vrot.slane %v11621_v52, 5  ;;  %v9665_v22 = vrot.slane %v2863_v44, 9  ;;  %v9666_v4 = vrot.slane %v2864_v20, 9  ;;  %v4304_v11 = vld [vmem:[#allocation2 + $0x30] sm:$0xf] }
 0x329   :  { %v9681_v56 = vcombine.low %v2913_v57, %v2917_v55  ;;  %v9668_v43 = vrot.slane %v2866_v32, 9  ;;  %v2940_v24 = vrot.slane %v15737_v26, 5  ;;  %v2937_v47 = vsel %vm13595_vm2, %v9667_v8, %v2936_v5  ;;  %v4298_v57 = vld [vmem:[#allocation2 + $0x18] sm:$0xf]  ;;  %v13812_v52 = vld [vmem:[#allocation2 + $0x1c] sm:$0x1] }
 0x32a   :  { %v2925_v18 = vsel %vm13595_vm2, %v9664_v59, %v2924_v15  ;;  %v2929_v9 = vsel %vm13595_vm2, %v9665_v22, %v2928_v16  ;;  %v2933_v50 = vsel %vm13595_vm2, %v9666_v4, %v2932_v17  ;;  %v4332_v58 = vshll.u32 %v4296_v23, 16  ;;  %v11320_v59 = vld [vmem:[#allocation2 + $0x40] ss:$8 sps:$4 sm:$0xff]   ;;  %v13816_v4 = vld [vmem:[#allocation2 + $0x24] sm:$0x1] }
 0x32b   :  { %v9682_v61 = vcombine.low %v2921_v48, %v2925_v18  ;;  %v9683_v49 = vcombine.low %v2929_v9, %v2933_v50  ;;  %v2941_v62 = vsel %vm13595_vm2, %v9668_v43, %v2940_v24  ;;  %v4346_v19 = vshll.u32 %v4298_v57, 16  ;;  %v4306_v17 = vld [vmem:[#allocation2 + $0x38] sm:$0xf]  ;;  %v13828_v50 = vld [vmem:[#allocation2 + $0x2c] sm:$0x1] }
 0x32c   :  { %10787 = vmatmul.mubr.msk.bf16.gmra.mrb[8].mxu1 %vm785_vm5, %v9768_v42  ;;  %v4329_v42 = vshrl.u32 %v4296_v23, 16  ;;  %v9684_v55 = vcombine.low %v2937_v47, %v2941_v62  ;;  %v4334_v20 = vrot.slane %v4332_v58, 5  ;;  %v4371_v29 = vshrl.u32 %v4302_v60, 16  ;;  %v4310_v26 = vld [vmem:[#allocation2 + $0x48] sm:$0xf] }
 0x32d   :  { %10790 = vmatprep.mubr.msk.bf16.mxu1 %vm785_vm5, %v9769_v63  ;;  %v11319_v63 = vld [vmem:[#allocation2 + $0x30] ss:$8 sps:$4 sm:$0xff]   ;;  %v4338_v22 = vshll.u32 %v13806_v0, 16  ;;  %v4348_v16 = vrot.slane %v4346_v19, 5  ;;  %v4388_v48 = vshll.u32 %v4304_v11, 16  ;;  %v4352_v14 = vshll.u32 %v13812_v52, 16 }
 0x32e   :  { %v4331_v44 = vrot.slane %v4329_v42, 4  ;;  %v4402_v8 = vshll.u32 %v4306_v17, 16  ;;  %v13834_v6 = vld [vmem:[#allocation2 + $0x34] sm:$0x1]  ;;  %v4308_v35 = vld [vmem:[#allocation2 + $0x40] sm:$0xf] }
 0x32f   :  { %10711 = vmatmul.mubr.msk.bf16.gmra.mrb[76].mxu0 %vm785_vm5, %v9650_v28  ;;  %v4343_v28 = vshrl.u32 %v4298_v57, 16  ;;  %v4390_v43 = vrot.slane %v4388_v48, 5  ;;  %v11324_v24 = vld [vmem:[#allocation2 + $0x80] ss:$8 sps:$4 sm:$0xff]   ;;  %v4380_v54 = vshll.u32 %v13828_v50, 16  ;;  %vm89_vm9 = vcmask 516096  }
 0x330   :  { %10718 = vmatprep.mubr.msk.bf16.mxu0 %vm785_vm5, %v9681_v56  ;;  %v4374_v56 = vshll.u32 %v4302_v60, 16  ;;  %v4335_v15 = vor.u32 %v4334_v20, %v4331_v44  ;;  %v4314_v42 = vld [vmem:[#allocation2 + $0x68] sm:$0xf]  ;;  %v4427_v60 = vshrl.u32 %v4310_v26, 16  ;;  %v4430_v44 = vshll.u32 %v4310_v26, 16 }
 0x331   :  { %v4345_v34 = vrot.slane %v4343_v28, 4  ;;  %v11327_v19 = vld [vmem:[#allocation2 + $0x8] ss:$8 sps:$4 sm:$0xff]   ;;  %v13868_v26 = vld [vmem:[#allocation2 + $0x6c] sm:$0x1]  ;;  %vm5252_vm10 = vcmask 518144  }
 0x332   :  { %v4376_v46 = vrot.slane %v4374_v56, 5  ;;  %v13820_v18 = vrot.slane %v4335_v15, 4  ;;  %v4458_v56 = vshll.u32 %v4314_v42, 16  ;;  %vm14246_vm12 = vmand %vm5252_vm10, %vm5253_vm11 }
 0x333   :  { %v4349_v9 = vor.u32 %v4348_v16, %v4345_v34 }
 0x334   :  { %10791 = vmatmul.mubr.msk.bf16.gmra.mrb[12].mxu1 %vm785_vm5, %v9770_v30  ;;  %v4385_v30 = vshrl.u32 %v4304_v11, 16 }
 0x335   :  { %10798 = vmatprep.mubr.msk.bf16.mxu1 %vm785_vm5, %v11315_v13  ;;  %v4366_v13 = vshll.u32 %v13816_v4, 16  ;;  %v4350_v39 = vrot.slane %v4349_v9, 4  ;;  %v11330_v9 = vld [vmem:[#allocation2 + $0x18] ss:$8 sps:$4 sm:$0xff]  }
 0x336   :  { %v4387_v5 = vrot.slane %v4385_v30, 4 }
 0x337   :  { %10719 = vmatmul.mubr.msk.bf16.vlgmr.msra.gmra.mrb[64].mxu0 %vm785_vm5, %v9682_v61  ;;  %v4399_v61 = vshrl.u32 %v4306_v17, 16  ;;  %v4368_v47 = vrot.slane %v4366_v13, 5 }
 0x338   :  { %10722 = vmatprep.mubr.msk.bf16.mxu0 %vm785_vm5, %v9683_v49  ;;  %10735 = vmatpush3.bf16.msra.mxu0 %v13654_v38  ;;  %v4300_v38 = vld [vmem:[#allocation2 + $0x20] sm:$0xf]  ;;  %v4340_v49 = vrot.slane %v4338_v22, 5  ;;  %v4391_v57 = vor.u32 %v4390_v43, %v4387_v5  ;;  %v11326_v22 = vld [vmem:[#allocation2 + $0x90] ss:$8 sps:$4 sm:$0xff]  }
 0x339   :  { %10736 = vmatprep.subr.bf16.mxu0 %v11328_v12  ;;  %v4357_v21 = vshrl.u32 %v4300_v38, 16  ;;  %v4401_v62 = vrot.slane %v4399_v61, 4  ;;  %v13866_v43 = vld [vmem:[#allocation2 + $0x64] sm:$0x1] }
 0x33a   :  { %v4341_v23 = vsel %vm13339_vm3, %v13820_v18, %v4340_v49  ;;  %v4392_v16 = vrot.slane %v4391_v57, 4  ;;  %v4460_v18 = vrot.slane %v4458_v56, 5  ;;  %v4450_v57 = vshll.u32 %v13866_v43, 16  ;;  %v11334_v56 = vld [vmem:[%s15431_s2 + $0x88] sm:$0xff]  }
 0x33b   :  { %v4359_v37 = vrot.slane %v4357_v21, 4  ;;  %v4382_v21 = vrot.slane %v4380_v54, 5  ;;  %v11331_v54 = vld [vmem:[#allocation2 + $0x28] ss:$8 sps:$4 sm:$0xff]  }
 0x33c   :  { %10799 = vmatmul.mubr.msk.bf16.vlgmr.msra.gmra.mrb[0].mxu1 %vm785_vm5, %v11318_v27  ;;  %10737 = vmatpush3.bf16.msra.mxu0 %v11328_v12  ;;  %v11323_v12 = vld [vmem:[#allocation2 + $0x70] ss:$8 sps:$4 sm:$0xff]   ;;  %v4354_v27 = vrot.slane %v4352_v14, 5 }
 0x33d   :  { %10815 = vmatpush3.bf16.msra.mxu1 %v13678_v53  ;;  %10802 = vmatprep.mubr.msk.bf16.mxu1 %vm785_vm5, %v11319_v63  ;;  %v4360_v53 = vshll.u32 %v4300_v38, 16  ;;  %v13841_v63 = vld [vmem:[#allocation2 + $0x3c] sm:$0x1]  ;;  %v4413_v38 = vshrl.u32 %v4308_v35, 16  ;;  %v4316_v14 = vld [vmem:[#allocation2 + $0x70] sm:$0xf] }
 0x33e   :  { %10816 = vmatprep.subr.bf16.mxu1 %v11322_v2  ;;  %v4408_v15 = vshll.u32 %v13841_v63, 16 }
 0x33f   :  { %10723 = vmatmul.mubr.msk.bf16.gmra.mrb[68].mxu0 %vm785_vm5, %v9684_v55  ;;  %v4362_v41 = vrot.slane %v4360_v53, 5  ;;  %v4416_v55 = vshll.u32 %v4308_v35, 16  ;;  %v4394_v53 = vshll.u32 %v13834_v6, 16  ;;  %v4415_v33 = vrot.slane %v4413_v38, 4 }
 0x340   :  { %10726 = vmatprep.mubr.msk.bf16.mxu0 %vm785_vm5, %v9685_v25  ;;  %v4373_v25 = vrot.slane %v4371_v29, 4  ;;  %v4455_v29 = vshrl.u32 %v4314_v42, 16  ;;  %v4464_v38 = vshll.u32 %v13868_v26, 16 }
 0x341   :  { %10817 = vmatpush3.bf16.msra.mxu1 %v11322_v2  ;;  %v4363_v32 = vor.u32 %v4362_v41, %v4359_v37  ;;  %v4404_v2 = vrot.slane %v4402_v8, 5  ;;  %v13857_v37 = vld [vmem:[#allocation2 + $0x4c] sm:$0x1]  ;;  %v4418_v51 = vrot.slane %v4416_v55, 5  ;;  %v4429_v41 = vrot.slane %v4427_v60, 4 }
 0x342   :  { %10834 = vmatprep.subr.bf16.mxu1 %v13803_v36  ;;  %v4377_v10 = vor.u32 %v4376_v46, %v4373_v25  ;;  %v4432_v25 = vrot.slane %v4430_v44, 5  ;;  %v4396_v30 = vrot.slane %v4394_v53, 5  ;;  %v4457_v48 = vrot.slane %v4455_v29, 4  ;;  %v4318_v8 = vld [vmem:[#allocation2 + $0x78] sm:$0xf] }
 0x343   :  { %v4436_v61 = vshll.u32 %v13857_v37, 16  ;;  %v4419_v35 = vor.u32 %v4418_v51, %v4415_v33  ;;  %v4324_v33 = vld [vmem:[#allocation2 + $0x90] sm:$0xf] }
 0x344   :  { %10803 = vmatmul.mubr.msk.bf16.gmra.mrb[4].mxu1 %vm785_vm5, %v11320_v59  ;;  %v4378_v58 = vrot.slane %v4377_v10, 4  ;;  %v4405_v59 = vor.u32 %v4404_v2, %v4401_v62  ;;  %v4397_v49 = vsel %vm13339_vm3, %v4392_v16, %v4396_v30  ;;  %v4410_v10 = vrot.slane %v4408_v15, 5  ;;  %v11332_v30 = vld [vmem:[#allocation2 + $0x38] ss:$8 sps:$4 sm:$0xff]  }
 0x345   :  { %10806 = vmatprep.mubr.msk.bf16.mxu1 %vm785_vm5, %v11321_v3  ;;  %v4355_v3 = vsel %vm13339_vm3, %v4350_v39, %v4354_v27  ;;  %v4320_v27 = vld [vmem:[#allocation2 + $0x80] sm:$0xf]  ;;  %v4461_v39 = vor.u32 %v4460_v18, %v4457_v48  ;;  %v4483_v62 = vshrl.u32 %v4318_v8, 16  ;;  %v4486_v2 = vshll.u32 %v4318_v8, 16 }
 0x346   :  { %v4383_v34 = vsel %vm13339_vm3, %v4378_v58, %v4382_v21  ;;  %v9807_v13 = vcombine.low %v4341_v23, %v4355_v3  ;;  %v4469_v23 = vshrl.u32 %v4316_v14, 16  ;;  %v4438_v58 = vrot.slane %v4436_v61, 5 }
 0x347   :  { %10727 = vmatmul.mubr.msk.bf16.gmra.mrb[72].mxu0 %vm785_vm5, %v9686_v1  ;;  %v4312_v1 = vld [vmem:[#allocation2 + $0x60] sm:$0xf]  ;;  %v4497_v55 = vshrl.u32 %v4320_v27, 16  ;;  %v4500_v60 = vshll.u32 %v4320_v27, 16  ;;  %v4462_v29 = vrot.slane %v4461_v39, 4  ;;  %v4466_v16 = vrot.slane %v4464_v38, 5 }
 0x348   :  { %10730 = vmatprep.mubr.msk.bf16.mxu0 %vm785_vm5, %v9687_v7  ;;  %v4364_v7 = vrot.slane %v4363_v32, 4  ;;  %v4441_v20 = vshrl.u32 %v4312_v1, 16  ;;  %v4444_v28 = vshll.u32 %v4312_v1, 16  ;;  %v4406_v32 = vrot.slane %v4405_v59, 4 }
 0x349   :  { %v4433_v1 = vor.u32 %v4432_v25, %v4429_v41  ;;  %v4471_v53 = vrot.slane %v4469_v23, 4  ;;  %v4488_v59 = vrot.slane %v4486_v2, 5  ;;  %v4499_v51 = vrot.slane %v4497_v55, 4 }
 0x34a   :  { %v4369_v11 = vsel %vm13339_vm3, %v4364_v7, %v4368_v47  ;;  %v4443_v46 = vrot.slane %v4441_v20, 4  ;;  %v4446_v17 = vrot.slane %v4444_v28, 5  ;;  %v4322_v47 = vld [vmem:[#allocation2 + $0x88] sm:$0xf]  ;;  %v4472_v7 = vshll.u32 %v4316_v14, 16 }
 0x34b   :  { %v4411_v42 = vsel %vm13339_vm3, %v4406_v32, %v4410_v10  ;;  %v4511_v44 = vshrl.u32 %v4322_v47, 16  ;;  %v4514_v20 = vshll.u32 %v4322_v47, 16  ;;  %v4420_v28 = vrot.slane %v4419_v35, 4  ;;  %v13887_v14 = vld [vmem:[#allocation2 + $0x74] sm:$0x1] }
 0x34c   :  { %10807 = vmatmul.mubr.msk.bf16.gmra.mrb[8].mxu1 %vm785_vm5, %v11323_v12  ;;  %v9808_v12 = vcombine.low %v4369_v11, %v4383_v34  ;;  %v4474_v3 = vrot.slane %v4472_v7, 5  ;;  %v4485_v11 = vrot.slane %v4483_v62, 4  ;;  %v9809_v15 = vcombine.low %v4397_v49, %v4411_v42  ;;  %v13898_v49 = vld [vmem:[#allocation2 + $0x8c] sm:$0x1] }
 0x34d   :  { %10810 = vmatprep.mubr.msk.bf16.mxu1 %vm785_vm5, %v11324_v24  ;;  %v4447_v24 = vor.u32 %v4446_v17, %v4443_v46  ;;  %v4452_v34 = vrot.slane %v4450_v57, 5  ;;  %v4502_v41 = vrot.slane %v4500_v60, 5  ;;  %v4513_v25 = vrot.slane %v4511_v44, 4  ;;  %v4326_v17 = vld [vmem:[#allocation2 + $0x98] sm:$0xf] }
 0x34e   :  { %v4516_v46 = vrot.slane %v4514_v20, 5  ;;  %v4467_v32 = vsel %vm13339_vm3, %v4462_v29, %v4466_v16  ;;  %v4475_v61 = vor.u32 %v4474_v3, %v4471_v53  ;;  %v4489_v8 = vor.u32 %v4488_v59, %v4485_v11  ;;  %v13909_v3 = vld [vmem:[#allocation2 + $0x94] sm:$0x1]  ;;  %v13911_v11 = vld [vmem:[#allocation2 + $0x9c] sm:$0x1] }
 0x34f   :  { %10731 = vmatmul.mubr.msk.bf16.gmra.mrb[76].mxu0 %vm785_vm5, %v9688_v40  ;;  %v13859_v40 = vld [vmem:[#allocation2 + $0x44] sm:$0x1]  ;;  %v4448_v21 = vrot.slane %v4447_v24, 4  ;;  %v4525_v10 = vshrl.u32 %v4324_v33, 16  ;;  %v4539_v35 = vshrl.u32 %v4326_v17, 16  ;;  %v4478_v24 = vshll.u32 %v13887_v14, 16 }
 0x350   :  { %10738 = vmatprep.mubr.msk.bf16.mxu0 %vm785_vm5, %v11327_v19  ;;  %v4422_v5 = vshll.u32 %v13859_v40, 16  ;;  %v4434_v19 = vrot.slane %v4433_v1, 4  ;;  %v4542_v1 = vshll.u32 %v4326_v17, 16  ;;  %v4503_v23 = vor.u32 %v4502_v41, %v4499_v51  ;;  %v4730_v41 = vld [vmem:[#allocation2 + $0x10] sm:$0xe] }
 0x351   :  { %v4517_v27 = vor.u32 %v4516_v46, %v4513_v25  ;;  %v4476_v62 = vrot.slane %v4475_v61, 4  ;;  %v4490_v2 = vrot.slane %v4489_v8, 4  ;;  %v4520_v42 = vshll.u32 %v13898_v49, 16  ;;  %v4731_v25 = vld [vmem:[#allocation2 + $0x18] sm:$0xe] }
 0x352   :  { %v4439_v18 = vsel %vm13339_vm3, %v4434_v19, %v4438_v58  ;;  %v4527_v58 = vrot.slane %v4525_v10, 4  ;;  %v4541_v38 = vrot.slane %v4539_v35, 4  ;;  %v4544_v55 = vrot.slane %v4542_v1, 5  ;;  %v11337_v8 = vld [vmem:[#allocation2 + $0x88] ss:$8 sps:$4 sm:$0xff]  }
 0x353   :  { %v4480_v60 = vrot.slane %v4478_v24, 5  ;;  %v4504_v44 = vrot.slane %v4503_v23, 4  ;;  %v4518_v20 = vrot.slane %v4517_v27, 4  ;;  %v4534_v51 = vshll.u32 %v13909_v3, 16  ;;  %v4732_v1 = vld [vmem:[#allocation2 + $0x20] sm:$0xe] }
 0x354   :  { %10811 = vmatmul.mubr.msk.bf16.gmra.mrb[12].mxu1 %vm785_vm5, %v11326_v22  ;;  %v4424_v22 = vrot.slane %v4422_v5, 5  ;;  %v4528_v5 = vshll.u32 %v4324_v33, 16  ;;  %v4784_v61 = vrot.slane %v13812_v52, 5  ;;  %v4733_v52 = vld [vmem:[#allocation2 + $0x28] sm:$0xe] }
 0x355   :  { %10818 = vmatprep.mubr.msk.bf16.mxu1 %vm785_vm5, %v9807_v13  ;;  %v11333_v13 = vld [vmem:[#allocation2 + $0x58] ss:$8 sps:$4 sm:$0xff]   ;;  %v4481_v53 = vsel %vm13339_vm3, %v4476_v62, %v4480_v60  ;;  %v4536_v10 = vrot.slane %v4534_v51, 5  ;;  %v4734_v23 = vld [vmem:[#allocation2 + $0x30] sm:$0xe]  ;;  %v9828_v62 = vrot.slane %v4733_v52, 9 }
 0x356   :  { %v4425_v48 = vsel %vm13339_vm3, %v4420_v28, %v4424_v22  ;;  %v4530_v57 = vrot.slane %v4528_v5, 5  ;;  %v11335_v28 = vld [vmem:[#allocation2 + $0x68] ss:$8 sps:$4 sm:$0xff]   ;;  %v4545_v22 = vor.u32 %v4544_v55, %v4541_v38  ;;  %v4735_v27 = vld [vmem:[#allocation2 + $0x38] sm:$0xe]  ;;  %v4800_v38 = vrot.slane %v13841_v63, 5 }
 0x357   :  { %10739 = vmatmul.mubr.msk.bf16.vlgmr.msra.gmra.mrb[64].mxu0 %vm785_vm5, %v11330_v9  ;;  %v4453_v9 = vsel %vm13339_vm3, %v4448_v21, %v4452_v34  ;;  %v9810_v47 = vcombine.low %v4425_v48, %v4439_v18  ;;  %v11336_v21 = vld [vmem:[#allocation2 + $0x78] ss:$8 sps:$4 sm:$0xff]   ;;  %v4548_v34 = vshll.u32 %v13911_v11, 16  ;;  %v4840_v52 = vrot.slane %v13911_v11, 5 }
 0x358   :  { %10742 = vmatprep.mubr.msk.bf16.mxu0 %vm785_vm5, %v11331_v54  ;;  %v9811_v7 = vcombine.low %v4453_v9, %v4467_v32  ;;  %v4546_v48 = vrot.slane %v4545_v22, 4  ;;  %v4780_v9 = vrot.slane %v13806_v0, 5  ;;  %v9826_v32 = vrot.slane %v4731_v25, 9  ;;  %v4743_v25 = vld [vmem:[#allocation2 + $0x88] sm:$0xe] }
 0x359   :  { %v4550_v18 = vrot.slane %v4548_v34, 5  ;;  %v4816_v34 = vrot.slane %v13868_v26, 5 }
 0x35a   :  { %v4785_v0 = vsel %vm13595_vm2, %v9826_v32, %v4784_v61  ;;  %v9838_v32 = vrot.slane %v4743_v25, 9  ;;  %v4832_v61 = vrot.slane %v13898_v49, 5  ;;  %v4836_v49 = vrot.slane %v13909_v3, 5 }
 0x35b   :  { %v4551_v35 = vsel %vm13339_vm3, %v4546_v48, %v4550_v18 }
 0x35c   :  { %10819 = vmatmul.mubr.msk.bf16.vlgmr.msra.gmra.mrb[0].mxu1 %vm785_vm5, %v9808_v12  ;;  %v13895_v12 = vld [vmem:[#allocation2 + $0x84] sm:$0x1] }
 0x35d   :  { %10835 = vmatpush3.bf16.msra.mxu1 %v13803_v36  ;;  %10822 = vmatprep.mubr.msk.bf16.mxu1 %vm785_vm5, %v9809_v15  ;;  %v13893_v36 = vld [vmem:[#allocation2 + $0x7c] sm:$0x1]  ;;  %v4506_v39 = vshll.u32 %v13895_v12, 16  ;;  %v4531_v15 = vor.u32 %v4530_v57, %v4527_v58  ;;  %v4796_v58 = vrot.slane %v13834_v6, 5  ;;  %v9830_v57 = vrot.slane %v4735_v27, 9 }
 0x35e   :  { %10836 = vmatprep.subr.bf16.mxu1 %v11334_v56  ;;  %v4492_v54 = vshll.u32 %v13893_v36, 16  ;;  %v4738_v6 = vld [vmem:[#allocation2 + $0x60] sm:$0xe]  ;;  %v4824_v18 = vrot.slane %v13893_v36, 5 }
 0x35f   :  { %10743 = vmatmul.mubr.msk.bf16.gmra.mrb[68].mxu0 %vm785_vm5, %v11332_v30  ;;  %v4508_v29 = vrot.slane %v4506_v39, 5  ;;  %v4532_v30 = vrot.slane %v4531_v15, 4  ;;  %v4812_v15 = vrot.slane %v13866_v43, 5  ;;  %v4742_v43 = vld [vmem:[#allocation2 + $0x80] sm:$0xe] }
 0x360   :  { %10746 = vmatprep.mubr.msk.bf16.mxu0 %vm785_vm5, %v11333_v13  ;;  %v4494_v19 = vrot.slane %v4492_v54, 5  ;;  %v9825_v13 = vrot.slane %v4730_v41, 9  ;;  %v9827_v54 = vrot.slane %v4732_v1, 9  ;;  %v4741_v41 = vld [vmem:[#allocation2 + $0x78] sm:$0xe] }
 0x361   :  { %10837 = vmatpush3.bf16.msra.mxu1 %v11334_v56  ;;  %v4522_v56 = vrot.slane %v4520_v42, 5  ;;  %v4509_v16 = vsel %vm13339_vm3, %v4504_v44, %v4508_v29  ;;  %v4537_v5 = vsel %vm13339_vm3, %v4532_v30, %v4536_v10  ;;  %v9829_v42 = vrot.slane %v4734_v23, 9 }
 0x362   :  { %v4495_v59 = vsel %vm13339_vm3, %v4490_v2, %v4494_v19  ;;  %v4781_v24 = vsel %vm13595_vm2, %v9825_v13, %v4780_v9  ;;  %v4792_v2 = vrot.slane %v13828_v50, 5  ;;  %v4801_v44 = vsel %vm13595_vm2, %v9830_v57, %v4800_v38 }
 0x363   :  { %v4523_v33 = vsel %vm13339_vm3, %v4518_v20, %v4522_v56  ;;  %v9812_v46 = vcombine.low %v4481_v53, %v4495_v59  ;;  %v9845_v39 = vcombine.low %v4781_v24, %v4785_v0  ;;  %v4797_v50 = vsel %vm13595_vm2, %v9829_v42, %v4796_v58  ;;  %v4737_v20 = vld [vmem:[#allocation2 + $0x48] sm:$0xe] }
 0x364   :  { %10823 = vmatmul.mubr.msk.bf16.gmra.mrb[4].mxu1 %vm785_vm5, %v9810_v47  ;;  %v9813_v17 = vcombine.low %v4509_v16, %v4523_v33  ;;  %v9814_v47 = vcombine.low %v4537_v5, %v4551_v35  ;;  %v4793_v60 = vsel %vm13595_vm2, %v9828_v62, %v4792_v2  ;;  %v4804_v53 = vrot.slane %v13859_v40, 5  ;;  %v4740_v40 = vld [vmem:[#allocation2 + $0x70] sm:$0xe]  ;;  %v4745_v35 = vld [vmem:[#allocation2 + $0x98] sm:$0xe] }
 0x365   :  { %10826 = vmatprep.mubr.msk.bf16.mxu1 %vm785_vm5, %v9811_v7  ;;  %v4788_v7 = vrot.slane %v13816_v4, 5  ;;  %v4736_v4 = vld [vmem:[#allocation2 + $0x40] sm:$0xe]  ;;  %v9832_v29 = vrot.slane %v4737_v20, 9  ;;  %v4808_v56 = vrot.slane %v13857_v37, 5  ;;  %v9833_v59 = vrot.slane %v4738_v6, 9 }
 0x366   :  { %v9831_v63 = vrot.slane %v4736_v4, 9  ;;  %v9835_v26 = vrot.slane %v4740_v40, 9  ;;  %v4820_v30 = vrot.slane %v13887_v14, 5  ;;  %v9836_v48 = vrot.slane %v4741_v41, 9  ;;  %v4744_v14 = vld [vmem:[#allocation2 + $0x90] sm:$0xe] }
 0x367   :  { %10747 = vmatmul.mubr.msk.bf16.gmra.mrb[72].mxu0 %vm785_vm5, %v11335_v28  ;;  %v4789_v55 = vsel %vm13595_vm2, %v9827_v54, %v4788_v7  ;;  %v4739_v28 = vld [vmem:[#allocation2 + $0x68] sm:$0xe]  ;;  %v4809_v33 = vsel %vm13595_vm2, %v9832_v29, %v4808_v56  ;;  %v4813_v37 = vsel %vm13595_vm2, %v9833_v59, %v4812_v15  ;;  %v9837_v13 = vrot.slane %v4742_v43, 9 }
 0x368   :  { %10750 = vmatprep.mubr.msk.bf16.mxu0 %vm785_vm5, %v11336_v21  ;;  %v9846_v19 = vcombine.low %v4789_v55, %v4793_v60  ;;  %v9847_v21 = vcombine.low %v4797_v50, %v4801_v44  ;;  %v9834_v22 = vrot.slane %v4739_v28, 9  ;;  %v4805_v16 = vsel %vm13595_vm2, %v9831_v63, %v4804_v53 }
 0x369   :  { %v4828_v9 = vrot.slane %v13895_v12, 5  ;;  %v4825_v10 = vsel %vm13595_vm2, %v9836_v48, %v4824_v18  ;;  %v4833_v5 = vsel %vm13595_vm2, %v9838_v32, %v4832_v61  ;;  %v9839_v1 = vrot.slane %v4744_v14, 9 }
 0x36a   :  { %v4817_v51 = vsel %vm13595_vm2, %v9834_v22, %v4816_v34  ;;  %v9840_v0 = vrot.slane %v4745_v35, 9  ;;  %v15738_v54 = vmov 0  }
 0x36b   :  { %v4829_v36 = vsel %vm13595_vm2, %v9837_v13, %v4828_v9  ;;  %v4837_v23 = vsel %vm13595_vm2, %v9839_v1, %v4836_v49  ;;  %107 = vst.msk [vmem:[#allocation3 + $0x48] sm:$0xf] %vm87_vm4, %v15738_v54  ;;  %88 = vst.msk [vmem:[#allocation3] sm:$0xf] %vm87_vm4, %v15738_v54 }
 0x36c   :  { %10827 = vmatmul.mubr.msk.bf16.gmra.mrb[8].mxu1 %vm785_vm5, %v9812_v46  ;;  %v9848_v46 = vcombine.low %v4805_v16, %v4809_v33  ;;  %v9851_v24 = vcombine.low %v4829_v36, %v4833_v5  ;;  %v4841_v27 = vsel %vm13595_vm2, %v9840_v0, %v4840_v52  ;;  %91 = vst.msk [vmem:[#allocation3 + $0x8] sm:$0xf] %vm87_vm4, %v15738_v54  ;;  %93 = vst.msk [vmem:[#allocation3 + $0x10] sm:$0xf] %vm87_vm4, %v15738_v54 }
 0x36d   :  { %10830 = vmatprep.mubr.msk.bf16.mxu1 %vm785_vm5, %v9813_v17  ;;  %v9849_v17 = vcombine.low %v4813_v37, %v4817_v51  ;;  %95 = vst.msk [vmem:[#allocation3 + $0x18] sm:$0xf] %vm87_vm4, %v15738_v54  ;;  %97 = vst.msk [vmem:[#allocation3 + $0x20] sm:$0xf] %vm87_vm4, %v15738_v54 }
 0x36e   :  { %99 = vst.msk [vmem:[#allocation3 + $0x28] sm:$0xf] %vm87_vm4, %v15738_v54  ;;  %101 = vst.msk [vmem:[#allocation3 + $0x30] sm:$0xf] %vm87_vm4, %v15738_v54 }
 0x36f   :  { %10751 = vmatmul.mubr.msk.bf16.gmra.mrb[76].mxu0 %vm785_vm5, %v11337_v8  ;;  %v4821_v8 = vsel %vm13595_vm2, %v9835_v26, %v4820_v30  ;;  %103 = vst.msk [vmem:[#allocation3 + $0x38] sm:$0xf] %vm87_vm4, %v15738_v54  ;;  %105 = vst.msk [vmem:[#allocation3 + $0x40] sm:$0xf] %vm87_vm4, %v15738_v54 }
 0x370   :  { %v9850_v12 = vcombine.low %v4821_v8, %v4825_v10  ;;  %109 = vst.msk [vmem:[#allocation3 + $0x50] sm:$0xf] %vm87_vm4, %v15738_v54  ;;  %111 = vst.msk [vmem:[#allocation3 + $0x58] sm:$0xf] %vm87_vm4, %v15738_v54 }
 0x371   :  { %90 = vst.msk [vmem:[#allocation3 + $0x4] sm:$0x1] %vm89_vm9, %v15738_v54  ;;  %92 = vst.msk [vmem:[#allocation3 + $0xc] sm:$0x1] %vm89_vm9, %v15738_v54 }
 0x372   :  { %94 = vst.msk [vmem:[#allocation3 + $0x14] sm:$0x1] %vm89_vm9, %v15738_v54  ;;  %96 = vst.msk [vmem:[#allocation3 + $0x1c] sm:$0x1] %vm89_vm9, %v15738_v54 }
 0x373   :  { %98 = vst.msk [vmem:[#allocation3 + $0x24] sm:$0x1] %vm89_vm9, %v15738_v54  ;;  %100 = vst.msk [vmem:[#allocation3 + $0x2c] sm:$0x1] %vm89_vm9, %v15738_v54 }
 0x374   :  { %10831 = vmatmul.mubr.msk.bf16.gmra.mrb[12].mxu1 %vm785_vm5, %v9814_v47  ;;  %v9852_v47 = vcombine.low %v4837_v23, %v4841_v27  ;;  %v11338_v23 = vld [vmem:[%s15434_s3 + $0x20] sm:$0xff]   ;;  %102 = vst.msk [vmem:[#allocation3 + $0x34] sm:$0x1] %vm89_vm9, %v15738_v54  ;;  %104 = vst.msk [vmem:[#allocation3 + $0x3c] sm:$0x1] %vm89_vm9, %v15738_v54 }
 0x375   :  { %10838 = vmatprep.mubr.msk.bf16.mxu1 %vm785_vm5, %v9845_v39  ;;  %106 = vst.msk [vmem:[#allocation3 + $0x44] sm:$0x1] %vm89_vm9, %v15738_v54  ;;  %108 = vst.msk [vmem:[#allocation3 + $0x4c] sm:$0x1] %vm89_vm9, %v15738_v54  ;;  %10854 = vmatprep.subr.bf16.mxu0 %v11338_v23 }
 0x376   :  { %110 = vst.msk [vmem:[#allocation3 + $0x54] sm:$0x1] %vm89_vm9, %v15738_v54  ;;  %112 = vst.msk [vmem:[#allocation3 + $0x5c] sm:$0x1] %vm89_vm9, %v15738_v54  ;;  %10855 = vmatpush3.bf16.msra.mxu0 %v11338_v23  ;;  %vm7458_vm9 = vsmask.f32 1282 }
 0x37c   :  { %10839 = vmatmul.mubr.msk.bf16.vlgmr.msra.gmra.mrb[0].mxu1 %vm785_vm5, %v9846_v19 }
 0x37d   :  { %10842 = vmatprep.mubr.msk.bf16.mxu1 %vm785_vm5, %v9847_v21 }
 0x384   :  { %10843 = vmatmul.mubr.msk.bf16.gmra.mrb[4].mxu1 %vm785_vm5, %v9848_v46 }
 0x385   :  { %10846 = vmatprep.mubr.msk.bf16.mxu1 %vm785_vm5, %v9849_v17 }
 0x38c   :  { %10847 = vmatmul.mubr.msk.bf16.gmra.mrb[8].mxu1 %vm785_vm5, %v9850_v12 }
 0x38d   :  { %10850 = vmatprep.mubr.msk.bf16.mxu1 %vm785_vm5, %v9851_v24 }
 0x394   :  { %10851 = vmatmul.mubr.msk.bf16.gmra.mrb[12].mxu1 %vm785_vm5, %v9852_v47  ;;  %vm5020_vm5 = vcmask 523264   ;;  %v11339_v47 = vld [vmem:[%s15434_s3 + $0x28] sm:$0xff]  }
 0x395   :  { %7732 = vmatprep.mubr.bf16.mxu1 %v15738_v54  ;;  %10856 = vmatprep.subr.bf16.mxu0 %v11339_v47 }
 0x396   :  { %10857 = vmatpush3.bf16.msra.mxu0 %v11339_v47 }
 0x42a   :  { %v10740_v3 = vpop.f32.mrb[64].mxu0 }
 0x42b   :  { %v3283_v11 = vpop.f32.mrb[65].mxu0 }
 0x42c   :  { %v10741_v39 = vpop.f32.mrb[66].mxu0 }
 0x42d   :  { %v3286_v7 = vpop.f32.mrb[67].mxu0 }
 0x432   :  { %v10744_v62 = vpop.f32.mrb[68].mxu0 }
 0x433   :  { %v3299_v2 = vpop.f32.mrb[69].mxu0 }
 0x434   :  { %v10745_v42 = vpop.f32.mrb[70].mxu0 }
 0x435   :  { %v3302_v58 = vpop.f32.mrb[71].mxu0 }
 0x43a   :  { %v10748_v57 = vpop.f32.mrb[72].mxu0 }
 0x43b   :  { %v3315_v38 = vpop.f32.mrb[73].mxu0 }
 0x43c   :  { %v10749_v55 = vpop.f32.mrb[74].mxu0 }
 0x43d   :  { %v3318_v60 = vpop.f32.mrb[75].mxu0 }
 0x442   :  { %v14000_v4 = vpop.f32.mrb[76].mxu0 }
 0x443   :  { %v14002_v50 = vpop.f32.mrb[77].mxu0 }
 0x444   :  { %v14004_v44 = vpop.f32.mrb[78].mxu0 }
 0x445   :  { %v14006_v20 = vpop.f32.mrb[79].mxu0 }
 0x44f   :  { %v10840_v6 = vpop.f32.mrb[0].mxu1 }
 0x450   :  { %v14008_v28 = vadd.f32 %v10840_v6, %v10740_v3  ;;  %v4941_v19 = vpop.f32.mrb[1].mxu1 }
 0x451   :  { %v14010_v63 = vadd.f32 %v4941_v19, %v3283_v11  ;;  %v10841_v21 = vpop.f32.mrb[2].mxu1 }
 0x452   :  { %v14012_v53 = vadd.f32 %v10841_v21, %v10741_v39  ;;  %v4944_v29 = vpop.f32.mrb[3].mxu1  ;;  %v5024_v34 = vsel %vm5020_vm5, %v14008_v28, 0.0  ;;  %v11341_v21 = vld [vmem:[%s15434_s3 + $0x38] sm:$0xff]  }
 0x453   :  { %v14014_v56 = vadd.f32 %v4944_v29, %v3286_v7  ;;  %v5021_v59 = vsel %vm5020_vm5, %v14010_v63, 0.0 }
 0x454   :  { %v5026_v51 = vsel %vm5020_vm5, %v14012_v53, 0.0 }
 0x455   :  { %v5022_v15 = vsel %vm5020_vm5, %v14014_v56, 0.0 }
 0x456   :  { %v5023_v22 = vadd.f32 %v5022_v15, %v5021_v59 }
 0x457   :  { %v10844_v16 = vpop.f32.mrb[4].mxu1 }
 0x458   :  { %v5025_v33 = vadd.f32 %v5024_v34, %v5023_v22  ;;  %v14022_v40 = vadd.f32 %v10844_v16, %v10744_v62  ;;  %v4957_v37 = vpop.f32.mrb[5].mxu1  ;;  %v14103_v16 = vld [vmem:[%s15434_s3] sm:$0xff]  }
 0x459   :  { %v14026_v41 = vadd.f32 %v4957_v37, %v3299_v2  ;;  %v10845_v43 = vpop.f32.mrb[6].mxu1 }
 0x45a   :  { %v5027_v25 = vadd.f32 %v5026_v51, %v5025_v33  ;;  %v14028_v46 = vadd.f32 %v10845_v43, %v10745_v42  ;;  %v4960_v26 = vpop.f32.mrb[7].mxu1  ;;  %v5032_v9 = vsel %vm5020_vm5, %v14022_v40, 0.0 }
 0x45b   :  { %v5028_v17 = vsel %vm5020_vm5, %v14026_v41, 0.0  ;;  %v14032_v30 = vadd.f32 %v4960_v26, %v3302_v58 }
 0x45c   :  { %v5029_v48 = vadd.f32 %v5028_v17, %v5027_v25  ;;  %v5034_v14 = vsel %vm5020_vm5, %v14028_v46, 0.0 }
 0x45d   :  { %v5030_v18 = vsel %vm5020_vm5, %v14032_v30, 0.0 }
 0x45e   :  { %v5031_v13 = vadd.f32 %v5030_v18, %v5029_v48 }
 0x45f   :  { %v10848_v32 = vpop.f32.mrb[8].mxu1 }
 0x460   :  { %v5033_v61 = vadd.f32 %v5032_v9, %v5031_v13  ;;  %v14038_v8 = vadd.f32 %v10848_v32, %v10748_v57  ;;  %v4973_v10 = vpop.f32.mrb[9].mxu1  ;;  %v11340_v57 = vld [vmem:[%s15434_s3 + $0x30] sm:$0xff]  }
 0x461   :  { %v14042_v36 = vadd.f32 %v4973_v10, %v3315_v38  ;;  %v10849_v5 = vpop.f32.mrb[10].mxu1  ;;  %10858 = vmatprep.subr.bf16.mxu0 %v11340_v57 }
 0x462   :  { %v5035_v35 = vadd.f32 %v5034_v14, %v5033_v61  ;;  %v14044_v12 = vadd.f32 %v10849_v5, %v10749_v55  ;;  %v4976_v1 = vpop.f32.mrb[11].mxu1  ;;  %v5040_v3 = vsel %vm5020_vm5, %v14038_v8, 0.0  ;;  %10859 = vmatpush3.bf16.msra.mxu0 %v11340_v57 }
 0x463   :  { %v5036_v24 = vsel %vm5020_vm5, %v14042_v36, 0.0  ;;  %v14048_v49 = vadd.f32 %v4976_v1, %v3318_v60  ;;  %10860 = vmatprep.subr.bf16.mxu0 %v11341_v21 }
 0x464   :  { %v5037_v0 = vadd.f32 %v5036_v24, %v5035_v35  ;;  %v5042_v39 = vsel %vm5020_vm5, %v14044_v12, 0.0 }
 0x465   :  { %v5038_v52 = vsel %vm5020_vm5, %v14048_v49, 0.0 }
 0x466   :  { %v5039_v27 = vadd.f32 %v5038_v52, %v5037_v0  ;;  %10861 = vmatpush3.bf16.msra.mxu0 %v11341_v21 }
 0x467   :  { %v10852_v11 = vpop.f32.mrb[12].mxu1  ;;  %10870 = vmatprep.subr.bf16.mxu0 %v14103_v16 }
 0x468   :  { %v5041_v7 = vadd.f32 %v5040_v3, %v5039_v27  ;;  %v14075_v62 = vadd.f32 %v10852_v11, %v14000_v4  ;;  %v4989_v2 = vpop.f32.mrb[13].mxu1 }
 0x469   :  { %v14078_v42 = vadd.f32 %v4989_v2, %v14002_v50  ;;  %v10853_v58 = vpop.f32.mrb[14].mxu1 }
 0x46a   :  { %v5043_v38 = vadd.f32 %v5042_v39, %v5041_v7  ;;  %v14084_v55 = vadd.f32 %v10853_v58, %v14004_v44  ;;  %v4992_v60 = vpop.f32.mrb[15].mxu1  ;;  %v5048_v44 = vsel %vm5020_vm5, %v14075_v62, 0.0 }
 0x46b   :  { %v5044_v4 = vsel %vm5020_vm5, %v14078_v42, 0.0  ;;  %v14089_v6 = vadd.f32 %v4992_v60, %v14006_v20 }
 0x46c   :  { %v5045_v19 = vadd.f32 %v5044_v4, %v5043_v38  ;;  %v5050_v20 = vsel %vm5020_vm5, %v14084_v55, 0.0 }
 0x46d   :  { %v5046_v50 = vsel %vm5020_vm5, %v14089_v6, 0.0 }
 0x46e   :  { %v5047_v29 = vadd.f32 %v5046_v50, %v5045_v19 }
 0x470   :  { %v5049_v59 = vadd.f32 %v5048_v44, %v5047_v29 }
 0x472   :  { %v5051_v15 = vadd.f32 %v5050_v20, %v5049_v59 }
 0x474   :  { %v5052_v22 = vrot.slane %v5051_v15, 4 }
 0x476   :  { %v5053_v34 = vadd.f32 %v5052_v22, %v5051_v15 }
 0x478   :  { %v5054_v33 = vrot.slane %v5053_v34, 2 }
 0x47a   :  { %v5055_v37 = vadd.f32 %v5054_v33, %v5053_v34 }
 0x47c   :  { %v5056_v51 = vrot.slane %v5055_v37, 1 }
 0x47e   :  { %v5057_v43 = vadd.f32 %v5056_v51, %v5055_v37 }
 0x480   :  { %v14106_v25 = vmul.f32 0.0078125, %v5057_v43 }
 0x482   :  { %v5060_v26 = vsub.f32 %v14010_v63, %v14106_v25  ;;  %v5061_v17 = vsub.f32 %v14014_v56, %v14106_v25  ;;  %v5062_v48 = vsub.f32 %v14008_v28, %v14106_v25  ;;  %v5063_v18 = vsub.f32 %v14012_v53, %v14106_v25 }
 0x483   :  { %v5064_v32 = vsub.f32 %v14026_v41, %v14106_v25  ;;  %v5065_v10 = vsub.f32 %v14032_v30, %v14106_v25  ;;  %v5066_v24 = vsub.f32 %v14022_v40, %v14106_v25  ;;  %v5067_v27 = vsub.f32 %v14028_v46, %v14106_v25 }
 0x484   :  { %v5076_v13 = vmul.f32 %v5060_v26, %v5060_v26  ;;  %v5077_v9 = vmul.f32 %v5061_v17, %v5061_v17  ;;  %v5078_v61 = vmul.f32 %v5062_v48, %v5062_v48  ;;  %v5079_v14 = vmul.f32 %v5063_v18, %v5063_v18 }
 0x485   :  { %v5080_v0 = vmul.f32 %v5064_v32, %v5064_v32  ;;  %v5081_v47 = vmul.f32 %v5065_v10, %v5065_v10  ;;  %v5068_v39 = vsub.f32 %v14042_v36, %v14106_v25  ;;  %v5082_v7 = vmul.f32 %v5066_v24, %v5066_v24 }
 0x486   :  { %v5092_v5 = vsel %vm5020_vm5, %v5076_v13, 0.0  ;;  %v5093_v35 = vsel %vm5020_vm5, %v5077_v9, 0.0  ;;  %v5095_v52 = vsel %vm5020_vm5, %v5078_v61, 0.0  ;;  %v5097_v3 = vsel %vm5020_vm5, %v5079_v14, 0.0 }
 0x487   :  { %v5094_v1 = vadd.f32 %v5093_v35, %v5092_v5  ;;  %v5099_v2 = vsel %vm5020_vm5, %v5080_v0, 0.0  ;;  %v5069_v57 = vsub.f32 %v14048_v49, %v14106_v25  ;;  %v5083_v38 = vmul.f32 %v5067_v27, %v5067_v27 }
 0x488   :  { %v5101_v60 = vsel %vm5020_vm5, %v5081_v47, 0.0  ;;  %v5070_v19 = vsub.f32 %v14038_v8, %v14106_v25  ;;  %v5084_v50 = vmul.f32 %v5068_v39, %v5068_v39  ;;  %v5103_v21 = vsel %vm5020_vm5, %v5082_v7, 0.0 }
 0x489   :  { %v5096_v23 = vadd.f32 %v5095_v52, %v5094_v1  ;;  %v5071_v44 = vsub.f32 %v14044_v12, %v14106_v25  ;;  %v5085_v59 = vmul.f32 %v5069_v57, %v5069_v57  ;;  %v5105_v20 = vsel %vm5020_vm5, %v5083_v38, 0.0 }
 0x48a   :  { %v5072_v22 = vsub.f32 %v14078_v42, %v14106_v25  ;;  %v5086_v34 = vmul.f32 %v5070_v19, %v5070_v19  ;;  %v5107_v33 = vsel %vm5020_vm5, %v5084_v50, 0.0  ;;  %v5073_v51 = vsub.f32 %v14089_v6, %v14106_v25 }
 0x48b   :  { %v5098_v11 = vadd.f32 %v5097_v3, %v5096_v23  ;;  %v5087_v43 = vmul.f32 %v5071_v44, %v5071_v44  ;;  %v5109_v26 = vsel %vm5020_vm5, %v5085_v59, 0.0  ;;  %v5074_v48 = vsub.f32 %v14075_v62, %v14106_v25 }
 0x48c   :  { %v5088_v18 = vmul.f32 %v5072_v22, %v5072_v22  ;;  %v5111_v13 = vsel %vm5020_vm5, %v5086_v34, 0.0  ;;  %v5075_v32 = vsub.f32 %v14084_v55, %v14106_v25  ;;  %v5089_v61 = vmul.f32 %v5073_v51, %v5073_v51  ;;  %v15739_v34 = vld [vmem:[#allocation21_spill] sm:$0xff]  ;;  %v14176_v51 = vld [vmem:[#allocation3 + $0xc] sm:$0x1] }
 0x48d   :  { %v5100_v58 = vadd.f32 %v5099_v2, %v5098_v11  ;;  %v5113_v10 = vsel %vm5020_vm5, %v5087_v43, 0.0  ;;  %v5090_v5 = vmul.f32 %v5074_v48, %v5074_v48 }
 0x48e   :  { %v5115_v35 = vsel %vm5020_vm5, %v5088_v18, 0.0  ;;  %v5091_v24 = vmul.f32 %v5075_v32, %v5075_v32  ;;  %v5117_v0 = vsel %vm5020_vm5, %v5089_v61, 0.0 }
 0x48f   :  { %v5102_v4 = vadd.f32 %v5101_v60, %v5100_v58  ;;  %v5119_v23 = vsel %vm5020_vm5, %v5090_v5, 0.0 }
 0x490   :  { %v5121_v47 = vsel %vm5020_vm5, %v5091_v24, 0.0 }
 0x491   :  { %v5104_v29 = vadd.f32 %v5103_v21, %v5102_v4  ;;  %v14156_v4 = vld [vmem:[#allocation3] sm:$0xf] }
 0x492   :  { %v5469_v19 = vshrl.u32 %v14156_v4, 16  ;;  %v5472_v50 = vshll.u32 %v14156_v4, 16  ;;  %v5130_v21 = vld [vmem:[%s15435_s7] sm:$0x1] }
 0x493   :  { %v5106_v15 = vadd.f32 %v5105_v20, %v5104_v29 }
 0x494   :  { %v14163_v44 = vrot.slane %v5469_v19, 4  ;;  %v14165_v59 = vrot.slane %v5472_v50, 5 }
 0x495   :  { %v5108_v37 = vadd.f32 %v5107_v33, %v5106_v15  ;;  %v5134_v15 = vld [vmem:[%s15436_s8] sm:$0x1] }
 0x496   :  { %v5475_v43 = vor.u32 %v14165_v59, %v14163_v44  ;;  %v5258_v44 = vld [vmem:[#allocation3 + $0x38] sm:$0x7] }
 0x497   :  { %v5110_v17 = vadd.f32 %v5109_v26, %v5108_v37  ;;  %v14174_v37 = vld [vmem:[#allocation3 + $0x4] sm:$0x1] }
 0x498   :  { %v5478_v26 = vshll.u32 %v14174_v37, 16 }
 0x499   :  { %v5112_v9 = vadd.f32 %v5111_v13, %v5110_v17  ;;  %v14181_v17 = vld [vmem:[#allocation3 + $0x14] sm:$0x1] }
 0x49a   :  { %v5506_v13 = vshll.u32 %v14181_v17, 16 }
 0x49b   :  { %v5114_v14 = vadd.f32 %v5113_v10, %v5112_v9 }
 0x49d   :  { %v5116_v1 = vadd.f32 %v5115_v35, %v5114_v14 }
 0x49f   :  { %v5118_v52 = vadd.f32 %v5117_v0, %v5116_v1 }
 0x4a1   :  { %v5120_v27 = vadd.f32 %v5119_v23, %v5118_v52 }
 0x4a3   :  { %v5122_v3 = vadd.f32 %v5121_v47, %v5120_v27 }
 0x4a5   :  { %v5123_v11 = vrot.slane %v5122_v3, 4 }
 0x4a7   :  { %v5124_v39 = vadd.f32 %v5123_v11, %v5122_v3 }
 0x4a9   :  { %v5125_v7 = vrot.slane %v5124_v39, 2 }
 0x4ab   :  { %v5126_v2 = vadd.f32 %v5125_v7, %v5124_v39 }
 0x4ad   :  { %v5127_v58 = vrot.slane %v5126_v2, 1 }
 0x4af   :  { %v5128_v57 = vadd.f32 %v5127_v58, %v5126_v2 }
 0x4b1   :  { %v5129_v38 = vmul.f32 0.0078125, %v5128_v57 }
 0x4b3   :  { %v5131_v60 = vadd.f32 1e-05, %v5129_v38 }
 0x4b5   :  { %11609 = vrsqrt.f32 %v5131_v60 }
 0x4bf   :  { %v11610_v29 = vpop.eup %11609 }
 0x4c0   :  { %v5133_v20 = vmul.f32 %v11610_v29, %v5130_v21 }
 0x4c2   :  { %v5135_v22 = vmul.f32 %v5133_v20, %v14106_v25  ;;  %v14172_v33 = vrot.slane %v5133_v20, %v15739_v34  ;;  %v5492_v25 = vshll.u32 %v14176_v51, 16 }
 0x4c4   :  { %v5136_v48 = vsub.f32 %v5134_v15, %v5135_v22  ;;  %v5155_v18 = vmul.f32 %v14078_v42, %v14172_v33  ;;  %v5156_v9 = vmul.f32 %v14089_v6, %v14172_v33  ;;  %v5143_v32 = vmul.f32 %v14010_v63, %v14172_v33 }
 0x4c5   :  { %v5144_v61 = vmul.f32 %v14014_v56, %v14172_v33  ;;  %v5145_v10 = vmul.f32 %v14008_v28, %v14172_v33  ;;  %v5146_v42 = vmul.f32 %v14012_v53, %v14172_v33  ;;  %v5147_v5 = vmul.f32 %v14026_v41, %v14172_v33 }
 0x4c6   :  { %v14196_v14 = vrot.slane %v5136_v48, %v15739_v34  ;;  %v5148_v6 = vmul.f32 %v14032_v30, %v14172_v33  ;;  %v5151_v63 = vmul.f32 %v14042_v36, %v14172_v33  ;;  %v5152_v56 = vmul.f32 %v14048_v49, %v14172_v33 }
 0x4c7   :  { %v5153_v28 = vmul.f32 %v14038_v8, %v14172_v33  ;;  %v5154_v35 = vmul.f32 %v14044_v12, %v14172_v33 }
 0x4c8   :  { %v5177_v53 = vadd.f32 %v14196_v14, %v5155_v18  ;;  %v5178_v1 = vadd.f32 %v14196_v14, %v5156_v9  ;;  %v5165_v41 = vadd.f32 %v14196_v14, %v5143_v32  ;;  %v5166_v30 = vadd.f32 %v14196_v14, %v5144_v61 }
 0x4c9   :  { %v5167_v24 = vadd.f32 %v14196_v14, %v5145_v10  ;;  %v5168_v36 = vadd.f32 %v14196_v14, %v5146_v42  ;;  %v5169_v49 = vadd.f32 %v14196_v14, %v5147_v5  ;;  %v5170_v0 = vadd.f32 %v14196_v14, %v5148_v6 }
 0x4ca   :  { %v5193_v8 = vmax.f32 %v5177_v53, 0.0  ;;  %v5194_v52 = vmax.f32 %v5178_v1, 0.0  ;;  %v5181_v23 = vmax.f32 %v5165_v41, 0.0  ;;  %v5182_v12 = vmax.f32 %v5166_v30, 0.0 }
 0x4cb   :  { %v5183_v27 = vmax.f32 %v5167_v24, 0.0  ;;  %v5184_v47 = vmax.f32 %v5168_v36, 0.0  ;;  %v5185_v3 = vmax.f32 %v5169_v49, 0.0  ;;  %v5186_v11 = vmax.f32 %v5170_v0, 0.0 }
 0x4cc   :  { %v5323_v39 = vmax.f32 %v5193_v8, %v5194_v52  ;;  %v5197_v7 = vmax.f32 %v5181_v23, %v5182_v12  ;;  %v5173_v2 = vadd.f32 %v14196_v14, %v5151_v63  ;;  %v5174_v58 = vadd.f32 %v14196_v14, %v5152_v56 }
 0x4cd   :  { %v5261_v57 = vmax.f32 %v5183_v27, %v5184_v47  ;;  %v5322_v38 = vmax.f32 %v5185_v3, %v5186_v11  ;;  %v5175_v60 = vadd.f32 %v14196_v14, %v5153_v28  ;;  %v5176_v19 = vadd.f32 %v14196_v14, %v5154_v35 }
 0x4ce   :  { %v5327_v50 = vrot.slane %v5323_v39, 1  ;;  %v5201_v21 = vrot.slane %v5197_v7, 1  ;;  %v5189_v29 = vmax.f32 %v5173_v2, 0.0  ;;  %v5190_v20 = vmax.f32 %v5174_v58, 0.0 }
 0x4cf   :  { %v5265_v15 = vrot.slane %v5261_v57, 1  ;;  %v5326_v22 = vrot.slane %v5322_v38, 1  ;;  %v5191_v48 = vmax.f32 %v5175_v60, 0.0  ;;  %v5192_v18 = vmax.f32 %v5176_v19, 0.0 }
 0x4d0   :  { %v5331_v9 = vmax.f32 %v5323_v39, %v5327_v50  ;;  %v5205_v32 = vmax.f32 %v5197_v7, %v5201_v21  ;;  %v14226_v61 = vmul.f32 %v14022_v40, %v14172_v33  ;;  %v14230_v10 = vmul.f32 %v14028_v46, %v14172_v33 }
 0x4d1   :  { %v5269_v42 = vmax.f32 %v5261_v57, %v5265_v15  ;;  %v5330_v5 = vmax.f32 %v5322_v38, %v5326_v22  ;;  %v5198_v6 = vmax.f32 %v5189_v29, %v5190_v20  ;;  %v5262_v63 = vmax.f32 %v5191_v48, %v5192_v18 }
 0x4d2   :  { %v5335_v56 = vrot.slane %v5331_v9, 1  ;;  %v5339_v28 = vrot.slane %v5331_v9, 2  ;;  %v5343_v35 = vrot.slane %v5331_v9, 3  ;;  %v5209_v53 = vrot.slane %v5205_v32, 1 }
 0x4d3   :  { %v5213_v1 = vrot.slane %v5205_v32, 2  ;;  %v5217_v41 = vrot.slane %v5205_v32, 3  ;;  %v5273_v30 = vrot.slane %v5269_v42, 1  ;;  %v5277_v24 = vrot.slane %v5269_v42, 2 }
 0x4d4   :  { %v5347_v40 = vsel %vm1446_vm6, %v5331_v9, %v5335_v56  ;;  %v5221_v36 = vsel %vm1446_vm6, %v5205_v32, %v5209_v53  ;;  %v5281_v46 = vrot.slane %v5269_v42, 3  ;;  %v5334_v49 = vrot.slane %v5330_v5, 1  ;;  %v5380_v9 = vld [vmem:[#allocation3 + $0x48] sm:$0x7] }
 0x4d5   :  { %v5349_v0 = vsel %vm1449_vm7, %v5347_v40, %v5339_v28  ;;  %v5223_v8 = vsel %vm1449_vm7, %v5221_v36, %v5213_v1  ;;  %v5285_v52 = vsel %vm1446_vm6, %v5269_v42, %v5273_v30  ;;  %v5338_v23 = vrot.slane %v5330_v5, 2  ;;  %v5255_v28 = vld [vmem:[#allocation3 + $0x8] sm:$0x7]  ;;  %v5316_v40 = vld [vmem:[#allocation3 + $0x10] sm:$0x7] }
 0x4d6   :  { %v5351_v12 = vsel %vm1452_vm8, %v5349_v0, %v5343_v35  ;;  %v5225_v27 = vsel %vm1452_vm8, %v5223_v8, %v5217_v41  ;;  %v5287_v47 = vsel %vm1449_vm7, %v5285_v52, %v5277_v24  ;;  %v5342_v3 = vrot.slane %v5330_v5, 3 }
 0x4d7   :  { %v10394_v11 = vpack.c.bf16 %v5351_v12, %v5351_v12  ;;  %v10389_v39 = vpack.c.bf16 %v5225_v27, %v5225_v27  ;;  %v5289_v7 = vsel %vm1452_vm8, %v5287_v47, %v5281_v46  ;;  %v5346_v2 = vsel %vm1446_vm6, %v5330_v5, %v5334_v49  ;;  %v11352_v5 = vld [vmem:[%s15434_s3 + $0x58] sm:$0xff]  }
 0x4d8   :  { %v10391_v58 = vpack.c.bf16 %v5289_v7, %v5289_v7  ;;  %v5348_v57 = vsel %vm1449_vm7, %v5346_v2, %v5338_v23  ;;  %v5202_v38 = vrot.slane %v5198_v6, 1  ;;  %v5266_v60 = vrot.slane %v5262_v63, 1 }
 0x4d9   :  { %v5368_v19 = vshrl.u32 %v10394_v11, 16  ;;  %v5371_v50 = vshll.u32 %v10394_v11, 16  ;;  %v5236_v21 = vshrl.u32 %v10389_v39, 16  ;;  %v5239_v29 = vshll.u32 %v10389_v39, 16 }
 0x4da   :  { %v5300_v20 = vshrl.u32 %v10391_v58, 16  ;;  %v5303_v15 = vshll.u32 %v10391_v58, 16  ;;  %v5350_v22 = vsel %vm1452_vm8, %v5348_v57, %v5342_v3  ;;  %v5206_v48 = vmax.f32 %v5198_v6, %v5202_v38  ;;  %v5377_v3 = vld [vmem:[#allocation3 + $0x18] sm:$0x7] }
 0x4db   :  { %v5370_v18 = vrot.slane %v5368_v19, 7  ;;  %v5238_v32 = vrot.slane %v5236_v21, 7  ;;  %v10393_v42 = vpack.c.bf16 %v5350_v22, %v5350_v22  ;;  %v5270_v56 = vmax.f32 %v5262_v63, %v5266_v60  ;;  %v14251_v63 = vld [vmem:[#allocation3 + $0x30] sm:$0xf] }
 0x4dc   :  { %v5302_v35 = vrot.slane %v5300_v20, 7  ;;  %v5210_v53 = vrot.slane %v5206_v48, 1  ;;  %v5214_v1 = vrot.slane %v5206_v48, 2  ;;  %v5218_v41 = vrot.slane %v5206_v48, 3  ;;  %v14272_v20 = vld [vmem:[#allocation3 + $0x1c] sm:$0x1] }
 0x4dd   :  { %v5373_v30 = vor.u32 %v5371_v50, %v5370_v18  ;;  %v5241_v24 = vor.u32 %v5239_v29, %v5238_v32  ;;  %v5361_v6 = vshrl.u32 %v10393_v42, 16  ;;  %v5364_v36 = vshll.u32 %v10393_v42, 16 }
 0x4de   :  { %v5305_v46 = vor.u32 %v5303_v15, %v5302_v35  ;;  %v5222_v49 = vsel %vm1446_vm6, %v5206_v48, %v5210_v53  ;;  %v5274_v0 = vrot.slane %v5270_v56, 1  ;;  %v5278_v8 = vrot.slane %v5270_v56, 2 }
 0x4df   :  { %v5381_v52 = vsel %vm14246_vm12, %v5373_v30, %v5380_v9  ;;  %v5256_v23 = vsel %vm14246_vm12, %v5241_v24, %v5255_v28  ;;  %v5363_v12 = vrot.slane %v5361_v6, 7  ;;  %v5224_v27 = vsel %vm1449_vm7, %v5222_v49, %v5214_v1  ;;  %v5319_v6 = vld [vmem:[#allocation3 + $0x40] sm:$0x7] }
 0x4e0   :  { %5382 = vst [vmem:[#allocation3 + $0x48] sm:$0x7] %v5381_v52  ;;  %5257 = vst [vmem:[#allocation3 + $0x8] sm:$0x7] %v5256_v23  ;;  %v5317_v47 = vsel %vm14246_vm12, %v5305_v46, %v5316_v40  ;;  %v5226_v11 = vsel %vm1452_vm8, %v5224_v27, %v5218_v41  ;;  %v5282_v39 = vrot.slane %v5270_v56, 3  ;;  %v5286_v7 = vsel %vm1446_vm6, %v5270_v56, %v5274_v0 }
 0x4e1   :  { %5318 = vst [vmem:[#allocation3 + $0x10] sm:$0x7] %v5317_v47  ;;  %v5366_v2 = vor.u32 %v5364_v36, %v5363_v12  ;;  %v10390_v58 = vpack.c.bf16 %v5226_v11, %v5226_v11  ;;  %v5525_v57 = vshrl.u32 %v14251_v63, 16  ;;  %v5288_v38 = vsel %vm1449_vm7, %v5286_v7, %v5278_v8  ;;  %v14308_v12 = vld [vmem:[#allocation3 + $0x34] sm:$0x1] }
 0x4e2   :  { %v5528_v60 = vshll.u32 %v14251_v63, 16  ;;  %v5290_v19 = vsel %vm1452_vm8, %v5288_v38, %v5282_v39  ;;  %v5171_v50 = vadd.f32 %v14196_v14, %v14226_v61  ;;  %v5172_v21 = vadd.f32 %v14196_v14, %v14230_v10 }
 0x4e3   :  { %v5378_v29 = vsel %vm14246_vm12, %v5366_v2, %v5377_v3  ;;  %v5243_v15 = vshrl.u32 %v10390_v58, 16  ;;  %v10392_v22 = vpack.c.bf16 %v5290_v19, %v5290_v19  ;;  %v14277_v48 = vrot.slane %v5475_v43, 4 }
 0x4e4   :  { %v14281_v18 = vrot.slane %v5478_v26, 5  ;;  %v5494_v61 = vrot.slane %v5492_v25, 5  ;;  %5379 = vst [vmem:[#allocation3 + $0x18] sm:$0x7] %v5378_v29  ;;  %v5520_v10 = vshll.u32 %v14272_v20, 16  ;;  %v14288_v9 = vrot.slane %v5506_v13, 5 }
 0x4e5   :  { %v5245_v32 = vrot.slane %v5243_v15, 7  ;;  %v5246_v42 = vshll.u32 %v10390_v58, 16  ;;  %v5307_v56 = vshrl.u32 %v10392_v22, 16  ;;  %v5527_v59 = vrot.slane %v5525_v57, 4 }
 0x4e6   :  { %v5530_v43 = vrot.slane %v5528_v60, 5  ;;  %v5187_v28 = vmax.f32 %v5171_v50, 0.0  ;;  %v5188_v35 = vmax.f32 %v5172_v21, 0.0  ;;  %v5310_v25 = vshll.u32 %v10392_v22, 16 }
 0x4e7   :  { %v14290_v26 = vld [vmem:[#allocation3 + $0x8] sm:$0xf]  ;;  %v5248_v53 = vor.u32 %v5246_v42, %v5245_v32  ;;  %v5309_v1 = vrot.slane %v5307_v56, 7  ;;  %v5481_v13 = vsel %vm13339_vm3, %v14277_v48, %v14281_v18  ;;  %v5157_v36 = vmul.f32 %v14075_v62, %v14172_v33  ;;  %v14323_v32 = vld [vmem:[#allocation3 + $0x3c] sm:$0x1] }
 0x4e8   :  { %v14292_v41 = vld [vmem:[#allocation3 + $0x48] sm:$0xf]  ;;  %v5483_v30 = vshrl.u32 %v14290_v26, 16  ;;  %v5486_v24 = vshll.u32 %v14290_v26, 16  ;;  %v14300_v40 = vld [vmem:[#allocation3 + $0x10] sm:$0xf]  ;;  %v5383_v47 = vmax.f32 %v5187_v28, %v5188_v35  ;;  %v5158_v38 = vmul.f32 %v14084_v55, %v14172_v33 }
 0x4e9   :  { %v5497_v46 = vshrl.u32 %v14300_v40, 16  ;;  %v5500_v49 = vshll.u32 %v14300_v40, 16  ;;  %v5259_v0 = vsel %vm14246_vm12, %v5248_v53, %v5258_v44  ;;  %v5312_v8 = vor.u32 %v5310_v25, %v5309_v1  ;;  %v14328_v28 = vld [vmem:[#allocation3 + $0x4c] sm:$0x1] }
 0x4ea   :  { %v5485_v52 = vrot.slane %v5483_v30, 4  ;;  %v5488_v23 = vrot.slane %v5486_v24, 5  ;;  %5260 = vst [vmem:[#allocation3 + $0x38] sm:$0x7] %v5259_v0  ;;  %v5567_v27 = vshrl.u32 %v14292_v41, 16  ;;  %v5570_v7 = vshll.u32 %v14292_v41, 16 }
 0x4eb   :  { %v14311_v3 = vld [vmem:[#allocation3 + $0x18] sm:$0xf]  ;;  %v5499_v11 = vrot.slane %v5497_v46, 4  ;;  %v5502_v62 = vrot.slane %v5500_v49, 5  ;;  %v5320_v39 = vsel %vm14246_vm12, %v5312_v8, %v5319_v6  ;;  %v5531_v19 = vor.u32 %v5530_v43, %v5527_v59 }
 0x4ec   :  { %v5489_v2 = vor.u32 %v5488_v23, %v5485_v52  ;;  %v5511_v58 = vshrl.u32 %v14311_v3, 16  ;;  %v5514_v57 = vshll.u32 %v14311_v3, 16  ;;  %5321 = vst [vmem:[#allocation3 + $0x40] sm:$0x7] %v5320_v39  ;;  %v5534_v50 = vshll.u32 %v14308_v12, 16 }
 0x4ed   :  { %v5503_v60 = vor.u32 %v5502_v62, %v5499_v11  ;;  %v5179_v21 = vadd.f32 %v14196_v14, %v5157_v36  ;;  %v5180_v48 = vadd.f32 %v14196_v14, %v5158_v38  ;;  %v5569_v42 = vrot.slane %v5567_v27, 4  ;;  %v11343_v11 = vld [vmem:[%s15434_s3 + $0x8] sm:$0xff]  }
 0x4ee   :  { %v5490_v29 = vrot.slane %v5489_v2, 4  ;;  %v5513_v15 = vrot.slane %v5511_v58, 4  ;;  %v5516_v22 = vrot.slane %v5514_v57, 5  ;;  %v5572_v56 = vrot.slane %v5570_v7, 5 }
 0x4ef   :  { %v5504_v18 = vrot.slane %v5503_v60, 4  ;;  %v5387_v44 = vrot.slane %v5383_v47, 1  ;;  %v5522_v59 = vrot.slane %v5520_v10, 5  ;;  %v5548_v43 = vshll.u32 %v14323_v32, 16 }
 0x4f0   :  { %v5495_v55 = vsel %vm13339_vm3, %v5490_v29, %v5494_v61  ;;  %v5517_v33 = vor.u32 %v5516_v22, %v5513_v15  ;;  %v5532_v1 = vrot.slane %v5531_v19, 4  ;;  %v5536_v14 = vrot.slane %v5534_v50, 5  ;;  %v11344_v15 = vld [vmem:[%s15434_s3 + $0x10] sm:$0xff]  }
 0x4f1   :  { %v9879_v35 = vcombine.low %v5481_v13, %v5495_v55  ;;  %v14330_v53 = vld [vmem:[#allocation3 + $0x38] sm:$0xf]  ;;  %v5576_v25 = vshll.u32 %v14328_v28, 16  ;;  %v5509_v30 = vsel %vm13339_vm3, %v5504_v18, %v14288_v9  ;;  %v14341_v13 = vld [vmem:[#allocation3 + $0x44] sm:$0x1]  ;;  %v5573_v36 = vor.u32 %v5572_v56, %v5569_v42 }
 0x4f2   :  { %v5518_v24 = vrot.slane %v5517_v33, 4  ;;  %v5539_v61 = vshrl.u32 %v14330_v53, 16  ;;  %v5542_v10 = vshll.u32 %v14330_v53, 16  ;;  %v5391_v46 = vmax.f32 %v5383_v47, %v5387_v44 }
 0x4f3   :  { %10862 = vmatprep.mubr.msk.bf16.mxu0 %vm5020_vm5, %v9879_v35  ;;  %v14339_v6 = vld [vmem:[#allocation3 + $0x40] sm:$0xf]  ;;  %v5195_v49 = vmax.f32 %v5179_v21, 0.0  ;;  %v5196_v0 = vmax.f32 %v5180_v48, 0.0  ;;  %v5562_v39 = vshll.u32 %v14341_v13, 16  ;;  %v5550_v47 = vrot.slane %v5548_v43, 5 }
 0x4f4   :  { %v5523_v8 = vsel %vm13339_vm3, %v5518_v24, %v5522_v59  ;;  %v5541_v52 = vrot.slane %v5539_v61, 4  ;;  %v5544_v9 = vrot.slane %v5542_v10, 5  ;;  %v5553_v23 = vshrl.u32 %v14339_v6, 16 }
 0x4f5   :  { %v9880_v27 = vcombine.low %v5509_v30, %v5523_v8  ;;  %v5556_v62 = vshll.u32 %v14339_v6, 16  ;;  %v5578_v58 = vrot.slane %v5576_v25, 5  ;;  %v5574_v38 = vrot.slane %v5573_v36, 4  ;;  %v11345_v30 = vld [vmem:[%s15434_s3 + $0x18] sm:$0xff]  }
 0x4f6   :  { %v5545_v7 = vor.u32 %v5544_v9, %v5541_v52  ;;  %v5555_v2 = vrot.slane %v5553_v23, 4  ;;  %v5395_v60 = vrot.slane %v5391_v46, 1  ;;  %v5399_v19 = vrot.slane %v5391_v46, 2  ;;  %v5438_v52 = vld [vmem:[#allocation3 + $0x20] sm:$0x7] }
 0x4f7   :  { %10863 = vmatmul.mubr.msk.bf16.vlgmr.msra.gmra.mrb[80].mxu0 %vm5020_vm5, %v9880_v27  ;;  %v5558_v57 = vrot.slane %v5556_v62, 5  ;;  %v5537_v50 = vsel %vm13339_vm3, %v5532_v1, %v5536_v14  ;;  %v5384_v29 = vmax.f32 %v5195_v49, %v5196_v0  ;;  %v5564_v48 = vrot.slane %v5562_v39, 5  ;;  %v11346_v23 = vld [vmem:[%s15434_s3 + $0x40] sm:$0xff]   ;;  %v5824_v39 = vld [vmem:[#allocation3 + $0x8] sm:$0xe] }
 0x4f8   :  { %10871 = vmatpush3.bf16.msra.mxu0 %v14103_v16  ;;  %v5546_v21 = vrot.slane %v5545_v7, 4  ;;  %v5403_v18 = vrot.slane %v5391_v46, 3  ;;  %v5407_v42 = vsel %vm1446_vm6, %v5391_v46, %v5395_v60  ;;  %v5579_v59 = vsel %vm13339_vm3, %v5574_v38, %v5578_v58  ;;  %v5823_v62 = vld [vmem:[#allocation3] sm:$0xe] }
 0x4f9   :  { %10872 = vmatprep.subr.bf16.mxu0 %v11343_v11  ;;  %v5559_v22 = vor.u32 %v5558_v57, %v5555_v2  ;;  %v5409_v16 = vsel %vm1449_vm7, %v5407_v42, %v5399_v19  ;;  %v5388_v44 = vrot.slane %v5384_v29, 1  ;;  %v9891_v10 = vcombine.low %v14156_v4, %v14290_v26  ;;  %v11349_v2 = vld [vmem:[%s15434_s3 + $0x48] sm:$0xff]  }
 0x4fa   :  { %v5551_v56 = vsel %vm13339_vm3, %v5546_v21, %v5550_v47  ;;  %v5411_v43 = vsel %vm1452_vm8, %v5409_v16, %v5403_v18  ;;  %v9892_v47 = vcombine.low %v14300_v40, %v14311_v3  ;;  %v9893_v58 = vcombine.low %v14251_v63, %v14330_v53  ;;  %v11350_v63 = vld [vmem:[%s15434_s3 + $0x50] sm:$0xff]  }
 0x4fb   :  { %v9881_v55 = vcombine.low %v5537_v50, %v5551_v56  ;;  %v5560_v33 = vrot.slane %v5559_v22, 4  ;;  %v10395_v35 = vpack.c.bf16 %v5411_v43, %v5411_v43  ;;  %v5392_v1 = vmax.f32 %v5384_v29, %v5388_v44  ;;  %v5441_v29 = vld [vmem:[#allocation3 + $0x50] sm:$0x7] }
 0x4fc   :  { %10873 = vmatpush3.bf16.msra.mxu0 %v11343_v11  ;;  %v9903_v60 = vrot.slane %v5823_v62, 9  ;;  %v5849_v19 = vrot.slane %v14174_v37, 5  ;;  %v9904_v50 = vrot.slane %v5824_v39, 9  ;;  %v5853_v21 = vrot.slane %v14176_v51, 5  ;;  %v5825_v51 = vld [vmem:[#allocation3 + $0x10] sm:$0xe] }
 0x4fd   :  { %10866 = vmatprep.mubr.msk.bf16.mxu0 %vm5020_vm5, %v9881_v55  ;;  %10874 = vmatprep.subr.bf16.mxu0 %v11344_v15  ;;  %v5565_v14 = vsel %vm13339_vm3, %v5560_v33, %v5564_v48  ;;  %v5422_v24 = vshrl.u32 %v10395_v35, 16  ;;  %v5396_v61 = vrot.slane %v5392_v1, 1  ;;  %v5400_v36 = vrot.slane %v5392_v1, 2  ;;  %v5827_v22 = vld [vmem:[#allocation3 + $0x30] sm:$0xe] }
 0x4fe   :  { %v9882_v25 = vcombine.low %v5565_v14, %v5579_v59  ;;  %v5425_v49 = vshll.u32 %v10395_v35, 16  ;;  %v5404_v0 = vrot.slane %v5392_v1, 3  ;;  %v5850_v53 = vsel %vm13595_vm2, %v9903_v60, %v5849_v19  ;;  %v5828_v48 = vld [vmem:[#allocation3 + $0x38] sm:$0xe] }
 0x4ff   :  { %v5424_v46 = vrot.slane %v5422_v24, 7  ;;  %v5408_v8 = vsel %vm1446_vm6, %v5392_v1, %v5396_v61  ;;  %v5854_v37 = vsel %vm13595_vm2, %v9904_v50, %v5853_v21  ;;  %v9894_v18 = vcombine.low %v14339_v6, %v14292_v41  ;;  %v5829_v41 = vld [vmem:[#allocation3 + $0x40] sm:$0xe]  ;;  %v5830_v6 = vld [vmem:[#allocation3 + $0x48] sm:$0xe] }
 0x500   :  { %10867 = vmatmul.mubr.msk.bf16.gmra.mrb[84].mxu0 %vm5020_vm5, %v9882_v25  ;;  %v5410_v9 = vsel %vm1449_vm7, %v5408_v8, %v5400_v36  ;;  %v5857_v42 = vrot.slane %v14181_v17, 5  ;;  %v9919_v56 = vcombine.low %v5850_v53, %v5854_v37  ;;  %v9905_v16 = vrot.slane %v5825_v51, 9  ;;  %v11353_v17 = vld [vmem:[%s15434_s3 + $0x60] sm:$0xff]   ;;  %v6163_v19 = vld [vmem:[#allocation3 + $0x38] sm:$0xf] }
 0x501   :  { %10875 = vmatpush3.bf16.msra.mxu0 %v11344_v15  ;;  %10878 = vmatprep.mubr.msk.bf16.mxu0 %vm5020_vm5, %v9891_v10  ;;  %v5427_v4 = vor.u32 %v5425_v49, %v5424_v46  ;;  %v5412_v26 = vsel %vm1452_vm8, %v5410_v9, %v5404_v0  ;;  %v5826_v15 = vld [vmem:[#allocation3 + $0x18] sm:$0xe]  ;;  %v5861_v55 = vrot.slane %v14272_v20, 5  ;;  %v9907_v33 = vrot.slane %v5827_v22, 9  ;;  %v11354_v10 = vld [vmem:[%s15434_s3 + $0x68] sm:$0xff]   ;;  %v11355_v0 = vld [vmem:[%s15434_s3 + $0x70] sm:$0xff]  }
 0x502   :  { %10876 = vmatprep.subr.bf16.mxu0 %v11345_v30  ;;  %v10396_v27 = vpack.c.bf16 %v5412_v26, %v5412_v26  ;;  %v9906_v44 = vrot.slane %v5826_v15, 9  ;;  %v5865_v59 = vrot.slane %v14308_v12, 5  ;;  %v9908_v43 = vrot.slane %v5828_v48, 9  ;;  %v6155_v46 = vld [vmem:[#allocation3 + $0x8] sm:$0xf]  ;;  %v11357_v26 = vld [vmem:[%s15434_s3 + $0x78] sm:$0xff]  }
 0x503   :  { %v5439_v11 = vsel %vm14246_vm12, %v5427_v4, %v5438_v52  ;;  %v5869_v35 = vrot.slane %v14323_v32, 5  ;;  %v5858_v20 = vsel %vm13595_vm2, %v9905_v16, %v5857_v42  ;;  %v9909_v14 = vrot.slane %v5829_v41, 9  ;;  %v6157_v49 = vld [vmem:[#allocation3 + $0x10] sm:$0xf]  ;;  %v6165_v50 = vld [vmem:[#allocation3 + $0x40] sm:$0xf] }
 0x504   :  { %5440 = vst [vmem:[#allocation3 + $0x20] sm:$0x7] %v5439_v11  ;;  %v5429_v7 = vshrl.u32 %v10396_v27, 16  ;;  %v5432_v38 = vshll.u32 %v10396_v27, 16  ;;  %v5862_v1 = vsel %vm13595_vm2, %v9906_v44, %v5861_v55  ;;  %v5866_v12 = vsel %vm13595_vm2, %v9907_v33, %v5865_v59  ;;  %v11358_v21 = vld [vmem:[%s15434_s3 + $0x80] sm:$0xff]  }
 0x505   :  { %10877 = vmatpush3.bf16.msra.mxu0 %v11345_v30  ;;  %v5870_v32 = vsel %vm13595_vm2, %v9908_v43, %v5869_v35  ;;  %v5873_v25 = vrot.slane %v14341_v13, 5  ;;  %v9910_v30 = vrot.slane %v5830_v6, 9  ;;  %v5877_v24 = vrot.slane %v14328_v28, 5  ;;  %v14456_v55 = vld [vmem:[#allocation3 + $0x1c] sm:$0x1] }
 0x506   :  { %10886 = vmatprep.subr.bf16.mxu0 %v11346_v23  ;;  %v5431_v57 = vrot.slane %v5429_v7, 7  ;;  %v9920_v61 = vcombine.low %v5858_v20, %v5862_v1  ;;  %v9921_v36 = vcombine.low %v5866_v12, %v5870_v32  ;;  %v6172_v8 = vshrl.u32 %v6155_v46, 16  ;;  %v11356_v7 = vld [vmem:[#allocation3 + $0x8] ss:$8 sps:$4 sm:$0xff]   ;;  %v14458_v33 = vld [vmem:[#allocation3 + $0x24] sm:$0x1] }
 0x507   :  { %v5874_v13 = vsel %vm13595_vm2, %v9909_v14, %v5873_v25  ;;  %v5878_v28 = vsel %vm13595_vm2, %v9910_v30, %v5877_v24  ;;  %v6175_v52 = vshll.u32 %v6155_v46, 16  ;;  %v6186_v9 = vshrl.u32 %v6157_v49, 16  ;;  %v11360_v35 = vld [vmem:[#allocation3 + $0x38] ss:$8 sps:$4 sm:$0xff]   ;;  %v6167_v6 = vld [vmem:[#allocation3 + $0x48] sm:$0xf] }
 0x508   :  { %10879 = vmatmul.mubr.msk.bf16.vlgmr.msra.gmra.mrb[80].mxu0 %vm5020_vm5, %v9892_v47  ;;  %v5434_v40 = vor.u32 %v5432_v38, %v5431_v57  ;;  %v9922_v4 = vcombine.low %v5874_v13, %v5878_v28  ;;  %v6174_v27 = vrot.slane %v6172_v8, 4  ;;  %v6159_v47 = vld [vmem:[#allocation3 + $0x18] sm:$0xf]  ;;  %v6228_v51 = vshrl.u32 %v6163_v19, 16  ;;  %v11362_v24 = vld [vmem:[%s15434_s3 + $0x90] sm:$0xff]  }
 0x509   :  { %10887 = vmatpush3.bf16.msra.mxu0 %v11346_v23  ;;  %10882 = vmatprep.mubr.msk.bf16.mxu0 %vm5020_vm5, %v9893_v58  ;;  %v6189_v23 = vshll.u32 %v6157_v49, 16  ;;  %v6177_v11 = vrot.slane %v6175_v52, 5  ;;  %v6188_v62 = vrot.slane %v6186_v9, 4  ;;  %v14445_v58 = vld [vmem:[#allocation3 + $0x14] sm:$0x1]  ;;  %v6231_v15 = vshll.u32 %v6163_v19, 16 }
 0x50a   :  { %10888 = vmatprep.subr.bf16.mxu0 %v11349_v2  ;;  %v5442_v3 = vsel %vm14246_vm12, %v5434_v40, %v5441_v29  ;;  %v6195_v60 = vshll.u32 %v14445_v58, 16  ;;  %v6242_v22 = vshrl.u32 %v6165_v50, 16  ;;  %v6245_v48 = vshll.u32 %v6165_v50, 16  ;;  %v14471_v46 = vld [vmem:[#allocation3 + $0x3c] sm:$0x1] }
 0x50b   :  { %5443 = vst [vmem:[#allocation3 + $0x50] sm:$0x7] %v5442_v3  ;;  %v6191_v39 = vrot.slane %v6189_v23, 5  ;;  %v6161_v57 = vld [vmem:[#allocation3 + $0x20] sm:$0xf]  ;;  %v6178_v29 = vor.u32 %v6177_v11, %v6174_v27  ;;  %v6203_v3 = vshll.u32 %v6159_v47, 16 }
 0x50c   :  { %v6214_v53 = vshrl.u32 %v6161_v57, 16  ;;  %v6217_v37 = vshll.u32 %v6161_v57, 16  ;;  %v6197_v42 = vrot.slane %v6195_v60, 5  ;;  %v6230_v20 = vrot.slane %v6228_v51, 4  ;;  %v14473_v28 = vld [vmem:[#allocation3 + $0x44] sm:$0x1] }
 0x50d   :  { %10889 = vmatpush3.bf16.msra.mxu0 %v11349_v2  ;;  %v14443_v2 = vld [vmem:[#allocation3 + $0xc] sm:$0x1]  ;;  %v6192_v40 = vor.u32 %v6191_v39, %v6188_v62  ;;  %v6179_v16 = vrot.slane %v6178_v29, 4  ;;  %v6205_v43 = vrot.slane %v6203_v3, 5  ;;  %v6233_v1 = vrot.slane %v6231_v15, 5  ;;  %v11364_v39 = vld [vmem:[%s15434_s3 + $0x98] sm:$0xff]  }
 0x50e   :  { %10890 = vmatprep.subr.bf16.mxu0 %v11350_v63  ;;  %v6181_v38 = vshll.u32 %v14443_v2, 16  ;;  %v6219_v41 = vrot.slane %v6217_v37, 5  ;;  %v6244_v12 = vrot.slane %v6242_v22, 4  ;;  %v6247_v32 = vrot.slane %v6245_v48, 5  ;;  %v14482_v3 = vld [vmem:[#allocation3 + $0x4c] sm:$0x1] }
 0x50f   :  { %v6193_v44 = vrot.slane %v6192_v40, 4  ;;  %v6209_v25 = vshll.u32 %v14456_v55, 16  ;;  %v6223_v30 = vshll.u32 %v14458_v33, 16  ;;  %v6256_v49 = vshrl.u32 %v6167_v6, 16  ;;  %v11365_v37 = vld [vmem:[%s15434_s3 + $0xa0] sm:$0xff]  }
 0x510   :  { %10883 = vmatmul.mubr.msk.bf16.gmra.mrb[84].mxu0 %vm5020_vm5, %v9894_v18  ;;  %v11361_v18 = vld [vmem:[%s15434_s3 + $0x88] sm:$0xff]   ;;  %v6234_v9 = vor.u32 %v6233_v1, %v6230_v20  ;;  %v6237_v23 = vshll.u32 %v14471_v46, 16  ;;  %v6265_v51 = vshll.u32 %v14482_v3, 16  ;;  %vm9524_vm12 = vcmask 1043459  }
 0x511   :  { %10891 = vmatpush3.bf16.msra.mxu0 %v11350_v63  ;;  %10894 = vmatprep.mubr.msk.bf16.mxu0 %vm5020_vm5, %v9919_v56  ;;  %v6200_v63 = vshrl.u32 %v6159_v47, 16  ;;  %v11359_v56 = vld [vmem:[#allocation3 + $0x18] ss:$8 sps:$4 sm:$0xff]   ;;  %v6211_v27 = vrot.slane %v6209_v25, 5  ;;  %v6225_v47 = vrot.slane %v6223_v30, 5  ;;  %v6258_v57 = vrot.slane %v6256_v49, 4 }
 0x512   :  { %10892 = vmatprep.subr.bf16.mxu0 %v11352_v5  ;;  %v6169_v14 = vld [vmem:[#allocation3 + $0x50] sm:$0xf]  ;;  %v6239_v29 = vrot.slane %v6237_v23, 5  ;;  %v6418_v49 = vld [vmem:[#allocation3 + $0x40] sm:$0xe] }
 0x513   :  { %v6202_v59 = vrot.slane %v6200_v63, 4  ;;  %v6270_v8 = vshrl.u32 %v6169_v14, 16  ;;  %v6273_v52 = vshll.u32 %v6169_v14, 16  ;;  %v11363_v11 = vld [vmem:[#allocation3 + $0x48] ss:$8 sps:$4 sm:$0xff]   ;;  %v6443_v14 = vrot.slane %v14445_v58, 5 }
 0x514   :  { %v11367_v25 = vld [vmem:[%s15434_s3 + $0xb0] sm:$0xff]  }
 0x515   :  { %10893 = vmatpush3.bf16.msra.mxu0 %v11352_v5  ;;  %v6183_v5 = vrot.slane %v6181_v38, 5  ;;  %v6272_v19 = vrot.slane %v6270_v8, 4  ;;  %v6275_v50 = vrot.slane %v6273_v52, 5  ;;  %v6447_v8 = vrot.slane %v14456_v55, 5  ;;  %v11369_v55 = vld [vmem:[%s15434_s3 + $0xc0] sm:$0xff]  }
 0x516   :  { %10902 = vmatprep.subr.bf16.mxu0 %v11353_v17 }
 0x518   :  { %10895 = vmatmul.mubr.msk.bf16.vlgmr.msra.gmra.mrb[80].mxu0 %vm5020_vm5, %v9920_v61  ;;  %v6184_v61 = vsel %vm13339_vm3, %v6179_v16, %v6183_v5  ;;  %v6276_v5 = vor.u32 %v6275_v50, %v6272_v19  ;;  %v6413_v16 = vld [vmem:[#allocation3 + $0x8] sm:$0xe]  ;;  %v6745_v19 = vld [vmem:[#allocation3 + $0x10] sm:$0xf] }
 0x519   :  { %10903 = vmatpush3.bf16.msra.mxu0 %v11353_v17  ;;  %10898 = vmatprep.mubr.msk.bf16.mxu0 %vm5020_vm5, %v9921_v36  ;;  %v6216_v17 = vrot.slane %v6214_v53, 4  ;;  %v6206_v36 = vor.u32 %v6205_v43, %v6202_v59  ;;  %v14484_v53 = vld [vmem:[#allocation3 + $0x54] sm:$0x1]  ;;  %v11366_v43 = vld [vmem:[%s15434_s3 + $0xa8] sm:$0xff]   ;;  %v9971_v1 = vrot.slane %v6413_v16, 9 }
 0x51a   :  { %10904 = vmatprep.subr.bf16.mxu0 %v11354_v10  ;;  %v6279_v15 = vshll.u32 %v14484_v53, 16 }
 0x51b   :  { %v6220_v13 = vor.u32 %v6219_v41, %v6216_v17 }
 0x51c   :  { %v6281_v20 = vrot.slane %v6279_v15, 5  ;;  %v11371_v15 = vld [vmem:[%s15434_s3 + $0xd0] sm:$0xff]  }
 0x51d   :  { %10905 = vmatpush3.bf16.msra.mxu0 %v11354_v10  ;;  %v6198_v10 = vsel %vm13339_vm3, %v6193_v44, %v6197_v42  ;;  %v6221_v38 = vrot.slane %v6220_v13, 4  ;;  %v6414_v44 = vld [vmem:[#allocation3 + $0x10] sm:$0xe] }
 0x51e   :  { %10906 = vmatprep.subr.bf16.mxu0 %v11355_v0  ;;  %v9959_v62 = vcombine.low %v6184_v61, %v6198_v10  ;;  %v6415_v61 = vld [vmem:[#allocation3 + $0x18] sm:$0xe]  ;;  %v6416_v10 = vld [vmem:[#allocation3 + $0x20] sm:$0xe] }
 0x51f   :  { %v6226_v48 = vsel %vm13339_vm3, %v6221_v38, %v6225_v47  ;;  %v9974_v23 = vrot.slane %v6416_v10, 9  ;;  %v6420_v47 = vld [vmem:[#allocation3 + $0x50] sm:$0xe]  ;;  %v11370_v38 = vld [vmem:[%s15434_s3 + $0xc8] sm:$0xff]  }
 0x520   :  { %10899 = vmatmul.mubr.msk.bf16.gmra.mrb[84].mxu0 %vm5020_vm5, %v9922_v4  ;;  %v6248_v4 = vor.u32 %v6247_v32, %v6244_v12  ;;  %v6439_v12 = vrot.slane %v14443_v2, 5  ;;  %v9972_v32 = vrot.slane %v6414_v44, 9 }
 0x521   :  { %10907 = vmatpush3.bf16.msra.mxu0 %v11355_v0  ;;  %10910 = vmatprep.mubr.msk.bf16.mxu0 %vm5020_vm5, %v11356_v7  ;;  %v6259_v0 = vshll.u32 %v6167_v6, 16  ;;  %v6207_v7 = vrot.slane %v6206_v36, 4  ;;  %v6277_v6 = vrot.slane %v6276_v5, 4  ;;  %v6417_v36 = vld [vmem:[#allocation3 + $0x38] sm:$0xe] }
 0x522   :  { %10908 = vmatprep.subr.bf16.mxu0 %v11357_v26  ;;  %v6249_v40 = vrot.slane %v6248_v4, 4  ;;  %v6440_v2 = vsel %vm13595_vm2, %v9971_v1, %v6439_v12  ;;  %v6444_v58 = vsel %vm13595_vm2, %v9972_v32, %v6443_v14  ;;  %v6451_v4 = vrot.slane %v14458_v33, 5  ;;  %v6755_v14 = vld [vmem:[#allocation3 + $0x48] sm:$0xf] }
 0x523   :  { %v6261_v60 = vrot.slane %v6259_v0, 5  ;;  %v6212_v22 = vsel %vm13339_vm3, %v6207_v7, %v6211_v27  ;;  %v11368_v0 = vld [vmem:[%s15434_s3 + $0xb8] sm:$0xff]   ;;  %v9987_v52 = vcombine.low %v6440_v2, %v6444_v58  ;;  %v6455_v27 = vrot.slane %v14471_v46, 5  ;;  %v6419_v7 = vld [vmem:[#allocation3 + $0x48] sm:$0xe] }
 0x524   :  { %v9960_v59 = vcombine.low %v6212_v22, %v6226_v48  ;;  %v6452_v33 = vsel %vm13595_vm2, %v9974_v23, %v6451_v4  ;;  %v11375_v23 = vld [vmem:[#allocation3 + $0x20] ss:$8 sps:$4 sm:$0xff]  }
 0x525   :  { %10909 = vmatpush3.bf16.msra.mxu0 %v11357_v26  ;;  %v6251_v26 = vshll.u32 %v14473_v28, 16 }
 0x526   :  { %10918 = vmatprep.subr.bf16.mxu0 %v11358_v21 }
 0x527   :  { %v6253_v63 = vrot.slane %v6251_v26, 5  ;;  %v9975_v26 = vrot.slane %v6417_v36, 9  ;;  %v6832_v36 = vshrl.u32 %v6755_v14, 16 }
 0x528   :  { %10911 = vmatmul.mubr.msk.bf16.vlgmr.msra.gmra.mrb[80].mxu0 %vm5020_vm5, %v11359_v56 }
 0x529   :  { %10919 = vmatpush3.bf16.msra.mxu0 %v11358_v21  ;;  %10914 = vmatprep.mubr.msk.bf16.mxu0 %vm5020_vm5, %v11360_v35  ;;  %v6235_v21 = vrot.slane %v6234_v9, 4  ;;  %v6254_v56 = vsel %vm13339_vm3, %v6249_v40, %v6253_v63  ;;  %v6267_v35 = vrot.slane %v6265_v51, 5  ;;  %v9973_v9 = vrot.slane %v6415_v61, 9  ;;  %v6747_v63 = vld [vmem:[#allocation3 + $0x18] sm:$0xf] }
 0x52a   :  { %10920 = vmatprep.subr.bf16.mxu0 %v11361_v18  ;;  %v6456_v46 = vsel %vm13595_vm2, %v9975_v26, %v6455_v27  ;;  %v6467_v40 = vrot.slane %v14484_v53, 5  ;;  %v6765_v51 = vshll.u32 %v6745_v19, 16  ;;  %v6776_v22 = vshrl.u32 %v6747_v63, 16 }
 0x52b   :  { %v6240_v42 = vsel %vm13339_vm3, %v6235_v21, %v6239_v29  ;;  %v6463_v21 = vrot.slane %v14482_v3, 5  ;;  %v9978_v29 = vrot.slane %v6420_v47, 9  ;;  %v6779_v48 = vshll.u32 %v6747_v63, 16  ;;  %v6757_v47 = vld [vmem:[#allocation3 + $0x50] sm:$0xf] }
 0x52c   :  { %v9961_v17 = vcombine.low %v6240_v42, %v6254_v56  ;;  %v6767_v5 = vrot.slane %v6765_v51, 5  ;;  %v11373_v56 = vld [vmem:[%s15434_s3 + $0xd8] sm:$0xff]   ;;  %v6778_v16 = vrot.slane %v6776_v22, 4  ;;  %v14583_v63 = vld [vmem:[#allocation3 + $0x44] sm:$0x1]  ;;  %v6846_v51 = vshrl.u32 %v6757_v47, 16 }
 0x52d   :  { %10921 = vmatpush3.bf16.msra.mxu0 %v11361_v18  ;;  %v6262_v18 = vor.u32 %v6261_v60, %v6258_v57  ;;  %v9977_v60 = vrot.slane %v6419_v7, 9  ;;  %v6468_v53 = vsel %vm13595_vm2, %v9978_v29, %v6467_v40  ;;  %v6781_v44 = vrot.slane %v6779_v48, 5 }
 0x52e   :  { %10922 = vmatprep.subr.bf16.mxu0 %v11362_v24 }
 0x52f   :  { %v6263_v41 = vrot.slane %v6262_v18, 4  ;;  %v6464_v3 = vsel %vm13595_vm2, %v9977_v60, %v6463_v21 }
 0x530   :  { %10915 = vmatmul.mubr.msk.bf16.gmra.mrb[84].mxu0 %vm5020_vm5, %v11363_v11  ;;  %v9976_v11 = vrot.slane %v6418_v49, 9  ;;  %v9990_v42 = vcombine.low %v6464_v3, %v6468_v53  ;;  %v6835_v49 = vshll.u32 %v6755_v14, 16  ;;  %v6827_v53 = vshll.u32 %v14583_v63, 16 }
 0x531   :  { %10923 = vmatpush3.bf16.msra.mxu0 %v11362_v24  ;;  %10926 = vmatprep.mubr.msk.bf16.mxu0 %vm5020_vm5, %v9959_v62  ;;  %v6268_v30 = vsel %vm13339_vm3, %v6263_v41, %v6267_v35  ;;  %v6282_v24 = vsel %vm13339_vm3, %v6277_v6, %v6281_v20  ;;  %v6459_v62 = vrot.slane %v14473_v28, 5  ;;  %v6751_v35 = vld [vmem:[#allocation3 + $0x28] sm:$0xf]  ;;  %v14557_v41 = vld [vmem:[#allocation3 + $0x1c] sm:$0x1] }
 0x532   :  { %10924 = vmatprep.subr.bf16.mxu0 %v11364_v39  ;;  %v9962_v13 = vcombine.low %v6268_v30, %v6282_v24  ;;  %v6753_v6 = vld [vmem:[#allocation3 + $0x40] sm:$0xf]  ;;  %v6785_v12 = vshll.u32 %v14557_v41, 16  ;;  %v6782_v30 = vor.u32 %v6781_v44, %v6778_v16  ;;  %v6804_v2 = vshrl.u32 %v6751_v35, 16  ;;  %v11380_v44 = vld [vmem:[%s15434_s3 + $0xf8] sm:$0xff]  }
 0x533   :  { %v6460_v28 = vsel %vm13595_vm2, %v9976_v11, %v6459_v62  ;;  %v6807_v58 = vshll.u32 %v6751_v35, 16  ;;  %v6818_v61 = vshrl.u32 %v6753_v6, 16  ;;  %v6821_v10 = vshll.u32 %v6753_v6, 16  ;;  %v11376_v62 = vld [vmem:[#allocation3 + $0x40] ss:$8 sps:$4 sm:$0xff]  }
 0x534   :  { %v9989_v50 = vcombine.low %v6456_v46, %v6460_v28  ;;  %v6783_v4 = vrot.slane %v6782_v30, 4  ;;  %v6806_v27 = vrot.slane %v6804_v2, 4  ;;  %v6834_v46 = vrot.slane %v6832_v36, 4  ;;  %v11381_v2 = vld [vmem:[%s15434_s3 + $0x100] sm:$0xff]  }
 0x535   :  { %10925 = vmatpush3.bf16.msra.mxu0 %v11364_v39  ;;  %v6448_v39 = vsel %vm13595_vm2, %v9973_v9, %v6447_v8  ;;  %v6809_v11 = vrot.slane %v6807_v58, 5  ;;  %v6823_v7 = vrot.slane %v6821_v10, 5  ;;  %v6837_v28 = vrot.slane %v6835_v49, 5 }
 0x536   :  { %10934 = vmatprep.subr.bf16.mxu0 %v11365_v37  ;;  %v9988_v57 = vcombine.low %v6448_v39, %v6452_v33  ;;  %v6759_v39 = vld [vmem:[#allocation3 + $0x58] sm:$0xf]  ;;  %v6820_v33 = vrot.slane %v6818_v61, 4  ;;  %v6848_v6 = vrot.slane %v6846_v51, 4  ;;  %v6829_v14 = vrot.slane %v6827_v53, 5 }
 0x537   :  { %v6810_v29 = vor.u32 %v6809_v11, %v6806_v27  ;;  %v6860_v22 = vshrl.u32 %v6759_v39, 16  ;;  %v6863_v48 = vshll.u32 %v6759_v39, 16  ;;  %v14601_v61 = vld [vmem:[#allocation3 + $0x5c] sm:$0x1] }
 0x538   :  { %10927 = vmatmul.mubr.msk.bf16.vlgmr.msra.gmra.mrb[80].mxu0 %vm5020_vm5, %v9960_v59  ;;  %v6749_v59 = vld [vmem:[#allocation3 + $0x20] sm:$0xf]  ;;  %v6824_v3 = vor.u32 %v6823_v7, %v6820_v33 }
 0x539   :  { %10935 = vmatpush3.bf16.msra.mxu0 %v11365_v37  ;;  %10930 = vmatprep.mubr.msk.bf16.mxu0 %vm5020_vm5, %v9961_v17  ;;  %v6762_v37 = vshrl.u32 %v6745_v19, 16  ;;  %v14555_v17 = vld [vmem:[#allocation3 + $0x14] sm:$0x1]  ;;  %v6790_v32 = vshrl.u32 %v6749_v59, 16  ;;  %v6793_v24 = vshll.u32 %v6749_v59, 16 }
 0x53a   :  { %10936 = vmatprep.subr.bf16.mxu0 %v11366_v43  ;;  %v6771_v1 = vshll.u32 %v14555_v17, 16  ;;  %v11378_v19 = vld [vmem:[%s15434_s3 + $0xf0] sm:$0xff]  }
 0x53b   :  { %v6764_v18 = vrot.slane %v6762_v37, 4  ;;  %v6792_v9 = vrot.slane %v6790_v32, 4  ;;  %v6795_v26 = vrot.slane %v6793_v24, 5  ;;  %v14585_v37 = vld [vmem:[#allocation3 + $0x4c] sm:$0x1]  ;;  %v6825_v32 = vrot.slane %v6824_v3, 4 }
 0x53c   :  { %v6773_v8 = vrot.slane %v6771_v1, 5  ;;  %v6862_v1 = vrot.slane %v6860_v22, 4  ;;  %v14594_v24 = vld [vmem:[#allocation3 + $0x54] sm:$0x1] }
 0x53d   :  { %10937 = vmatpush3.bf16.msra.mxu0 %v11366_v43  ;;  %v11372_v43 = vld [vmem:[#allocation3 + $0x10] ss:$8 sps:$4 sm:$0xff]   ;;  %v6768_v20 = vor.u32 %v6767_v5, %v6764_v18  ;;  %v6796_v21 = vor.u32 %v6795_v26, %v6792_v9  ;;  %v6838_v18 = vor.u32 %v6837_v28, %v6834_v46  ;;  %v6841_v5 = vshll.u32 %v14585_v37, 16  ;;  %v11382_v26 = vld [vmem:[%s15434_s3 + $0x108] sm:$0xff]  }
 0x53e   :  { %10938 = vmatprep.subr.bf16.mxu0 %v11367_v25  ;;  %v6855_v10 = vshll.u32 %v14594_v24, 16  ;;  %v7003_v9 = vld [vmem:[#allocation3 + $0x10] sm:$0xe]  ;;  %v7029_v46 = vrot.slane %v14555_v17, 5 }
 0x53f   :  { %v6797_v59 = vrot.slane %v6796_v21, 4  ;;  %v6843_v30 = vrot.slane %v6841_v5, 5  ;;  %v10039_v7 = vrot.slane %v7003_v9, 9  ;;  %v7006_v21 = vld [vmem:[#allocation3 + $0x28] sm:$0xe] }
 0x540   :  { %10931 = vmatmul.mubr.msk.bf16.gmra.mrb[84].mxu0 %vm5020_vm5, %v9962_v13  ;;  %v11377_v13 = vld [vmem:[%s15434_s3 + $0xe8] sm:$0xff]   ;;  %v6857_v27 = vrot.slane %v6855_v10, 5  ;;  %v10042_v53 = vrot.slane %v7006_v21, 9  ;;  %v11396_v9 = vld [vmem:[%s15437_s4 + $0xb4] ss:$8 sps:$4 sm:$0xff]  }
 0x541   :  { %10939 = vmatpush3.bf16.msra.mxu0 %v11367_v25  ;;  %10942 = vmatprep.mubr.msk.bf16.mxu0 %vm5020_vm5, %v9987_v52  ;;  %v11374_v25 = vld [vmem:[%s15434_s3 + $0xe0] sm:$0xff]   ;;  %v6787_v52 = vrot.slane %v6785_v12, 5  ;;  %v6865_v12 = vrot.slane %v6863_v48, 5  ;;  %v7030_v17 = vsel %vm13595_vm2, %v10039_v7, %v7029_v46 }
 0x542   :  { %10940 = vmatprep.subr.bf16.mxu0 %v11368_v0  ;;  %v11397_v46 = vld [vmem:[%s15437_s4 + $0xc0] ss:$8 sps:$4 sm:$0xff]  }
 0x545   :  { %10941 = vmatpush3.bf16.msra.mxu0 %v11368_v0  ;;  %v6769_v0 = vrot.slane %v6768_v20, 4 }
 0x546   :  { %10950 = vmatprep.subr.bf16.mxu0 %v11369_v55 }
 0x548   :  { %10943 = vmatmul.mubr.msk.bf16.vlgmr.msra.gmra.mrb[80].mxu0 %vm5020_vm5, %v9988_v57  ;;  %v6774_v57 = vsel %vm13339_vm3, %v6769_v0, %v6773_v8  ;;  %v6869_v0 = vshll.u32 %v14601_v61, 16  ;;  %v6830_v8 = vsel %vm13339_vm3, %v6825_v32, %v6829_v14 }
 0x549   :  { %10951 = vmatpush3.bf16.msra.mxu0 %v11369_v55  ;;  %10946 = vmatprep.mubr.msk.bf16.mxu0 %vm5020_vm5, %v9989_v50  ;;  %v14568_v55 = vld [vmem:[#allocation3 + $0x24] sm:$0x1]  ;;  %v6788_v50 = vsel %vm13339_vm3, %v6783_v4, %v6787_v52 }
 0x54a   :  { %10952 = vmatprep.subr.bf16.mxu0 %v11370_v38  ;;  %v6799_v60 = vshll.u32 %v14568_v55, 16  ;;  %v10027_v16 = vcombine.low %v6774_v57, %v6788_v50  ;;  %v6871_v33 = vrot.slane %v6869_v0, 5  ;;  %v11383_v57 = vld [vmem:[%s15434_s3 + $0x110] sm:$0xff]   ;;  %v7005_v50 = vld [vmem:[#allocation3 + $0x20] sm:$0xe]  ;;  %v7037_v3 = vrot.slane %v14568_v55, 5 }
 0x54b   :  { %v10041_v22 = vrot.slane %v7005_v50, 9 }
 0x54d   :  { %10953 = vmatpush3.bf16.msra.mxu0 %v11370_v38  ;;  %v14574_v38 = vld [vmem:[#allocation3 + $0x2c] sm:$0x1] }
 0x54e   :  { %10954 = vmatprep.subr.bf16.mxu0 %v11371_v15  ;;  %v6813_v40 = vshll.u32 %v14574_v38, 16 }
 0x550   :  { %10947 = vmatmul.mubr.msk.bf16.gmra.mrb[84].mxu0 %vm5020_vm5, %v9990_v42  ;;  %v6801_v42 = vrot.slane %v6799_v60, 5  ;;  %v6815_v35 = vrot.slane %v6813_v40, 5  ;;  %v7008_v40 = vld [vmem:[#allocation3 + $0x48] sm:$0xe] }
 0x551   :  { %10955 = vmatpush3.bf16.msra.mxu0 %v11371_v15  ;;  %10958 = vmatprep.mubr.msk.bf16.mxu0 %vm5020_vm5, %v11372_v43  ;;  %v6849_v15 = vshll.u32 %v6757_v47, 16  ;;  %v6811_v43 = vrot.slane %v6810_v29, 4  ;;  %v7033_v47 = vrot.slane %v14557_v41, 5  ;;  %v7007_v29 = vld [vmem:[#allocation3 + $0x40] sm:$0xe] }
 0x552   :  { %10956 = vmatprep.subr.bf16.mxu0 %v11373_v56  ;;  %v6802_v58 = vsel %vm13339_vm3, %v6797_v59, %v6801_v42  ;;  %v10043_v5 = vrot.slane %v7007_v29, 9  ;;  %v7045_v42 = vrot.slane %v14583_v63, 5  ;;  %v7009_v59 = vld [vmem:[#allocation3 + $0x50] sm:$0xe] }
 0x553   :  { %v6851_v20 = vrot.slane %v6849_v15, 5  ;;  %v6816_v36 = vsel %vm13339_vm3, %v6811_v43, %v6815_v35  ;;  %v11384_v15 = vld [vmem:[%s15434_s3 + $0x118] sm:$0xff]   ;;  %v10045_v35 = vrot.slane %v7009_v59, 9 }
 0x554   :  { %v10028_v4 = vcombine.low %v6802_v58, %v6816_v36  ;;  %v7010_v43 = vld [vmem:[#allocation3 + $0x58] sm:$0xe]  ;;  %v11393_v36 = vld [vmem:[%s15437_s4 + $0xa4] ss:$8 sps:$4 sm:$0xff]  }
 0x555   :  { %10957 = vmatpush3.bf16.msra.mxu0 %v11373_v56  ;;  %v11379_v56 = vld [vmem:[#allocation3 + $0x50] ss:$8 sps:$4 sm:$0xff]   ;;  %v6852_v49 = vor.u32 %v6851_v20, %v6848_v6  ;;  %v7053_v20 = vrot.slane %v14594_v24, 5  ;;  %v11387_v24 = vld [vmem:[%s15437_s4 + $0x84] ss:$8 sps:$4 sm:$0xff]  }
 0x556   :  { %10966 = vmatprep.subr.bf16.mxu0 %v11374_v25  ;;  %7700 = vmatprep.subr.bf16.mxu1 %v11387_v24  ;;  %v11388_v58 = vld [vmem:[%s15437_s4 + $0x90] ss:$8 sps:$4 sm:$0xff]  }
 0x557   :  { %v7054_v32 = vsel %vm13595_vm2, %v10045_v35, %v7053_v20 }
 0x558   :  { %10959 = vmatmul.mubr.msk.bf16.vlgmr.msra.gmra.mrb[80].mxu0 %vm5020_vm5, %v11375_v23  ;;  %v7004_v23 = vld [vmem:[#allocation3 + $0x18] sm:$0xe] }
 0x559   :  { %10967 = vmatpush3.bf16.msra.mxu0 %v11374_v25  ;;  %10962 = vmatprep.mubr.msk.bf16.mxu0 %vm5020_vm5, %v11376_v62  ;;  %v6839_v25 = vrot.slane %v6838_v18, 4  ;;  %v6853_v62 = vrot.slane %v6852_v49, 4  ;;  %v10040_v28 = vrot.slane %v7004_v23, 9  ;;  %v7041_v18 = vrot.slane %v14574_v38, 5 }
 0x55a   :  { %10968 = vmatprep.subr.bf16.mxu0 %v11377_v13  ;;  %v7046_v38 = vsel %vm13595_vm2, %v10043_v5, %v7045_v42 }
 0x55b   :  { %v6844_v52 = vsel %vm13339_vm3, %v6839_v25, %v6843_v30  ;;  %v6858_v60 = vsel %vm13339_vm3, %v6853_v62, %v6857_v27  ;;  %v7034_v41 = vsel %vm13595_vm2, %v10040_v28, %v7033_v47  ;;  %v7042_v55 = vsel %vm13595_vm2, %v10042_v53, %v7041_v18  ;;  %v11385_v30 = vld [vmem:[%s15437_s4 + $0x80] ss:$8 sps:$4 sm:$0xff]   ;;  %v11394_v27 = vld [vmem:[%s15437_s4 + $0xb0] ss:$8 sps:$4 sm:$0xff]  }
 0x55c   :  { %v10029_v11 = vcombine.low %v6830_v8, %v6844_v52  ;;  %v10055_v48 = vcombine.low %v7030_v17, %v7034_v41  ;;  %7701 = vmatpush1.bf16.msra.mxu1 %v11385_v30  ;;  %v11391_v8 = vld [vmem:[%s15437_s4 + $0xa0] ss:$8 sps:$4 sm:$0xff]  }
 0x55d   :  { %10969 = vmatpush3.bf16.msra.mxu0 %v11377_v13  ;;  %v6866_v13 = vor.u32 %v6865_v12, %v6862_v1  ;;  %v10046_v1 = vrot.slane %v7010_v43, 9  ;;  %v7057_v12 = vrot.slane %v14601_v61, 5  ;;  %v15742_v61 = vld [vmem:[#allocation19_spill] sm:$0xff] }
 0x55e   :  { %10970 = vmatprep.subr.bf16.mxu0 %v11378_v19  ;;  %v14668_v10 = vadd.s32 8, %v15742_v61  ;;  %v14674_v49 = vadd.s32 16, %v15742_v61  ;;  %v14678_v0 = vadd.s32 24, %v15742_v61  ;;  %v7195_v62 = vadd.s32 40, %v15742_v61  ;;  %v11408_v43 = vld [vmem:[%s15437_s4 + $0xf4] ss:$8 sps:$4 sm:$0xff]  }
 0x55f   :  { %v6867_v39 = vrot.slane %v6866_v13, 4  ;;  %v7058_v14 = vsel %vm13595_vm2, %v10046_v1, %v7057_v12  ;;  %v7202_v13 = vand.u32 7, %v15742_v61  ;;  %v7196_v47 = vadd.s32 48, %v15742_v61  ;;  %v11406_v12 = vld [vmem:[%s15437_s4 + $0xf0] ss:$8 sps:$4 sm:$0xff]  }
 0x560   :  { %10963 = vmatmul.mubr.msk.bf16.gmra.mrb[84].mxu0 %vm5020_vm5, %v11379_v56  ;;  %v10044_v56 = vrot.slane %v7008_v40, 9  ;;  %v10058_v25 = vcombine.low %v7054_v32, %v7058_v14  ;;  %v7209_v52 = vand.u32 7, %v14668_v10  ;;  %v7216_v23 = vand.u32 7, %v14674_v49 }
 0x561   :  { %10971 = vmatpush3.bf16.msra.mxu0 %v11378_v19  ;;  %10974 = vmatprep.mubr.msk.bf16.mxu0 %vm5020_vm5, %v10027_v16  ;;  %v6872_v19 = vsel %vm13339_vm3, %v6867_v39, %v6871_v33  ;;  %v7049_v16 = vrot.slane %v14585_v37, 5  ;;  %vm7294_vm8 = vcmp.lt.s32.totalorder %v7202_v13, 4  ;;  %v11624_v33 = vmov 0.0  }
 0x562   :  { %10972 = vmatprep.subr.bf16.mxu0 %v11380_v44  ;;  %v10030_v51 = vcombine.low %v6858_v60, %v6872_v19  ;;  %vm7295_vm13 = vcmp.lt.s32.totalorder %v7209_v52, 4  ;;  %vm14703_vm14 = vcmp.lt.s32.totalorder %v7216_v23, 4  ;;  %v14708_v7 = vsel %vm7294_vm8, 1.0, %v11624_v33  ;;  %v11402_v60 = vld [vmem:[%s15437_s4 + $0xd4] ss:$8 sps:$4 sm:$0xff]  }
 0x563   :  { %v7050_v63 = vsel %vm13595_vm2, %v10044_v56, %v7049_v16  ;;  %v14724_v50 = vsel %vm7295_vm13, 1.0, %v11624_v33  ;;  %v7197_v41 = vadd.s32 56, %v15742_v61  ;;  %v7237_v21 = vand.u32 7, %v7195_v62 }
 0x564   :  { %v10057_v6 = vcombine.low %v7046_v38, %v7050_v63  ;;  %v14732_v29 = vsel %vm14703_vm14, 1.0, %v11624_v33  ;;  %v11403_v63 = vld [vmem:[%s15437_s4 + $0xe0] ss:$8 sps:$4 sm:$0xff]   ;;  %vm9289_vm10 = vcmp.lt.s32.totalorder %v7209_v52, 2  ;;  %vm9526_vm8 = vcmask 1045509  }
 0x565   :  { %10973 = vmatpush3.bf16.msra.mxu0 %v11380_v44  ;;  %v7038_v44 = vsel %vm13595_vm2, %v10041_v22, %v7037_v3  ;;  %v11405_v3 = vld [vmem:[%s15437_s4 + $0xe4] ss:$8 sps:$4 sm:$0xff]   ;;  %v7251_v42 = vand.u32 7, %v7197_v41  ;;  %vm7299_vm0 = vcmp.lt.s32.totalorder %v7237_v21, 4  ;;  %vm9528_vm13 = vcmask 1047559  }
 0x566   :  { %10982 = vmatprep.subr.bf16.mxu0 %v11381_v2  ;;  %v10056_v37 = vcombine.low %v7038_v44, %v7042_v55  ;;  %v7307_v38 = vsel %vm7299_vm0, 1.0, %v11624_v33 }
 0x568   :  { %10975 = vmatmul.mubr.msk.bf16.vlgmr.msra.gmra.mrb[80].mxu0 %vm5020_vm5, %v10028_v4  ;;  %v7194_v4 = vadd.s32 32, %v15742_v61 }
 0x569   :  { %10983 = vmatpush3.bf16.msra.mxu0 %v11381_v2  ;;  %10978 = vmatprep.mubr.msk.bf16.mxu0 %vm5020_vm5, %v10029_v11  ;;  %v11390_v2 = vld [vmem:[%s15437_s4 + $0x94] ss:$8 sps:$4 sm:$0xff]   ;;  %v11399_v11 = vld [vmem:[%s15437_s4 + $0xc4] ss:$8 sps:$4 sm:$0xff]  }
 0x56a   :  { %10984 = vmatprep.subr.bf16.mxu0 %v11382_v26  ;;  %7702 = vmatprep.subr.bf16.mxu1 %v11390_v2 }
 0x56b   :  { %7703 = vmatpush1.bf16.msra.mxu1 %v11388_v58 }
 0x56c   :  { %7704 = vmatprep.subr.bf16.mxu1 %v11393_v36 }
 0x56d   :  { %10985 = vmatpush3.bf16.msra.mxu0 %v11382_v26  ;;  %v7223_v26 = vand.u32 7, %v14678_v0 }
 0x56e   :  { %10986 = vmatprep.subr.bf16.mxu0 %v11383_v57 }
 0x56f   :  { %7705 = vmatpush1.bf16.msra.mxu1 %v11391_v8  ;;  %vm7297_vm15 = vcmp.lt.s32.totalorder %v7223_v26, 4  ;;  %vm9291_vm11 = vcmp.lt.s32.totalorder %v7223_v26, 2 }
 0x570   :  { %10979 = vmatmul.mubr.msk.bf16.gmra.mrb[84].mxu0 %vm5020_vm5, %v10030_v51  ;;  %7706 = vmatprep.subr.bf16.mxu1 %v11396_v9  ;;  %v11400_v51 = vld [vmem:[%s15437_s4 + $0xd0] ss:$8 sps:$4 sm:$0xff]   ;;  %v14747_v53 = vsel %vm7297_vm15, 1.0, %v11624_v33 }
 0x571   :  { %10987 = vmatpush3.bf16.msra.mxu0 %v11383_v57  ;;  %10990 = vmatprep.mubr.msk.bf16.mxu0 %vm5020_vm5, %v10055_v48  ;;  %v7230_v57 = vand.u32 7, %v7194_v4  ;;  %v7244_v48 = vand.u32 7, %v7196_v47 }
 0x572   :  { %10988 = vmatprep.subr.bf16.mxu0 %v11384_v15 }
 0x573   :  { %7707 = vmatpush1.bf16.msra.mxu1 %v11394_v27  ;;  %vm7298_vm1 = vcmp.lt.s32.totalorder %v7230_v57, 4  ;;  %vm7300_vm4 = vcmp.lt.s32.totalorder %v7244_v48, 4 }
 0x574   :  { %7708 = vmatprep.subr.bf16.mxu1 %v11399_v11  ;;  %v7306_v56 = vsel %vm7298_vm1, 1.0, %v11624_v33  ;;  %v7308_v20 = vsel %vm7300_vm4, 1.0, %v11624_v33 }
 0x575   :  { %10989 = vmatpush3.bf16.msra.mxu0 %v11384_v15 }
 0x577   :  { %7709 = vmatpush1.bf16.msra.mxu1 %v11397_v46 }
 0x578   :  { %10991 = vmatmul.mubr.msk.bf16.vlgmr.msra.gmra.mrb[80].mxu0 %vm5020_vm5, %v10056_v37  ;;  %7710 = vmatprep.subr.bf16.mxu1 %v11402_v60 }
 0x579   :  { %10994 = vmatprep.mubr.msk.bf16.mxu0 %vm5020_vm5, %v10057_v6 }
 0x57b   :  { %7711 = vmatpush1.bf16.msra.mxu1 %v11400_v51 }
 0x57c   :  { %7712 = vmatprep.subr.bf16.mxu1 %v11405_v3 }
 0x57f   :  { %7713 = vmatpush1.bf16.msra.mxu1 %v11403_v63 }
 0x580   :  { %10995 = vmatmul.mubr.msk.bf16.gmra.mrb[84].mxu0 %vm5020_vm5, %v10058_v25  ;;  %vm7301_vm5 = vcmp.lt.s32.totalorder %v7251_v42, 4  ;;  %v11411_v25 = vld [vmem:[%s15437_s4 + $0x4] ss:$8 sps:$4 sm:$0xff]   ;;  %7714 = vmatprep.subr.bf16.mxu1 %v11408_v43 }
 0x581   :  { %v7309_v30 = vsel %vm7301_vm5, 1.0, %v11624_v33 }
 0x583   :  { %7715 = vmatpush1.bf16.msra.mxu1 %v11406_v12 }
 0x584   :  { %7845 = vmatprep.subr.bf16.mxu1 %v11411_v25 }
 0x64b   :  { %v14713_v28 = vpop.f32.mrb[80].mxu0 }
 0x64c   :  { %v14719_v19 = vpop.f32.mrb[81].mxu0  ;;  %v7312_v18 = vmul.f32 %v14713_v28, %v14732_v29 }
 0x64d   :  { %v14726_v17 = vpop.f32.mrb[82].mxu0  ;;  %v7310_v15 = vmul.f32 %v14708_v7, %v14719_v19 }
 0x64e   :  { %v14734_v40 = vpop.f32.mrb[83].mxu0  ;;  %v7313_v16 = vmul.f32 %v14726_v17, %v14747_v53 }
 0x64f   :  { %v7311_v22 = vmul.f32 %v14724_v50, %v14734_v40 }
 0x651   :  { %v7318_v5 = vadd.f32 %v7311_v22, %v7310_v15 }
 0x653   :  { %v7319_v44 = vadd.f32 %v7318_v5, %v7312_v18  ;;  %v14754_v55 = vpop.f32.mrb[84].mxu0 }
 0x654   :  { %v14756_v59 = vpop.f32.mrb[85].mxu0  ;;  %v7316_v24 = vmul.f32 %v14754_v55, %v7308_v20 }
 0x655   :  { %v7314_v37 = vmul.f32 %v7306_v56, %v14756_v59  ;;  %v7320_v35 = vadd.f32 %v7319_v44, %v7313_v16  ;;  %v14766_v6 = vpop.f32.mrb[86].mxu0 }
 0x656   :  { %v14769_v1 = vpop.f32.mrb[87].mxu0  ;;  %v7317_v58 = vmul.f32 %v14766_v6, %v7309_v30 }
 0x657   :  { %v7321_v32 = vadd.f32 %v7320_v35, %v7314_v37  ;;  %v7315_v14 = vmul.f32 %v7307_v38, %v14769_v1 }
 0x659   :  { %v7322_v2 = vadd.f32 %v7321_v32, %v7315_v14 }
 0x65b   :  { %v7323_v36 = vadd.f32 %v7322_v2, %v7316_v24 }
 0x65d   :  { %v7324_v8 = vadd.f32 %v7323_v36, %v7317_v58 }
 0x65f   :  { %v7325_v9 = vrot.slane %v7324_v8, 4 }
 0x661   :  { %v7326_v4 = vadd.f32 %v7325_v9, %v7324_v8 }
 0x663   :  { %v7327_v27 = vrot.slane %v7326_v4, 2 }
 0x665   :  { %v7328_v11 = vadd.f32 %v7327_v27, %v7326_v4 }
 0x667   :  { %v7329_v62 = vrot.slane %v7328_v11, 1 }
 0x669   :  { %v7330_v39 = vadd.f32 %v7329_v62, %v7328_v11 }
 0x66b   :  { %v7332_v46 = vmul.f32 0.03125, %v7330_v39 }
 0x66d   :  { %v7333_v47 = vsub.f32 %v14719_v19, %v7332_v46  ;;  %v7334_v57 = vsub.f32 %v14734_v40, %v7332_v46  ;;  %v7335_v60 = vsub.f32 %v14713_v28, %v7332_v46  ;;  %v7336_v41 = vsub.f32 %v14726_v17, %v7332_v46 }
 0x66e   :  { %v7337_v21 = vsub.f32 %v14756_v59, %v7332_v46  ;;  %v7338_v51 = vsub.f32 %v14769_v1, %v7332_v46  ;;  %v7339_v15 = vsub.f32 %v14754_v55, %v7332_v46  ;;  %v7340_v22 = vsub.f32 %v14766_v6, %v7332_v46 }
 0x66f   :  { %v7341_v48 = vmul.f32 %v7333_v47, %v7333_v47  ;;  %v7342_v3 = vmul.f32 %v7334_v57, %v7334_v57  ;;  %v7343_v18 = vmul.f32 %v7335_v60, %v7335_v60  ;;  %v7344_v5 = vmul.f32 %v7336_v41, %v7336_v41 }
 0x670   :  { %v7345_v44 = vmul.f32 %v7337_v21, %v7337_v21  ;;  %v7346_v37 = vmul.f32 %v7338_v51, %v7338_v51  ;;  %v7347_v32 = vmul.f32 %v7339_v15, %v7339_v15  ;;  %v7348_v24 = vmul.f32 %v7340_v22, %v7340_v22 }
 0x671   :  { %v7349_v42 = vmul.f32 %v7341_v48, %v14708_v7  ;;  %v7350_v16 = vmul.f32 %v7342_v3, %v14724_v50  ;;  %v7351_v63 = vmul.f32 %v7343_v18, %v14732_v29  ;;  %v7352_v35 = vmul.f32 %v7344_v5, %v14747_v53 }
 0x672   :  { %v7353_v14 = vmul.f32 %v7345_v44, %v7306_v56  ;;  %v7354_v2 = vmul.f32 %v7346_v37, %v7307_v38  ;;  %v7355_v36 = vmul.f32 %v7347_v32, %v7308_v20  ;;  %v7356_v9 = vmul.f32 %v7348_v24, %v7309_v30  ;;  %v7371_v56 = vld [vmem:[%s15438_s9] sm:$0x1] }
 0x673   :  { %v7357_v43 = vadd.f32 %v7350_v16, %v7349_v42  ;;  %v7375_v20 = vld [vmem:[%s15439_s10] sm:$0x1] }
 0x675   :  { %v7358_v12 = vadd.f32 %v7357_v43, %v7351_v63 }
 0x677   :  { %v7359_v25 = vadd.f32 %v7358_v12, %v7352_v35 }
 0x679   :  { %v7360_v58 = vadd.f32 %v7359_v25, %v7353_v14 }
 0x67b   :  { %v7361_v8 = vadd.f32 %v7360_v58, %v7354_v2 }
 0x67d   :  { %v7362_v7 = vadd.f32 %v7361_v8, %v7355_v36 }
 0x67f   :  { %v7363_v4 = vadd.f32 %v7362_v7, %v7356_v9 }
 0x681   :  { %v7364_v50 = vrot.slane %v7363_v4, 4 }
 0x683   :  { %v7365_v27 = vadd.f32 %v7364_v50, %v7363_v4 }
 0x685   :  { %v7366_v11 = vrot.slane %v7365_v27, 2 }
 0x687   :  { %v7367_v29 = vadd.f32 %v7366_v11, %v7365_v27 }
 0x689   :  { %v7368_v62 = vrot.slane %v7367_v29, 1 }
 0x68b   :  { %v7369_v39 = vadd.f32 %v7368_v62, %v7367_v29 }
 0x68d   :  { %v7370_v47 = vmul.f32 0.03125, %v7369_v39 }
 0x68f   :  { %v7372_v53 = vadd.f32 1e-05, %v7370_v47 }
 0x691   :  { %11611 = vrsqrt.f32 %v7372_v53 }
 0x69b   :  { %v11612_v38 = vpop.eup %11611 }
 0x69c   :  { %v7374_v57 = vmul.f32 %v11612_v38, %v7371_v56 }
 0x69e   :  { %v7376_v30 = vmul.f32 %v7374_v57, %v7332_v46  ;;  %v7382_v60 = vrot.slane %v7374_v57, %v15739_v34 }
 0x6a0   :  { %v7377_v41 = vsub.f32 %v7375_v20, %v7376_v30  ;;  %v7384_v21 = vmul.f32 %v7382_v60, %v14719_v19  ;;  %v7385_v51 = vmul.f32 %v7382_v60, %v14734_v40  ;;  %v7386_v15 = vmul.f32 %v14713_v28, %v7382_v60  ;;  %v14813_v20 = vld [vmem:[#allocation4] sm:$0xf] }
 0x6a1   :  { %v7387_v22 = vmul.f32 %v14726_v17, %v7382_v60  ;;  %v7388_v48 = vmul.f32 %v7382_v60, %v14756_v59  ;;  %v7389_v3 = vmul.f32 %v7382_v60, %v14769_v1  ;;  %v7390_v18 = vmul.f32 %v14754_v55, %v7382_v60 }
 0x6a2   :  { %v7391_v5 = vmul.f32 %v14766_v6, %v7382_v60  ;;  %v7396_v46 = vrot.slane %v7377_v41, %v15739_v34 }
 0x6a4   :  { %v7398_v42 = vadd.f32 %v7396_v46, %v7384_v21  ;;  %v7399_v16 = vadd.f32 %v7396_v46, %v7385_v51  ;;  %v7400_v44 = vadd.f32 %v7396_v46, %v7386_v15  ;;  %v7401_v19 = vadd.f32 %v7396_v46, %v7387_v22 }
 0x6a5   :  { %v7402_v63 = vadd.f32 %v7396_v46, %v7388_v48  ;;  %v7403_v40 = vadd.f32 %v7396_v46, %v7389_v3  ;;  %v7404_v43 = vadd.f32 %v7396_v46, %v7390_v18  ;;  %v7405_v28 = vadd.f32 %v7396_v46, %v7391_v5  ;;  %v7460_v5 = vld [vmem:[#allocation4 + $0x8] sm:$0x3] }
 0x6a6   :  { %v7406_v37 = vmax.f32 %v7398_v42, 0.0  ;;  %v7407_v17 = vmax.f32 %v7399_v16, 0.0  ;;  %v7408_v35 = vmax.f32 %v7400_v44, 0.0  ;;  %v7409_v59 = vmax.f32 %v7401_v19, 0.0 }
 0x6a7   :  { %v7410_v12 = vmax.f32 %v7402_v63, 0.0  ;;  %v7411_v1 = vmax.f32 %v7403_v40, 0.0  ;;  %v7412_v32 = vmax.f32 %v7404_v43, 0.0  ;;  %v7413_v55 = vmax.f32 %v7405_v28, 0.0  ;;  %v7509_v43 = vld [vmem:[#allocation4 + $0x10] sm:$0x3] }
 0x6a8   :  { %v7414_v14 = vmax.f32 %v7406_v37, %v7407_v17  ;;  %v7466_v6 = vmax.f32 %v7408_v35, %v7409_v59  ;;  %v7540_v22 = vshrl.u32 %v14813_v20, 16  ;;  %v7543_v48 = vshll.u32 %v14813_v20, 16  ;;  %v7463_v37 = vld [vmem:[#allocation4 + $0x28] sm:$0x3]  ;;  %v7512_v35 = vld [vmem:[#allocation4 + $0x30] sm:$0x3] }
 0x6a9   :  { %v7415_v25 = vmax.f32 %v7410_v12, %v7411_v1  ;;  %v7467_v24 = vmax.f32 %v7412_v32, %v7413_v55 }
 0x6aa   :  { %v7418_v2 = vrot.slane %v7414_v14, 1  ;;  %v7470_v58 = vrot.slane %v7466_v6, 1  ;;  %v7542_v1 = vrot.slane %v7540_v22, 4  ;;  %v7545_v32 = vrot.slane %v7543_v48, 5 }
 0x6ab   :  { %v7419_v36 = vrot.slane %v7415_v25, 1  ;;  %v7471_v8 = vrot.slane %v7467_v24, 1 }
 0x6ac   :  { %v7422_v9 = vmax.f32 %v7414_v14, %v7418_v2  ;;  %v7474_v7 = vmax.f32 %v7466_v6, %v7470_v58  ;;  %v14832_v2 = vld [vmem:[#allocation4 + $0x4] sm:$0x1]  ;;  %v7546_v58 = vor.u32 %v7545_v32, %v7542_v1  ;;  %v11414_v1 = vld [vmem:[%s15437_s4 + $0x14] ss:$8 sps:$4 sm:$0xff]  }
 0x6ad   :  { %v7423_v4 = vmax.f32 %v7415_v25, %v7419_v36  ;;  %v7475_v50 = vmax.f32 %v7467_v24, %v7471_v8  ;;  %v14830_v24 = vld [vmem:[#allocation4 + $0x20] sm:$0xf]  ;;  %v7549_v36 = vshll.u32 %v14832_v2, 16  ;;  %v7537_v8 = vld [vmem:[#allocation4 + $0x24] sm:$0x1] }
 0x6ae   :  { %v7426_v27 = vrot.slane %v7422_v9, 1  ;;  %v7478_v11 = vrot.slane %v7474_v7, 1 }
 0x6af   :  { %v7427_v29 = vrot.slane %v7423_v4, 1  ;;  %v7479_v62 = vrot.slane %v7475_v50, 1 }
 0x6b0   :  { %v7430_v39 = vsel %vm1446_vm6, %v7422_v9, %v7426_v27  ;;  %v7482_v47 = vsel %vm1446_vm6, %v7474_v7, %v7478_v11  ;;  %v7568_v9 = vshrl.u32 %v14830_v24, 16  ;;  %v7900_v7 = vld [vmem:[#allocation4 + $0x20] sm:$0xe]  ;;  %v7538_v27 = vld [vmem:[#allocation4 + $0x2c] sm:$0x1]  ;;  %v7547_v11 = vrot.slane %v7546_v58, 4 }
 0x6b1   :  { %v7431_v53 = vsel %vm1446_vm6, %v7423_v4, %v7427_v29  ;;  %v10397_v56 = vpack.c.bf16 %v7430_v39, %v7430_v39  ;;  %v7483_v38 = vsel %vm1446_vm6, %v7475_v50, %v7479_v62  ;;  %v10399_v57 = vpack.c.bf16 %v7482_v47, %v7482_v47  ;;  %vm14818_vm6 = vmand %vm1449_vm7, %vm7458_vm9  ;;  %v14837_v50 = vld [vmem:[#allocation4 + $0xc] sm:$0x1] }
 0x6b2   :  { %v10398_v30 = vpack.c.bf16 %v7431_v53, %v7431_v53  ;;  %v10400_v60 = vpack.c.bf16 %v7483_v38, %v7483_v38  ;;  %v7571_v4 = vshll.u32 %v14830_v24, 16  ;;  %v7563_v29 = vshll.u32 %v14837_v50, 16  ;;  %v11417_v58 = vld [vmem:[%s15437_s4 + $0x24] ss:$8 sps:$4 sm:$0xff]  }
 0x6b3   :  { %v7441_v41 = vshrl.u32 %v10397_v56, 16  ;;  %v7493_v21 = vshrl.u32 %v10399_v57, 16  ;;  %v7444_v18 = vshll.u32 %v10397_v56, 16  ;;  %v7496_v42 = vshll.u32 %v10399_v57, 16 }
 0x6b4   :  { %v7448_v51 = vshrl.u32 %v10398_v30, 16  ;;  %v7500_v15 = vshrl.u32 %v10400_v60, 16  ;;  %v7451_v44 = vshll.u32 %v10398_v30, 16  ;;  %v7503_v40 = vshll.u32 %v10400_v60, 16 }
 0x6b5   :  { %v7443_v3 = vrot.slane %v7441_v41, 7  ;;  %v7495_v46 = vrot.slane %v7493_v21, 7  ;;  %v10125_v62 = vrot.slane %v7900_v7, 9  ;;  %v7920_v39 = vrot.slane %v7537_v8, 5 }
 0x6b6   :  { %v7450_v16 = vrot.slane %v7448_v51, 7  ;;  %v7502_v63 = vrot.slane %v7500_v15, 7  ;;  %v7551_v53 = vrot.slane %v7549_v36, 5  ;;  %v7570_v56 = vrot.slane %v7568_v9, 4  ;;  %v11415_v9 = vld [vmem:[%s15437_s4 + $0x20] ss:$8 sps:$4 sm:$0xff]  }
 0x6b7   :  { %v7446_v28 = vor.u32 %v7444_v18, %v7443_v3  ;;  %v7498_v17 = vor.u32 %v7496_v42, %v7495_v46  ;;  %v7573_v60 = vrot.slane %v7571_v4, 5  ;;  %v7924_v41 = vrot.slane %v7538_v27, 5  ;;  %v11420_v4 = vld [vmem:[%s15437_s4 + $0x34] ss:$8 sps:$4 sm:$0xff]  }
 0x6b8   :  { %v7453_v59 = vor.u32 %v7451_v44, %v7450_v16  ;;  %v7505_v12 = vor.u32 %v7503_v40, %v7502_v63  ;;  %v14850_v3 = vsel %vm13595_vm2, %v10125_v62, %v7920_v39  ;;  %v7565_v16 = vrot.slane %v7563_v29, 5  ;;  %v11421_v29 = vld [vmem:[%s15437_s4 + $0x40] ss:$8 sps:$4 sm:$0xff]   ;;  %v11426_v62 = vld [vmem:[%s15437_s4 + $0x54] ss:$8 sps:$4 sm:$0xff]  }
 0x6b9   :  { %v7461_v55 = vsel %vm14818_vm6, %v7446_v28, %v7460_v5  ;;  %v7510_v14 = vsel %vm14818_vm6, %v7498_v17, %v7509_v43  ;;  %v7552_v19 = vsel %vm13339_vm3, %v7547_v11, %v7551_v53  ;;  %v7577_v63 = vshll.u32 %v7537_v8, 16  ;;  %v11423_v11 = vld [vmem:[%s15437_s4 + $0x44] ss:$8 sps:$4 sm:$0xff]   ;;  %v11424_v39 = vld [vmem:[%s15437_s4 + $0x50] ss:$8 sps:$4 sm:$0xff]  }
 0x6ba   :  { %7462 = vst [vmem:[#allocation4 + $0x8] sm:$0x3] %v7461_v55  ;;  %v7464_v6 = vsel %vm14818_vm6, %v7453_v59, %v7463_v37  ;;  %7511 = vst [vmem:[#allocation4 + $0x10] sm:$0x3] %v7510_v14  ;;  %v7513_v25 = vsel %vm14818_vm6, %v7505_v12, %v7512_v35  ;;  %v7574_v28 = vor.u32 %v7573_v60, %v7570_v56  ;;  %v7591_v17 = vshll.u32 %v7538_v27, 16 }
 0x6bb   :  { %7465 = vst [vmem:[#allocation4 + $0x28] sm:$0x3] %v7464_v6  ;;  %7514 = vst [vmem:[#allocation4 + $0x30] sm:$0x3] %v7513_v25  ;;  %v11409_v35 = vld [vmem:[%s15437_s4] ss:$8 sps:$4 sm:$0xff]  }
 0x6bc   :  { %v7575_v32 = vrot.slane %v7574_v28, 4  ;;  %v7579_v55 = vrot.slane %v7577_v63, 5  ;;  %v7593_v6 = vrot.slane %v7591_v17, 5  ;;  %v11412_v25 = vld [vmem:[%s15437_s4 + $0x10] ss:$8 sps:$4 sm:$0xff]  }
 0x6bd   :  { %v11418_v27 = vld [vmem:[%s15437_s4 + $0x30] ss:$8 sps:$4 sm:$0xff]   ;;  %v11429_v53 = vld [vmem:[%s15437_s4 + $0x64] ss:$8 sps:$4 sm:$0xff]   ;;  %v11427_v56 = vld [vmem:[%s15437_s4 + $0x60] ss:$8 sps:$4 sm:$0xff]  }
 0x6be   :  { %v7580_v36 = vsel %vm13339_vm3, %v7575_v32, %v7579_v55  ;;  %v11436_v60 = vld [vmem:[%s15437_s4 + $0x104] ss:$8 sps:$4 sm:$0xff]   ;;  %v11453_v63 = vld [vmem:[%s15437_s4 + $0x160] ss:$8 sps:$4 sm:$0xff]   ;;  %v11464_v55 = vld [vmem:[%s15437_s4 + $0x194] ss:$8 sps:$4 sm:$0xff]  }
 0x6c1   :  { %v14840_v47 = vld [vmem:[#allocation4 + $0x8] sm:$0xf] }
 0x6c2   :  { %v7554_v38 = vshrl.u32 %v14840_v47, 16  ;;  %v7557_v57 = vshll.u32 %v14840_v47, 16  ;;  %v14844_v30 = vld [vmem:[#allocation4 + $0x28] sm:$0xf] }
 0x6c3   :  { %v7582_v21 = vshrl.u32 %v14844_v30, 16  ;;  %v7585_v51 = vshll.u32 %v14844_v30, 16  ;;  %v7901_v15 = vld [vmem:[#allocation4 + $0x28] sm:$0xe] }
 0x6c4   :  { %v7556_v22 = vrot.slane %v7554_v38, 4  ;;  %v7559_v48 = vrot.slane %v7557_v57, 5  ;;  %v10126_v18 = vrot.slane %v7901_v15, 9  ;;  %v11432_v38 = vld [vmem:[%s15437_s4 + $0x74] ss:$8 sps:$4 sm:$0xff]  }
 0x6c5   :  { %v7584_v5 = vrot.slane %v7582_v21, 4  ;;  %v7587_v46 = vrot.slane %v7585_v51, 5  ;;  %v11430_v57 = vld [vmem:[%s15437_s4 + $0x70] ss:$8 sps:$4 sm:$0xff]   ;;  %v10105_v21 = vcombine.low %v14813_v20, %v14840_v47  ;;  %v11439_v51 = vld [vmem:[%s15437_s4 + $0x114] ss:$8 sps:$4 sm:$0xff]   ;;  %v10106_v47 = vcombine.low %v14830_v24, %v14844_v30 }
 0x6c6   :  { %v7560_v42 = vor.u32 %v7559_v48, %v7556_v22  ;;  %v14854_v44 = vsel %vm13595_vm2, %v10126_v18, %v7924_v41  ;;  %v11434_v41 = vld [vmem:[%s15437_s4 + $0x100] ss:$8 sps:$4 sm:$0xff]   ;;  %v11437_v15 = vld [vmem:[%s15437_s4 + $0x110] ss:$8 sps:$4 sm:$0xff]   ;;  %v11443_v22 = vld [vmem:[%s15437_s4 + $0x124] ss:$8 sps:$4 sm:$0xff]  }
 0x6c7   :  { %v10144_v40 = vcombine.low %v14850_v3, %v14854_v44  ;;  %v7588_v37 = vor.u32 %v7587_v46, %v7584_v5  ;;  %v11441_v20 = vld [vmem:[%s15437_s4 + $0x120] ss:$8 sps:$4 sm:$0xff]   ;;  %v11446_v48 = vld [vmem:[%s15437_s4 + $0x134] ss:$8 sps:$4 sm:$0xff]   ;;  %v11444_v18 = vld [vmem:[%s15437_s4 + $0x130] ss:$8 sps:$4 sm:$0xff]  }
 0x6c8   :  { %v7561_v43 = vrot.slane %v7560_v42, 4  ;;  %v11449_v5 = vld [vmem:[%s15437_s4 + $0x144] ss:$8 sps:$4 sm:$0xff]   ;;  %v11447_v24 = vld [vmem:[%s15437_s4 + $0x140] ss:$8 sps:$4 sm:$0xff]  }
 0x6c9   :  { %v7589_v14 = vrot.slane %v7588_v37, 4  ;;  %v11452_v30 = vld [vmem:[%s15437_s4 + $0x154] ss:$8 sps:$4 sm:$0xff]   ;;  %v11450_v46 = vld [vmem:[%s15437_s4 + $0x150] ss:$8 sps:$4 sm:$0xff]   ;;  %v7912_v37 = vrot.slane %v14832_v2, 5 }
 0x6ca   :  { %v7566_v59 = vsel %vm13339_vm3, %v7561_v43, %v7565_v16  ;;  %v11455_v42 = vld [vmem:[%s15437_s4 + $0x164] ss:$8 sps:$4 sm:$0xff]   ;;  %v7898_v16 = vld [vmem:[#allocation4] sm:$0xe]  ;;  %v11458_v43 = vld [vmem:[%s15437_s4 + $0x174] ss:$8 sps:$4 sm:$0xff]  }
 0x6cb   :  { %v10087_v12 = vcombine.low %v7552_v19, %v7566_v59  ;;  %v7594_v8 = vsel %vm13339_vm3, %v7589_v14, %v7593_v6  ;;  %v7899_v19 = vld [vmem:[#allocation4 + $0x8] sm:$0xe]  ;;  %v10123_v28 = vrot.slane %v7898_v16, 9  ;;  %v11456_v59 = vld [vmem:[%s15437_s4 + $0x170] ss:$8 sps:$4 sm:$0xff]  }
 0x6cc   :  { %v10088_v7 = vcombine.low %v7580_v36, %v7594_v8  ;;  %v10124_v17 = vrot.slane %v7899_v19, 9  ;;  %v11459_v2 = vld [vmem:[%s15437_s4 + $0x180] ss:$8 sps:$4 sm:$0xff]   ;;  %v11462_v14 = vld [vmem:[%s15437_s4 + $0x190] ss:$8 sps:$4 sm:$0xff]  }
 0x6cd   :  { %7733 = vmatmul.mubr.bf16.vlgmr.msra.gmra.mrb[16].mxu1 %v10087_v12  ;;  %v11461_v12 = vld [vmem:[%s15437_s4 + $0x184] ss:$8 sps:$4 sm:$0xff]   ;;  %v11468_v36 = vld [vmem:[%s15437_s4 + $0x1b0] ss:$8 sps:$4 sm:$0xff]   ;;  %v11476_v3 = vld [vmem:[%s15437_s4 + $0x1d4] ss:$8 sps:$4 sm:$0xff]  }
 0x6ce   :  { %7846 = vmatpush1.bf16.msra.mxu1 %v11409_v35  ;;  %7742 = vmatprep.mubr.bf16.mxu1 %v15738_v54  ;;  %v7916_v35 = vrot.slane %v14837_v50, 5  ;;  %v11467_v6 = vld [vmem:[%s15437_s4 + $0x1a4] ss:$8 sps:$4 sm:$0xff]   ;;  %v11474_v44 = vld [vmem:[%s15437_s4 + $0x1d0] ss:$8 sps:$4 sm:$0xff]  }
 0x6cf   :  { %7847 = vmatprep.subr.bf16.mxu1 %v11414_v1  ;;  %v7913_v1 = vsel %vm13595_vm2, %v10123_v28, %v7912_v37  ;;  %v11473_v8 = vld [vmem:[%s15437_s4 + $0x1c4] ss:$8 sps:$4 sm:$0xff]   ;;  %v8270_v16 = vld [vmem:[#allocation4 + $0x28] sm:$0xf]  ;;  %v8272_v19 = vld [vmem:[#allocation4 + $0x30] sm:$0xf] }
 0x6d0   :  { %v7917_v32 = vsel %vm13595_vm2, %v10124_v17, %v7916_v35  ;;  %v15066_v28 = vld [vmem:[#allocation4 + $0x14] sm:$0x1]  ;;  %v11505_v37 = vld [vmem:[%s15437_s4 + $0x264] ss:$8 sps:$4 sm:$0xff]  }
 0x6d1   :  { %v10143_v50 = vcombine.low %v7913_v1, %v7917_v32  ;;  %v8306_v32 = vshll.u32 %v8270_v16, 16 }
 0x6d2   :  { %7848 = vmatpush1.bf16.msra.mxu1 %v11412_v25  ;;  %v11465_v25 = vld [vmem:[%s15437_s4 + $0x1a0] ss:$8 sps:$4 sm:$0xff]  }
 0x6d3   :  { %7849 = vmatprep.subr.bf16.mxu1 %v11417_v58  ;;  %v11470_v58 = vld [vmem:[%s15437_s4 + $0x1b4] ss:$8 sps:$4 sm:$0xff]  }
 0x6d5   :  { %7743 = vmatmul.mubr.bf16.gmra.mrb[20].mxu1 %v10088_v7  ;;  %v11477_v7 = vld [vmem:[%s15437_s4 + $0x1e0] ss:$8 sps:$4 sm:$0xff]  }
 0x6d6   :  { %7850 = vmatpush1.bf16.msra.mxu1 %v11415_v9  ;;  %7877 = vmatprep.mubr.bf16.mxu1 %v15738_v54  ;;  %v11471_v9 = vld [vmem:[%s15437_s4 + $0x1c0] ss:$8 sps:$4 sm:$0xff]  }
 0x6d7   :  { %7851 = vmatprep.subr.bf16.mxu1 %v11420_v4  ;;  %v11482_v4 = vld [vmem:[%s15437_s4 + $0x1f4] ss:$8 sps:$4 sm:$0xff]  }
 0x6da   :  { %7852 = vmatpush1.bf16.msra.mxu1 %v11418_v27  ;;  %v11480_v27 = vld [vmem:[%s15437_s4 + $0x1f0] ss:$8 sps:$4 sm:$0xff]  }
 0x6db   :  { %7853 = vmatprep.subr.bf16.mxu1 %v11423_v11  ;;  %v11486_v11 = vld [vmem:[%s15437_s4 + $0x204] ss:$8 sps:$4 sm:$0xff]  }
 0x6de   :  { %7854 = vmatpush1.bf16.msra.mxu1 %v11421_v29  ;;  %v11484_v29 = vld [vmem:[%s15437_s4 + $0x200] ss:$8 sps:$4 sm:$0xff]  }
 0x6df   :  { %7855 = vmatprep.subr.bf16.mxu1 %v11426_v62  ;;  %v11483_v62 = vld [vmem:[#allocation4 + $0x8] ss:$8 sps:$4 sm:$0xff]  }
 0x6e2   :  { %7856 = vmatpush1.bf16.msra.mxu1 %v11424_v39  ;;  %v11489_v39 = vld [vmem:[%s15437_s4 + $0x214] ss:$8 sps:$4 sm:$0xff]  }
 0x6e3   :  { %7857 = vmatprep.subr.bf16.mxu1 %v11429_v53  ;;  %v11487_v53 = vld [vmem:[%s15437_s4 + $0x210] ss:$8 sps:$4 sm:$0xff]  }
 0x6e6   :  { %7858 = vmatpush1.bf16.msra.mxu1 %v11427_v56  ;;  %v11493_v56 = vld [vmem:[%s15437_s4 + $0x224] ss:$8 sps:$4 sm:$0xff]  }
 0x6e7   :  { %7859 = vmatprep.subr.bf16.mxu1 %v11432_v38  ;;  %v11491_v38 = vld [vmem:[%s15437_s4 + $0x220] ss:$8 sps:$4 sm:$0xff]  }
 0x6ea   :  { %7860 = vmatpush1.bf16.msra.mxu1 %v11430_v57  ;;  %v11490_v57 = vld [vmem:[#allocation4 + $0x28] ss:$8 sps:$4 sm:$0xff]  }
 0x6eb   :  { %8031 = vmatprep.subr.bf16.mxu1 %v11436_v60  ;;  %v11496_v60 = vld [vmem:[%s15437_s4 + $0x234] ss:$8 sps:$4 sm:$0xff]  }
 0x6ed   :  { %7878 = vmatmul.mubr.bf16.vlgmr.msra.gmra.mrb[16].mxu1 %v10105_v21  ;;  %v8268_v21 = vld [vmem:[#allocation4 + $0x10] sm:$0xf] }
 0x6ee   :  { %8032 = vmatpush1.bf16.msra.mxu1 %v11434_v41  ;;  %7887 = vmatprep.mubr.bf16.mxu1 %v15738_v54  ;;  %v8266_v41 = vld [vmem:[#allocation4 + $0x8] sm:$0xf] }
 0x6ef   :  { %8033 = vmatprep.subr.bf16.mxu1 %v11439_v51  ;;  %v11494_v51 = vld [vmem:[%s15437_s4 + $0x230] ss:$8 sps:$4 sm:$0xff]  }
 0x6f2   :  { %8034 = vmatpush1.bf16.msra.mxu1 %v11437_v15  ;;  %v11499_v15 = vld [vmem:[%s15437_s4 + $0x244] ss:$8 sps:$4 sm:$0xff]  }
 0x6f3   :  { %8035 = vmatprep.subr.bf16.mxu1 %v11443_v22  ;;  %v8275_v22 = vshrl.u32 %v8266_v41, 16 }
 0x6f5   :  { %7888 = vmatmul.mubr.bf16.gmra.mrb[20].mxu1 %v10106_v47  ;;  %v8289_v47 = vshrl.u32 %v8268_v21, 16 }
 0x6f6   :  { %8036 = vmatpush1.bf16.msra.mxu1 %v11441_v20  ;;  %8063 = vmatprep.mubr.bf16.mxu1 %v15738_v54  ;;  %v8278_v20 = vshll.u32 %v8266_v41, 16 }
 0x6f7   :  { %8037 = vmatprep.subr.bf16.mxu1 %v11446_v48  ;;  %v8292_v48 = vshll.u32 %v8268_v21, 16 }
 0x6fa   :  { %8038 = vmatpush1.bf16.msra.mxu1 %v11444_v18  ;;  %v11497_v18 = vld [vmem:[%s15437_s4 + $0x240] ss:$8 sps:$4 sm:$0xff]  }
 0x6fb   :  { %8039 = vmatprep.subr.bf16.mxu1 %v11449_v5  ;;  %v11502_v5 = vld [vmem:[%s15437_s4 + $0x254] ss:$8 sps:$4 sm:$0xff]  }
 0x6fe   :  { %8040 = vmatpush1.bf16.msra.mxu1 %v11447_v24  ;;  %v8277_v24 = vrot.slane %v8275_v22, 4  ;;  %v11512_v22 = vld [vmem:[%s15437_s4 + $0x290] ss:$8 sps:$4 sm:$0xff]  }
 0x6ff   :  { %8041 = vmatprep.subr.bf16.mxu1 %v11452_v30  ;;  %v8280_v30 = vrot.slane %v8278_v20, 5  ;;  %v11517_v20 = vld [vmem:[%s15437_s4 + $0x2a4] ss:$8 sps:$4 sm:$0xff]  }
 0x701   :  { %v8281_v17 = vor.u32 %v8280_v30, %v8277_v24  ;;  %v11520_v24 = vld [vmem:[%s15437_s4 + $0x2b4] ss:$8 sps:$4 sm:$0xff]   ;;  %v11518_v30 = vld [vmem:[%s15437_s4 + $0x2b0] ss:$8 sps:$4 sm:$0xff]  }
 0x702   :  { %8042 = vmatpush1.bf16.msra.mxu1 %v11450_v46  ;;  %v8291_v46 = vrot.slane %v8289_v47, 4 }
 0x703   :  { %8043 = vmatprep.subr.bf16.mxu1 %v11455_v42  ;;  %v8294_v42 = vrot.slane %v8292_v48, 5 }
 0x705   :  { %v8295_v1 = vor.u32 %v8294_v42, %v8291_v46  ;;  %v11523_v46 = vld [vmem:[%s15437_s4 + $0x2c4] ss:$8 sps:$4 sm:$0xff]   ;;  %v11521_v42 = vld [vmem:[%s15437_s4 + $0x2c0] ss:$8 sps:$4 sm:$0xff]  }
 0x706   :  { %8044 = vmatpush1.bf16.msra.mxu1 %v11453_v63  ;;  %v11500_v63 = vld [vmem:[%s15437_s4 + $0x250] ss:$8 sps:$4 sm:$0xff]  }
 0x707   :  { %8045 = vmatprep.subr.bf16.mxu1 %v11458_v43  ;;  %v15064_v43 = vld [vmem:[#allocation4 + $0xc] sm:$0x1] }
 0x708   :  { %v8284_v35 = vshll.u32 %v15064_v43, 16 }
 0x70a   :  { %8046 = vmatpush1.bf16.msra.mxu1 %v11456_v59  ;;  %v8298_v59 = vshll.u32 %v15066_v28, 16 }
 0x70b   :  { %8205 = vmatprep.subr.bf16.mxu1 %v11461_v12  ;;  %v8303_v12 = vshrl.u32 %v8270_v16, 16  ;;  %v11526_v16 = vld [vmem:[%s15437_s4 + $0x2d4] ss:$8 sps:$4 sm:$0xff]  }
 0x70d   :  { %8064 = vmatmul.mubr.bf16.vlgmr.msra.gmra.mrb[16].mxu1 %v10143_v50  ;;  %v8320_v50 = vshll.u32 %v8272_v19, 16 }
 0x70e   :  { %8206 = vmatpush1.bf16.msra.mxu1 %v11459_v2  ;;  %8073 = vmatprep.mubr.bf16.mxu1 %v15738_v54  ;;  %v8317_v2 = vshrl.u32 %v8272_v19, 16  ;;  %v11524_v19 = vld [vmem:[%s15437_s4 + $0x2d0] ss:$8 sps:$4 sm:$0xff]  }
 0x70f   :  { %8207 = vmatprep.subr.bf16.mxu1 %v11464_v55  ;;  %v11503_v55 = vld [vmem:[%s15437_s4 + $0x260] ss:$8 sps:$4 sm:$0xff]  }
 0x712   :  { %8208 = vmatpush1.bf16.msra.mxu1 %v11462_v14  ;;  %v11508_v14 = vld [vmem:[%s15437_s4 + $0x274] ss:$8 sps:$4 sm:$0xff]  }
 0x713   :  { %8209 = vmatprep.subr.bf16.mxu1 %v11467_v6  ;;  %v8282_v6 = vrot.slane %v8281_v17, 4  ;;  %v8497_v17 = vld [vmem:[#allocation4 + $0x10] sm:$0xe] }
 0x715   :  { %8074 = vmatmul.mubr.bf16.gmra.mrb[20].mxu1 %v10144_v40  ;;  %v11479_v40 = vld [vmem:[%s15437_s4 + $0x1e4] ss:$8 sps:$4 sm:$0xff]  }
 0x716   :  { %8210 = vmatpush1.bf16.msra.mxu1 %v11465_v25  ;;  %8237 = vmatprep.mubr.bf16.mxu1 %v15738_v54  ;;  %v8286_v25 = vrot.slane %v8284_v35, 5  ;;  %v11527_v35 = vld [vmem:[%s15437_s4 + $0x2e0] ss:$8 sps:$4 sm:$0xff]  }
 0x717   :  { %8211 = vmatprep.subr.bf16.mxu1 %v11470_v58  ;;  %v8300_v58 = vrot.slane %v8298_v59, 5  ;;  %v11532_v59 = vld [vmem:[%s15437_s4 + $0x2f4] ss:$8 sps:$4 sm:$0xff]  }
 0x71a   :  { %8212 = vmatpush1.bf16.msra.mxu1 %v11468_v36  ;;  %v8305_v36 = vrot.slane %v8303_v12, 4 }
 0x71b   :  { %8213 = vmatprep.subr.bf16.mxu1 %v11473_v8  ;;  %v8296_v8 = vrot.slane %v8295_v1, 4  ;;  %v8510_v1 = vrot.slane %v15064_v43, 5  ;;  %v8498_v43 = vld [vmem:[#allocation4 + $0x28] sm:$0xe] }
 0x71e   :  { %8214 = vmatpush1.bf16.msra.mxu1 %v11471_v9  ;;  %v8308_v9 = vrot.slane %v8306_v32, 5  ;;  %v10230_v32 = vrot.slane %v8497_v17, 9 }
 0x71f   :  { %8215 = vmatprep.subr.bf16.mxu1 %v11476_v3  ;;  %v8319_v3 = vrot.slane %v8317_v2, 4  ;;  %v8514_v2 = vrot.slane %v15066_v28, 5  ;;  %v11533_v28 = vld [vmem:[%s15437_s4 + $0x300] ss:$8 sps:$4 sm:$0xff]  }
 0x722   :  { %8216 = vmatpush1.bf16.msra.mxu1 %v11474_v44  ;;  %v8322_v44 = vrot.slane %v8320_v50, 5  ;;  %v11530_v50 = vld [vmem:[%s15437_s4 + $0x2f0] ss:$8 sps:$4 sm:$0xff]  }
 0x723   :  { %8217 = vmatprep.subr.bf16.mxu1 %v11479_v40  ;;  %v11506_v40 = vld [vmem:[%s15437_s4 + $0x270] ss:$8 sps:$4 sm:$0xff]  }
 0x726   :  { %8218 = vmatpush1.bf16.msra.mxu1 %v11477_v7  ;;  %v15082_v7 = vld [vmem:[#allocation4 + $0x2c] sm:$0x1] }
 0x727   :  { %8219 = vmatprep.subr.bf16.mxu1 %v11482_v4  ;;  %v15084_v4 = vld [vmem:[#allocation4 + $0x34] sm:$0x1] }
 0x72a   :  { %8220 = vmatpush1.bf16.msra.mxu1 %v11480_v27  ;;  %v11511_v27 = vld [vmem:[%s15437_s4 + $0x284] ss:$8 sps:$4 sm:$0xff]  }
 0x72b   :  { %8435 = vmatprep.subr.bf16.mxu1 %v11486_v11  ;;  %v8312_v11 = vshll.u32 %v15082_v7, 16 }
 0x72d   :  { %8238 = vmatmul.mubr.bf16.vlgmr.msra.gmra.mrb[16].mxu1 %v11483_v62  ;;  %v8287_v62 = vsel %vm13339_vm3, %v8282_v6, %v8286_v25  ;;  %v8314_v21 = vrot.slane %v8312_v11, 5  ;;  %v8515_v6 = vsel %vm13595_vm2, %v10230_v32, %v8514_v2  ;;  %v8499_v25 = vld [vmem:[#allocation4 + $0x30] sm:$0xe] }
 0x72e   :  { %8436 = vmatpush1.bf16.msra.mxu1 %v11484_v29  ;;  %8247 = vmatprep.mubr.bf16.mxu1 %v15738_v54  ;;  %v8326_v29 = vshll.u32 %v15084_v4, 16 }
 0x72f   :  { %8437 = vmatprep.subr.bf16.mxu1 %v11489_v39  ;;  %v8301_v39 = vsel %vm13339_vm3, %v8296_v8, %v8300_v58  ;;  %v10231_v8 = vrot.slane %v8498_v43, 9  ;;  %v15246_v43 = vld [vmem:[#allocation4 + $0x14] sm:$0x1] }
 0x732   :  { %8438 = vmatpush1.bf16.msra.mxu1 %v11487_v53  ;;  %v8309_v53 = vor.u32 %v8308_v9, %v8305_v36  ;;  %v11538_v36 = vld [vmem:[%s15437_s4 + $0x314] ss:$8 sps:$4 sm:$0xff]   ;;  %v8518_v9 = vrot.slane %v15082_v7, 5 }
 0x733   :  { %8439 = vmatprep.subr.bf16.mxu1 %v11493_v56  ;;  %v8323_v56 = vor.u32 %v8322_v44, %v8319_v3  ;;  %v10232_v3 = vrot.slane %v8499_v25, 9  ;;  %v8522_v44 = vrot.slane %v15084_v4, 5  ;;  %v11539_v4 = vld [vmem:[%s15437_s4 + $0x320] ss:$8 sps:$4 sm:$0xff]   ;;  %v15248_v25 = vld [vmem:[#allocation4 + $0x1c] sm:$0x1] }
 0x734   :  { %v8310_v41 = vrot.slane %v8309_v53, 4  ;;  %v8519_v11 = vsel %vm13595_vm2, %v10231_v8, %v8518_v9  ;;  %v11547_v53 = vld [vmem:[%s15437_s4 + $0x344] ss:$8 sps:$4 sm:$0xff]   ;;  %v8896_v8 = vshll.u32 %v15248_v25, 16 }
 0x735   :  { %8248 = vmatmul.mubr.bf16.gmra.mrb[20].mxu1 %v11490_v57  ;;  %v10211_v57 = vcombine.low %v8287_v62, %v8301_v39  ;;  %v8523_v7 = vsel %vm13595_vm2, %v10232_v3, %v8522_v44  ;;  %v11544_v62 = vld [vmem:[%s15437_s4 + $0x334] ss:$8 sps:$4 sm:$0xff]   ;;  %v11542_v39 = vld [vmem:[%s15437_s4 + $0x330] ss:$8 sps:$4 sm:$0xff]  }
 0x736   :  { %8440 = vmatpush1.bf16.msra.mxu1 %v11491_v38  ;;  %8467 = vmatprep.mubr.bf16.mxu1 %v15738_v54  ;;  %v11509_v38 = vld [vmem:[%s15437_s4 + $0x280] ss:$8 sps:$4 sm:$0xff]   ;;  %v8315_v47 = vsel %vm13339_vm3, %v8310_v41, %v8314_v21  ;;  %v11556_v21 = vld [vmem:[%s15437_s4 + $0x374] ss:$8 sps:$4 sm:$0xff]  }
 0x737   :  { %8441 = vmatprep.subr.bf16.mxu1 %v11496_v60  ;;  %v11514_v60 = vld [vmem:[%s15437_s4 + $0x294] ss:$8 sps:$4 sm:$0xff]   ;;  %v11551_v41 = vld [vmem:[%s15437_s4 + $0x360] ss:$8 sps:$4 sm:$0xff]  }
 0x73a   :  { %8442 = vmatpush1.bf16.msra.mxu1 %v11494_v51  ;;  %v8324_v51 = vrot.slane %v8323_v56, 4  ;;  %v11545_v56 = vld [vmem:[%s15437_s4 + $0x340] ss:$8 sps:$4 sm:$0xff]  }
 0x73b   :  { %8443 = vmatprep.subr.bf16.mxu1 %v11499_v15  ;;  %v8328_v15 = vrot.slane %v8326_v29, 5  ;;  %v10250_v29 = vcombine.low %v8519_v11, %v8523_v7  ;;  %v11577_v11 = vld [vmem:[%s15437_s4 + $0x3e0] ss:$8 sps:$4 sm:$0xff]   ;;  %v11582_v7 = vld [vmem:[%s15437_s4 + $0x3f4] ss:$8 sps:$4 sm:$0xff]  }
 0x73d   :  { %v8329_v48 = vsel %vm13339_vm3, %v8324_v51, %v8328_v15  ;;  %v11554_v51 = vld [vmem:[%s15437_s4 + $0x370] ss:$8 sps:$4 sm:$0xff]   ;;  %v11560_v15 = vld [vmem:[%s15437_s4 + $0x384] ss:$8 sps:$4 sm:$0xff]  }
 0x73e   :  { %8444 = vmatpush1.bf16.msra.mxu1 %v11497_v18  ;;  %v11515_v18 = vld [vmem:[%s15437_s4 + $0x2a0] ss:$8 sps:$4 sm:$0xff]  }
 0x73f   :  { %8445 = vmatprep.subr.bf16.mxu1 %v11502_v5  ;;  %v10212_v5 = vcombine.low %v8315_v47, %v8329_v48  ;;  %v11563_v47 = vld [vmem:[%s15437_s4 + $0x394] ss:$8 sps:$4 sm:$0xff]   ;;  %v11561_v48 = vld [vmem:[%s15437_s4 + $0x390] ss:$8 sps:$4 sm:$0xff]  }
 0x742   :  { %8446 = vmatpush1.bf16.msra.mxu1 %v11500_v63  ;;  %v11529_v63 = vld [vmem:[%s15437_s4 + $0x2e4] ss:$8 sps:$4 sm:$0xff]  }
 0x743   :  { %8447 = vmatprep.subr.bf16.mxu1 %v11505_v37  ;;  %v8496_v37 = vld [vmem:[#allocation4 + $0x8] sm:$0xe] }
 0x744   :  { %v10229_v12 = vrot.slane %v8496_v37, 9 }
 0x746   :  { %8448 = vmatpush1.bf16.msra.mxu1 %v11503_v55  ;;  %v11535_v55 = vld [vmem:[%s15437_s4 + $0x304] ss:$8 sps:$4 sm:$0xff]  }
 0x747   :  { %8449 = vmatprep.subr.bf16.mxu1 %v11508_v14  ;;  %v8511_v14 = vsel %vm13595_vm2, %v10229_v12, %v8510_v1  ;;  %v11576_v12 = vld [vmem:[%s15437_s4 + $0x3d4] ss:$8 sps:$4 sm:$0xff]  }
 0x748   :  { %v10249_v58 = vcombine.low %v8511_v14, %v8515_v6  ;;  %v8868_v14 = vld [vmem:[#allocation4 + $0x30] sm:$0xf] }
 0x749   :  { %v11574_v6 = vld [vmem:[%s15437_s4 + $0x3d0] ss:$8 sps:$4 sm:$0xff]   ;;  %v8901_v44 = vshrl.u32 %v8868_v14, 16 }
 0x74a   :  { %8450 = vmatpush1.bf16.msra.mxu1 %v11506_v40  ;;  %v11536_v40 = vld [vmem:[%s15437_s4 + $0x310] ss:$8 sps:$4 sm:$0xff]  }
 0x74b   :  { %8629 = vmatprep.subr.bf16.mxu1 %v11511_v27  ;;  %v11541_v27 = vld [vmem:[%s15437_s4 + $0x324] ss:$8 sps:$4 sm:$0xff]  }
 0x74d   :  { %8468 = vmatmul.mubr.bf16.vlgmr.msra.gmra.mrb[16].mxu1 %v10211_v57  ;;  %v11548_v57 = vld [vmem:[%s15437_s4 + $0x350] ss:$8 sps:$4 sm:$0xff]  }
 0x74e   :  { %8630 = vmatpush1.bf16.msra.mxu1 %v11509_v38  ;;  %8477 = vmatprep.mubr.bf16.mxu1 %v15738_v54  ;;  %v11550_v38 = vld [vmem:[%s15437_s4 + $0x354] ss:$8 sps:$4 sm:$0xff]  }
 0x74f   :  { %8631 = vmatprep.subr.bf16.mxu1 %v11514_v60  ;;  %v11553_v60 = vld [vmem:[%s15437_s4 + $0x364] ss:$8 sps:$4 sm:$0xff]  }
 0x752   :  { %8632 = vmatpush1.bf16.msra.mxu1 %v11512_v22  ;;  %v11558_v22 = vld [vmem:[%s15437_s4 + $0x380] ss:$8 sps:$4 sm:$0xff]  }
 0x753   :  { %8633 = vmatprep.subr.bf16.mxu1 %v11517_v20  ;;  %v11557_v20 = vld [vmem:[#allocation4 + $0x10] ss:$8 sps:$4 sm:$0xff]  }
 0x755   :  { %8478 = vmatmul.mubr.bf16.gmra.mrb[20].mxu1 %v10212_v5  ;;  %v11565_v5 = vld [vmem:[%s15437_s4 + $0x3a0] ss:$8 sps:$4 sm:$0xff]  }
 0x756   :  { %8634 = vmatpush1.bf16.msra.mxu1 %v11515_v18  ;;  %8661 = vmatprep.mubr.bf16.mxu1 %v15738_v54  ;;  %v11567_v18 = vld [vmem:[%s15437_s4 + $0x3a4] ss:$8 sps:$4 sm:$0xff]  }
 0x757   :  { %8635 = vmatprep.subr.bf16.mxu1 %v11520_v24  ;;  %v11564_v24 = vld [vmem:[#allocation4 + $0x30] ss:$8 sps:$4 sm:$0xff]  }
 0x75a   :  { %8636 = vmatpush1.bf16.msra.mxu1 %v11518_v30  ;;  %v11570_v30 = vld [vmem:[%s15437_s4 + $0x3b4] ss:$8 sps:$4 sm:$0xff]  }
 0x75b   :  { %8637 = vmatprep.subr.bf16.mxu1 %v11523_v46  ;;  %v8866_v46 = vld [vmem:[#allocation4 + $0x18] sm:$0xf] }
 0x75c   :  { %v8890_v37 = vshll.u32 %v8866_v46, 16 }
 0x75e   :  { %8638 = vmatpush1.bf16.msra.mxu1 %v11521_v42  ;;  %v8864_v42 = vld [vmem:[#allocation4 + $0x10] sm:$0xf]  ;;  %v8892_v32 = vrot.slane %v8890_v37, 5  ;;  %v11591_v37 = vld [vmem:[%s15437_s4 + $0x424] ss:$8 sps:$4 sm:$0xff]  }
 0x75f   :  { %8639 = vmatprep.subr.bf16.mxu1 %v11526_v16  ;;  %v11568_v16 = vld [vmem:[%s15437_s4 + $0x3b0] ss:$8 sps:$4 sm:$0xff]   ;;  %v8873_v17 = vshrl.u32 %v8864_v42, 16 }
 0x761   :  { %v8875_v2 = vrot.slane %v8873_v17, 4 }
 0x762   :  { %8640 = vmatpush1.bf16.msra.mxu1 %v11524_v19  ;;  %v11573_v19 = vld [vmem:[%s15437_s4 + $0x3c4] ss:$8 sps:$4 sm:$0xff]  }
 0x763   :  { %8641 = vmatprep.subr.bf16.mxu1 %v11529_v63  ;;  %v8887_v63 = vshrl.u32 %v8866_v46, 16 }
 0x765   :  { %v8889_v1 = vrot.slane %v8887_v63, 4  ;;  %v11586_v63 = vld [vmem:[%s15437_s4 + $0x410] ss:$8 sps:$4 sm:$0xff]  }
 0x766   :  { %8642 = vmatpush1.bf16.msra.mxu1 %v11527_v35  ;;  %v8876_v35 = vshll.u32 %v8864_v42, 16 }
 0x767   :  { %8643 = vmatprep.subr.bf16.mxu1 %v11532_v59  ;;  %v11571_v59 = vld [vmem:[%s15437_s4 + $0x3c0] ss:$8 sps:$4 sm:$0xff]  }
 0x76a   :  { %8644 = vmatpush1.bf16.msra.mxu1 %v11530_v50  ;;  %v8878_v50 = vrot.slane %v8876_v35, 5 }
 0x76b   :  { %8803 = vmatprep.subr.bf16.mxu1 %v11535_v55  ;;  %v8870_v55 = vld [vmem:[#allocation4 + $0x38] sm:$0xf] }
 0x76c   :  { %v8915_v9 = vshrl.u32 %v8870_v55, 16  ;;  %v8879_v3 = vor.u32 %v8878_v50, %v8875_v2  ;;  %v11595_v2 = vld [vmem:[%s15437_s4 + $0x440] ss:$8 sps:$4 sm:$0xff]   ;;  %v11600_v50 = vld [vmem:[%s15437_s4 + $0x454] ss:$8 sps:$4 sm:$0xff]  }
 0x76d   :  { %8662 = vmatmul.mubr.bf16.vlgmr.msra.gmra.mrb[16].mxu1 %v10249_v58  ;;  %v8882_v58 = vshll.u32 %v15246_v43, 16 }
 0x76e   :  { %8804 = vmatpush1.bf16.msra.mxu1 %v11533_v28  ;;  %8671 = vmatprep.mubr.bf16.mxu1 %v15738_v54  ;;  %v11579_v28 = vld [vmem:[%s15437_s4 + $0x3e4] ss:$8 sps:$4 sm:$0xff]  }
 0x76f   :  { %8805 = vmatprep.subr.bf16.mxu1 %v11538_v36  ;;  %v8893_v36 = vor.u32 %v8892_v32, %v8889_v1  ;;  %v11594_v1 = vld [vmem:[%s15437_s4 + $0x434] ss:$8 sps:$4 sm:$0xff]   ;;  %v11592_v32 = vld [vmem:[%s15437_s4 + $0x430] ss:$8 sps:$4 sm:$0xff]  }
 0x772   :  { %8806 = vmatpush1.bf16.msra.mxu1 %v11536_v40  ;;  %v8904_v40 = vshll.u32 %v8868_v14, 16  ;;  %v11603_v14 = vld [vmem:[%s15437_s4 + $0x464] ss:$8 sps:$4 sm:$0xff]  }
 0x773   :  { %8807 = vmatprep.subr.bf16.mxu1 %v11541_v27  ;;  %v8918_v27 = vshll.u32 %v8870_v55, 16  ;;  %v11598_v55 = vld [vmem:[%s15437_s4 + $0x450] ss:$8 sps:$4 sm:$0xff]  }
 0x775   :  { %8672 = vmatmul.mubr.bf16.gmra.mrb[20].mxu1 %v10250_v29  ;;  %v8894_v29 = vrot.slane %v8893_v36, 4  ;;  %v11606_v36 = vld [vmem:[%s15437_s4 + $0x474] ss:$8 sps:$4 sm:$0xff]  }
 0x776   :  { %8808 = vmatpush1.bf16.msra.mxu1 %v11539_v4  ;;  %8835 = vmatprep.mubr.bf16.mxu1 %v15738_v54  ;;  %v8884_v4 = vrot.slane %v8882_v58, 5  ;;  %v11601_v58 = vld [vmem:[%s15437_s4 + $0x460] ss:$8 sps:$4 sm:$0xff]  }
 0x777   :  { %8809 = vmatprep.subr.bf16.mxu1 %v11544_v62  ;;  %v8898_v62 = vrot.slane %v8896_v8, 5 }
 0x77a   :  { %8810 = vmatpush1.bf16.msra.mxu1 %v11542_v39  ;;  %v8917_v39 = vrot.slane %v8915_v9, 4  ;;  %v9108_v9 = vrot.slane %v15246_v43, 5 }
 0x77b   :  { %8811 = vmatprep.subr.bf16.mxu1 %v11547_v53  ;;  %v8880_v53 = vrot.slane %v8879_v3, 4 }
 0x77e   :  { %8812 = vmatpush1.bf16.msra.mxu1 %v11545_v56  ;;  %v8903_v56 = vrot.slane %v8901_v44, 4  ;;  %v9112_v44 = vrot.slane %v15248_v25, 5 }
 0x77f   :  { %8813 = vmatprep.subr.bf16.mxu1 %v11550_v38  ;;  %v8906_v38 = vrot.slane %v8904_v40, 5  ;;  %v11604_v40 = vld [vmem:[%s15437_s4 + $0x470] ss:$8 sps:$4 sm:$0xff]  }
 0x782   :  { %8814 = vmatpush1.bf16.msra.mxu1 %v11548_v57  ;;  %v8920_v57 = vrot.slane %v8918_v27, 5 }
 0x783   :  { %8815 = vmatprep.subr.bf16.mxu1 %v11553_v60  ;;  %v11580_v60 = vld [vmem:[%s15437_s4 + $0x3f0] ss:$8 sps:$4 sm:$0xff]  }
 0x786   :  { %8816 = vmatpush1.bf16.msra.mxu1 %v11551_v41  ;;  %v15264_v41 = vld [vmem:[#allocation4 + $0x34] sm:$0x1] }
 0x787   :  { %8817 = vmatprep.subr.bf16.mxu1 %v11556_v21  ;;  %v15266_v21 = vld [vmem:[#allocation4 + $0x3c] sm:$0x1] }
 0x78a   :  { %8818 = vmatpush1.bf16.msra.mxu1 %v11554_v51  ;;  %v11585_v51 = vld [vmem:[%s15437_s4 + $0x404] ss:$8 sps:$4 sm:$0xff]  }
 0x78b   :  { %9033 = vmatprep.subr.bf16.mxu1 %v11560_v15  ;;  %v8910_v15 = vshll.u32 %v15264_v41, 16 }
 0x78d   :  { %8836 = vmatmul.mubr.bf16.vlgmr.msra.gmra.mrb[16].mxu1 %v11557_v20  ;;  %v8885_v20 = vsel %vm13339_vm3, %v8880_v53, %v8884_v4  ;;  %v8912_v42 = vrot.slane %v8910_v15, 5  ;;  %v9097_v4 = vld [vmem:[#allocation4 + $0x38] sm:$0xe] }
 0x78e   :  { %9034 = vmatpush1.bf16.msra.mxu1 %v11558_v22  ;;  %8845 = vmatprep.mubr.bf16.mxu1 %v15738_v54  ;;  %v8924_v22 = vshll.u32 %v15266_v21, 16  ;;  %v10338_v25 = vrot.slane %v9097_v4, 9 }
 0x78f   :  { %9035 = vmatprep.subr.bf16.mxu1 %v11563_v47  ;;  %v8899_v47 = vsel %vm13339_vm3, %v8894_v29, %v8898_v62  ;;  %v9116_v62 = vrot.slane %v15264_v41, 5 }
 0x792   :  { %9036 = vmatpush1.bf16.msra.mxu1 %v11561_v48  ;;  %v8907_v48 = vor.u32 %v8906_v38, %v8903_v56 }
 0x793   :  { %9037 = vmatprep.subr.bf16.mxu1 %v11567_v18  ;;  %v8921_v18 = vor.u32 %v8920_v57, %v8917_v39  ;;  %v9120_v39 = vrot.slane %v15266_v21, 5 }
 0x794   :  { %v8908_v46 = vrot.slane %v8907_v48, 4  ;;  %v9295_v48 = vsel %vm9291_vm11, 1.0, %v11624_v33 }
 0x795   :  { %8846 = vmatmul.mubr.bf16.gmra.mrb[20].mxu1 %v11564_v24  ;;  %v10317_v24 = vcombine.low %v8885_v20, %v8899_v47  ;;  %v9121_v56 = vsel %vm13595_vm2, %v10338_v25, %v9120_v39 }
 0x796   :  { %9038 = vmatpush1.bf16.msra.mxu1 %v11565_v5  ;;  %9065 = vmatprep.mubr.bf16.mxu1 %v15738_v54  ;;  %v11583_v5 = vld [vmem:[%s15437_s4 + $0x400] ss:$8 sps:$4 sm:$0xff]   ;;  %v8913_v17 = vsel %vm13339_vm3, %v8908_v46, %v8912_v42 }
 0x797   :  { %9039 = vmatprep.subr.bf16.mxu1 %v11570_v30  ;;  %v11588_v30 = vld [vmem:[%s15437_s4 + $0x414] ss:$8 sps:$4 sm:$0xff]  }
 0x79a   :  { %9040 = vmatpush1.bf16.msra.mxu1 %v11568_v16  ;;  %v8922_v16 = vrot.slane %v8921_v18, 4 }
 0x79b   :  { %9041 = vmatprep.subr.bf16.mxu1 %v11573_v19  ;;  %v8926_v19 = vrot.slane %v8924_v22, 5 }
 0x79d   :  { %v8927_v35 = vsel %vm13339_vm3, %v8922_v16, %v8926_v19  ;;  %vm9288_vm3 = vcmp.lt.s32.totalorder %v7202_v13, 2 }
 0x79e   :  { %9042 = vmatpush1.bf16.msra.mxu1 %v11571_v59  ;;  %v11589_v59 = vld [vmem:[%s15437_s4 + $0x420] ss:$8 sps:$4 sm:$0xff]  }
 0x79f   :  { %9043 = vmatprep.subr.bf16.mxu1 %v11576_v12  ;;  %v10318_v12 = vcombine.low %v8913_v17, %v8927_v35 }
 0x7a2   :  { %9044 = vmatpush1.bf16.msra.mxu1 %v11574_v6  ;;  %v9094_v6 = vld [vmem:[#allocation4 + $0x10] sm:$0xe] }
 0x7a3   :  { %9045 = vmatprep.subr.bf16.mxu1 %v11579_v28  ;;  %v9095_v28 = vld [vmem:[#allocation4 + $0x18] sm:$0xe]  ;;  %v10335_v8 = vrot.slane %v9094_v6, 9 }
 0x7a4   :  { %v10336_v3 = vrot.slane %v9095_v28, 9 }
 0x7a5   :  { %v9109_v27 = vsel %vm13595_vm2, %v10335_v8, %v9108_v9 }
 0x7a6   :  { %9046 = vmatpush1.bf16.msra.mxu1 %v11577_v11  ;;  %v9113_v11 = vsel %vm13595_vm2, %v10336_v3, %v9112_v44 }
 0x7a7   :  { %9047 = vmatprep.subr.bf16.mxu1 %v11582_v7  ;;  %v9096_v7 = vld [vmem:[#allocation4 + $0x30] sm:$0xe]  ;;  %v10355_v29 = vcombine.low %v9109_v27, %v9113_v11 }
 0x7a8   :  { %v10337_v43 = vrot.slane %v9096_v7, 9 }
 0x7aa   :  { %9048 = vmatpush1.bf16.msra.mxu1 %v11580_v60  ;;  %v9117_v53 = vsel %vm13595_vm2, %v10337_v43, %v9116_v62  ;;  %v9292_v60 = vsel %vm9288_vm3, 1.0, %v11624_v33  ;;  %vm9290_vm2 = vcmp.lt.s32.totalorder %v7216_v23, 2 }
 0x7ab   :  { %9227 = vmatprep.subr.bf16.mxu1 %v11585_v51  ;;  %v10356_v38 = vcombine.low %v9117_v53, %v9121_v56  ;;  %v9294_v20 = vsel %vm9290_vm2, 1.0, %v11624_v33 }
 0x7ad   :  { %9066 = vmatmul.mubr.bf16.vlgmr.msra.gmra.mrb[16].mxu1 %v10317_v24 }
 0x7ae   :  { %9228 = vmatpush1.bf16.msra.mxu1 %v11583_v5  ;;  %9075 = vmatprep.mubr.bf16.mxu1 %v15738_v54 }
 0x7af   :  { %9229 = vmatprep.subr.bf16.mxu1 %v11588_v30 }
 0x7b2   :  { %9230 = vmatpush1.bf16.msra.mxu1 %v11586_v63 }
 0x7b3   :  { %9231 = vmatprep.subr.bf16.mxu1 %v11591_v37 }
 0x7b5   :  { %9076 = vmatmul.mubr.bf16.gmra.mrb[20].mxu1 %v10318_v12 }
 0x7b6   :  { %9232 = vmatpush1.bf16.msra.mxu1 %v11589_v59  ;;  %9259 = vmatprep.mubr.bf16.mxu1 %v15738_v54 }
 0x7b7   :  { %9233 = vmatprep.subr.bf16.mxu1 %v11594_v1 }
 0x7ba   :  { %9234 = vmatpush1.bf16.msra.mxu1 %v11592_v32 }
 0x7bb   :  { %9235 = vmatprep.subr.bf16.mxu1 %v11597_v45 }
 0x7be   :  { %9236 = vmatpush1.bf16.msra.mxu1 %v11595_v2 }
 0x7bf   :  { %9237 = vmatprep.subr.bf16.mxu1 %v11600_v50 }
 0x7c2   :  { %9238 = vmatpush1.bf16.msra.mxu1 %v11598_v55 }
 0x7c3   :  { %9239 = vmatprep.subr.bf16.mxu1 %v11603_v14 }
 0x7c6   :  { %9240 = vmatpush1.bf16.msra.mxu1 %v11601_v58 }
 0x7c7   :  { %9241 = vmatprep.subr.bf16.mxu1 %v11606_v36 }
 0x7ca   :  { %9242 = vmatpush1.bf16.msra.mxu1 %v11604_v40 }
 0x7cd   :  { %9260 = vmatmul.mubr.bf16.vlgmr.msra.gmra.mrb[16].mxu1 %v10355_v29 }
 0x7ce   :  { %9269 = vmatprep.mubr.bf16.mxu1 %v15738_v54  ;;  %v9293_v54 = vsel %vm9289_vm10, 1.0, %v11624_v33 }
 0x7d5   :  { %9270 = vmatmul.mubr.bf16.gmra.mrb[20].mxu1 %v10356_v38 }
 0x8a0   :  { %v15345_v57 = vpop.f32.mrb[16].mxu1 }
 0x8a1   :  { %v15349_v41 = vpop.f32.mrb[17].mxu1  ;;  %v9296_v31 = vmul.f32 %v9292_v60, %v15345_v57 }
 0x8a2   :  { %v15351_v21 = vpop.f32.mrb[18].mxu1  ;;  %v9297_v10 = vmul.f32 %v9292_v60, %v15349_v41 }
 0x8a3   :  { %v9298_v51 = vmul.f32 %v9293_v54, %v15351_v21  ;;  %v15355_v15 = vpop.f32.mrb[19].mxu1 }
 0x8a4   :  { %v9299_v13 = vmul.f32 %v9293_v54, %v15355_v15 }
 0x8a5   :  { %v9304_v52 = vadd.f32 %v9298_v51, %v9296_v31 }
 0x8a6   :  { %v9313_v22 = vadd.f32 %v9299_v13, %v9297_v10 }
 0x8a8   :  { %v15364_v47 = vpop.f32.mrb[20].mxu1 }
 0x8a9   :  { %v9300_v18 = vmul.f32 %v9294_v20, %v15364_v47  ;;  %v15368_v5 = vpop.f32.mrb[21].mxu1 }
 0x8aa   :  { %v9301_v49 = vmul.f32 %v9294_v20, %v15368_v5  ;;  %v15371_v23 = vpop.f32.mrb[22].mxu1 }
 0x8ab   :  { %v9305_v24 = vadd.f32 %v9304_v52, %v9300_v18  ;;  %v9302_v30 = vmul.f32 %v9295_v48, %v15371_v23  ;;  %v15374_v0 = vpop.f32.mrb[23].mxu1 }
 0x8ac   :  { %v9314_v26 = vadd.f32 %v9313_v22, %v9301_v49  ;;  %v9303_v46 = vmul.f32 %v9295_v48, %v15374_v0 }
 0x8ad   :  { %v9306_v42 = vadd.f32 %v9305_v24, %v9302_v30 }
 0x8ae   :  { %v9315_v16 = vadd.f32 %v9314_v26, %v9303_v46 }
 0x8af   :  { %v9307_v19 = vrot.slane %v9306_v42, 4 }
 0x8b0   :  { %v9316_v33 = vrot.slane %v9315_v16, 4 }
 0x8b1   :  { %v9308_v63 = vadd.f32 %v9307_v19, %v9306_v42 }
 0x8b2   :  { %v9317_v37 = vadd.f32 %v9316_v33, %v9315_v16 }
 0x8b3   :  { %v9309_v17 = vrot.slane %v9308_v63, 2 }
 0x8b4   :  { %v9318_v35 = vrot.slane %v9317_v37, 2 }
 0x8b5   :  { %v9310_v59 = vadd.f32 %v9309_v17, %v9308_v63 }
 0x8b6   :  { %v9319_v12 = vadd.f32 %v9318_v35, %v9317_v37 }
 0x8b7   :  { %v9311_v1 = vrot.slane %v9310_v59, 1 }
 0x8b8   :  { %v9320_v32 = vrot.slane %v9319_v12, 1 }
 0x8b9   :  { %v9312_v45 = vadd.f32 %v9311_v1, %v9310_v59 }
 0x8ba   :  { %v9321_v2 = vadd.f32 %v9320_v32, %v9319_v12 }
 0x8bb   :  { %v15377_v50 = vmul.f32 0.125, %v9312_v45 }
 0x8bc   :  { %v15379_v55 = vmul.f32 0.125, %v9321_v2 }
 0x8bd   :  { %v9325_v14 = vsub.f32 %v15345_v57, %v15377_v50  ;;  %v9327_v6 = vsub.f32 %v15351_v21, %v15377_v50  ;;  %v9329_v28 = vsub.f32 %v15364_v47, %v15377_v50  ;;  %v9331_v58 = vsub.f32 %v15371_v23, %v15377_v50 }
 0x8be   :  { %v9326_v36 = vsub.f32 %v15349_v41, %v15379_v55  ;;  %v9328_v8 = vsub.f32 %v15355_v15, %v15379_v55  ;;  %v9330_v9 = vsub.f32 %v15368_v5, %v15379_v55  ;;  %v9332_v3 = vsub.f32 %v15374_v0, %v15379_v55 }
 0x8bf   :  { %v9333_v44 = vmul.f32 %v9325_v14, %v9325_v14  ;;  %v9335_v40 = vmul.f32 %v9327_v6, %v9327_v6  ;;  %v9337_v27 = vmul.f32 %v9329_v28, %v9329_v28  ;;  %v9339_v29 = vmul.f32 %v9331_v58, %v9331_v58  ;;  %v9369_v28 = vld [vmem:[%s15440_s11] sm:$0x3] }
 0x8c0   :  { %v9334_v11 = vmul.f32 %v9326_v36, %v9326_v36  ;;  %v9336_v7 = vmul.f32 %v9328_v8, %v9328_v8  ;;  %v9338_v4 = vmul.f32 %v9330_v9, %v9330_v9  ;;  %v9340_v25 = vmul.f32 %v9332_v3, %v9332_v3 }
 0x8c1   :  { %v9341_v43 = vmul.f32 %v9333_v44, %v9292_v60  ;;  %v9343_v62 = vmul.f32 %v9335_v40, %v9293_v54  ;;  %v9345_v56 = vmul.f32 %v9337_v27, %v9294_v20  ;;  %v9347_v10 = vmul.f32 %v9339_v29, %v9295_v48 }
 0x8c2   :  { %v9342_v39 = vmul.f32 %v9334_v11, %v9292_v60  ;;  %v9344_v53 = vmul.f32 %v9336_v7, %v9293_v54  ;;  %v9346_v31 = vmul.f32 %v9338_v4, %v9294_v20  ;;  %v9348_v52 = vmul.f32 %v9340_v25, %v9295_v48 }
 0x8c3   :  { %v9349_v38 = vadd.f32 %v9343_v62, %v9341_v43  ;;  %v11625_v48 = vmov 1966171168   ;;  %v9401_v36 = vsub.s32 1, %v15742_v61 }
 0x8c4   :  { %v9358_v51 = vadd.f32 %v9344_v53, %v9342_v39  ;;  %v9378_v12 = vunpack.c.l.s4 %v11625_v48 }
 0x8c5   :  { %v9350_v13 = vadd.f32 %v9349_v38, %v9345_v56 }
 0x8c6   :  { %v9359_v22 = vadd.f32 %v9358_v51, %v9346_v31  ;;  %v9379_v1 = vunpack.c.0.s8 %v9378_v12 }
 0x8c7   :  { %v9351_v18 = vadd.f32 %v9350_v13, %v9347_v10 }
 0x8c8   :  { %v9360_v49 = vadd.f32 %v9359_v22, %v9348_v52  ;;  %v9382_v45 = vsub.s32 %v9379_v1, %v15742_v61 }
 0x8c9   :  { %v9352_v24 = vrot.slane %v9351_v18, 4 }
 0x8ca   :  { %v9361_v30 = vrot.slane %v9360_v49, 4 }
 0x8cb   :  { %v9353_v26 = vadd.f32 %v9352_v24, %v9351_v18 }
 0x8cc   :  { %v9362_v46 = vadd.f32 %v9361_v30, %v9360_v49 }
 0x8cd   :  { %v9354_v42 = vrot.slane %v9353_v26, 2 }
 0x8ce   :  { %v9363_v16 = vrot.slane %v9362_v46, 2 }
 0x8cf   :  { %v9355_v19 = vadd.f32 %v9354_v42, %v9353_v26 }
 0x8d0   :  { %v9364_v33 = vadd.f32 %v9363_v16, %v9362_v46 }
 0x8d1   :  { %v9356_v60 = vrot.slane %v9355_v19, 1 }
 0x8d2   :  { %v9365_v54 = vrot.slane %v9364_v33, 1 }
 0x8d3   :  { %v9357_v63 = vadd.f32 %v9356_v60, %v9355_v19 }
 0x8d4   :  { %v9366_v37 = vadd.f32 %v9365_v54, %v9364_v33 }
 0x8d5   :  { %v9367_v20 = vmul.f32 0.125, %v9357_v63 }
 0x8d6   :  { %v9368_v17 = vmul.f32 0.125, %v9366_v37 }
 0x8d7   :  { %v9370_v35 = vadd.f32 1e-05, %v9367_v20 }
 0x8d8   :  { %v9371_v59 = vadd.f32 1e-05, %v9368_v17 }
 0x8d9   :  { %11613 = vrsqrt.f32 %v9370_v35 }
 0x8da   :  { %11615 = vrsqrt.f32 %v9371_v59 }
 0x8e3   :  { %v11614_v32 = vpop.eup %11613 }
 0x8e4   :  { %v11616_v2 = vpop.eup %11615 }
 0x8e5   :  { %v9376_v14 = vcombine.low %v11614_v32, %v11616_v2 }
 0x8e7   :  { %v9383_v6 = vrot.slane %v9376_v14, %v9382_v45  ;;  %v11626_v14 = vmov 1983009808  }
 0x8e9   :  { %v9390_v58 = vrot.slane %v9383_v6, %v9382_v45  ;;  %v9503_v6 = vunpack.c.l.s4 %v11626_v14 }
 0x8eb   :  { %v9392_v8 = vmul.f32 %v9390_v58, %v9369_v28 }
 0x8ed   :  { %v9398_v9 = vrot.slane %v9392_v8, %v15739_v34  ;;  %v9402_v3 = vrot.slane %v9392_v8, %v9401_v36 }
 0x8ef   :  { %v9405_v44 = vmul.f32 %v9398_v9, %v15377_v50  ;;  %v9406_v40 = vmul.f32 %v9402_v3, %v15379_v55  ;;  %v9426_v27 = vmul.f32 %v9398_v9, %v15345_v57  ;;  %v9427_v11 = vmul.f32 %v9402_v3, %v15349_v41  ;;  %v9393_v57 = vld [vmem:[%s15441_s12] sm:$0x3] }
 0x8f0   :  { %v9428_v7 = vmul.f32 %v9398_v9, %v15351_v21  ;;  %v9429_v4 = vmul.f32 %v9402_v3, %v15355_v15  ;;  %v9430_v29 = vmul.f32 %v9398_v9, %v15364_v47  ;;  %v9431_v43 = vmul.f32 %v9402_v3, %v15368_v5 }
 0x8f1   :  { %v9409_v62 = vcombine.low %v9405_v44, %v9406_v40  ;;  %v9432_v25 = vmul.f32 %v9398_v9, %v15371_v23  ;;  %v9433_v39 = vmul.f32 %v9402_v3, %v15374_v0 }
 0x8f3   :  { %v9416_v50 = vrot.slane %v9409_v62, %v9382_v45 }
 0x8f5   :  { %v9423_v55 = vrot.slane %v9416_v50, %v9382_v45 }
 0x8f7   :  { %v9425_v41 = vsub.f32 %v9393_v57, %v9423_v55 }
 0x8f9   :  { %v9438_v21 = vrot.slane %v9425_v41, %v15739_v34  ;;  %v9442_v53 = vrot.slane %v9425_v41, %v9401_v36 }
 0x8fb   :  { %v9445_v15 = vadd.f32 %v9438_v21, %v9426_v27  ;;  %v9446_v56 = vadd.f32 %v9442_v53, %v9427_v11  ;;  %v9447_v47 = vadd.f32 %v9438_v21, %v9428_v7  ;;  %v9448_v38 = vadd.f32 %v9442_v53, %v9429_v4 }
 0x8fc   :  { %v9449_v5 = vadd.f32 %v9438_v21, %v9430_v29  ;;  %v9450_v31 = vadd.f32 %v9442_v53, %v9431_v43  ;;  %v9451_v51 = vadd.f32 %v9438_v21, %v9432_v25  ;;  %v9452_v23 = vadd.f32 %v9442_v53, %v9433_v39 }
 0x8fd   :  { %v9453_v10 = vmax.f32 %v9445_v15, 0.0  ;;  %v9454_v0 = vmax.f32 %v9446_v56, 0.0  ;;  %v9455_v13 = vmax.f32 %v9447_v47, 0.0  ;;  %v9456_v52 = vmax.f32 %v9448_v38, 0.0 }
 0x8fe   :  { %v9457_v22 = vmax.f32 %v9449_v5, 0.0  ;;  %v9458_v18 = vmax.f32 %v9450_v31, 0.0  ;;  %v9459_v49 = vmax.f32 %v9451_v51, 0.0  ;;  %v9460_v24 = vmax.f32 %v9452_v23, 0.0 }
 0x8ff   :  { %v9461_v30 = vsel %vm1449_vm7, %v9453_v10, -inf  ;;  %v9462_v34 = vsel %vm1449_vm7, %v9455_v13, -inf  ;;  %v9470_v26 = vsel %vm1449_vm7, %v9454_v0, -inf  ;;  %v9471_v46 = vsel %vm1449_vm7, %v9456_v52, -inf }
 0x900   :  { %v9463_v42 = vmax.f32 %v9461_v30, %v9462_v34  ;;  %v9472_v16 = vmax.f32 %v9470_v26, %v9471_v46  ;;  %v9479_v19 = vsel %vm1449_vm7, %v9457_v22, -inf  ;;  %v9480_v33 = vsel %vm1449_vm7, %v9459_v49, -inf }
 0x901   :  { %v9481_v60 = vmax.f32 %v9479_v19, %v9480_v33  ;;  %v9488_v54 = vsel %vm1449_vm7, %v9458_v18, -inf  ;;  %v9489_v63 = vsel %vm1449_vm7, %v9460_v24, -inf  ;;  %v9504_v27 = vunpack.c.0.s8 %v9503_v6 }
 0x902   :  { %v9464_v37 = vrot.slane %v9463_v42, 4  ;;  %v9473_v20 = vrot.slane %v9472_v16, 4  ;;  %v9490_v17 = vmax.f32 %v9488_v54, %v9489_v63  ;;  %vm9522_vm7 = vcmask 1041409  }
 0x903   :  { %v9482_v35 = vrot.slane %v9481_v60, 4  ;;  %v9507_v39 = vsub.s32 %v9504_v27, %v15742_v61 }
 0x904   :  { %v9465_v59 = vmax.f32 %v9463_v42, %v9464_v37  ;;  %v9474_v48 = vmax.f32 %v9472_v16, %v9473_v20  ;;  %v9491_v12 = vrot.slane %v9490_v17, 4 }
 0x905   :  { %v9483_v1 = vmax.f32 %v9481_v60, %v9482_v35 }
 0x906   :  { %v9466_v32 = vrot.slane %v9465_v59, 2  ;;  %v9475_v45 = vrot.slane %v9474_v48, 2  ;;  %v9492_v2 = vmax.f32 %v9490_v17, %v9491_v12 }
 0x907   :  { %v9484_v28 = vrot.slane %v9483_v1, 2 }
 0x908   :  { %v9467_v58 = vmax.f32 %v9465_v59, %v9466_v32  ;;  %v9476_v36 = vmax.f32 %v9474_v48, %v9475_v45  ;;  %v9493_v8 = vrot.slane %v9492_v2, 2 }
 0x909   :  { %v9485_v9 = vmax.f32 %v9483_v1, %v9484_v28 }
 0x90a   :  { %v9468_v3 = vrot.slane %v9467_v58, 1  ;;  %v9477_v44 = vrot.slane %v9476_v36, 1  ;;  %v9494_v40 = vmax.f32 %v9492_v2, %v9493_v8 }
 0x90b   :  { %v9486_v11 = vrot.slane %v9485_v9, 1 }
 0x90c   :  { %v9469_v7 = vmax.f32 %v9467_v58, %v9468_v3  ;;  %v9478_v4 = vmax.f32 %v9476_v36, %v9477_v44  ;;  %v9495_v29 = vrot.slane %v9494_v40, 1 }
 0x90d   :  { %v9487_v43 = vmax.f32 %v9485_v9, %v9486_v11 }
 0x90e   :  { %v9496_v62 = vmax.f32 %v9494_v40, %v9495_v29  ;;  %v9501_v25 = vcombine.low %v9469_v7, %v9478_v4 }
 0x910   :  { %v9509_v50 = vcombine.low %v9487_v43, %v9496_v62  ;;  %v9508_v55 = vrot.slane %v9501_v25, %v9507_v39 }
 0x912   :  { %v9516_v57 = vrot.slane %v9509_v50, %v9507_v39 }
 0x914   :  { %v9521_v41 = vrot.slane %v9516_v57, 7 }
 0x916   :  { %v9523_v21 = vsel %vm9522_vm7, %v9521_v41, %v9508_v55 }
 0x917   :  { %v9525_v53 = vsel %vm9524_vm12, %v9521_v41, %v9523_v21 }
 0x918   :  { %v9527_v15 = vsel %vm9526_vm8, %v9521_v41, %v9525_v53 }
 0x919   :  { %v9529_v56 = vsel %vm9528_vm13, %v9521_v41, %v9527_v15 }
 0x91a   :  { %9531 = vst [vmem:[%s15442_s13] sm:$0xf] %v9529_v56 }

</bundles_post_ra>
